<compile_context>
chip_gen: v6e
topology: v6e:2x2x1
jax: 0.10.0
libtpu: 0.0.40
codegen_flags: <defaults>
</compile_context>

<pallas_src>
import functools

import jax
import jax.numpy as jnp
from jax.experimental import pallas as pl
from jax.experimental.pallas import tpu as pltpu


# --------------------------------- kernel ------------------------------------

def _rgat_conv_kernel(x_ref, wcat_ref, b_ref, alpha_ref,
                      src_oh_ref, dst_oh_t_ref, rel_oh_ref,
                      *rest, num_relations, cout, apply_relu, fuse_linear):
    if fuse_linear:
        wl_ref, bl_ref, o_ref, acc_sc = rest
    else:
        o_ref, acc_sc = rest

    t = pl.program_id(0)

    @pl.when(t == 0)
    def _init():
        acc_sc[...] = jnp.zeros_like(acc_sc)

    x = x_ref[...]                                   # [N, Cin]   bf16
    src_oh = src_oh_ref[...]                         # [TE, N]    bf16
    dst_oh_t = dst_oh_t_ref[...]                     # [N, TE]    bf16
    rel_oh = rel_oh_ref[...].astype(jnp.float32)     # [TE, R]
    alpha = alpha_ref[...]                           # [TE, 1]    f32 (pre-shifted)

    # Gather source features for this edge tile: bf16 x bf16 -> native MXU path.
    x_src = jnp.dot(src_oh, x, preferred_element_type=jnp.float32)     # [TE, Cin]

    # One stacked relation transform [TE, Cin] x [Cin, R*Cout] (f32 weights),
    # then select the per-edge relation slice with R masked adds.
    h_all = jnp.dot(x_src, wcat_ref[...], preferred_element_type=jnp.float32)
    hj = rel_oh[:, 0:1] * h_all[:, 0:cout]
    for r in range(1, num_relations):                # static unroll, R small
        hj = hj + rel_oh[:, r:r + 1] * h_all[:, r * cout:(r + 1) * cout]

    # Segment softmax scatter: alpha is already shifted by the per-node max,
    # so p <= 1 and padded edges (alpha = -1e30) contribute exactly 0.
    p = jnp.exp(alpha)                                               # [TE, 1]
    msg = jnp.concatenate([p, p * hj], axis=1).astype(jnp.bfloat16)  # [TE, 1+Cout]
    acc_sc[...] += jnp.dot(dst_oh_t, msg, preferred_element_type=jnp.float32)

    @pl.when(t == pl.num_programs(0) - 1)
    def _finish():
        acc = acc_sc[...]
        l = acc[:, 0:1]                                              # denominator
        num = acc[:, 1:]                                             # numerator
        safe_l = jnp.maximum(l, 1e-30)
        inv = pl.reciprocal(safe_l, approx=True)                     # EUP
        inv = inv * (2.0 - safe_l * inv)                             # Newton step
        out = jnp.where(l > 0.0, num * inv, 0.0) + b_ref[...]        # isolated -> bias
        if apply_relu:
            out = jnp.maximum(out, 0.0)
        if fuse_linear:
            logits = jnp.dot(out, wl_ref[...],
                             preferred_element_type=jnp.float32) + bl_ref[...]
            zmax = jnp.max(logits, axis=-1, keepdims=True)
            z = logits - zmax
            lse = jnp.log(jnp.sum(jnp.exp(z), axis=-1, keepdims=True))
            out = z - lse
        o_ref[...] = out.astype(o_ref.dtype)


# -------------------------------- wrappers ------------------------------------

def _full_spec(shape):
    nd = len(shape)
    return pl.BlockSpec(shape, lambda t, _nd=nd: (0,) * _nd)


def rgat_conv(x_bf16, wcat, b, alpha, src_oh, dst_oh_t, rel_oh,
              *, num_relations, cout, apply_relu, wl=None, bl=None,
              edge_tile=512):
    n = x_bf16.shape[0]
    e_pad = src_oh.shape[0]
    assert edge_tile % 128 == 0          # lane-dense dst_oh_T tiles
    assert e_pad % edge_tile == 0
    num_tiles = e_pad // edge_tile
    fuse_linear = wl is not None
    c_final = bl.shape[1] if fuse_linear else cout

    kern = functools.partial(_rgat_conv_kernel, num_relations=num_relations,
                             cout=cout, apply_relu=apply_relu,
                             fuse_linear=fuse_linear)

    in_specs = [
        _full_spec(x_bf16.shape),                              # x (resident)
        _full_spec(wcat.shape),                                # stacked weights
        _full_spec(b.shape),                                   # bias
        pl.BlockSpec((edge_tile, 1), lambda t: (t, 0)),        # pre-shifted scores
        pl.BlockSpec((edge_tile, n), lambda t: (t, 0)),        # src_oh   [E, N]
        pl.BlockSpec((n, edge_tile), lambda t: (0, t)),        # dst_oh_T [N, E]
        pl.BlockSpec((edge_tile, num_relations), lambda t: (t, 0)),  # rel_oh
    ]
    args = [x_bf16, wcat, b, alpha, src_oh, dst_oh_t, rel_oh]
    if fuse_linear:
        in_specs += [_full_spec(wl.shape), _full_spec(bl.shape)]
        args += [wl, bl]

    return pl.pallas_call(
        kern,
        out_shape=jax.ShapeDtypeStruct((n, c_final), jnp.float32),
        grid_spec=pltpu.PrefetchScalarGridSpec(
            num_scalar_prefetch=0,
            grid=(num_tiles,),
            in_specs=in_specs,
            out_specs=pl.BlockSpec((n, c_final), lambda t: (0, 0)),
            scratch_shapes=[pltpu.VMEM((n, cout + 1), jnp.float32)]),  # [l | acc]
        compiler_params=pltpu.CompilerParams(
            dimension_semantics=("arbitrary",),
            # NOTE: re-derive per generation for large N (v7x has 64 MiB VMEM);
            # at these sizes the tiles are tiny so 32 MiB is a safe cap everywhere.
            vmem_limit_bytes=32 * 1024 * 1024),
    )(*args)


def _build_edge_operators(src, dst, etype, num_nodes, num_relations, edge_tile):
    """Dense one-hot gather/scatter operators (bf16), padded to the edge tile."""
    # TODO(synk): for non-toy graphs replace the O(E*N) one-hot operators with
    # scalar-prefetch index-driven gathers; kept dense here for small N.
    e = src.shape[0]
    e_pad = pl.cdiv(e, edge_tile) * edge_tile
    pad = e_pad - e
    if pad:
        # out-of-range indices -> all-zero one-hot rows/cols (inert padded edges)
        src = jnp.concatenate([src, jnp.full((pad,), num_nodes, src.dtype)])
        dst = jnp.concatenate([dst, jnp.full((pad,), num_nodes, dst.dtype)])
        etype = jnp.concatenate([etype,
                                 jnp.full((pad,), num_relations, etype.dtype)])
    src_oh = jax.nn.one_hot(src, num_nodes, dtype=jnp.bfloat16)        # [E_pad, N]
    dst_oh_t = jax.nn.one_hot(dst, num_nodes, dtype=jnp.bfloat16).T    # [N, E_pad]
    rel_oh = jax.nn.one_hot(etype, num_relations, dtype=jnp.bfloat16)  # [E_pad, R]
    return src_oh, dst_oh_t, rel_oh, e_pad


def _edge_scores(x, w, q, k, src, dst, etype, num_nodes, e_pad,
                 negative_slope=0.2):
    """Per-edge leaky-relu attention scores, shifted by the per-node segment max.

    q.(W_r x_i) collapses to x_i . (W_r q^T); same for k, so the whole score is
    two tiny [N,Cin]x[Cin,R] matmuls + index gathers (O(E) work, f32 exact).
    """
    wq = jnp.einsum("rcd,d->rc", w, q[0])            # [R, Cin]
    wk = jnp.einsum("rcd,d->rc", w, k[0])
    qtab = x @ wq.T                                  # [N, R]
    ktab = x @ wk.T
    s = qtab[dst, etype] + ktab[src, etype]          # [E]
    alpha = jnp.where(s >= 0, s, negative_slope * s)
    node_max = jax.ops.segment_max(alpha, dst, num_segments=num_nodes)
    alpha = alpha - node_max[dst]                    # exact per-node shift (<= 0)
    pad = e_pad - alpha.shape[0]
    if pad:
        alpha = jnp.concatenate(
            [alpha, jnp.full((pad,), -1e30, jnp.float32)])   # padded edges -> p=0
    return alpha.astype(jnp.float32)[:, None]        # [E_pad, 1]


def rgat_forward(x, src, dst, etype, params, *, edge_tile=512):
    num_relations = params["w1"].shape[0]
    n = x.shape[0]
    src_oh, dst_oh_t, rel_oh, e_pad = _build_edge_operators(
        src, dst, etype, n, num_relations, edge_tile)

    def conv(h, w, q, k, b, apply_relu, wl=None, bl=None):
        cin, cout = w.shape[1], w.shape[2]
        alpha = _edge_scores(h, w, q, k, src, dst, etype, n, e_pad)
        wcat = jnp.transpose(w, (1, 0, 2)).reshape(cin, num_relations * cout)
        return rgat_conv(h.astype(jnp.bfloat16), wcat, b, alpha,
                         src_oh, dst_oh_t, rel_oh,
                         num_relations=num_relations, cout=cout,
                         apply_relu=apply_relu, wl=wl, bl=bl,
                         edge_tile=edge_tile)

    h = conv(x, params["w1"], params["q1"], params["k1"], params["b1"], True)
    # second conv with the final Linear + log_softmax fused into its epilogue
    return conv(h, params["w2"], params["q2"], params["k2"], params["b2"], True,
                wl=params["wl"], bl=params["bl"])


# --------------------------- pure-JAX reference --------------------------------

def _rgat_conv_ref(x, w, q, k, b, src, dst, etype, apply_relu):
    n = x.shape[0]
    h = jnp.einsum("nc,rcd->rnd", x, w)                              # [R, N, Cout]
    hj = h[etype, src]                                               # [E, Cout]
    hi = h[etype, dst]
    qi = jnp.sum(hi * q, axis=1, keepdims=True)
    kj = jnp.sum(hj * k, axis=1, keepdims=True)
    s = qi + kj
    alpha = jnp.where(s >= 0, s, 0.2 * s)
    node_max = jax.ops.segment_max(alpha, dst, num_segments=n)
    p = jnp.exp(alpha - node_max[dst])
    node_sum = jax.ops.segment_sum(p, dst, num_segments=n)
    an = p / (node_sum[dst] + 1e-16)
    out = jax.ops.segment_sum(an * hj, dst, num_segments=n) + b
    if apply_relu:
        out = jnp.maximum(out, 0.0)
    return out


def rgat_forward_ref(x, src, dst, etype, p):
    h = _rgat_conv_ref(x, p["w1"], p["q1"], p["k1"], p["b1"], src, dst, etype, True)
    h = _rgat_conv_ref(h, p["w2"], p["q2"], p["k2"], p["b2"], src, dst, etype, True)
    logits = h @ p["wl"] + p["bl"]
    return jax.nn.log_softmax(logits, axis=-1)


# ----------------------------------- main ---------------------------------------

if __name__ == "__main__":
    key = jax.random.PRNGKey(0)
    num_nodes, num_edges = 64, 600          # pads to 1024 edges -> 2 tiles of 512
    in_channels, hidden, num_classes, num_relations = 8, 16, 4, 3

    ks = jax.random.split(key, 12)
    x = jax.random.normal(ks[0], (num_nodes, in_channels), jnp.float32)
    src = jax.random.randint(ks[1], (num_edges,), 0, num_nodes)
    dst = jax.random.randint(ks[2], (num_edges,), 0, num_nodes)
    etype = jax.random.randint(ks[3], (num_edges,), 0, num_relations)

    def glorot(k_, shape):
        fan_in, fan_out = shape[-2], shape[-1]
        limit = (6.0 / (fan_in + fan_out)) ** 0.5
        return jax.random.uniform(k_, shape, jnp.float32, -limit, limit)

    params = {
        # conv1: in_channels -> hidden
        "w1": glorot(ks[4], (num_relations, in_channels, hidden)),
        "q1": glorot(ks[5], (1, hidden)),
        "k1": glorot(ks[6], (1, hidden)),
        "b1": jnp.zeros((1, hidden), jnp.float32),
        # conv2: hidden -> hidden
        "w2": glorot(ks[7], (num_relations, hidden, hidden)),
        "q2": glorot(ks[8], (1, hidden)),
        "k2": glorot(ks[9], (1, hidden)),
        "b2": jnp.zeros((1, hidden), jnp.float32),
        # lin: hidden -> num_classes   (stored pre-transposed: [H, C])
        "wl": glorot(ks[10], (hidden, num_classes)),
        "bl": jax.random.normal(ks[11], (1, num_classes), jnp.float32) * 0.01,
    }

    fwd = jax.jit(rgat_forward)
    out = jax.block_until_ready(fwd(x, src, dst, etype, params))
    ref = jax.block_until_ready(rgat_forward_ref(x, src, dst, etype, params))

    assert out.shape == (num_nodes, num_classes)
    err = float(jnp.max(jnp.abs(out - ref)))
    # bf16 casts on the MXU gather/scatter operands bound achievable accuracy
    # vs. the pure-f32 reference (two stacked layers + final linear).
    assert err < 1e-1, f"max abs diff vs reference: {err}"
    print("KERNEL_OK")
</pallas_src>

<mosaic_0001>
module attributes {stable_mosaic.version = 11 : i64} {
  func.func private @main(%arg0: i32) attributes {dimension_semantics = [#tpu.dimension_semantics<core_parallel>], iteration_bounds = array<i64: 2>, tpu.core_type = #tpu.core_type<sc_scalar_subcore>, window_params = []} {
    return
  }
}

module attributes {stable_mosaic.version = 11 : i64} {
  func.func private @main(%arg0: i32) attributes {dimension_semantics = [#tpu.dimension_semantics<core_parallel>], iteration_bounds = array<i64: 2>, tpu.core_type = #tpu.core_type<sc_scalar_subcore>, window_params = []} {
    return
  }
}

module attributes {stable_mosaic.version = 11 : i64} {
  func.func @_rgat_conv_kernel(%arg0: i32, %arg1: memref<64x8xbf16, #tpu.memory_space<vmem>>, %arg2: memref<8x48xf32, #tpu.memory_space<vmem>>, %arg3: memref<1x16xf32, #tpu.memory_space<vmem>>, %arg4: memref<512x1xf32, #tpu.memory_space<vmem>>, %arg5: memref<512x64xbf16, #tpu.memory_space<vmem>>, %arg6: memref<64x512xbf16, #tpu.memory_space<vmem>>, %arg7: memref<512x3xbf16, #tpu.memory_space<vmem>>, %arg8: memref<64x16xf32, #tpu.memory_space<vmem>>, %arg9: memref<64x17xf32, #tpu.memory_space<vmem>>) attributes {dimension_semantics = [#tpu.dimension_semantics<arbitrary>], iteration_bounds = array<i64: 2>, scalar_prefetch = 0 : i64, scratch_operands = 1 : i64, tpu.core_type = #tpu.core_type<tc>, window_params = [{pipeline_mode = #tpu.pipeline_mode<synchronous>, transform_indices = @transform_0, window_bounds = array<i64: 64, 8>}, {pipeline_mode = #tpu.pipeline_mode<synchronous>, transform_indices = @transform_1, window_bounds = array<i64: 8, 48>}, {pipeline_mode = #tpu.pipeline_mode<synchronous>, transform_indices = @transform_2, window_bounds = array<i64: 1, 16>}, {transform_indices = @transform_3, window_bounds = array<i64: 512, 1>}, {transform_indices = @transform_4, window_bounds = array<i64: 512, 64>}, {transform_indices = @transform_5, window_bounds = array<i64: 64, 512>}, {transform_indices = @transform_6, window_bounds = array<i64: 512, 3>}, {pipeline_mode = #tpu.pipeline_mode<synchronous>, transform_indices = @transform_7, window_bounds = array<i64: 64, 16>}]} {
    %c0_i32 = arith.constant 0 : i32
    %0 = arith.cmpi eq, %arg0, %c0_i32 : i32
    %1 = arith.extui %0 : i1 to i32
    %c0_i32_0 = arith.constant 0 : i32
    %2 = arith.cmpi ne, %1, %c0_i32_0 : i32
    scf.if %2 {
      %cst_19 = arith.constant 0.000000e+00 : f32
      %38 = vector.broadcast %cst_19 : f32 to vector<64x17xf32>
      %c0_20 = arith.constant 0 : index
      %c0_21 = arith.constant 0 : index
      %39 = vector.load %arg9[%c0_20, %c0_21] : memref<64x17xf32, #tpu.memory_space<vmem>>, vector<64x17xf32>
      tpu.vector_store %arg9[%c0_20, %c0_21], %38 {strides = array<i32>} : memref<64x17xf32, #tpu.memory_space<vmem>>, vector<64x17xf32>,
    } else {
    }
    %c0 = arith.constant 0 : index
    %c0_1 = arith.constant 0 : index
    %3 = vector.load %arg1[%c0, %c0_1] : memref<64x8xbf16, #tpu.memory_space<vmem>>, vector<64x8xbf16>
    %c0_2 = arith.constant 0 : index
    %c0_3 = arith.constant 0 : index
    %4 = vector.load %arg5[%c0_2, %c0_3] : memref<512x64xbf16, #tpu.memory_space<vmem>>, vector<512x64xbf16>
    %c0_4 = arith.constant 0 : index
    %c0_5 = arith.constant 0 : index
    %5 = vector.load %arg6[%c0_4, %c0_5] : memref<64x512xbf16, #tpu.memory_space<vmem>>, vector<64x512xbf16>
    %c0_6 = arith.constant 0 : index
    %c0_7 = arith.constant 0 : index
    %6 = vector.load %arg7[%c0_6, %c0_7] : memref<512x3xbf16, #tpu.memory_space<vmem>>, vector<512x3xbf16>
    %7 = arith.extf %6 : vector<512x3xbf16> to vector<512x3xf32>
    %c0_8 = arith.constant 0 : index
    %c0_9 = arith.constant 0 : index
    %8 = vector.load %arg4[%c0_8, %c0_9] : memref<512x1xf32, #tpu.memory_space<vmem>>, vector<512x1xf32>
    %cst = arith.constant dense<0.000000e+00> : vector<512x8xf32>
    %9 = tpu.matmul %4, %3, %cst {dimension_numbers = #tpu.dot_dimension_numbers<[1], [0], [0], [1], [0, 0, 1, 1], [], []>} : vector<512x64xbf16>, vector<64x8xbf16>, vector<512x8xf32> -> vector<512x8xf32>
    %c0_10 = arith.constant 0 : index
    %c0_11 = arith.constant 0 : index
    %10 = vector.load %arg2[%c0_10, %c0_11] : memref<8x48xf32, #tpu.memory_space<vmem>>, vector<8x48xf32>
    %cst_12 = arith.constant dense<0.000000e+00> : vector<512x48xf32>
    %11 = tpu.matmul %9, %10, %cst_12 {dimension_numbers = #tpu.dot_dimension_numbers<[1], [0], [0], [1], [0, 0, 1, 1], [], []>} : vector<512x8xf32>, vector<8x48xf32>, vector<512x48xf32> -> vector<512x48xf32>
    %12 = vector.extract_strided_slice %7 {offsets = [0, 0], sizes = [512, 1], strides = [1, 1]} : vector<512x3xf32> to vector<512x1xf32>
    %13 = vector.extract_strided_slice %11 {offsets = [0, 0], sizes = [512, 16], strides = [1, 1]} : vector<512x48xf32> to vector<512x16xf32>
    %14 = vector.broadcast %12 : vector<512x1xf32> to vector<512x16xf32>
    %15 = arith.mulf %14, %13 : vector<512x16xf32>
    %16 = vector.extract_strided_slice %7 {offsets = [0, 1], sizes = [512, 1], strides = [1, 1]} : vector<512x3xf32> to vector<512x1xf32>
    %17 = vector.extract_strided_slice %11 {offsets = [0, 16], sizes = [512, 16], strides = [1, 1]} : vector<512x48xf32> to vector<512x16xf32>
    %18 = vector.broadcast %16 : vector<512x1xf32> to vector<512x16xf32>
    %19 = arith.mulf %18, %17 : vector<512x16xf32>
    %20 = arith.addf %15, %19 : vector<512x16xf32>
    %21 = vector.extract_strided_slice %7 {offsets = [0, 2], sizes = [512, 1], strides = [1, 1]} : vector<512x3xf32> to vector<512x1xf32>
    %22 = vector.extract_strided_slice %11 {offsets = [0, 32], sizes = [512, 16], strides = [1, 1]} : vector<512x48xf32> to vector<512x16xf32>
    %23 = vector.broadcast %21 : vector<512x1xf32> to vector<512x16xf32>
    %24 = arith.mulf %23, %22 : vector<512x16xf32>
    %25 = arith.addf %20, %24 : vector<512x16xf32>
    %26 = math.exp %8 : vector<512x1xf32>
    %27 = vector.broadcast %26 : vector<512x1xf32> to vector<512x16xf32>
    %28 = arith.mulf %27, %25 : vector<512x16xf32>
    %29 = tpu.concatenate %26, %28 in 1 : vector<512x1xf32>, vector<512x16xf32> -> vector<512x17xf32>
    %30 = arith.truncf %29 : vector<512x17xf32> to vector<512x17xbf16>
    %c0_13 = arith.constant 0 : index
    %c0_14 = arith.constant 0 : index
    %31 = vector.load %arg9[%c0_13, %c0_14] : memref<64x17xf32, #tpu.memory_space<vmem>>, vector<64x17xf32>
    %cst_15 = arith.constant dense<0.000000e+00> : vector<64x17xf32>
    %32 = tpu.matmul %5, %30, %cst_15 {dimension_numbers = #tpu.dot_dimension_numbers<[1], [0], [0], [1], [0, 0, 1, 1], [], []>} : vector<64x512xbf16>, vector<512x17xbf16>, vector<64x17xf32> -> vector<64x17xf32>
    %33 = arith.addf %31, %32 : vector<64x17xf32>
    %c0_16 = arith.constant 0 : index
    %c0_17 = arith.constant 0 : index
    %34 = vector.load %arg9[%c0_16, %c0_17] : memref<64x17xf32, #tpu.memory_space<vmem>>, vector<64x17xf32>
    tpu.vector_store %arg9[%c0_16, %c0_17], %33 {strides = array<i32>} : memref<64x17xf32, #tpu.memory_space<vmem>>, vector<64x17xf32>,
    %c1_i32 = arith.constant 1 : i32
    %35 = arith.cmpi eq, %arg0, %c1_i32 : i32
    %36 = arith.extui %35 : i1 to i32
    %c0_i32_18 = arith.constant 0 : i32
    %37 = arith.cmpi ne, %36, %c0_i32_18 : i32
    scf.if %37 {
      %c0_19 = arith.constant 0 : index
      %c0_20 = arith.constant 0 : index
      %38 = vector.load %arg9[%c0_19, %c0_20] : memref<64x17xf32, #tpu.memory_space<vmem>>, vector<64x17xf32>
      %39 = vector.extract_strided_slice %38 {offsets = [0, 0], sizes = [64, 1], strides = [1, 1]} : vector<64x17xf32> to vector<64x1xf32>
      %40 = vector.extract_strided_slice %38 {offsets = [0, 1], sizes = [64, 16], strides = [1, 1]} : vector<64x17xf32> to vector<64x16xf32>
      %cst_21 = arith.constant 1.000000e-30 : f32
      %41 = vector.broadcast %cst_21 : f32 to vector<64x1xf32>
      %42 = arith.maximumf %39, %41 : vector<64x1xf32>
      %43 = tpu.reciprocal %42 {approx = true} : vector<64x1xf32> -> vector<64x1xf32>
      %44 = arith.mulf %42, %43 : vector<64x1xf32>
      %cst_22 = arith.constant 2.000000e+00 : f32
      %45 = vector.broadcast %cst_22 : f32 to vector<64x1xf32>
      %46 = arith.subf %45, %44 : vector<64x1xf32>
      %47 = arith.mulf %43, %46 : vector<64x1xf32>
      %cst_23 = arith.constant 0.000000e+00 : f32
      %48 = vector.broadcast %cst_23 : f32 to vector<64x1xf32>
      %49 = arith.cmpf ogt, %39, %48 : vector<64x1xf32>
      %50 = vector.broadcast %47 : vector<64x1xf32> to vector<64x16xf32>
      %51 = arith.mulf %40, %50 : vector<64x16xf32>
      %cst_24 = arith.constant 0.000000e+00 : f32
      %52 = vector.shape_cast %49 : vector<64x1xi1> to vector<64x1xi1>
      %53 = vector.broadcast %52 : vector<64x1xi1> to vector<64x16xi1>
      %54 = vector.broadcast %cst_24 : f32 to vector<64x16xf32>
      %55 = arith.select %53, %51, %54 : vector<64x16xi1>, vector<64x16xf32>
      %c0_25 = arith.constant 0 : index
      %c0_26 = arith.constant 0 : index
      %56 = vector.load %arg3[%c0_25, %c0_26] : memref<1x16xf32, #tpu.memory_space<vmem>>, vector<1x16xf32>
      %57 = vector.broadcast %56 : vector<1x16xf32> to vector<64x16xf32>
      %58 = arith.addf %55, %57 : vector<64x16xf32>
      %cst_27 = arith.constant 0.000000e+00 : f32
      %59 = vector.broadcast %cst_27 : f32 to vector<64x16xf32>
      %60 = arith.maximumf %58, %59 : vector<64x16xf32>
      %c0_28 = arith.constant 0 : index
      %c0_29 = arith.constant 0 : index
      %61 = vector.load %arg8[%c0_28, %c0_29] : memref<64x16xf32, #tpu.memory_space<vmem>>, vector<64x16xf32>
      tpu.vector_store %arg8[%c0_28, %c0_29], %60 {strides = array<i32>} : memref<64x16xf32, #tpu.memory_space<vmem>>, vector<64x16xf32>,
    } else {
    }
    return
  }
  func.func @transform_0(%arg0: i32) -> (i32, i32) {
    %c0_i32 = arith.constant 0 : i32
    %c0_i32_0 = arith.constant 0 : i32
    %c0_i32_1 = arith.constant 0 : i32
    return %c0_i32, %c0_i32_0 : i32, i32
  }
  func.func @transform_1(%arg0: i32) -> (i32, i32) {
    %c0_i32 = arith.constant 0 : i32
    %c0_i32_0 = arith.constant 0 : i32
    %c0_i32_1 = arith.constant 0 : i32
    return %c0_i32, %c0_i32_0 : i32, i32
  }
  func.func @transform_2(%arg0: i32) -> (i32, i32) {
    %c0_i32 = arith.constant 0 : i32
    %c0_i32_0 = arith.constant 0 : i32
    %c0_i32_1 = arith.constant 0 : i32
    return %c0_i32, %c0_i32_0 : i32, i32
  }
  func.func @transform_3(%arg0: i32) -> (i32, i32) {
    %c0_i32 = arith.constant 0 : i32
    %c0_i32_0 = arith.constant 0 : i32
    return %arg0, %c0_i32 : i32, i32
  }
  func.func @transform_4(%arg0: i32) -> (i32, i32) {
    %c0_i32 = arith.constant 0 : i32
    %c0_i32_0 = arith.constant 0 : i32
    return %arg0, %c0_i32 : i32, i32
  }
  func.func @transform_5(%arg0: i32) -> (i32, i32) {
    %c0_i32 = arith.constant 0 : i32
    %c0_i32_0 = arith.constant 0 : i32
    return %c0_i32, %arg0 : i32, i32
  }
  func.func @transform_6(%arg0: i32) -> (i32, i32) {
    %c0_i32 = arith.constant 0 : i32
    %c0_i32_0 = arith.constant 0 : i32
    return %arg0, %c0_i32 : i32, i32
  }
  func.func @transform_7(%arg0: i32) -> (i32, i32) {
    %c0_i32 = arith.constant 0 : i32
    %c0_i32_0 = arith.constant 0 : i32
    %c0_i32_1 = arith.constant 0 : i32
    return %c0_i32, %c0_i32_0 : i32, i32
  }
}

module attributes {stable_mosaic.version = 11 : i64} {
  func.func @_rgat_conv_kernel(%arg0: i32, %arg1: memref<64x16xbf16, #tpu.memory_space<vmem>>, %arg2: memref<16x48xf32, #tpu.memory_space<vmem>>, %arg3: memref<1x16xf32, #tpu.memory_space<vmem>>, %arg4: memref<512x1xf32, #tpu.memory_space<vmem>>, %arg5: memref<512x64xbf16, #tpu.memory_space<vmem>>, %arg6: memref<64x512xbf16, #tpu.memory_space<vmem>>, %arg7: memref<512x3xbf16, #tpu.memory_space<vmem>>, %arg8: memref<16x4xf32, #tpu.memory_space<vmem>>, %arg9: memref<1x4xf32, #tpu.memory_space<vmem>>, %arg10: memref<64x4xf32, #tpu.memory_space<vmem>>, %arg11: memref<64x17xf32, #tpu.memory_space<vmem>>) attributes {dimension_semantics = [#tpu.dimension_semantics<arbitrary>], iteration_bounds = array<i64: 2>, scalar_prefetch = 0 : i64, scratch_operands = 1 : i64, tpu.core_type = #tpu.core_type<tc>, window_params = [{pipeline_mode = #tpu.pipeline_mode<synchronous>, transform_indices = @transform_0, window_bounds = array<i64: 64, 16>}, {pipeline_mode = #tpu.pipeline_mode<synchronous>, transform_indices = @transform_1, window_bounds = array<i64: 16, 48>}, {pipeline_mode = #tpu.pipeline_mode<synchronous>, transform_indices = @transform_2, window_bounds = array<i64: 1, 16>}, {transform_indices = @transform_3, window_bounds = array<i64: 512, 1>}, {transform_indices = @transform_4, window_bounds = array<i64: 512, 64>}, {transform_indices = @transform_5, window_bounds = array<i64: 64, 512>}, {transform_indices = @transform_6, window_bounds = array<i64: 512, 3>}, {pipeline_mode = #tpu.pipeline_mode<synchronous>, transform_indices = @transform_7, window_bounds = array<i64: 16, 4>}, {pipeline_mode = #tpu.pipeline_mode<synchronous>, transform_indices = @transform_8, window_bounds = array<i64: 1, 4>}, {pipeline_mode = #tpu.pipeline_mode<synchronous>, transform_indices = @transform_9, window_bounds = array<i64: 64, 4>}]} {
    %c0_i32 = arith.constant 0 : i32
    %0 = arith.cmpi eq, %arg0, %c0_i32 : i32
    %1 = arith.extui %0 : i1 to i32
    %c0_i32_0 = arith.constant 0 : i32
    %2 = arith.cmpi ne, %1, %c0_i32_0 : i32
    scf.if %2 {
      %cst_19 = arith.constant 0.000000e+00 : f32
      %38 = vector.broadcast %cst_19 : f32 to vector<64x17xf32>
      %c0_20 = arith.constant 0 : index
      %c0_21 = arith.constant 0 : index
      %39 = vector.load %arg11[%c0_20, %c0_21] : memref<64x17xf32, #tpu.memory_space<vmem>>, vector<64x17xf32>
      tpu.vector_store %arg11[%c0_20, %c0_21], %38 {strides = array<i32>} : memref<64x17xf32, #tpu.memory_space<vmem>>, vector<64x17xf32>,
    } else {
    }
    %c0 = arith.constant 0 : index
    %c0_1 = arith.constant 0 : index
    %3 = vector.load %arg1[%c0, %c0_1] : memref<64x16xbf16, #tpu.memory_space<vmem>>, vector<64x16xbf16>
    %c0_2 = arith.constant 0 : index
    %c0_3 = arith.constant 0 : index
    %4 = vector.load %arg5[%c0_2, %c0_3] : memref<512x64xbf16, #tpu.memory_space<vmem>>, vector<512x64xbf16>
    %c0_4 = arith.constant 0 : index
    %c0_5 = arith.constant 0 : index
    %5 = vector.load %arg6[%c0_4, %c0_5] : memref<64x512xbf16, #tpu.memory_space<vmem>>, vector<64x512xbf16>
    %c0_6 = arith.constant 0 : index
    %c0_7 = arith.constant 0 : index
    %6 = vector.load %arg7[%c0_6, %c0_7] : memref<512x3xbf16, #tpu.memory_space<vmem>>, vector<512x3xbf16>
    %7 = arith.extf %6 : vector<512x3xbf16> to vector<512x3xf32>
    %c0_8 = arith.constant 0 : index
    %c0_9 = arith.constant 0 : index
    %8 = vector.load %arg4[%c0_8, %c0_9] : memref<512x1xf32, #tpu.memory_space<vmem>>, vector<512x1xf32>
    %cst = arith.constant dense<0.000000e+00> : vector<512x16xf32>
    %9 = tpu.matmul %4, %3, %cst {dimension_numbers = #tpu.dot_dimension_numbers<[1], [0], [0], [1], [0, 0, 1, 1], [], []>} : vector<512x64xbf16>, vector<64x16xbf16>, vector<512x16xf32> -> vector<512x16xf32>
    %c0_10 = arith.constant 0 : index
    %c0_11 = arith.constant 0 : index
    %10 = vector.load %arg2[%c0_10, %c0_11] : memref<16x48xf32, #tpu.memory_space<vmem>>, vector<16x48xf32>
    %cst_12 = arith.constant dense<0.000000e+00> : vector<512x48xf32>
    %11 = tpu.matmul %9, %10, %cst_12 {dimension_numbers = #tpu.dot_dimension_numbers<[1], [0], [0], [1], [0, 0, 1, 1], [], []>} : vector<512x16xf32>, vector<16x48xf32>, vector<512x48xf32> -> vector<512x48xf32>
    %12 = vector.extract_strided_slice %7 {offsets = [0, 0], sizes = [512, 1], strides = [1, 1]} : vector<512x3xf32> to vector<512x1xf32>
    %13 = vector.extract_strided_slice %11 {offsets = [0, 0], sizes = [512, 16], strides = [1, 1]} : vector<512x48xf32> to vector<512x16xf32>
    %14 = vector.broadcast %12 : vector<512x1xf32> to vector<512x16xf32>
    %15 = arith.mulf %14, %13 : vector<512x16xf32>
    %16 = vector.extract_strided_slice %7 {offsets = [0, 1], sizes = [512, 1], strides = [1, 1]} : vector<512x3xf32> to vector<512x1xf32>
    %17 = vector.extract_strided_slice %11 {offsets = [0, 16], sizes = [512, 16], strides = [1, 1]} : vector<512x48xf32> to vector<512x16xf32>
    %18 = vector.broadcast %16 : vector<512x1xf32> to vector<512x16xf32>
    %19 = arith.mulf %18, %17 : vector<512x16xf32>
    %20 = arith.addf %15, %19 : vector<512x16xf32>
    %21 = vector.extract_strided_slice %7 {offsets = [0, 2], sizes = [512, 1], strides = [1, 1]} : vector<512x3xf32> to vector<512x1xf32>
    %22 = vector.extract_strided_slice %11 {offsets = [0, 32], sizes = [512, 16], strides = [1, 1]} : vector<512x48xf32> to vector<512x16xf32>
    %23 = vector.broadcast %21 : vector<512x1xf32> to vector<512x16xf32>
    %24 = arith.mulf %23, %22 : vector<512x16xf32>
    %25 = arith.addf %20, %24 : vector<512x16xf32>
    %26 = math.exp %8 : vector<512x1xf32>
    %27 = vector.broadcast %26 : vector<512x1xf32> to vector<512x16xf32>
    %28 = arith.mulf %27, %25 : vector<512x16xf32>
    %29 = tpu.concatenate %26, %28 in 1 : vector<512x1xf32>, vector<512x16xf32> -> vector<512x17xf32>
    %30 = arith.truncf %29 : vector<512x17xf32> to vector<512x17xbf16>
    %c0_13 = arith.constant 0 : index
    %c0_14 = arith.constant 0 : index
    %31 = vector.load %arg11[%c0_13, %c0_14] : memref<64x17xf32, #tpu.memory_space<vmem>>, vector<64x17xf32>
    %cst_15 = arith.constant dense<0.000000e+00> : vector<64x17xf32>
    %32 = tpu.matmul %5, %30, %cst_15 {dimension_numbers = #tpu.dot_dimension_numbers<[1], [0], [0], [1], [0, 0, 1, 1], [], []>} : vector<64x512xbf16>, vector<512x17xbf16>, vector<64x17xf32> -> vector<64x17xf32>
    %33 = arith.addf %31, %32 : vector<64x17xf32>
    %c0_16 = arith.constant 0 : index
    %c0_17 = arith.constant 0 : index
    %34 = vector.load %arg11[%c0_16, %c0_17] : memref<64x17xf32, #tpu.memory_space<vmem>>, vector<64x17xf32>
    tpu.vector_store %arg11[%c0_16, %c0_17], %33 {strides = array<i32>} : memref<64x17xf32, #tpu.memory_space<vmem>>, vector<64x17xf32>,
    %c1_i32 = arith.constant 1 : i32
    %35 = arith.cmpi eq, %arg0, %c1_i32 : i32
    %36 = arith.extui %35 : i1 to i32
    %c0_i32_18 = arith.constant 0 : i32
    %37 = arith.cmpi ne, %36, %c0_i32_18 : i32
    scf.if %37 {
      %c0_19 = arith.constant 0 : index
      %c0_20 = arith.constant 0 : index
      %38 = vector.load %arg11[%c0_19, %c0_20] : memref<64x17xf32, #tpu.memory_space<vmem>>, vector<64x17xf32>
      %39 = vector.extract_strided_slice %38 {offsets = [0, 0], sizes = [64, 1], strides = [1, 1]} : vector<64x17xf32> to vector<64x1xf32>
      %40 = vector.extract_strided_slice %38 {offsets = [0, 1], sizes = [64, 16], strides = [1, 1]} : vector<64x17xf32> to vector<64x16xf32>
      %cst_21 = arith.constant 1.000000e-30 : f32
      %41 = vector.broadcast %cst_21 : f32 to vector<64x1xf32>
      %42 = arith.maximumf %39, %41 : vector<64x1xf32>
      %43 = tpu.reciprocal %42 {approx = true} : vector<64x1xf32> -> vector<64x1xf32>
      %44 = arith.mulf %42, %43 : vector<64x1xf32>
      %cst_22 = arith.constant 2.000000e+00 : f32
      %45 = vector.broadcast %cst_22 : f32 to vector<64x1xf32>
      %46 = arith.subf %45, %44 : vector<64x1xf32>
      %47 = arith.mulf %43, %46 : vector<64x1xf32>
      %cst_23 = arith.constant 0.000000e+00 : f32
      %48 = vector.broadcast %cst_23 : f32 to vector<64x1xf32>
      %49 = arith.cmpf ogt, %39, %48 : vector<64x1xf32>
      %50 = vector.broadcast %47 : vector<64x1xf32> to vector<64x16xf32>
      %51 = arith.mulf %40, %50 : vector<64x16xf32>
      %cst_24 = arith.constant 0.000000e+00 : f32
      %52 = vector.shape_cast %49 : vector<64x1xi1> to vector<64x1xi1>
      %53 = vector.broadcast %52 : vector<64x1xi1> to vector<64x16xi1>
      %54 = vector.broadcast %cst_24 : f32 to vector<64x16xf32>
      %55 = arith.select %53, %51, %54 : vector<64x16xi1>, vector<64x16xf32>
      %c0_25 = arith.constant 0 : index
      %c0_26 = arith.constant 0 : index
      %56 = vector.load %arg3[%c0_25, %c0_26] : memref<1x16xf32, #tpu.memory_space<vmem>>, vector<1x16xf32>
      %57 = vector.broadcast %56 : vector<1x16xf32> to vector<64x16xf32>
      %58 = arith.addf %55, %57 : vector<64x16xf32>
      %cst_27 = arith.constant 0.000000e+00 : f32
      %59 = vector.broadcast %cst_27 : f32 to vector<64x16xf32>
      %60 = arith.maximumf %58, %59 : vector<64x16xf32>
      %c0_28 = arith.constant 0 : index
      %c0_29 = arith.constant 0 : index
      %61 = vector.load %arg8[%c0_28, %c0_29] : memref<16x4xf32, #tpu.memory_space<vmem>>, vector<16x4xf32>
      %cst_30 = arith.constant dense<0.000000e+00> : vector<64x4xf32>
      %62 = tpu.matmul %60, %61, %cst_30 {dimension_numbers = #tpu.dot_dimension_numbers<[1], [0], [0], [1], [0, 0, 1, 1], [], []>} : vector<64x16xf32>, vector<16x4xf32>, vector<64x4xf32> -> vector<64x4xf32>
      %c0_31 = arith.constant 0 : index
      %c0_32 = arith.constant 0 : index
      %63 = vector.load %arg9[%c0_31, %c0_32] : memref<1x4xf32, #tpu.memory_space<vmem>>, vector<1x4xf32>
      %64 = vector.broadcast %63 : vector<1x4xf32> to vector<64x4xf32>
      %65 = arith.addf %62, %64 : vector<64x4xf32>
      %cst_33 = arith.constant dense<0xFF800000> : vector<64xf32>
      %66 = vector.multi_reduction <maximumf>, %65, %cst_33 [1] : vector<64x4xf32> to vector<64xf32>
      %67 = vector.shape_cast %66 : vector<64xf32> to vector<64x1xf32>
      %68 = vector.broadcast %67 : vector<64x1xf32> to vector<64x4xf32>
      %69 = arith.subf %65, %68 : vector<64x4xf32>
      %70 = math.exp %69 : vector<64x4xf32>
      %cst_34 = arith.constant dense<0.000000e+00> : vector<64xf32>
      %71 = vector.multi_reduction <add>, %70, %cst_34 [1] : vector<64x4xf32> to vector<64xf32>
      %72 = vector.shape_cast %71 : vector<64xf32> to vector<64x1xf32>
      %73 = math.log %72 : vector<64x1xf32>
      %74 = vector.broadcast %73 : vector<64x1xf32> to vector<64x4xf32>
      %75 = arith.subf %69, %74 : vector<64x4xf32>
      %c0_35 = arith.constant 0 : index
      %c0_36 = arith.constant 0 : index
      %76 = vector.load %arg10[%c0_35, %c0_36] : memref<64x4xf32, #tpu.memory_space<vmem>>, vector<64x4xf32>
      tpu.vector_store %arg10[%c0_35, %c0_36], %75 {strides = array<i32>} : memref<64x4xf32, #tpu.memory_space<vmem>>, vector<64x4xf32>,
    } else {
    }
    return
  }
  func.func @transform_0(%arg0: i32) -> (i32, i32) {
    %c0_i32 = arith.constant 0 : i32
    %c0_i32_0 = arith.constant 0 : i32
    %c0_i32_1 = arith.constant 0 : i32
    return %c0_i32, %c0_i32_0 : i32, i32
  }
  func.func @transform_1(%arg0: i32) -> (i32, i32) {
    %c0_i32 = arith.constant 0 : i32
    %c0_i32_0 = arith.constant 0 : i32
    %c0_i32_1 = arith.constant 0 : i32
    return %c0_i32, %c0_i32_0 : i32, i32
  }
  func.func @transform_2(%arg0: i32) -> (i32, i32) {
    %c0_i32 = arith.constant 0 : i32
    %c0_i32_0 = arith.constant 0 : i32
    %c0_i32_1 = arith.constant 0 : i32
    return %c0_i32, %c0_i32_0 : i32, i32
  }
  func.func @transform_3(%arg0: i32) -> (i32, i32) {
    %c0_i32 = arith.constant 0 : i32
    %c0_i32_0 = arith.constant 0 : i32
    return %arg0, %c0_i32 : i32, i32
  }
  func.func @transform_4(%arg0: i32) -> (i32, i32) {
    %c0_i32 = arith.constant 0 : i32
    %c0_i32_0 = arith.constant 0 : i32
    return %arg0, %c0_i32 : i32, i32
  }
  func.func @transform_5(%arg0: i32) -> (i32, i32) {
    %c0_i32 = arith.constant 0 : i32
    %c0_i32_0 = arith.constant 0 : i32
    return %c0_i32, %arg0 : i32, i32
  }
  func.func @transform_6(%arg0: i32) -> (i32, i32) {
    %c0_i32 = arith.constant 0 : i32
    %c0_i32_0 = arith.constant 0 : i32
    return %arg0, %c0_i32 : i32, i32
  }
  func.func @transform_7(%arg0: i32) -> (i32, i32) {
    %c0_i32 = arith.constant 0 : i32
    %c0_i32_0 = arith.constant 0 : i32
    %c0_i32_1 = arith.constant 0 : i32
    return %c0_i32, %c0_i32_0 : i32, i32
  }
  func.func @transform_8(%arg0: i32) -> (i32, i32) {
    %c0_i32 = arith.constant 0 : i32
    %c0_i32_0 = arith.constant 0 : i32
    %c0_i32_1 = arith.constant 0 : i32
    return %c0_i32, %c0_i32_0 : i32, i32
  }
  func.func @transform_9(%arg0: i32) -> (i32, i32) {
    %c0_i32 = arith.constant 0 : i32
    %c0_i32_0 = arith.constant 0 : i32
    %c0_i32_1 = arith.constant 0 : i32
    return %c0_i32, %c0_i32_0 : i32, i32
  }
}

</mosaic_0001>

<bundles_post_ra>
// kernel: rgat_forward.2
= control target key start
LH: loop header
LB: loop body
LE: loop exit
PB: predicated region body
PF: predicated region fallthrough
CT: control target
= control target key end

     0   :  { %s6519_s24 = smov 0   ;;  %s6521_s25 = smov 0   ;;  %s8671_s0 = inlined_call_operand.vmem [shape: bf16[64,8], index: 0, kind: input, shape index: {}]   ;;  %s8672_s1 = inlined_call_operand.vmem [shape: f32[8,48], index: 1, kind: input, shape index: {}]   ;;  %s8673_s2 = inlined_call_operand.vmem [shape: f32[1,16], index: 2, kind: input, shape index: {}]   ;;  %s8674_s3 = inlined_call_operand.vmem [shape: f32[1024,1], index: 3, kind: input, shape index: {}]   ;;  %s8675_s4 = inlined_call_operand.vmem [shape: bf16[1024,64], index: 4, kind: input, shape index: {}]   ;;  %s8676_s5 = inlined_call_operand.vmem [shape: bf16[64,1024], index: 5, kind: input, shape index: {}]   ;;  %s8677_s6 = inlined_call_operand.vmem [shape: bf16[1024,3], index: 6, kind: input, shape index: {}]   ;;  %s8678_s7 = inlined_call_operand.vmem [shape: f32[64,16], index: 7, kind: output, shape index: {}]  }
   0x1   :  { %s6523_s26 = smov 0  }
   0x2 LB: > { %s6535_s27 = sadd.s32 4294967295, %s6467_s26   ;;  %s6538_s28 = sadd.s32 1, %s6467_s26   ;;  %s6467_s26 = sphi %s6523_s26, %s9195_s26   ;;  %s6463_s25 = sphi %s6521_s25, %s9194_s25   ;;  %s6459_s24 = sphi %s6519_s24, %s9193_s24  }
   0x3   : > { %s136_s29 = ssub.s32 %s6467_s26, %s6538_s28  ;;  %s139_s30 = sadd.s32 1, %s6463_s25 }
   0x4   : > { %p137_p0 = scmp.eq.s32.totalorder %s136_s29, 0  ;;  %p146_p1 = scmp.ne.s32.totalorder %s6463_s25, %s6459_s24 }
   0x5   : > { %p147_p2 = scmp.eq.s32.totalorder %s6467_s26, 0  ;;  %p4882_p4 = scmp.ge.s32.totalorder %s6467_s26, 2 }
   0x6   : > { %s6547_s8 = scalar_select %p137_p0, %s6463_s25, %s139_s30  }
   0x7   : > { %p148_p3 = por %p147_p2, %p146_p1  ;;  %228 = sbr.rel (%p4882_p4) target bundleno = 24 (0x18), region = 28 }
   0xc   : > { %249 = sbr.rel (!%p148_p3) target bundleno = 24 (0x18), region = 40  ;;  %s251_s9 = sand.u32 (%p148_p3), 1, %s6463_s25  }
   0xd   : > { %s5047_s10 = sshll.u32 (%p148_p3), %s6467_s26, 4  ;;  %s4883_s11 = sshll.u32 (%p148_p3), %s251_s9, 7 }
   0xe   : > { %s6555_s14 = scalar_lea.vmem (%p148_p3), %s8676_s5, %s5047_s10  ;;  %s253_s15 = scalar_lea.vmem (%p148_p3), [#allocation3], %s4883_s11 }
   0xf   : > { %v269_v0 = vld [vmem:[%s6555_s14] sm:$0xff] (%p148_p3)  ;;  %v271_v1 = vld [vmem:[%s6555_s14 + $0x8] sm:$0xff] (%p148_p3) }
  0x10   : > { %v273_v2 = vld [vmem:[%s6555_s14 + $0x20] sm:$0xff] (%p148_p3)  ;;  %270 = vst [vmem:[%s253_s15] sm:$0xff] (%p148_p3), %v269_v0  ;;  %272 = vst [vmem:[%s253_s15 + $0x8] sm:$0xff] (%p148_p3), %v271_v1  ;;  %v275_v3 = vld [vmem:[%s6555_s14 + $0x28] sm:$0xff] (%p148_p3) }
  0x11   : > { %274 = vst [vmem:[%s253_s15 + $0x10] sm:$0xff] %v273_v2  ;;  %v277_v4 = vld [vmem:[%s6555_s14 + $0x40] sm:$0xff]  ;;  %v279_v5 = vld [vmem:[%s6555_s14 + $0x48] sm:$0xff]  ;;  %276 = vst [vmem:[%s253_s15 + $0x18] sm:$0xff] %v275_v3 }
  0x12   : > { %278 = vst [vmem:[%s253_s15 + $0x20] sm:$0xff] %v277_v4  ;;  %280 = vst [vmem:[%s253_s15 + $0x28] sm:$0xff] %v279_v5  ;;  %v281_v6 = vld [vmem:[%s6555_s14 + $0x60] sm:$0xff]  ;;  %v283_v7 = vld [vmem:[%s6555_s14 + $0x68] sm:$0xff] }
  0x13   : > { %v285_v8 = vld [vmem:[%s6555_s14 + $0x80] sm:$0xff]  ;;  %282 = vst [vmem:[%s253_s15 + $0x30] sm:$0xff] %v281_v6  ;;  %284 = vst [vmem:[%s253_s15 + $0x38] sm:$0xff] %v283_v7  ;;  %v287_v9 = vld [vmem:[%s6555_s14 + $0x88] sm:$0xff] }
  0x14   : > { %286 = vst [vmem:[%s253_s15 + $0x40] sm:$0xff] %v285_v8  ;;  %v289_v10 = vld [vmem:[%s6555_s14 + $0xa0] sm:$0xff]  ;;  %v291_v11 = vld [vmem:[%s6555_s14 + $0xa8] sm:$0xff]  ;;  %288 = vst [vmem:[%s253_s15 + $0x48] sm:$0xff] %v287_v9 }
  0x15   : > { %290 = vst [vmem:[%s253_s15 + $0x50] sm:$0xff] %v289_v10  ;;  %292 = vst [vmem:[%s253_s15 + $0x58] sm:$0xff] %v291_v11  ;;  %v293_v12 = vld [vmem:[%s6555_s14 + $0xc0] sm:$0xff]  ;;  %v295_v13 = vld [vmem:[%s6555_s14 + $0xc8] sm:$0xff] }
  0x16   : > { %v297_v14 = vld [vmem:[%s6555_s14 + $0xe0] sm:$0xff]  ;;  %294 = vst [vmem:[%s253_s15 + $0x60] sm:$0xff] %v293_v12  ;;  %296 = vst [vmem:[%s253_s15 + $0x68] sm:$0xff] %v295_v13  ;;  %v299_v15 = vld [vmem:[%s6555_s14 + $0xe8] sm:$0xff] }
  0x17   : > { %298 = vst [vmem:[%s253_s15 + $0x70] sm:$0xff] %v297_v14  ;;  %300 = vst [vmem:[%s253_s15 + $0x78] sm:$0xff] %v299_v15 }
  0x18 PF: > { %p4886_p5 = scmp.ge.s32.totalorder %s6467_s26, 1  ;;  %p314_p6 = scmp.lt.s32.totalorder %s6467_s26, 3 }
  0x1a   : > { %p315_p7 = pnand %p4886_p5, %p314_p6 }
  0x1c   : > { %318 = sbr.rel (%p315_p7) target bundleno = 1544 (0x608), region = 67 }
  0x21   : > { %s321_s16 = sand.u32 1, %s6459_s24   ;;  %s4888_s17 = sshll.u32 %s6535_s27, 6 }
  0x22   : > { %s4887_s18 = sshll.u32 %s321_s16, 7  ;;  %p363_p8 = scmp.lt.s32.totalorder %s4888_s17, 127 }
  0x23   : > { %s6592_s11 = scalar_lea.vmem [#allocation3], %s4887_s18  ;;  %p4894_p9 = scmp.ne.s32.totalorder %s6535_s27, 0 }
  0x24   : > { %s9197_s17 = smov (!%p363_p8, %s4888_s17), 127 }
  0x25   : > { %s4889_s19 = sshll.u32 %s9197_s17, 3  ;;  %s4891_s20 = sshll.u32 %s9197_s17, 2 }
  0x26   : > { %s6580_s23 = scalar_lea.vmem %s8674_s3, %s4889_s19  ;;  %s6585_s26 = scalar_lea.vmem %s8675_s4, %s4891_s20 }
  0x27   : > { %s6590_s24 = scalar_lea.vmem %s8677_s6, %s4891_s20  ;;  %385 = sbr.rel (%p4894_p9) target bundleno = 49 (0x31), region = 75 }
  0x2c   : > { %vm386_vm0 = vcmask 138240   ;;  %v6469_v16 = vmov 0.0  }
  0x2d   : > { %387 = vst.msk [vmem:[#allocation2] sm:$0xff] %vm386_vm0, %v6469_v16  ;;  %388 = vst.msk [vmem:[#allocation2 + $0x8] sm:$0xff] %vm386_vm0, %v6469_v16 }
  0x2e   : > { %389 = vst.msk [vmem:[#allocation2 + $0x10] sm:$0xff] %vm386_vm0, %v6469_v16  ;;  %390 = vst.msk [vmem:[#allocation2 + $0x18] sm:$0xff] %vm386_vm0, %v6469_v16 }
  0x2f   : > { %391 = vst.msk [vmem:[#allocation2 + $0x20] sm:$0xff] %vm386_vm0, %v6469_v16  ;;  %392 = vst.msk [vmem:[#allocation2 + $0x28] sm:$0xff] %vm386_vm0, %v6469_v16 }
  0x30   : > { %393 = vst.msk [vmem:[#allocation2 + $0x30] sm:$0xff] %vm386_vm0, %v6469_v16  ;;  %394 = vst.msk [vmem:[#allocation2 + $0x38] sm:$0xff] %vm386_vm0, %v6469_v16 }
  0x31 PF: > { %v6239_v17 = vld [vmem:[%s8671_s0 + $0x18] sm:$0xff]   ;;  %v6470_v18 = vmov 1   ;;  %v5049_v19 = vld [vmem:[%s6590_s24] sm:$0xff]   ;;  %v6240_v22 = vld [vmem:[%s8671_s0 + $0x10] sm:$0xff]   ;;  %v6471_v27 = vmov 0   ;;  %vm859_vm1 = vcmask 523264  }
  0x32   : > { %5673 = vset.pattern.permute.xlu0 %v6470_v18  ;;  %5388 = vmatprep.subr.bf16.mxu0 %v6239_v17  ;;  %v5050_v20 = vunpack.c.l.bf16 %v5049_v19  ;;  %v5051_v21 = vunpack.c.h.bf16 %v5049_v19  ;;  %v5178_v23 = vld [vmem:[%s6590_s24 + $0x18] sm:$0xff]   ;;  %v5180_v26 = vld [vmem:[%s6590_s24 + $0x28] sm:$0xff]   ;;  %v6243_v33 = vld [vmem:[%s6585_s26] sm:$0xff]   ;;  %vm1246_vm2 = vcmask 64512   ;;  %s6473_s22 = smov 96   ;;  %s6474_s29 = smov 112  }
  0x33   : > { %5389 = vmatpush3.bf16.msra.mxu0 %v6239_v17  ;;  %v5062_v24 = vunpack.c.l.bf16 %v5178_v23  ;;  %v5063_v25 = vunpack.c.h.bf16 %v5178_v23  ;;  %5592 = vset.pattern.permute.xlu1 %v6471_v27  ;;  %v6241_v29 = vld [vmem:[%s8671_s0 + $0x8] sm:$0xff]   ;;  %v5070_v31 = vunpack.c.l.bf16 %v5180_v26  ;;  %v5071_v32 = vunpack.c.h.bf16 %v5180_v26  ;;  %v5182_v34 = vld [vmem:[%s6590_s24 + $0x38] sm:$0xff]   ;;  %v6242_v35 = vld [vmem:[%s8671_s0] sm:$0xff]   ;;  %p5043_p10 = scmp.ne.s32.totalorder %s6535_s27, 1 }
  0x34   : > { %v6606_v28 = vpack.i.bf16 %v5051_v21, %v5050_v20  ;;  %5390 = vmatprep.subr.bf16.mxu0 %v6240_v22  ;;  %5396 = vmatprep.mubr.msk.bf16.mxu0 %vm859_vm1, %v6243_v33  ;;  %v5078_v37 = vunpack.c.l.bf16 %v5182_v34  ;;  %v5079_v38 = vunpack.c.h.bf16 %v5182_v34  ;;  %v5177_v39 = vld [vmem:[%s6590_s24 + $0x10] sm:$0xff]   ;;  %v5184_v40 = vld [vmem:[%s6590_s24 + $0x48] sm:$0xff]   ;;  %v5186_v48 = vld [vmem:[%s6590_s24 + $0x58] sm:$0xff]   ;;  %vm4256_vm3 = vcmask 7168   ;;  %s6478_s9 = smov (!%p5043_p10), 127  }
  0x35   : > { %v6612_v30 = vpack.i.bf16 %v5063_v25, %v5062_v24  ;;  %v6621_v36 = vpack.i.bf16 %v5071_v32, %v5070_v31  ;;  %v5058_v41 = vunpack.c.l.bf16 %v5177_v39  ;;  %v5059_v42 = vunpack.c.h.bf16 %v5177_v39  ;;  %v6244_v44 = vld [vmem:[%s6585_s26 + $0x8] sm:$0xff]   ;;  %v6245_v49 = vld [vmem:[%s6585_s26 + $0x10] sm:$0xff]   ;;  %v6246_v54 = vld [vmem:[%s6585_s26 + $0x18] sm:$0xff]  }
  0x36   : > { %5675 = vperm.xlu0 %5673, %v6606_v28   ;;  %v6626_v43 = vpack.i.bf16 %v5079_v38, %v5078_v37  ;;  %v5086_v45 = vunpack.c.l.bf16 %v5184_v40  ;;  %v5087_v46 = vunpack.c.h.bf16 %v5184_v40  ;;  %v5094_v51 = vunpack.c.l.bf16 %v5186_v48  ;;  %v5188_v53 = vld [vmem:[%s6590_s24 + $0x68] sm:$0xff]   ;;  %v5190_v58 = vld [vmem:[%s6590_s24 + $0x78] sm:$0xff]   ;;  %v6247_v59 = vld [vmem:[%s6585_s26 + $0x20] sm:$0xff]  }
  0x37   : > { %5391 = vmatpush3.bf16.msra.mxu0 %v6240_v22  ;;  %v6629_v47 = vpack.i.bf16 %v5059_v42, %v5058_v41  ;;  %v5095_v52 = vunpack.c.h.bf16 %v5186_v48  ;;  %v5102_v56 = vunpack.c.l.bf16 %v5188_v53  ;;  %v5103_v57 = vunpack.c.h.bf16 %v5188_v53  ;;  %v5176_v60 = vld [vmem:[%s6590_s24 + $0x8] sm:$0xff]   ;;  %v5179_v63 = vld [vmem:[%s6590_s24 + $0x20] sm:$0xff]   ;;  %v5181_v6 = vld [vmem:[%s6590_s24 + $0x30] sm:$0xff]  }
  0x38   : > { %5392 = vmatprep.subr.bf16.mxu0 %v6241_v29  ;;  %v6636_v50 = vpack.i.bf16 %v5087_v46, %v5086_v45  ;;  %v5054_v61 = vunpack.c.l.bf16 %v5176_v60  ;;  %v5055_v62 = vunpack.c.h.bf16 %v5176_v60  ;;  %v5110_v0 = vunpack.c.l.bf16 %v5190_v58  ;;  %v5192_v2 = vld [vmem:[%s6590_s24 + $0x88] sm:$0xff]   ;;  %v5183_v7 = vld [vmem:[%s6590_s24 + $0x40] sm:$0xff]   ;;  %v5194_v15 = vld [vmem:[%s6590_s24 + $0x98] sm:$0xff]  }
  0x39   : > { %5594 = vperm.xlu1 %5592, %v6629_v47   ;;  %v6643_v55 = vpack.i.bf16 %v5095_v52, %v5094_v51  ;;  %v5111_v1 = vunpack.c.h.bf16 %v5190_v58  ;;  %v6653_v3 = vpack.i.bf16 %v5103_v57, %v5102_v56  ;;  %v5066_v4 = vunpack.c.l.bf16 %v5179_v63  ;;  %v6248_v11 = vld [vmem:[%s6585_s26 + $0x28] sm:$0xff]   ;;  %v5185_v19 = vld [vmem:[%s6590_s24 + $0x50] sm:$0xff]   ;;  %v5187_v22 = vld [vmem:[%s6590_s24 + $0x60] sm:$0xff]  }
  0x3a   : > { %5691 = vperm.xlu0 %5673, %v6612_v30   ;;  %v5067_v5 = vunpack.c.h.bf16 %v5179_v63  ;;  %v6657_v8 = vpack.i.bf16 %v5055_v62, %v5054_v61  ;;  %v5074_v9 = vunpack.c.l.bf16 %v5181_v6  ;;  %v5075_v10 = vunpack.c.h.bf16 %v5181_v6  ;;  %v6249_v23 = vld [vmem:[%s6585_s26 + $0x30] sm:$0xff]   ;;  %v5191_v31 = vld [vmem:[%s6590_s24 + $0x80] sm:$0xff]   ;;  %v5196_v42 = vld [vmem:[%s6590_s24 + $0xa8] sm:$0xff]  }
  0x3b   : > { %5393 = vmatpush3.bf16.msra.mxu0 %v6241_v29  ;;  %v5118_v12 = vunpack.c.l.bf16 %v5192_v2  ;;  %v5119_v14 = vunpack.c.h.bf16 %v5192_v2  ;;  %v5082_v16 = vunpack.c.l.bf16 %v5183_v7  ;;  %v5083_v17 = vunpack.c.h.bf16 %v5183_v7  ;;  %v5189_v24 = vld [vmem:[%s6590_s24 + $0x70] sm:$0xff]   ;;  %v5198_v58 = vld [vmem:[%s6590_s24 + $0xb8] sm:$0xff]   ;;  %v5195_v60 = vld [vmem:[%s6590_s24 + $0xa0] sm:$0xff]  }
  0x3c   : > { %5394 = vmatprep.subr.bf16.mxu0 %v6242_v35  ;;  %v6662_v13 = vpack.i.bf16 %v5067_v5, %v5066_v4  ;;  %v6666_v20 = vpack.i.bf16 %v5075_v10, %v5074_v9  ;;  %v6669_v21 = vpack.i.bf16 %v5111_v1, %v5110_v0  ;;  %v5090_v26 = vunpack.c.l.bf16 %v5185_v19  ;;  %v5193_v40 = vld [vmem:[%s6590_s24 + $0x90] sm:$0xff]   ;;  %v5200_v5 = vld [vmem:[%s6590_s24 + $0xc8] sm:$0xff]  }
  0x3d   : > { %5599 = vperm.xlu1 %5592, %v6612_v30   ;;  %v6674_v25 = vpack.i.bf16 %v5083_v17, %v5082_v16  ;;  %v5091_v29 = vunpack.c.h.bf16 %v5185_v19  ;;  %v6678_v32 = vpack.i.bf16 %v5119_v14, %v5118_v12  ;;  %v5126_v33 = vunpack.c.l.bf16 %v5194_v15  ;;  %v5197_v0 = vld [vmem:[%s6590_s24 + $0xb0] sm:$0xff]   ;;  %v6252_v6 = vld [vmem:[%s6585_s26 + $0x48] sm:$0xff]   ;;  %v5199_v12 = vld [vmem:[%s6590_s24 + $0xc0] sm:$0xff]  }
  0x3e   : > { %5701 = vperm.xlu0 %5673, %v6621_v36   ;;  %v5127_v34 = vunpack.c.h.bf16 %v5194_v15  ;;  %v5099_v37 = vunpack.c.h.bf16 %v5187_v22  ;;  %v5106_v38 = vunpack.c.l.bf16 %v5189_v24  ;;  %v5107_v39 = vunpack.c.h.bf16 %v5189_v24  ;;  %v6253_v17 = vld [vmem:[%s6585_s26 + $0x50] sm:$0xff]  }
  0x3f   : > { %5395 = vmatpush3.bf16.msra.mxu0 %v6242_v35  ;;  %v5098_v35 = vunpack.c.l.bf16 %v5187_v22  ;;  %v6683_v41 = vpack.i.bf16 %v5091_v29, %v5090_v26  ;;  %v5115_v45 = vunpack.c.h.bf16 %v5191_v31  ;;  %v5122_v51 = vunpack.c.l.bf16 %v5193_v40  ;;  %v5201_v22 = vld [vmem:[%s6590_s24 + $0xd0] sm:$0xff]  }
  0x40   : > { %v6690_v48 = vpack.i.bf16 %v5107_v39, %v5106_v38  ;;  %v5123_v52 = vunpack.c.h.bf16 %v5193_v40  ;;  %v5134_v56 = vunpack.c.l.bf16 %v5196_v42  ;;  %v5135_v57 = vunpack.c.h.bf16 %v5196_v42  ;;  %v5203_v38 = vld [vmem:[%s6590_s24 + $0xe0] sm:$0xff]   ;;  %v6254_v40 = vld [vmem:[%s6585_s26 + $0x58] sm:$0xff]  }
  0x41   : > { %5604 = vperm.xlu1 %5592, %v6621_v36   ;;  %v6688_v46 = vpack.i.bf16 %v5099_v37, %v5098_v35  ;;  %v5142_v62 = vunpack.c.l.bf16 %v5198_v58  ;;  %v5143_v63 = vunpack.c.h.bf16 %v5198_v58  ;;  %v5130_v2 = vunpack.c.l.bf16 %v5195_v60 }
  0x42   : > { %5711 = vperm.xlu0 %5673, %v6626_v43   ;;  %5397 = vmatmul.mubr.msk.bf16.vlgmr.msra.gmra.mxu0 %vm859_vm1, %v6244_v44  ;;  %v5114_v44 = vunpack.c.l.bf16 %v5191_v31  ;;  %v6701_v61 = vpack.i.bf16 %v5123_v52, %v5122_v51  ;;  %v6707_v1 = vpack.i.bf16 %v5135_v57, %v5134_v56  ;;  %v5131_v4 = vunpack.c.h.bf16 %v5195_v60  ;;  %v6255_v51 = vld [vmem:[%s6585_s26 + $0x60] sm:$0xff]   ;;  %v5205_v57 = vld [vmem:[%s6590_s24 + $0xf0] sm:$0xff]  }
  0x43   : > { %5400 = vmatprep.mubr.msk.bf16.mxu0 %vm859_vm1, %v6245_v49  ;;  %v6250_v49 = vld [vmem:[%s6585_s26 + $0x38] sm:$0xff]   ;;  %v5138_v7 = vunpack.c.l.bf16 %v5197_v0  ;;  %v5139_v9 = vunpack.c.h.bf16 %v5197_v0  ;;  %v6718_v14 = vpack.i.bf16 %v5143_v63, %v5142_v62  ;;  %v5150_v15 = vunpack.c.l.bf16 %v5200_v5 }
  0x44   : > { %v6693_v53 = vpack.i.bf16 %v5115_v45, %v5114_v44  ;;  %v6713_v10 = vpack.i.bf16 %v5131_v4, %v5130_v2  ;;  %v5151_v16 = vunpack.c.h.bf16 %v5200_v5  ;;  %v5147_v24 = vunpack.c.h.bf16 %v5199_v12  ;;  %v6256_v4 = vld [vmem:[%s6585_s26 + $0x68] sm:$0xff]  }
  0x45   : > { %5609 = vperm.xlu1 %5592, %v6626_v43   ;;  %v6721_v19 = vpack.i.bf16 %v5139_v9, %v5138_v7  ;;  %v5154_v35 = vunpack.c.l.bf16 %v5201_v22  ;;  %v5155_v37 = vunpack.c.h.bf16 %v5201_v22  ;;  %v5162_v52 = vunpack.c.l.bf16 %v5203_v38  ;;  %v6258_v9 = vld [vmem:[%s6585_s26 + $0x78] sm:$0xff]   ;;  %v6264_v22 = vld [vmem:[%s6585_s26 + $0xa8] sm:$0xff]  }
  0x46   : > { %5721 = vperm.xlu0 %5673, %v6636_v50   ;;  %v6727_v26 = vpack.i.bf16 %v5151_v16, %v5150_v15  ;;  %v5163_v56 = vunpack.c.h.bf16 %v5203_v38  ;;  %v5170_v63 = vunpack.c.l.bf16 %v5205_v57  ;;  %v5171_v0 = vunpack.c.h.bf16 %v5205_v57  ;;  %v6261_v15 = vld [vmem:[%s6585_s26 + $0x90] sm:$0xff]   ;;  %v6262_v16 = vld [vmem:[%s6585_s26 + $0x98] sm:$0xff]   ;;  %v6272_v38 = vld [vmem:[%s6585_s26 + $0xe8] sm:$0xff]  }
  0x47   : > { %v6739_v45 = vpack.i.bf16 %v5155_v37, %v5154_v35  ;;  %v6472_v7 = vmov 2   ;;  %v6270_v35 = vld [vmem:[%s6585_s26 + $0xd8] sm:$0xff]   ;;  %v6271_v37 = vld [vmem:[%s6585_s26 + $0xe0] sm:$0xff]   ;;  %vm4579_vm4 = vcmask 138240  }
  0x48   : > { %v6749_v62 = vpack.i.bf16 %v5163_v56, %v5162_v52  ;;  %v6757_v5 = vpack.i.bf16 %v5171_v0, %v5170_v63  ;;  %v657_v63 = vld [vmem:[%s6580_s23 + $0x170] sm:$0xff]  ;;  %v640_v0 = vld [vmem:[%s6580_s23 + $0xe8] sm:$0xff] }
  0x49   : > { %5614 = vperm.xlu1 %5592, %v6636_v50  }
  0x4a   : > { %5731 = vperm.xlu0 %5673, %v6643_v55   ;;  %5401 = vmatmul.mubr.msk.bf16.gmra.mxu0 %vm859_vm1, %v6246_v54  ;;  %v6696_v54 = vpack.i.bf16 %v5127_v34, %v5126_v33  ;;  %v5204_v34 = vld [vmem:[%s6590_s24 + $0xe8] sm:$0xff]  }
  0x4b   : > { %5404 = vmatprep.mubr.msk.bf16.mxu0 %vm859_vm1, %v6247_v59  ;;  %v6251_v59 = vld [vmem:[%s6585_s26 + $0x40] sm:$0xff]   ;;  %v5166_v42 = vunpack.c.l.bf16 %v5204_v34  ;;  %v5167_v44 = vunpack.c.h.bf16 %v5204_v34  ;;  %v6269_v34 = vld [vmem:[%s6585_s26 + $0xd0] sm:$0xff]  }
  0x4d   : > { %5619 = vperm.xlu1 %5592, %v6643_v55   ;;  %v6747_v58 = vpack.i.bf16 %v5167_v44, %v5166_v42 }
  0x4e   : > { %5741 = vperm.xlu0 %5673, %v6653_v3  }
  0x51   : > { %5624 = vperm.xlu1 %5592, %v6653_v3  }
  0x52   : > { %5751 = vperm.xlu0 %5673, %v6669_v21   ;;  %5405 = vmatmul.mubr.msk.bf16.gmra.mxu0 %vm859_vm1, %v6248_v11  ;;  %v5202_v11 = vld [vmem:[%s6590_s24 + $0xd8] sm:$0xff]  }
  0x53   : > { %5408 = vmatprep.mubr.msk.bf16.mxu0 %vm859_vm1, %v6249_v23  ;;  %v5146_v23 = vunpack.c.l.bf16 %v5199_v12  ;;  %v5158_v29 = vunpack.c.l.bf16 %v5202_v11  ;;  %v5159_v31 = vunpack.c.h.bf16 %v5202_v11  ;;  %v6259_v11 = vld [vmem:[%s6585_s26 + $0x80] sm:$0xff]   ;;  %v6260_v12 = vld [vmem:[%s6585_s26 + $0x88] sm:$0xff]  }
  0x55   : > { %5629 = vperm.xlu1 %5592, %v6669_v21   ;;  %v6729_v33 = vpack.i.bf16 %v5147_v24, %v5146_v23  ;;  %v6736_v39 = vpack.i.bf16 %v5159_v31, %v5158_v29  ;;  %v6265_v23 = vld [vmem:[%s6585_s26 + $0xb0] sm:$0xff]   ;;  %v6266_v24 = vld [vmem:[%s6585_s26 + $0xb8] sm:$0xff]   ;;  %v6267_v29 = vld [vmem:[%s6585_s26 + $0xc0] sm:$0xff]  }
  0x56   : > { %5761 = vperm.xlu0 %5673, %v6678_v32   ;;  %v6268_v31 = vld [vmem:[%s6585_s26 + $0xc8] sm:$0xff]  }
  0x59   : > { %5634 = vperm.xlu1 %5592, %v6678_v32  }
  0x5a   : > { %5771 = vperm.xlu0 %5673, %v6696_v54   ;;  %5409 = vmatmul.mubr.msk.bf16.gmra.mxu0 %vm859_vm1, %v6250_v49  ;;  %v5206_v49 = vld [vmem:[%s6590_s24 + $0xf8] sm:$0xff]  }
  0x5b   : > { %5412 = vmatprep.mubr.msk.bf16.mxu0 %vm859_vm1, %v6251_v59  ;;  %v5174_v59 = vunpack.c.l.bf16 %v5206_v49  ;;  %v5175_v60 = vunpack.c.h.bf16 %v5206_v49  ;;  %v6274_v49 = vld [vmem:[%s6585_s26 + $0xf8] sm:$0xff]  }
  0x5d   : > { %5639 = vperm.xlu1 %5592, %v6696_v54   ;;  %v6754_v2 = vpack.i.bf16 %v5175_v60, %v5174_v59 }
  0x5e   : > { %5781 = vperm.xlu0 %5673, %v6707_v1  }
  0x61   : > { %5644 = vperm.xlu1 %5592, %v6707_v1  }
  0x62   : > { %5791 = vperm.xlu0 %5673, %v6718_v14   ;;  %5413 = vmatmul.mubr.msk.bf16.gmra.mxu0 %vm859_vm1, %v6252_v6  ;;  %v6257_v6 = vld [vmem:[%s6585_s26 + $0x70] sm:$0xff]  }
  0x63   : > { %5416 = vmatprep.mubr.msk.bf16.mxu0 %vm859_vm1, %v6253_v17  ;;  %v6263_v17 = vld [vmem:[%s6585_s26 + $0xa0] sm:$0xff]  }
  0x65   : > { %5649 = vperm.xlu1 %5592, %v6718_v14  }
  0x66   : > { %5801 = vperm.xlu0 %5673, %v6727_v26  }
  0x69   : > { %5654 = vperm.xlu1 %5592, %v6727_v26  }
  0x6a   : > { %5811 = vperm.xlu0 %5673, %v6736_v39   ;;  %5417 = vmatmul.mubr.msk.bf16.gmra.mxu0 %vm859_vm1, %v6254_v40  ;;  %v6273_v40 = vld [vmem:[%s6585_s26 + $0xf0] sm:$0xff]   ;;  %s6477_s26 = smov (!%p5043_p10), 1  }
  0x6b   : > { %5420 = vmatprep.mubr.msk.bf16.mxu0 %vm859_vm1, %v6255_v51 }
  0x6d   : > { %5659 = vperm.xlu1 %5592, %v6736_v39  }
  0x6e   : > { %5821 = vperm.xlu0 %5673, %v6747_v58  }
  0x71   : > { %5664 = vperm.xlu1 %5592, %v6747_v58  }
  0x72   : > { %5831 = vperm.xlu0 %5673, %v6754_v2   ;;  %5421 = vmatmul.mubr.msk.bf16.gmra.mxu0 %vm859_vm1, %v6256_v4  ;;  %v3546_v4 = vmul.f32 1.442695, %v640_v0 }
  0x73   : > { %5424 = vmatprep.mubr.msk.bf16.mxu0 %vm859_vm1, %v6257_v6 }
  0x75   : > { %5669 = vperm.xlu1 %5592, %v6754_v2  }
  0x76   : > { %5841 = vset.pattern.permute.xlu0 %v6472_v7 }
  0x77   : > { %5843 = vperm.xlu0 %5841, %v6657_v8  }
  0x79   : > { %5679 = vset.pattern.permute.xlu1 %v6470_v18  ;;  %v1245_v18 = vld [vmem:[%s8672_s1] sm:$0xff] }
  0x7a   : > { %5425 = vmatmul.mubr.msk.bf16.gmra.mxu0 %vm859_vm1, %v6258_v9  ;;  %5681 = vperm.xlu1 %5679, %v6657_v8  }
  0x7b   : > { %5858 = vperm.xlu0 %5841, %v6662_v13   ;;  %5428 = vmatprep.mubr.msk.bf16.mxu0 %vm859_vm1, %v6259_v11  ;;  %v624_v11 = vld [vmem:[%s6580_s23 + $0x68] sm:$0xff] }
  0x7c   : > { %5460 = vmatprep.subr.mxu1 %v1245_v18 }
  0x7d   : > { %5461 = vmatpush3.msra.mxu1 %v1245_v18 }
  0x7e   : > { %5686 = vperm.xlu1 %5679, %v6629_v47  }
  0x7f   : > { %5868 = vperm.xlu0 %5841, %v6666_v20  }
  0x82   : > { %5429 = vmatmul.mubr.msk.bf16.gmra.mxu0 %vm859_vm1, %v6260_v12  ;;  %5696 = vperm.xlu1 %5679, %v6662_v13  }
  0x83   : > { %5878 = vperm.xlu0 %5841, %v6674_v25   ;;  %5432 = vmatprep.mubr.msk.bf16.mxu0 %vm859_vm1, %v6261_v15  ;;  %v673_v15 = vld [vmem:[%s6580_s23 + $0x1f0] sm:$0xff] }
  0x86   : > { %5706 = vperm.xlu1 %5679, %v6666_v20  }
  0x87   : > { %5888 = vperm.xlu0 %5841, %v6683_v41  }
  0x8a   : > { %5433 = vmatmul.mubr.msk.bf16.gmra.mxu0 %vm859_vm1, %v6262_v16  ;;  %5716 = vperm.xlu1 %5679, %v6674_v25  }
  0x8b   : > { %5898 = vperm.xlu0 %5841, %v6688_v46   ;;  %5436 = vmatprep.mubr.msk.bf16.mxu0 %vm859_vm1, %v6263_v17  ;;  %v656_v17 = vld [vmem:[%s6580_s23 + $0x168] sm:$0xff] }
  0x8e   : > { %5726 = vperm.xlu1 %5679, %v6683_v41  }
  0x8f   : > { %5908 = vperm.xlu0 %5841, %v6690_v48  }
  0x92   : > { %5437 = vmatmul.mubr.msk.bf16.gmra.mxu0 %vm859_vm1, %v6264_v22  ;;  %5736 = vperm.xlu1 %5679, %v6688_v46   ;;  %v3578_v22 = vmul.f32 1.442695, %v656_v17 }
  0x93   : > { %5918 = vperm.xlu0 %5841, %v6693_v53   ;;  %5440 = vmatprep.mubr.msk.bf16.mxu0 %vm859_vm1, %v6265_v23  ;;  %v674_v23 = vld [vmem:[%s6580_s23 + $0x1f8] sm:$0xff] }
  0x96   : > { %5746 = vperm.xlu1 %5679, %v6690_v48  }
  0x97   : > { %5928 = vperm.xlu0 %5841, %v6701_v61  }
  0x9a   : > { %5441 = vmatmul.mubr.msk.bf16.gmra.mxu0 %vm859_vm1, %v6266_v24  ;;  %5756 = vperm.xlu1 %5679, %v6693_v53  }
  0x9b   : > { %5938 = vperm.xlu0 %5841, %v6713_v10   ;;  %5444 = vmatprep.mubr.msk.bf16.mxu0 %vm859_vm1, %v6267_v29  ;;  %v638_v29 = vld [vmem:[%s6580_s23 + $0xd8] sm:$0xff] }
  0x9e   : > { %5766 = vperm.xlu1 %5679, %v6701_v61  }
  0x9f   : > { %5948 = vperm.xlu0 %5841, %v6721_v19  }
  0xa2   : > { %5445 = vmatmul.mubr.msk.bf16.gmra.mxu0 %vm859_vm1, %v6268_v31  ;;  %5776 = vperm.xlu1 %5679, %v6713_v10  }
  0xa3   : > { %5958 = vperm.xlu0 %5841, %v6729_v33   ;;  %5448 = vmatprep.mubr.msk.bf16.mxu0 %vm859_vm1, %v6269_v34 }
  0xa6   : > { %5786 = vperm.xlu1 %5679, %v6721_v19  }
  0xa7   : > { %5968 = vperm.xlu0 %5841, %v6739_v45  }
  0xaa   : > { %5449 = vmatmul.mubr.msk.bf16.gmra.mxu0 %vm859_vm1, %v6270_v35  ;;  %5796 = vperm.xlu1 %5679, %v6729_v33   ;;  %v3542_v35 = vmul.f32 1.442695, %v638_v29  ;;  %v671_v29 = vld [vmem:[%s6580_s23 + $0x1e0] sm:$0xff] }
  0xab   : > { %5978 = vperm.xlu0 %5841, %v6749_v62   ;;  %5452 = vmatprep.mubr.msk.bf16.mxu0 %vm859_vm1, %v6271_v37  ;;  %v626_v37 = vld [vmem:[%s6580_s23 + $0x78] sm:$0xff] }
  0xae   : > { %5806 = vperm.xlu1 %5679, %v6739_v45  }
  0xaf   : > { %5988 = vperm.xlu0 %5841, %v6757_v5  }
  0xb1   : > { %v6829_v42 = vpop.permute.xlu0 %5675 }
  0xb2   : > { %5453 = vmatmul.mubr.msk.bf16.gmra.mxu0 %vm859_vm1, %v6272_v38  ;;  %5816 = vperm.xlu1 %5679, %v6749_v62  }
  0xb3   : > { %5992 = vset.pattern.permute.xlu0 %v6471_v27  ;;  %5456 = vmatprep.mubr.msk.bf16.mxu0 %vm859_vm1, %v6273_v40  ;;  %v670_v40 = vld [vmem:[%s6580_s23 + $0x1d8] sm:$0xff] }
  0xb4   : > { %5994 = vperm.xlu0 %5992, %v6606_v28   ;;  %v6845_v52 = vpop.permute.xlu1 %5594 }
  0xb5   : > { %v6836_v44 = vpop.permute.xlu0 %5691  ;;  %8805 = vst [vmem:[#allocation4_spill] sm:$0xff] %v6845_v52 }
  0xb6   : > { %5826 = vperm.xlu1 %5679, %v6757_v5  }
  0xb8   : > { %5999 = vperm.xlu0 %5992, %v6657_v8   ;;  %v6851_v57 = vpop.permute.xlu1 %5599 }
  0xb9   : > { %v6841_v51 = vpop.permute.xlu0 %5701 }
  0xba   : > { %5457 = vmatmul.mubr.msk.bf16.gmra.mxu0 %vm859_vm1, %v6274_v49  ;;  %5835 = vset.pattern.permute.xlu1 %v6472_v7 }
  0xbb   : > { %5837 = vperm.xlu1 %5835, %v6606_v28  }
  0xbc   : > { %6004 = vperm.xlu0 %5992, %v6662_v13   ;;  %v6856_v8 = vpop.permute.xlu1 %5604 }
  0xbd   : > { %v6849_v56 = vpop.permute.xlu0 %5711 }
  0xbf   : > { %5848 = vperm.xlu1 %5835, %v6629_v47  }
  0xc0   : > { %6009 = vperm.xlu0 %5992, %v6666_v20   ;;  %v6862_v13 = vpop.permute.xlu1 %5609 }
  0xc1   : > { %v6859_v59 = vpop.permute.xlu0 %5721 }
  0xc3   : > { %5853 = vperm.xlu1 %5835, %v6612_v30  }
  0xc4   : > { %6014 = vperm.xlu0 %5992, %v6674_v25   ;;  %v6868_v20 = vpop.permute.xlu1 %5614 }
  0xc5   : > { %v6866_v60 = vpop.permute.xlu0 %5731  ;;  %8806 = vst [vmem:[#allocation5_spill] sm:$0xff] %v6868_v20 }
  0xc7   : > { %5863 = vperm.xlu1 %5835, %v6621_v36  }
  0xc8   : > { %6019 = vperm.xlu0 %5992, %v6683_v41   ;;  %v6872_v28 = vpop.permute.xlu1 %5619 }
  0xc9   : > { %8807 = vst [vmem:[#allocation6_spill] sm:$0xff] %v6872_v28  ;;  %v6875_v47 = vpop.permute.xlu0 %5741 }
  0xcb   : > { %5873 = vperm.xlu1 %5835, %v6626_v43  }
  0xcc   : > { %6024 = vperm.xlu0 %5992, %v6688_v46   ;;  %v6878_v25 = vpop.permute.xlu1 %5624  ;;  %v642_v46 = vld [vmem:[%s6580_s23 + $0xf8] sm:$0xff] }
  0xcd   : > { %8808 = vst [vmem:[#allocation7_spill] sm:$0xff] %v6878_v25  ;;  %v6882_v30 = vpop.permute.xlu0 %5751 }
  0xcf   : > { %5883 = vperm.xlu1 %5835, %v6636_v50   ;;  %v3550_v50 = vmul.f32 1.442695, %v642_v46  ;;  %v3606_v46 = vmul.f32 1.442695, %v670_v40 }
  0xd0   : > { %6029 = vperm.xlu0 %5992, %v6690_v48   ;;  %v6884_v41 = vpop.permute.xlu1 %5629 }
  0xd1   : > { %8809 = vst [vmem:[#allocation8_spill] sm:$0xff] %v6884_v41  ;;  %v6891_v43 = vpop.permute.xlu0 %5761  ;;  %6299 = vpow2.f32 %v3550_v50  ;;  %v658_v50 = vld [vmem:[%s6580_s23 + $0x178] sm:$0xff] }
  0xd3   : > { %5893 = vperm.xlu1 %5835, %v6643_v55  }
  0xd4   : > { %6034 = vperm.xlu0 %5992, %v6693_v53   ;;  %v6888_v36 = vpop.permute.xlu1 %5634  ;;  %v625_v53 = vld [vmem:[%s6580_s23 + $0x70] sm:$0xff] }
  0xd5   : > { %8810 = vst [vmem:[#allocation9_spill] sm:$0xff] %v6888_v36  ;;  %v6900_v55 = vpop.permute.xlu0 %5771  ;;  %v665_v36 = vld [vmem:[%s6580_s23 + $0x1b0] sm:$0xff] }
  0xd7   : > { %5903 = vperm.xlu1 %5835, %v6653_v3  }
  0xd8   : > { %6039 = vperm.xlu0 %5992, %v6701_v61   ;;  %v6895_v48 = vpop.permute.xlu1 %5639 }
  0xd9   : > { %8811 = vst [vmem:[#allocation10_spill] sm:$0xff] %v6895_v48 }
  0xdb   : > { %5913 = vperm.xlu1 %5835, %v6669_v21   ;;  %v6910_v21 = vpop.permute.xlu0 %5781 }
  0xdc   : > { %6044 = vperm.xlu0 %5992, %v6713_v10   ;;  %v6902_v61 = vpop.permute.xlu1 %5644  ;;  %v3516_v10 = vmul.f32 1.442695, %v625_v53 }
  0xdd   : > { %8812 = vst [vmem:[#allocation11_spill] sm:$0xff] %v6902_v61 }
  0xde   : > { %6301 = vpow2.f32 %v3516_v10  ;;  %v6925_v9 = vpop.eup %6299 }
  0xdf   : > { %5923 = vperm.xlu1 %5835, %v6678_v32   ;;  %v672_v32 = vld [vmem:[%s6580_s23 + $0x1e8] sm:$0xff]  ;;  %8817 = vst [vmem:[#allocation16_spill] sm:$0xff] %v6925_v9 }
  0xe0   : > { %6049 = vperm.xlu0 %5992, %v6721_v19   ;;  %v6907_v3 = vpop.permute.xlu1 %5649  ;;  %v3580_v19 = vmul.f32 1.442695, %v657_v63  ;;  %v3610_v7 = vmul.f32 1.442695, %v672_v32  ;;  %v622_v63 = vld [vmem:[%s6580_s23 + $0x58] sm:$0xff] }
  0xe1   : > { %8813 = vst [vmem:[#allocation12_spill] sm:$0xff] %v6907_v3 }
  0xe2   : > { %6303 = vpow2.f32 %v3580_v19 }
  0xe3   : > { %5933 = vperm.xlu1 %5835, %v6696_v54   ;;  %6305 = vpow2.f32 %v3546_v4  ;;  %v641_v54 = vld [vmem:[%s6580_s23 + $0xf0] sm:$0xff] }
  0xe4   : > { %6054 = vperm.xlu0 %5992, %v6729_v33   ;;  %v6914_v33 = vpop.permute.xlu1 %5654  ;;  %v3548_v12 = vmul.f32 1.442695, %v641_v54  ;;  %6307 = vpow2.f32 %v3610_v7  ;;  %v3510_v7 = vmul.f32 1.442695, %v622_v63  ;;  %v639_v54 = vld [vmem:[%s6580_s23 + $0xe0] sm:$0xff] }
  0xe5   : > { %8814 = vst [vmem:[#allocation13_spill] sm:$0xff] %v6914_v33  ;;  %v623_v63 = vld [vmem:[%s6580_s23 + $0x60] sm:$0xff] }
  0xe6   : > { %6309 = vpow2.f32 %v3548_v12  ;;  %v654_v12 = vld [vmem:[%s6580_s23 + $0x158] sm:$0xff] }
  0xe7   : > { %5943 = vperm.xlu1 %5835, %v6707_v1   ;;  %v3514_v1 = vmul.f32 1.442695, %v624_v11 }
  0xe8   : > { %6059 = vperm.xlu0 %5992, %v6739_v45   ;;  %v6919_v45 = vpop.permute.xlu0 %5791  ;;  %v6921_v6 = vpop.permute.xlu1 %5659 }
  0xe9   : > { %8815 = vst [vmem:[#allocation14_spill] sm:$0xff] %v6919_v45  ;;  %8816 = vst [vmem:[#allocation15_spill] sm:$0xff] %v6921_v6  ;;  %6311 = vpow2.f32 %v3514_v1 }
  0xeb   : > { %5953 = vperm.xlu1 %5835, %v6718_v14   ;;  %v6933_v16 = vpop.eup %6301  ;;  %v3612_v14 = vmul.f32 1.442695, %v673_v15  ;;  %v3544_v15 = vmul.f32 1.442695, %v639_v54  ;;  %v3512_v54 = vmul.f32 1.442695, %v623_v63 }
  0xec   : > { %6064 = vperm.xlu0 %5992, %v6749_v62   ;;  %v6929_v62 = vpop.permute.xlu1 %5664  ;;  %8819 = vst [vmem:[#allocation18_spill] sm:$0xff] %v6933_v16 }
  0xed   : > { %8818 = vst [vmem:[#allocation17_spill] sm:$0xff] %v6929_v62  ;;  %6313 = vpow2.f32 %v3612_v14 }
  0xee   : > { %6315 = vpow2.f32 %v3578_v22 }
  0xef   : > { %5963 = vperm.xlu1 %5835, %v6727_v26   ;;  %v6943_v24 = vpop.eup %6303  ;;  %v3614_v26 = vmul.f32 1.442695, %v674_v23  ;;  %v3574_v23 = vmul.f32 1.442695, %v654_v12 }
  0xf0   : > { %6069 = vperm.xlu0 %5992, %v6757_v5   ;;  %v6935_v5 = vpop.permute.xlu0 %5801  ;;  %v6939_v18 = vpop.permute.xlu1 %5669  ;;  %8822 = vst [vmem:[#allocation21_spill] sm:$0xff] %v6943_v24 }
  0xf1   : > { %8820 = vst [vmem:[#allocation19_spill] sm:$0xff] %v6935_v5  ;;  %8821 = vst [vmem:[#allocation20_spill] sm:$0xff] %v6939_v18  ;;  %v6953_v38 = vpop.eup %6305  ;;  %6317 = vpow2.f32 %v3614_v26 }
  0xf2   : > { %8824 = vst [vmem:[#allocation23_spill] sm:$0xff] %v6953_v38  ;;  %6319 = vpow2.f32 %v3542_v35  ;;  %v6961_v53 = vpop.eup %6307 }
  0xf3   : > { %5973 = vperm.xlu1 %5835, %v6736_v39   ;;  %v3518_v39 = vmul.f32 1.442695, %v626_v37  ;;  %8825 = vst [vmem:[#allocation24_spill] sm:$0xff] %v6961_v53  ;;  %v6967_v0 = vpop.eup %6309  ;;  %v3608_v37 = vmul.f32 1.442695, %v671_v29  ;;  %v655_v29 = vld [vmem:[%s6580_s23 + $0x160] sm:$0xff] }
  0xf4   : > { %3773 = vperm.xlu0 %5992, %v6925_v9   ;;  %v6947_v31 = vpop.permute.xlu0 %5811  ;;  %8827 = vst [vmem:[#allocation26_spill] sm:$0xff] %v6967_v0 }
  0xf5   : > { %8823 = vst [vmem:[#allocation22_spill] sm:$0xff] %v6947_v31  ;;  %v6950_v34 = vpop.permute.xlu1 %5681  ;;  %6321 = vpow2.f32 %v3518_v39 }
  0xf6   : > { %6323 = vpow2.f32 %v3606_v46  ;;  %v6973_v11 = vpop.eup %6311 }
  0xf7   : > { %5983 = vperm.xlu1 %5835, %v6747_v58   ;;  %v3582_v58 = vmul.f32 1.442695, %v658_v50  ;;  %8828 = vst [vmem:[#allocation27_spill] sm:$0xff] %v6973_v11 }
  0xf8   : > { %3688 = vperm.xlu0 %5992, %v6933_v16   ;;  %v6963_v10 = vpop.permute.xlu0 %5821 }
  0xf9   : > { %v6958_v49 = vpop.permute.xlu1 %5686  ;;  %8826 = vst [vmem:[#allocation25_spill] sm:$0xff] %v6963_v10  ;;  %6325 = vpow2.f32 %v3582_v58 }
  0xfa   : > { %v6981_v17 = vpop.eup %6313  ;;  %6327 = vpow2.f32 %v3510_v7 }
  0xfb   : > { %6074 = vperm.xlu1 %5835, %v6754_v2   ;;  %8830 = vst [vmem:[#allocation29_spill] sm:$0xff] %v6981_v17  ;;  %v6987_v26 = vpop.eup %6315  ;;  %6329 = vpow2.f32 %v3544_v15 }
  0xfc   : > { %3848 = vperm.xlu0 %5992, %v6943_v24   ;;  %v6978_v1 = vpop.permute.xlu0 %5831  ;;  %8831 = vst [vmem:[#allocation30_spill] sm:$0xff] %v6987_v26  ;;  %6331 = vpow2.f32 %v3574_v23 }
  0xfd   : > { %v6970_v32 = vpop.permute.xlu1 %5696  ;;  %8829 = vst [vmem:[#allocation28_spill] sm:$0xff] %v6978_v1  ;;  %6333 = vpow2.f32 %v3608_v37 }
  0xfe   : > { %v6993_v40 = vpop.eup %6317 }
  0xff   : > { %6078 = vset.pattern.permute.xlu1 %v6471_v27  ;;  %v636_v27 = vld [vmem:[%s6580_s23 + $0xc8] sm:$0xff]  ;;  %8832 = vst [vmem:[#allocation31_spill] sm:$0xff] %v6993_v40  ;;  %v6999_v58 = vpop.eup %6319 }
 0x100   : > { %3763 = vperm.xlu0 %5992, %v6953_v38   ;;  %3768 = vperm.xlu1 %6078, %v6967_v0   ;;  %v3538_v50 = vmul.f32 1.442695, %v636_v27  ;;  %8833 = vst [vmem:[#allocation32_spill] sm:$0xff] %v6999_v58  ;;  %v620_v27 = vld [vmem:[%s6580_s23 + $0x48] sm:$0xff]  ;;  %v653_v38 = vld [vmem:[%s6580_s23 + $0x150] sm:$0xff]  ;;  %v667_v0 = vld [vmem:[%s6580_s23 + $0x1c0] sm:$0xff] }
 0x101   : > { %v6984_v22 = vpop.permute.xlu1 %5706 }
 0x102   : > { %v5398_v19 = vpop.f32.mrf.mxu0  ;;  %v7007_v12 = vpop.eup %6321  ;;  %6335 = vpow2.f32 %v3538_v50  ;;  %v3576_v50 = vmul.f32 1.442695, %v655_v29 }
 0x103   : > { %8834 = vst [vmem:[#allocation33_spill] sm:$0xff] %v7007_v12  ;;  %6337 = vpow2.f32 %v3512_v54 }
 0x104   : > { %3923 = vperm.xlu0 %5992, %v6961_v53   ;;  %v990_v4 = vpop.f32.mrf.mxu0  ;;  %3928 = vperm.xlu1 %6078, %v6981_v17   ;;  %v637_v53 = vld [vmem:[%s6580_s23 + $0xd0] sm:$0xff] }
 0x105   : > { %5462 = vmatprep.mubr.msk.f32.mxu1 %vm1246_vm2, %v990_v4  ;;  %v6996_v46 = vpop.permute.xlu1 %5716  ;;  %v7001_v4 = vpop.permute.xlu0 %5843  ;;  %v3540_v54 = vmul.f32 1.442695, %v637_v53 }
 0x106   : > { %v5399_v2 = vpop.f32.mrf.mxu0 }
 0x108   : > { %3683 = vperm.xlu0 %5992, %v6973_v11   ;;  %v993_v14 = vpop.f32.mrf.mxu0  ;;  %3933 = vperm.xlu1 %6078, %v6993_v40  }
 0x109   : > { %5463 = vmatmul.mubr.msk.f32.vlgmr.msra.gmra.mxu1 %vm1246_vm2, %v993_v14  ;;  %v7010_v14 = vpop.permute.xlu1 %5726  ;;  %v7018_v37 = vpop.permute.xlu0 %5858 }
 0x10a   : > { %v5402_v35 = vpop.f32.mrf.mxu0  ;;  %5465 = vmatprep.mubr.msk.f32.mxu1 %vm1246_vm2, %v5398_v19  ;;  %v668_v19 = vld [vmem:[%s6580_s23 + $0x1c8] sm:$0xff] }
 0x10b   : > { %v3602_v23 = vmul.f32 1.442695, %v668_v19 }
 0x10c   : > { %3843 = vperm.xlu0 %5992, %v6987_v26   ;;  %v1006_v39 = vpop.f32.mrf.mxu0  ;;  %3693 = vperm.xlu1 %6078, %v7007_v12  }
 0x10d   : > { %5466 = vmatmul.mubr.msk.f32.gmra.mxu1 %vm1246_vm2, %v5399_v2  ;;  %v7013_v2 = vpop.eup %6323  ;;  %6339 = vpow2.f32 %v3602_v23  ;;  %v7024_v26 = vpop.permute.xlu1 %5736 }
 0x10e   : > { %v5403_v7 = vpop.f32.mrf.mxu0  ;;  %5468 = vmatprep.mubr.msk.f32.mxu1 %vm1246_vm2, %v1006_v39  ;;  %8835 = vst [vmem:[#allocation34_spill] sm:$0xff] %v7013_v2  ;;  %v7021_v63 = vpop.eup %6325  ;;  %6341 = vpow2.f32 %v3576_v50 }
 0x10f   : > { %8836 = vst [vmem:[#allocation35_spill] sm:$0xff] %v7021_v63  ;;  %v7027_v40 = vpop.eup %6327 }
 0x110   : > { %3753 = vperm.xlu0 %5992, %v6999_v58   ;;  %v1009_v15 = vpop.f32.mrf.mxu0  ;;  %8837 = vst [vmem:[#allocation36_spill] sm:$0xff] %v7027_v40  ;;  %3853 = vperm.xlu1 %6078, %v7021_v63   ;;  %v7033_v29 = vpop.eup %6329  ;;  %v621_v58 = vld [vmem:[%s6580_s23 + $0x50] sm:$0xff] }
 0x111   : > { %5469 = vmatmul.mubr.msk.f32.gmra.mxu1 %vm1246_vm2, %v1009_v15  ;;  %v3506_v15 = vmul.f32 1.442695, %v620_v27  ;;  %8838 = vst [vmem:[#allocation37_spill] sm:$0xff] %v7033_v29  ;;  %v7037_v24 = vpop.eup %6331  ;;  %v7044_v53 = vpop.permute.xlu1 %5746 }
 0x112   : > { %v5406_v39 = vpop.f32.mrf.mxu0  ;;  %5471 = vmatprep.mubr.msk.f32.mxu1 %vm1246_vm2, %v5402_v35  ;;  %v652_v35 = vld [vmem:[%s6580_s23 + $0x148] sm:$0xff]  ;;  %8839 = vst [vmem:[#allocation38_spill] sm:$0xff] %v7037_v24 }
 0x113   : > { %6343 = vpow2.f32 %v3506_v15  ;;  %v3570_v27 = vmul.f32 1.442695, %v652_v35  ;;  %v7047_v15 = vpop.eup %6333 }
 0x114   : > { %3913 = vperm.xlu0 %5992, %v7013_v2   ;;  %v1022_v19 = vpop.f32.mrf.mxu0  ;;  %v669_v2 = vld [vmem:[%s6580_s23 + $0x1d0] sm:$0xff]  ;;  %3758 = vperm.xlu1 %6078, %v7033_v29   ;;  %6345 = vpow2.f32 %v3540_v54  ;;  %8840 = vst [vmem:[#allocation39_spill] sm:$0xff] %v7047_v15 }
 0x115   : > { %5472 = vmatmul.mubr.msk.f32.gmra.mxu1 %vm1246_vm2, %v5403_v7  ;;  %v7039_v7 = vpop.permute.xlu0 %5868  ;;  %v3604_v50 = vmul.f32 1.442695, %v669_v2  ;;  %6347 = vpow2.f32 %v3570_v27  ;;  %v3508_v2 = vmul.f32 1.442695, %v621_v58  ;;  %v3572_v58 = vmul.f32 1.442695, %v653_v38 }
 0x116   : > { %v5407_v17 = vpop.f32.mrf.mxu0  ;;  %5474 = vmatprep.mubr.msk.f32.mxu1 %vm1246_vm2, %v1022_v19  ;;  %v634_v19 = vld [vmem:[%s6580_s23 + $0xb8] sm:$0xff] }
 0x117   : > { %6349 = vpow2.f32 %v3604_v50 }
 0x118   : > { %3673 = vperm.xlu0 %5992, %v7027_v40   ;;  %v1025_v23 = vpop.f32.mrf.mxu0  ;;  %v3534_v40 = vmul.f32 1.442695, %v634_v19  ;;  %3918 = vperm.xlu1 %6078, %v7047_v15   ;;  %v7062_v19 = vpop.permute.xlu1 %5756 }
 0x119   : > { %5475 = vmatmul.mubr.msk.f32.gmra.mxu1 %vm1246_vm2, %v1025_v23  ;;  %v7051_v23 = vpop.eup %6335  ;;  %v7056_v54 = vpop.permute.xlu0 %5878 }
 0x11a   : > { %v5410_v63 = vpop.f32.mrf.mxu0  ;;  %5477 = vmatprep.mubr.msk.f32.mxu1 %vm1246_vm2, %v5406_v39  ;;  %8841 = vst [vmem:[#allocation40_spill] sm:$0xff] %v7051_v23  ;;  %v666_v39 = vld [vmem:[%s6580_s23 + $0x1b8] sm:$0xff]  ;;  %6351 = vpow2.f32 %v3534_v40 }
 0x11b   : > { %6353 = vpow2.f32 %v3508_v2 }
 0x11c   : > { %3833 = vperm.xlu0 %5992, %v7037_v24   ;;  %v1038_v35 = vpop.f32.mrf.mxu0  ;;  %v7059_v24 = vpop.eup %6337 }
 0x11d   : > { %5478 = vmatmul.mubr.msk.f32.gmra.mxu1 %vm1246_vm2, %v5407_v17  ;;  %8842 = vst [vmem:[#allocation41_spill] sm:$0xff] %v7059_v24  ;;  %v3598_v17 = vmul.f32 1.442695, %v666_v39  ;;  %v7065_v29 = vpop.eup %6339  ;;  %3678 = vperm.xlu1 %6078, %v7059_v24   ;;  %v7082_v38 = vpop.permute.xlu1 %5766 }
 0x11e   : > { %v5411_v11 = vpop.f32.mrf.mxu0  ;;  %5480 = vmatprep.mubr.msk.f32.mxu1 %vm1246_vm2, %v1038_v35  ;;  %8843 = vst [vmem:[#allocation42_spill] sm:$0xff] %v7065_v29  ;;  %v618_v35 = vld [vmem:[%s6580_s23 + $0x38] sm:$0xff]  ;;  %v7071_v50 = vpop.eup %6341 }
 0x11f   : > { %8844 = vst [vmem:[#allocation43_spill] sm:$0xff] %v7071_v50  ;;  %6355 = vpow2.f32 %v3598_v17  ;;  %v3502_v39 = vmul.f32 1.442695, %v618_v35 }
 0x120   : > { %3743 = vperm.xlu0 %5992, %v7051_v23   ;;  %v1041_v27 = vpop.f32.mrf.mxu0  ;;  %v635_v23 = vld [vmem:[%s6580_s23 + $0xc0] sm:$0xff]  ;;  %v7075_v9 = vpop.eup %6343  ;;  %6357 = vpow2.f32 %v3572_v58 }
 0x121   : > { %5481 = vmatmul.mubr.msk.f32.gmra.mxu1 %vm1246_vm2, %v1041_v27  ;;  %8845 = vst [vmem:[#allocation44_spill] sm:$0xff] %v7075_v9  ;;  %v7077_v27 = vpop.permute.xlu0 %5888  ;;  %3838 = vperm.xlu1 %6078, %v7071_v50   ;;  %v3536_v2 = vmul.f32 1.442695, %v635_v23  ;;  %v7085_v17 = vpop.eup %6345  ;;  %6359 = vpow2.f32 %v3502_v39  ;;  %v3600_v23 = vmul.f32 1.442695, %v667_v0 }
 0x122   : > { %v5414_v15 = vpop.f32.mrf.mxu0  ;;  %5483 = vmatprep.mubr.msk.f32.mxu1 %vm1246_vm2, %v5410_v63  ;;  %v650_v63 = vld [vmem:[%s6580_s23 + $0x138] sm:$0xff]  ;;  %8846 = vst [vmem:[#allocation45_spill] sm:$0xff] %v7085_v17 }
 0x123   : > { %6361 = vpow2.f32 %v3536_v2 }
 0x124   : > { %3903 = vperm.xlu0 %5992, %v7065_v29   ;;  %v1054_v40 = vpop.f32.mrf.mxu0  ;;  %v3566_v29 = vmul.f32 1.442695, %v650_v63  ;;  %v7100_v63 = vpop.permute.xlu1 %5776 }
 0x125   : > { %5484 = vmatmul.mubr.msk.f32.gmra.mxu1 %vm1246_vm2, %v5411_v11  ;;  %v7089_v11 = vpop.eup %6347  ;;  %v7094_v50 = vpop.permute.xlu0 %5898  ;;  %3748 = vperm.xlu1 %6078, %v7085_v17  }
 0x126   : > { %v5415_v24 = vpop.f32.mrf.mxu0  ;;  %5486 = vmatprep.mubr.msk.f32.mxu1 %vm1246_vm2, %v1054_v40  ;;  %8847 = vst [vmem:[#allocation46_spill] sm:$0xff] %v7089_v11  ;;  %v632_v40 = vld [vmem:[%s6580_s23 + $0xa8] sm:$0xff]  ;;  %v7097_v58 = vpop.eup %6349  ;;  %6363 = vpow2.f32 %v3566_v29  ;;  %v651_v29 = vld [vmem:[%s6580_s23 + $0x140] sm:$0xff] }
 0x127   : > { %8848 = vst [vmem:[#allocation47_spill] sm:$0xff] %v7097_v58  ;;  %v7103_v12 = vpop.eup %6351  ;;  %6365 = vpow2.f32 %v3600_v23 }
 0x128   : > { %3663 = vperm.xlu0 %5992, %v7075_v9   ;;  %v1057_v35 = vpop.f32.mrf.mxu0  ;;  %v619_v9 = vld [vmem:[%s6580_s23 + $0x40] sm:$0xff]  ;;  %8849 = vst [vmem:[#allocation48_spill] sm:$0xff] %v7103_v12  ;;  %v7108_v2 = vpop.eup %6353 }
 0x129   : > { %5487 = vmatmul.mubr.msk.f32.gmra.mxu1 %vm1246_vm2, %v1057_v35  ;;  %v3530_v35 = vmul.f32 1.442695, %v632_v40  ;;  %3908 = vperm.xlu1 %6078, %v7097_v58   ;;  %v3504_v0 = vmul.f32 1.442695, %v619_v9  ;;  %8850 = vst [vmem:[#allocation49_spill] sm:$0xff] %v7108_v2  ;;  %v7114_v17 = vpop.permute.xlu0 %5908  ;;  %v633_v58 = vld [vmem:[%s6580_s23 + $0xb0] sm:$0xff] }
 0x12a   : > { %v5418_v16 = vpop.f32.mrf.mxu0  ;;  %5489 = vmatprep.mubr.msk.f32.mxu1 %vm1246_vm2, %v5414_v15  ;;  %v3568_v9 = vmul.f32 1.442695, %v651_v29 }
 0x12b   : > { %6367 = vpow2.f32 %v3530_v35 }
 0x12c   : > { %3823 = vperm.xlu0 %5992, %v7089_v11   ;;  %v1070_v39 = vpop.f32.mrf.mxu0  ;;  %v7112_v40 = vpop.eup %6355  ;;  %6369 = vpow2.f32 %v3504_v0  ;;  %v3532_v0 = vmul.f32 1.442695, %v633_v58  ;;  %v3596_v58 = vmul.f32 1.442695, %v665_v36 }
 0x12d   : > { %5490 = vmatmul.mubr.msk.f32.gmra.mxu1 %vm1246_vm2, %v5415_v24  ;;  %8851 = vst [vmem:[#allocation50_spill] sm:$0xff] %v7112_v40  ;;  %3668 = vperm.xlu1 %6078, %v7108_v2   ;;  %v7121_v23 = vpop.eup %6357  ;;  %6371 = vpow2.f32 %v3568_v9 }
 0x12e   : > { %v5419_v15 = vpop.f32.mrf.mxu0  ;;  %5492 = vmatprep.mubr.msk.f32.mxu1 %vm1246_vm2, %v1070_v39  ;;  %v7118_v39 = vpop.permute.xlu1 %5786  ;;  %8852 = vst [vmem:[#allocation51_spill] sm:$0xff] %v7121_v23  ;;  %6373 = vpow2.f32 %v3532_v0 }
 0x12f   : > { %6375 = vpow2.f32 %v3596_v58 }
 0x130   : > { %3733 = vperm.xlu0 %5992, %v7103_v12   ;;  %v1073_v11 = vpop.f32.mrf.mxu0  ;;  %v7125_v12 = vpop.eup %6359 }
 0x131   : > { %5493 = vmatmul.mubr.msk.f32.gmra.mxu1 %vm1246_vm2, %v1073_v11  ;;  %8853 = vst [vmem:[#allocation52_spill] sm:$0xff] %v7125_v12  ;;  %3828 = vperm.xlu1 %6078, %v7121_v23   ;;  %v7132_v29 = vpop.eup %6361  ;;  %v617_v23 = vld [vmem:[%s6580_s23 + $0x30] sm:$0xff] }
 0x132   : > { %v5422_v24 = vpop.f32.mrf.mxu0  ;;  %5495 = vmatprep.mubr.msk.f32.mxu1 %vm1246_vm2, %v5418_v16  ;;  %v7129_v16 = vpop.permute.xlu0 %5918  ;;  %8854 = vst [vmem:[#allocation53_spill] sm:$0xff] %v7132_v29  ;;  %v3500_v36 = vmul.f32 1.442695, %v617_v23 }
 0x133   : > { %v7135_v2 = vpop.permute.xlu1 %5796  ;;  %v7138_v20 = vpop.eup %6363 }
 0x134   : > { %3893 = vperm.xlu0 %5992, %v7112_v40   ;;  %v1086_v35 = vpop.f32.mrf.mxu0  ;;  %8855 = vst [vmem:[#allocation54_spill] sm:$0xff] %v7135_v2  ;;  %8856 = vst [vmem:[#allocation55_spill] sm:$0xff] %v7138_v20  ;;  %v7143_v9 = vpop.eup %6365  ;;  %6377 = vpow2.f32 %v3500_v36  ;;  %v663_v36 = vld [vmem:[%s6580_s23 + $0x1a0] sm:$0xff] }
 0x135   : > { %5496 = vmatmul.mubr.msk.f32.gmra.mxu1 %vm1246_vm2, %v5419_v15  ;;  %3738 = vperm.xlu1 %6078, %v7132_v29   ;;  %8857 = vst [vmem:[#allocation56_spill] sm:$0xff] %v7143_v9 }
 0x136   : > { %v5423_v11 = vpop.f32.mrf.mxu0  ;;  %5498 = vmatprep.mubr.msk.f32.mxu1 %vm1246_vm2, %v1086_v35  ;;  %v7149_v52 = vpop.permute.xlu0 %5928 }
 0x137   : > { %v7152_v18 = vpop.permute.xlu1 %5806 }
 0x138   : > { %3653 = vperm.xlu0 %5992, %v7125_v12   ;;  %v1089_v40 = vpop.f32.mrf.mxu0  ;;  %v7147_v12 = vpop.eup %6367  ;;  %8859 = vst [vmem:[#allocation58_spill] sm:$0xff] %v7152_v18 }
 0x139   : > { %5499 = vmatmul.mubr.msk.f32.gmra.mxu1 %vm1246_vm2, %v1089_v40  ;;  %8858 = vst [vmem:[#allocation57_spill] sm:$0xff] %v7147_v12  ;;  %3898 = vperm.xlu1 %6078, %v7143_v9  }
 0x13a   : > { %v5426_v15 = vpop.f32.mrf.mxu0  ;;  %5501 = vmatprep.mubr.msk.f32.mxu1 %vm1246_vm2, %v5422_v24  ;;  %v7156_v24 = vpop.eup %6369 }
 0x13b   : > { %8860 = vst [vmem:[#allocation59_spill] sm:$0xff] %v7156_v24  ;;  %v7167_v23 = vpop.permute.xlu1 %5816 }
 0x13c   : > { %3813 = vperm.xlu0 %5992, %v7138_v20   ;;  %v1102_v35 = vpop.f32.mrf.mxu0  ;;  %v649_v20 = vld [vmem:[%s6580_s23 + $0x130] sm:$0xff]  ;;  %8862 = vst [vmem:[#allocation61_spill] sm:$0xff] %v7167_v23 }
 0x13d   : > { %5502 = vmatmul.mubr.msk.f32.gmra.mxu1 %vm1246_vm2, %v5423_v11  ;;  %v7162_v11 = vpop.permute.xlu0 %5938  ;;  %3658 = vperm.xlu1 %6078, %v7156_v24   ;;  %v3564_v58 = vmul.f32 1.442695, %v649_v20 }
 0x13e   : > { %v5427_v40 = vpop.f32.mrf.mxu0  ;;  %5504 = vmatprep.mubr.msk.f32.mxu1 %vm1246_vm2, %v1102_v35  ;;  %v7165_v35 = vpop.eup %6371 }
 0x13f   : > { %8861 = vst [vmem:[#allocation60_spill] sm:$0xff] %v7165_v35  ;;  %6379 = vpow2.f32 %v3564_v58  ;;  %v7179_v6 = vpop.permute.xlu1 %5826 }
 0x140   : > { %3723 = vperm.xlu0 %5992, %v7147_v12   ;;  %v1105_v0 = vpop.f32.mrf.mxu0  ;;  %v631_v12 = vld [vmem:[%s6580_s23 + $0xa0] sm:$0xff]  ;;  %8864 = vst [vmem:[#allocation63_spill] sm:$0xff] %v7179_v6 }
 0x141   : > { %5505 = vmatmul.mubr.msk.f32.gmra.mxu1 %vm1246_vm2, %v1105_v0  ;;  %3818 = vperm.xlu1 %6078, %v7165_v35   ;;  %v7173_v0 = vpop.eup %6373  ;;  %v7176_v20 = vpop.permute.xlu0 %5948 }
 0x142   : > { %v5430_v29 = vpop.f32.mrf.mxu0  ;;  %5507 = vmatprep.mubr.msk.f32.mxu1 %vm1246_vm2, %v5426_v15  ;;  %v3528_v15 = vmul.f32 1.442695, %v631_v12  ;;  %8863 = vst [vmem:[#allocation62_spill] sm:$0xff] %v7173_v0 }
 0x144   : > { %v1118_v9 = vpop.f32.mrf.mxu0  ;;  %6381 = vpow2.f32 %v3528_v15 }
 0x145   : > { %5508 = vmatmul.mubr.msk.f32.gmra.mxu1 %vm1246_vm2, %v5427_v40  ;;  %3728 = vperm.xlu1 %6078, %v7173_v0   ;;  %v7183_v40 = vpop.eup %6375  ;;  %v7187_v35 = vpop.permute.xlu0 %5958 }
 0x146   : > { %v5431_v62 = vpop.f32.mrf.mxu0  ;;  %5510 = vmatprep.mubr.msk.f32.mxu1 %vm1246_vm2, %v1118_v9  ;;  %v3592_v9 = vmul.f32 1.442695, %v663_v36  ;;  %8865 = vst [vmem:[#allocation64_spill] sm:$0xff] %v7183_v40  ;;  %8866 = vst [vmem:[#allocation65_spill] sm:$0xff] %v7187_v35 }
 0x148   : > { %v1121_v24 = vpop.f32.mrf.mxu0  ;;  %6383 = vpow2.f32 %v3592_v9 }
 0x149   : > { %5511 = vmatmul.mubr.msk.f32.gmra.mxu1 %vm1246_vm2, %v1121_v24  ;;  %3888 = vperm.xlu1 %6078, %v7183_v40   ;;  %v7190_v24 = vpop.eup %6377 }
 0x14a   : > { %v5434_v33 = vpop.f32.mrf.mxu0  ;;  %5513 = vmatprep.mubr.msk.f32.mxu1 %vm1246_vm2, %v5430_v29  ;;  %8867 = vst [vmem:[#allocation66_spill] sm:$0xff] %v7190_v24  ;;  %v7192_v29 = vpop.permute.xlu1 %5837 }
 0x14c   : > { %v1134_v12 = vpop.f32.mrf.mxu0 }
 0x14d   : > { %5514 = vmatmul.mubr.msk.f32.gmra.mxu1 %vm1246_vm2, %v5431_v62  ;;  %3648 = vperm.xlu1 %6078, %v7190_v24   ;;  %v7197_v62 = vpop.eup %6379 }
 0x14e   : > { %v5435_v58 = vpop.f32.mrf.mxu0  ;;  %5516 = vmatprep.mubr.msk.f32.mxu1 %vm1246_vm2, %v1134_v12  ;;  %8868 = vst [vmem:[#allocation67_spill] sm:$0xff] %v7197_v62  ;;  %v7199_v12 = vpop.permute.xlu0 %5968 }
 0x14f   : > { %8869 = vst [vmem:[#allocation68_spill] sm:$0xff] %v7199_v12  ;;  %v7202_v9 = vpop.permute.xlu1 %5848 }
 0x150   : > { %v1137_v0 = vpop.f32.mrf.mxu0 }
 0x151   : > { %5517 = vmatmul.mubr.msk.f32.gmra.mxu1 %vm1246_vm2, %v1137_v0  ;;  %3808 = vperm.xlu1 %6078, %v7197_v62   ;;  %v7206_v0 = vpop.eup %6381 }
 0x152   : > { %v5438_v15 = vpop.f32.mrf.mxu0  ;;  %5519 = vmatprep.mubr.msk.f32.mxu1 %vm1246_vm2, %v5434_v33  ;;  %8870 = vst [vmem:[#allocation69_spill] sm:$0xff] %v7206_v0  ;;  %v7210_v24 = vpop.permute.xlu0 %5978 }
 0x153   : > { %8871 = vst [vmem:[#allocation70_spill] sm:$0xff] %v7210_v24  ;;  %v7215_v61 = vpop.permute.xlu1 %5853 }
 0x154   : > { %v1150_v36 = vpop.f32.mrf.mxu0 }
 0x155   : > { %5520 = vmatmul.mubr.msk.f32.gmra.mxu1 %vm1246_vm2, %v5435_v58  ;;  %3718 = vperm.xlu1 %6078, %v7206_v0   ;;  %v7213_v58 = vpop.eup %6383 }
 0x156   : > { %v5439_v40 = vpop.f32.mrf.mxu0  ;;  %5522 = vmatprep.mubr.msk.f32.mxu1 %vm1246_vm2, %v1150_v36  ;;  %8872 = vst [vmem:[#allocation71_spill] sm:$0xff] %v7213_v58  ;;  %v7220_v62 = vpop.permute.xlu0 %5988 }
 0x157   : > { %8873 = vst [vmem:[#allocation72_spill] sm:$0xff] %v7220_v62 }
 0x158   : > { %v1153_v3 = vpop.f32.mrf.mxu0 }
 0x159   : > { %5523 = vmatmul.mubr.msk.f32.gmra.mxu1 %vm1246_vm2, %v1153_v3  ;;  %3878 = vperm.xlu1 %6078, %v7213_v58  }
 0x15a   : > { %v5442_v33 = vpop.f32.mrf.mxu0  ;;  %5525 = vmatprep.mubr.msk.f32.mxu1 %vm1246_vm2, %v5438_v15  ;;  %v7223_v15 = vpop.permute.xlu1 %5863 }
 0x15c   : > { %v1166_v48 = vpop.f32.mrf.mxu0 }
 0x15d   : > { %5526 = vmatmul.mubr.msk.f32.gmra.mxu1 %vm1246_vm2, %v5439_v40  ;;  %v7228_v40 = vpop.permute.xlu0 %5994 }
 0x15e   : > { %v5443_v36 = vpop.f32.mrf.mxu0  ;;  %5528 = vmatprep.mubr.msk.f32.mxu1 %vm1246_vm2, %v1166_v48  ;;  %8874 = vst [vmem:[#allocation73_spill] sm:$0xff] %v7228_v40  ;;  %v7230_v48 = vpop.permute.xlu1 %5873 }
 0x160   : > { %v1169_v3 = vpop.f32.mrf.mxu0 }
 0x161   : > { %5529 = vmatmul.mubr.msk.f32.gmra.mxu1 %vm1246_vm2, %v1169_v3  ;;  %v7234_v41 = vpop.permute.xlu0 %5999 }
 0x162   : > { %v5446_v0 = vpop.f32.mrf.mxu0  ;;  %5531 = vmatprep.mubr.msk.f32.mxu1 %vm1246_vm2, %v5442_v33  ;;  %8875 = vst [vmem:[#allocation74_spill] sm:$0xff] %v7234_v41  ;;  %v7237_v33 = vpop.permute.xlu1 %5883 }
 0x164   : > { %v1182_v1 = vpop.f32.mrf.mxu0 }
 0x165   : > { %5532 = vmatmul.mubr.msk.f32.gmra.mxu1 %vm1246_vm2, %v5443_v36 }
 0x166   : > { %v5447_v6 = vpop.f32.mrf.mxu0  ;;  %5534 = vmatprep.mubr.msk.f32.mxu1 %vm1246_vm2, %v1182_v1  ;;  %v7244_v10 = vpop.permute.xlu1 %5893 }
 0x168   : > { %v1185_v58 = vpop.f32.mrf.mxu0 }
 0x169   : > { %5535 = vmatmul.mubr.msk.f32.gmra.mxu1 %vm1246_vm2, %v1185_v58  ;;  %v7242_v58 = vpop.permute.xlu0 %6004 }
 0x16a   : > { %v5450_v62 = vpop.f32.mrf.mxu0  ;;  %5537 = vmatprep.mubr.msk.f32.mxu1 %vm1246_vm2, %v5446_v0 }
 0x16c   : > { %v1198_v3 = vpop.f32.mrf.mxu0 }
 0x16d   : > { %5538 = vmatmul.mubr.msk.f32.gmra.mxu1 %vm1246_vm2, %v5447_v6  ;;  %v7248_v23 = vpop.permute.xlu0 %6009 }
 0x16e   : > { %v5451_v36 = vpop.f32.mrf.mxu0  ;;  %5540 = vmatprep.mubr.msk.f32.mxu1 %vm1246_vm2, %v1198_v3  ;;  %v7251_v3 = vpop.permute.xlu1 %5903 }
 0x170   : > { %v1201_v1 = vpop.f32.mrf.mxu0 }
 0x171   : > { %5541 = vmatmul.mubr.msk.f32.gmra.mxu1 %vm1246_vm2, %v1201_v1 }
 0x172   : > { %v5454_v40 = vpop.f32.mrf.mxu0  ;;  %5543 = vmatprep.mubr.msk.f32.mxu1 %vm1246_vm2, %v5450_v62  ;;  %v7258_v25 = vpop.permute.xlu1 %5913 }
 0x174   : > { %v1214_v0 = vpop.f32.mrf.mxu0 }
 0x175   : > { %5544 = vmatmul.mubr.msk.f32.gmra.mxu1 %vm1246_vm2, %v5451_v36  ;;  %v7256_v36 = vpop.permute.xlu0 %6014 }
 0x176   : > { %v5455_v41 = vpop.f32.mrf.mxu0  ;;  %5546 = vmatprep.mubr.msk.f32.mxu1 %vm1246_vm2, %v1214_v0  ;;  %8876 = vst [vmem:[#allocation75_spill] sm:$0xff] %v7256_v36 }
 0x178   : > { %v1217_v6 = vpop.f32.mrf.mxu0 }
 0x179   : > { %5547 = vmatmul.mubr.msk.f32.gmra.mxu1 %vm1246_vm2, %v1217_v6  ;;  %v7263_v6 = vpop.permute.xlu0 %6019 }
 0x17a   : > { %v5458_v1 = vpop.f32.mrf.mxu0  ;;  %5549 = vmatprep.mubr.msk.f32.mxu1 %vm1246_vm2, %v5454_v40  ;;  %8877 = vst [vmem:[#allocation76_spill] sm:$0xff] %v7263_v6  ;;  %v7265_v40 = vpop.permute.xlu1 %5923 }
 0x17c   : > { %v1230_v62 = vpop.f32.mrf.mxu0 }
 0x17d   : > { %5550 = vmatmul.mubr.msk.f32.gmra.mxu1 %vm1246_vm2, %v5455_v41  ;;  %v7267_v31 = vpop.permute.xlu0 %6024 }
 0x17e   : > { %v5459_v24 = vpop.f32.mrf.mxu0  ;;  %5552 = vmatprep.mubr.msk.f32.mxu1 %vm1246_vm2, %v1230_v62  ;;  %8878 = vst [vmem:[#allocation77_spill] sm:$0xff] %v7267_v31  ;;  %v7269_v41 = vpop.permute.xlu1 %5933 }
 0x180   : > { %v1233_v0 = vpop.f32.mrf.mxu0 }
 0x181   : > { %5553 = vmatmul.mubr.msk.f32.gmra.mxu1 %vm1246_vm2, %v1233_v0  ;;  %v7271_v62 = vpop.permute.xlu0 %6029 }
 0x182   : > { %5555 = vmatprep.mubr.msk.f32.mxu1 %vm1246_vm2, %v5458_v1  ;;  %8879 = vst [vmem:[#allocation78_spill] sm:$0xff] %v7271_v62  ;;  %v7273_v36 = vpop.permute.xlu1 %5943 }
 0x185   : > { %5556 = vmatmul.mubr.msk.f32.gmra.mxu1 %vm1246_vm2, %v5459_v24  ;;  %v7275_v18 = vpop.permute.xlu0 %6034 }
 0x186   : > { %8880 = vst [vmem:[#allocation79_spill] sm:$0xff] %v7275_v18  ;;  %v7277_v12 = vpop.permute.xlu1 %5953 }
 0x187   : > { %8881 = vst [vmem:[#allocation80_spill] sm:$0xff] %v7277_v12 }
 0x189   : > { %v7279_v0 = vpop.permute.xlu0 %6039 }
 0x18a   : > { %8882 = vst [vmem:[#allocation81_spill] sm:$0xff] %v7279_v0  ;;  %v7281_v1 = vpop.permute.xlu1 %5963 }
 0x18b   : > { %8883 = vst [vmem:[#allocation82_spill] sm:$0xff] %v7281_v1 }
 0x18d   : > { %v7283_v24 = vpop.permute.xlu0 %6044 }
 0x18e   : > { %8884 = vst [vmem:[#allocation83_spill] sm:$0xff] %v7283_v24  ;;  %v7285_v28 = vpop.permute.xlu1 %5973 }
 0x18f   : > { %8885 = vst [vmem:[#allocation84_spill] sm:$0xff] %v7285_v28 }
 0x191   : > { %v7287_v5 = vpop.permute.xlu0 %6049 }
 0x192   : > { %8886 = vst [vmem:[#allocation85_spill] sm:$0xff] %v7287_v5  ;;  %v7289_v31 = vpop.permute.xlu1 %5983  ;;  %v5678_v5 = vunpack.i.h.bf16 %v6829_v42 }
 0x193   : > { %8887 = vst [vmem:[#allocation86_spill] sm:$0xff] %v7289_v31  ;;  %v5840_v31 = vunpack.i.h.bf16 %v7192_v29 }
 0x195   : > { %v7291_v6 = vpop.permute.xlu0 %6054 }
 0x196   : > { %8888 = vst [vmem:[#allocation87_spill] sm:$0xff] %v7291_v6  ;;  %v7293_v62 = vpop.permute.xlu1 %6074 }
 0x197   : > { %8889 = vst [vmem:[#allocation88_spill] sm:$0xff] %v7293_v62 }
 0x199   : > { %v7295_v2 = vpop.permute.xlu0 %6059 }
 0x19a   : > { %8890 = vst [vmem:[#allocation89_spill] sm:$0xff] %v7295_v2  ;;  %v7297_v18 = vpop.permute.xlu1 %3768 }
 0x19b   : > { %8891 = vst [vmem:[#allocation90_spill] sm:$0xff] %v7297_v18 }
 0x19d   : > { %v7299_v35 = vpop.permute.xlu0 %6064 }
 0x19e   : > { %8892 = vst [vmem:[#allocation91_spill] sm:$0xff] %v7299_v35  ;;  %v7301_v0 = vpop.permute.xlu1 %3928 }
 0x19f   : > { %8893 = vst [vmem:[#allocation92_spill] sm:$0xff] %v7301_v0  ;;  %v5677_v0 = vunpack.i.l.bf16 %v6829_v42  ;;  %v5846_v42 = vunpack.i.h.bf16 %v7001_v4 }
 0x1a1   : > { %v7303_v1 = vpop.permute.xlu0 %6069 }
 0x1a2   : > { %8894 = vst [vmem:[#allocation93_spill] sm:$0xff] %v7303_v1  ;;  %v7305_v24 = vpop.permute.xlu1 %3933 }
 0x1a3   : > { %8895 = vst [vmem:[#allocation94_spill] sm:$0xff] %v7305_v24  ;;  %v5839_v24 = vunpack.i.l.bf16 %v7192_v29  ;;  %v5684_v29 = vunpack.i.h.bf16 %v6950_v34 }
 0x1a5   : > { %v7309_v28 = vpop.permute.xlu0 %3773 }
 0x1a6   : > { %8896 = vst [vmem:[#allocation95_spill] sm:$0xff] %v7309_v28  ;;  %v7311_v6 = vpop.permute.xlu1 %3693 }
 0x1a9   : > { %v7325_v28 = vpop.permute.xlu0 %3688 }
 0x1aa   : > { %v7327_v12 = vpop.permute.xlu1 %3853 }
 0x1ab   : > { %8900 = vst [vmem:[#allocation99_spill] sm:$0xff] %v7327_v12 }
 0x1ae   : > { %v7345_v12 = vpop.permute.xlu1 %3758 }
 0x1af   : > { %8904 = vst [vmem:[#allocation103_spill] sm:$0xff] %v7345_v12  ;;  %v5865_v12 = vunpack.i.l.bf16 %v7223_v15 }
 0x1c9   : > { %v7313_v62 = vpop.f32.mrf.mxu1 }
 0x1ca   : > { %8897 = vst [vmem:[#allocation96_spill] sm:$0xff] %v7313_v62  ;;  %v2465_v2 = vmul.f32 %v5678_v5, %v7313_v62  ;;  %v3105_v35 = vmul.f32 %v5840_v31, %v7313_v62 }
 0x1cb   : > { %v7317_v18 = vpop.f32.mrf.mxu1 }
 0x1cc   : > { %8898 = vst [vmem:[#allocation97_spill] sm:$0xff] %v7317_v18  ;;  %3234 = vrot.lane.b32.xlu1 %v3105_v35, %s6473_s22  ;;  %2594 = vrot.lane.b32.xlu0 %v2465_v2, %s6474_s29  ;;  %v2464_v5 = vmul.f32 %v5677_v0, %v7317_v18  ;;  %v3104_v31 = vmul.f32 %v5839_v24, %v7317_v18  ;;  %v5845_v0 = vunpack.i.l.bf16 %v7001_v4  ;;  %v5683_v24 = vunpack.i.l.bf16 %v6950_v34  ;;  %v7343_v18 = vpop.permute.xlu0 %3848 }
 0x1cd   : > { %v7323_v1 = vpop.f32.mrf.mxu1  ;;  %8903 = vst [vmem:[#allocation102_spill] sm:$0xff] %v7343_v18  ;;  %v5851_v4 = vunpack.i.h.bf16 %v7202_v9 }
 0x1ce   : > { %8899 = vst [vmem:[#allocation98_spill] sm:$0xff] %v7323_v1  ;;  %v2467_v2 = vmul.f32 %v5684_v29, %v7323_v1  ;;  %v3107_v35 = vmul.f32 %v5846_v42, %v7323_v1  ;;  %v5689_v42 = vunpack.i.h.bf16 %v6958_v49  ;;  %v7359_v1 = vpop.permute.xlu1 %3918 }
 0x1cf   : > { %v7331_v62 = vpop.f32.mrf.mxu1  ;;  %8907 = vst [vmem:[#allocation106_spill] sm:$0xff] %v7359_v1 }
 0x1d0   : > { %8901 = vst [vmem:[#allocation100_spill] sm:$0xff] %v7331_v62  ;;  %3232 = vrot.lane.b32.xlu0 %v3104_v31, %s6473_s22  ;;  %2592 = vrot.lane.b32.xlu1 %v2464_v5, %s6474_s29  ;;  %v2466_v5 = vmul.f32 %v5683_v24, %v7331_v62  ;;  %v3106_v31 = vmul.f32 %v5845_v0, %v7331_v62  ;;  %v7357_v34 = vpop.permute.xlu0 %3763  ;;  %v5688_v0 = vunpack.i.l.bf16 %v6958_v49  ;;  %v5850_v62 = vunpack.i.l.bf16 %v7202_v9 }
 0x1d1   : > { %v7339_v45 = vpop.f32.mrf.mxu1  ;;  %8906 = vst [vmem:[#allocation105_spill] sm:$0xff] %v7357_v34 }
 0x1d2   : > { %8902 = vst [vmem:[#allocation101_spill] sm:$0xff] %v7339_v45  ;;  %v7377_v1 = vpop.permute.xlu1 %3678 }
 0x1d3   : > { %v7351_v29 = vpop.f32.mrf.mxu1 }
 0x1d4   : > { %3238 = vrot.lane.b32.xlu1 %v3107_v35, %s6473_s22  ;;  %2598 = vrot.lane.b32.xlu0 %v2467_v2, %s6474_s29  ;;  %8905 = vst [vmem:[#allocation104_spill] sm:$0xff] %v7351_v29  ;;  %v2469_v2 = vmul.f32 %v5689_v42, %v7339_v45  ;;  %v3109_v35 = vmul.f32 %v5851_v4, %v7339_v45  ;;  %v5694_v42 = vunpack.i.h.bf16 %v6836_v44  ;;  %v5856_v4 = vunpack.i.h.bf16 %v7215_v61  ;;  %v7375_v45 = vpop.permute.xlu0 %3923 }
 0x1d5   : > { %v7363_v24 = vpop.f32.mrf.mxu1  ;;  %8908 = vst [vmem:[#allocation107_spill] sm:$0xff] %v7375_v45 }
 0x1d6   : > { %v2471_v49 = vmul.f32 %v5694_v42, %v7363_v24  ;;  %v3111_v9 = vmul.f32 %v5856_v4, %v7363_v24  ;;  %v5861_v4 = vunpack.i.h.bf16 %v7018_v37 }
 0x1d7   : > { %v7371_v18 = vpop.f32.mrf.mxu1 }
 0x1d8   : > { %3236 = vrot.lane.b32.xlu0 %v3106_v31, %s6473_s22  ;;  %2596 = vrot.lane.b32.xlu1 %v2466_v5, %s6474_s29  ;;  %v2468_v5 = vmul.f32 %v5688_v0, %v7351_v29  ;;  %v3108_v31 = vmul.f32 %v5850_v62, %v7351_v29  ;;  %v5693_v62 = vunpack.i.l.bf16 %v6836_v44  ;;  %v7389_v0 = vpop.permute.xlu0 %3683  ;;  %v7391_v29 = vpop.permute.xlu1 %3838  ;;  %v5699_v44 = vunpack.i.h.bf16 %v6970_v32 }
 0x1d9   : > { %8909 = vst [vmem:[#allocation108_spill] sm:$0xff] %v7391_v29 }
 0x1dc   : > { %3242 = vrot.lane.b32.xlu1 %v3109_v35, %s6473_s22  ;;  %2602 = vrot.lane.b32.xlu0 %v2469_v2, %s6474_s29  ;;  %v7383_v2 = vpop.f32.mrf.mxu1  ;;  %v5855_v35 = vunpack.i.l.bf16 %v7215_v61  ;;  %v7407_v45 = vpop.permute.xlu0 %3843 }
 0x1dd   : > { %v2473_v61 = vmul.f32 %v5699_v44, %v7383_v2  ;;  %8910 = vst [vmem:[#allocation109_spill] sm:$0xff] %v7407_v45  ;;  %v7409_v29 = vpop.permute.xlu1 %3748 }
 0x1de   : > { %v7395_v42 = vpop.f32.mrf.mxu1  ;;  %8911 = vst [vmem:[#allocation110_spill] sm:$0xff] %v7409_v29 }
 0x1e0   : > { %3240 = vrot.lane.b32.xlu0 %v3108_v31, %s6473_s22  ;;  %2600 = vrot.lane.b32.xlu1 %v2468_v5, %s6474_s29  ;;  %v2470_v5 = vmul.f32 %v5693_v62, %v7371_v18  ;;  %v3110_v31 = vmul.f32 %v5855_v35, %v7371_v18  ;;  %v5860_v62 = vunpack.i.l.bf16 %v7018_v37  ;;  %v5698_v35 = vunpack.i.l.bf16 %v6970_v32  ;;  %v7421_v32 = vpop.permute.xlu0 %3753 }
 0x1e1   : > { %v5866_v37 = vunpack.i.h.bf16 %v7223_v15  ;;  %8912 = vst [vmem:[#allocation111_spill] sm:$0xff] %v7421_v32  ;;  %v7423_v45 = vpop.permute.xlu1 %3908 }
 0x1e2   : > { %8913 = vst [vmem:[#allocation112_spill] sm:$0xff] %v7423_v45 }
 0x1e4   : > { %3246 = vrot.lane.b32.xlu1 %v3111_v9, %s6473_s22  ;;  %2606 = vrot.lane.b32.xlu0 %v2471_v49, %s6474_s29  ;;  %v3113_v49 = vmul.f32 %v5861_v4, %v7383_v2  ;;  %v7403_v9 = vpop.f32.mrf.mxu1  ;;  %v5704_v4 = vunpack.i.h.bf16 %v6841_v51  ;;  %v7439_v45 = vpop.permute.xlu0 %3913 }
 0x1e5   : > { %8914 = vst [vmem:[#allocation113_spill] sm:$0xff] %v7439_v45  ;;  %v7441_v29 = vpop.permute.xlu1 %3668 }
 0x1e6   : > { %v7415_v44 = vpop.f32.mrf.mxu1 }
 0x1e8   : > { %3244 = vrot.lane.b32.xlu0 %v3110_v31, %s6473_s22  ;;  %2604 = vrot.lane.b32.xlu1 %v2470_v5, %s6474_s29  ;;  %v2472_v5 = vmul.f32 %v5698_v35, %v7395_v42  ;;  %v3112_v31 = vmul.f32 %v5860_v62, %v7395_v42  ;;  %v7427_v35 = vpop.f32.mrf.mxu1  ;;  %v5703_v62 = vunpack.i.l.bf16 %v6841_v51 }
 0x1e9   : > { %v7455_v45 = vpop.permute.xlu1 %3828 }
 0x1ea   : > { %v7435_v34 = vpop.f32.mrf.mxu1  ;;  %8915 = vst [vmem:[#allocation114_spill] sm:$0xff] %v7455_v45 }
 0x1ec   : > { %3250 = vrot.lane.b32.xlu1 %v3113_v49, %s6473_s22  ;;  %2610 = vrot.lane.b32.xlu0 %v2473_v61, %s6474_s29  ;;  %v2475_v61 = vmul.f32 %v5704_v4, %v7403_v9  ;;  %v3115_v49 = vmul.f32 %v5866_v37, %v7403_v9  ;;  %v5871_v4 = vunpack.i.h.bf16 %v7039_v7  ;;  %v5709_v37 = vunpack.i.h.bf16 %v6984_v22 }
 0x1ed   : > { %v7473_v32 = vpop.permute.xlu1 %3738 }
 0x1ee   : > { %v2477_v51 = vmul.f32 %v5709_v37, %v7427_v35  ;;  %v3117_v15 = vmul.f32 %v5871_v4, %v7427_v35  ;;  %v5714_v4 = vunpack.i.h.bf16 %v6849_v56  ;;  %8918 = vst [vmem:[#allocation117_spill] sm:$0xff] %v7473_v32  ;;  %v5718_v32 = vunpack.i.l.bf16 %v6996_v46 }
 0x1f0   : > { %3248 = vrot.lane.b32.xlu0 %v3112_v31, %s6473_s22  ;;  %2608 = vrot.lane.b32.xlu1 %v2472_v5, %s6474_s29  ;;  %v2474_v5 = vmul.f32 %v5703_v62, %v7415_v44  ;;  %v3114_v31 = vmul.f32 %v5865_v12, %v7415_v44  ;;  %v5870_v12 = vunpack.i.l.bf16 %v7039_v7  ;;  %v7453_v62 = vpop.permute.xlu0 %3673  ;;  %v5876_v7 = vunpack.i.h.bf16 %v7230_v48 }
 0x1f4   : > { %3254 = vrot.lane.b32.xlu1 %v3115_v49, %s6473_s22  ;;  %2614 = vrot.lane.b32.xlu0 %v2475_v61, %s6474_s29  ;;  %v7447_v61 = vpop.f32.mrf.mxu1  ;;  %v5708_v49 = vunpack.i.l.bf16 %v6984_v22  ;;  %v7471_v45 = vpop.permute.xlu0 %3833 }
 0x1f5   : > { %v2479_v22 = vmul.f32 %v5714_v4, %v7447_v61  ;;  %8917 = vst [vmem:[#allocation116_spill] sm:$0xff] %v7471_v45  ;;  %v7487_v45 = vpop.permute.xlu1 %3898 }
 0x1f6   : > { %v7459_v37 = vpop.f32.mrf.mxu1  ;;  %8921 = vst [vmem:[#allocation120_spill] sm:$0xff] %v7487_v45 }
 0x1f8   : > { %3252 = vrot.lane.b32.xlu0 %v3114_v31, %s6473_s22  ;;  %2612 = vrot.lane.b32.xlu1 %v2474_v5, %s6474_s29  ;;  %v2476_v5 = vmul.f32 %v5708_v49, %v7435_v34  ;;  %v3116_v31 = vmul.f32 %v5870_v12, %v7435_v34  ;;  %v5713_v49 = vunpack.i.l.bf16 %v6849_v56  ;;  %v5875_v12 = vunpack.i.l.bf16 %v7230_v48  ;;  %v7485_v48 = vpop.permute.xlu0 %3743 }
 0x1f9   : > { %v5719_v56 = vunpack.i.h.bf16 %v6996_v46  ;;  %8920 = vst [vmem:[#allocation119_spill] sm:$0xff] %v7485_v48  ;;  %v7505_v45 = vpop.permute.xlu1 %3658 }
 0x1fc   : > { %3258 = vrot.lane.b32.xlu1 %v3117_v15, %s6473_s22  ;;  %2618 = vrot.lane.b32.xlu0 %v2477_v51, %s6474_s29  ;;  %v3119_v51 = vmul.f32 %v5876_v7, %v7447_v61  ;;  %v7467_v15 = vpop.f32.mrf.mxu1  ;;  %v5881_v7 = vunpack.i.h.bf16 %v7056_v54 }
 0x1fd   : > { %8916 = vst [vmem:[#allocation115_spill] sm:$0xff] %v7467_v15 }
 0x1fe   : > { %v7479_v4 = vpop.f32.mrf.mxu1 }
 0x1ff   : > { %8919 = vst [vmem:[#allocation118_spill] sm:$0xff] %v7479_v4 }
 0x200   : > { %3256 = vrot.lane.b32.xlu0 %v3116_v31, %s6473_s22  ;;  %2616 = vrot.lane.b32.xlu1 %v2476_v5, %s6474_s29  ;;  %v2478_v5 = vmul.f32 %v5713_v49, %v7459_v37  ;;  %v3118_v31 = vmul.f32 %v5875_v12, %v7459_v37  ;;  %v7491_v49 = vpop.f32.mrf.mxu1  ;;  %v5880_v12 = vunpack.i.l.bf16 %v7056_v54 }
 0x201   : > { %8922 = vst [vmem:[#allocation121_spill] sm:$0xff] %v7491_v49 }
 0x202   : > { %v7499_v48 = vpop.f32.mrf.mxu1 }
 0x203   : > { %8923 = vst [vmem:[#allocation122_spill] sm:$0xff] %v7499_v48 }
 0x204   : > { %3262 = vrot.lane.b32.xlu1 %v3119_v51, %s6473_s22  ;;  %2622 = vrot.lane.b32.xlu0 %v2479_v22, %s6474_s29  ;;  %v2481_v22 = vmul.f32 %v5719_v56, %v7467_v15  ;;  %v3121_v51 = vmul.f32 %v5881_v7, %v7467_v15  ;;  %v5724_v56 = vunpack.i.h.bf16 %v6859_v59  ;;  %v5886_v7 = vunpack.i.h.bf16 %v7237_v33  ;;  %v7503_v15 = vpop.permute.xlu0 %3903 }
 0x205   : > { %8924 = vst [vmem:[#allocation123_spill] sm:$0xff] %v7503_v15 }
 0x206   : > { %v2483_v46 = vmul.f32 %v5724_v56, %v7491_v49  ;;  %v3123_v54 = vmul.f32 %v5886_v7, %v7491_v49  ;;  %v5891_v7 = vunpack.i.h.bf16 %v7077_v27 }
 0x208   : > { %3260 = vrot.lane.b32.xlu0 %v3118_v31, %s6473_s22  ;;  %2620 = vrot.lane.b32.xlu1 %v2478_v5, %s6474_s29  ;;  %v2480_v5 = vmul.f32 %v5718_v32, %v7479_v4  ;;  %v3120_v31 = vmul.f32 %v5880_v12, %v7479_v4  ;;  %v7511_v32 = vpop.f32.mrf.mxu1  ;;  %v7517_v12 = vpop.permute.xlu0 %3663 }
 0x209   : > { %v7519_v4 = vpop.permute.xlu1 %3818 }
 0x20a   : > { %8925 = vst [vmem:[#allocation124_spill] sm:$0xff] %v7519_v4  ;;  %v7523_v56 = vpop.f32.mrf.mxu1  ;;  %v5895_v4 = vunpack.i.l.bf16 %v7244_v10 }
 0x20c   : > { %3266 = vrot.lane.b32.xlu1 %v3121_v51, %s6473_s22  ;;  %2626 = vrot.lane.b32.xlu0 %v2481_v22, %s6474_s29  ;;  %v5723_v22 = vunpack.i.l.bf16 %v6859_v59  ;;  %v5885_v51 = vunpack.i.l.bf16 %v7237_v33  ;;  %v5729_v59 = vunpack.i.h.bf16 %v7010_v14 }
 0x20d   : > { %v7537_v49 = vpop.permute.xlu1 %3728 }
 0x20e   : > { %v2485_v33 = vmul.f32 %v5729_v59, %v7511_v32  ;;  %8927 = vst [vmem:[#allocation126_spill] sm:$0xff] %v7537_v49 }
 0x210   : > { %3264 = vrot.lane.b32.xlu0 %v3120_v31, %s6473_s22  ;;  %2624 = vrot.lane.b32.xlu1 %v2480_v5, %s6474_s29  ;;  %v2482_v5 = vmul.f32 %v5723_v22, %v7499_v48  ;;  %v3122_v31 = vmul.f32 %v5885_v51, %v7499_v48  ;;  %v5890_v22 = vunpack.i.l.bf16 %v7077_v27  ;;  %v5728_v51 = vunpack.i.l.bf16 %v7010_v14  ;;  %v7535_v48 = vpop.permute.xlu0 %3823 }
 0x211   : > { %8926 = vst [vmem:[#allocation125_spill] sm:$0xff] %v7535_v48  ;;  %v5896_v27 = vunpack.i.h.bf16 %v7244_v10  ;;  %v7551_v15 = vpop.permute.xlu1 %3888 }
 0x212   : > { %8928 = vst [vmem:[#allocation127_spill] sm:$0xff] %v7551_v15 }
 0x214   : > { %3270 = vrot.lane.b32.xlu1 %v3123_v54, %s6473_s22  ;;  %2630 = vrot.lane.b32.xlu0 %v2483_v46, %s6474_s29  ;;  %v3125_v46 = vmul.f32 %v5891_v7, %v7511_v32  ;;  %v7531_v54 = vpop.f32.mrf.mxu1  ;;  %v5734_v7 = vunpack.i.h.bf16 %v6866_v60  ;;  %v7549_v14 = vpop.permute.xlu0 %3733 }
 0x215   : > { %v7569_v49 = vpop.permute.xlu1 %3648 }
 0x216   : > { %v7543_v59 = vpop.f32.mrf.mxu1 }
 0x218   : > { %3268 = vrot.lane.b32.xlu0 %v3122_v31, %s6473_s22  ;;  %2628 = vrot.lane.b32.xlu1 %v2482_v5, %s6474_s29  ;;  %v2484_v5 = vmul.f32 %v5728_v51, %v7523_v56  ;;  %v3124_v31 = vmul.f32 %v5890_v22, %v7523_v56  ;;  %v7555_v51 = vpop.f32.mrf.mxu1  ;;  %v5733_v22 = vunpack.i.l.bf16 %v6866_v60  ;;  %v7567_v15 = vpop.permute.xlu0 %3893 }
 0x219   : > { %8930 = vst [vmem:[#allocation129_spill] sm:$0xff] %v7567_v15  ;;  %v7583_v15 = vpop.permute.xlu1 %3808 }
 0x21a   : > { %v7563_v48 = vpop.f32.mrf.mxu1  ;;  %8932 = vst [vmem:[#allocation131_spill] sm:$0xff] %v7583_v15 }
 0x21b   : > { %8929 = vst [vmem:[#allocation128_spill] sm:$0xff] %v7563_v48 }
 0x21c   : > { %3274 = vrot.lane.b32.xlu1 %v3125_v46, %s6473_s22  ;;  %2634 = vrot.lane.b32.xlu0 %v2485_v33, %s6474_s29  ;;  %v2487_v33 = vmul.f32 %v5734_v7, %v7531_v54  ;;  %v3127_v46 = vmul.f32 %v5896_v27, %v7531_v54  ;;  %v5901_v7 = vunpack.i.h.bf16 %v7094_v50  ;;  %v5739_v27 = vunpack.i.h.bf16 %v7024_v26 }
 0x21e   : > { %v2489_v60 = vmul.f32 %v5739_v27, %v7555_v51  ;;  %v3129_v10 = vmul.f32 %v5901_v7, %v7555_v51  ;;  %v5744_v7 = vunpack.i.h.bf16 %v6875_v47 }
 0x220   : > { %3272 = vrot.lane.b32.xlu0 %v3124_v31, %s6473_s22  ;;  %2632 = vrot.lane.b32.xlu1 %v2484_v5, %s6474_s29  ;;  %v2486_v5 = vmul.f32 %v5733_v22, %v7543_v59  ;;  %v3126_v31 = vmul.f32 %v5895_v4, %v7543_v59  ;;  %v5900_v4 = vunpack.i.l.bf16 %v7094_v50  ;;  %v7581_v22 = vpop.permute.xlu0 %3653  ;;  %v5906_v50 = vunpack.i.h.bf16 %v7251_v3 }
 0x224   : > { %3278 = vrot.lane.b32.xlu1 %v3127_v46, %s6473_s22  ;;  %2638 = vrot.lane.b32.xlu0 %v2487_v33, %s6474_s29  ;;  %v7575_v33 = vpop.f32.mrf.mxu1  ;;  %v5738_v46 = vunpack.i.l.bf16 %v7024_v26  ;;  %v7599_v15 = vpop.permute.xlu0 %3813 }
 0x225   : > { %8931 = vst [vmem:[#allocation130_spill] sm:$0xff] %v7575_v33  ;;  %v2491_v26 = vmul.f32 %v5744_v7, %v7575_v33  ;;  %8934 = vst [vmem:[#allocation133_spill] sm:$0xff] %v7599_v15 }
 0x226   : > { %v7587_v27 = vpop.f32.mrf.mxu1 }
 0x227   : > { %8933 = vst [vmem:[#allocation132_spill] sm:$0xff] %v7587_v27 }
 0x228   : > { %3276 = vrot.lane.b32.xlu0 %v3126_v31, %s6473_s22  ;;  %2636 = vrot.lane.b32.xlu1 %v2486_v5, %s6474_s29  ;;  %v2488_v5 = vmul.f32 %v5738_v46, %v7563_v48  ;;  %v3128_v31 = vmul.f32 %v5900_v4, %v7563_v48  ;;  %v5743_v46 = vunpack.i.l.bf16 %v6875_v47  ;;  %v5905_v4 = vunpack.i.l.bf16 %v7251_v3  ;;  %v7601_v48 = vpop.permute.xlu1 %3718  ;;  %v7613_v3 = vpop.permute.xlu0 %3723 }
 0x229   : > { %v5749_v47 = vunpack.i.h.bf16 %v7044_v53 }
 0x22c   : > { %3282 = vrot.lane.b32.xlu1 %v3129_v10, %s6473_s22  ;;  %2642 = vrot.lane.b32.xlu0 %v2489_v60, %s6474_s29  ;;  %v3131_v60 = vmul.f32 %v5906_v50, %v7575_v33  ;;  %v7595_v10 = vpop.f32.mrf.mxu1  ;;  %v5911_v50 = vunpack.i.h.bf16 %v7114_v17  ;;  %v7615_v15 = vpop.permute.xlu1 %3878 }
 0x22d   : > { %8935 = vst [vmem:[#allocation134_spill] sm:$0xff] %v7615_v15 }
 0x22e   : > { %v7607_v7 = vpop.f32.mrf.mxu1 }
 0x230   : > { %3280 = vrot.lane.b32.xlu0 %v3128_v31, %s6473_s22  ;;  %2640 = vrot.lane.b32.xlu1 %v2488_v5, %s6474_s29  ;;  %v2490_v5 = vmul.f32 %v5743_v46, %v7587_v27  ;;  %v3130_v31 = vmul.f32 %v5905_v4, %v7587_v27  ;;  %v7619_v46 = vpop.f32.mrf.mxu1  ;;  %v5910_v4 = vunpack.i.l.bf16 %v7114_v17  ;;  %v5748_v27 = vunpack.i.l.bf16 %v7044_v53 }
 0x231   : > { %v5916_v17 = vunpack.i.h.bf16 %v7258_v25 }
 0x234   : > { %3286 = vrot.lane.b32.xlu1 %v3131_v60, %s6473_s22  ;;  %2646 = vrot.lane.b32.xlu0 %v2491_v26, %s6474_s29  ;;  %v2493_v26 = vmul.f32 %v5749_v47, %v7595_v10  ;;  %v3133_v60 = vmul.f32 %v5911_v50, %v7595_v10  ;;  %v7631_v47 = vpop.f32.mrf.mxu1  ;;  %v5754_v50 = vunpack.i.h.bf16 %v6882_v30 }
 0x236   : > { %v2495_v53 = vmul.f32 %v5754_v50, %v7619_v46 }
 0x238   : > { %3284 = vrot.lane.b32.xlu0 %v3130_v31, %s6473_s22  ;;  %2644 = vrot.lane.b32.xlu1 %v2490_v5, %s6474_s29  ;;  %v2492_v5 = vmul.f32 %v5748_v27, %v7607_v7  ;;  %v3132_v31 = vmul.f32 %v5910_v4, %v7607_v7  ;;  %v3135_v27 = vmul.f32 %v5916_v17, %v7619_v46  ;;  %v7643_v4 = vpop.f32.mrf.mxu1 }
 0x239   : > { %8940 = vst [vmem:[#allocation139_spill] sm:$0xff] %v7643_v4 }
 0x23c   : > { %3290 = vrot.lane.b32.xlu1 %v3133_v60, %s6473_s22  ;;  %2650 = vrot.lane.b32.xlu0 %v2493_v26, %s6474_s29 }
 0x23e   : > { %v7627_v33 = vpop.permute.xlu1 %3234  ;;  %v7629_v15 = vpop.permute.xlu0 %2594 }
 0x23f   : > { %8936 = vst [vmem:[#allocation135_spill] sm:$0xff] %v7627_v33  ;;  %8937 = vst [vmem:[#allocation136_spill] sm:$0xff] %v7629_v15  ;;  %v5753_v33 = vunpack.i.l.bf16 %v6882_v30  ;;  %v5915_v15 = vunpack.i.l.bf16 %v7258_v25  ;;  %v5759_v30 = vunpack.i.h.bf16 %v7062_v19 }
 0x240   : > { %3288 = vrot.lane.b32.xlu0 %v3132_v31, %s6473_s22  ;;  %2648 = vrot.lane.b32.xlu1 %v2492_v5, %s6474_s29 }
 0x241   : > { %v2494_v5 = vmul.f32 %v5753_v33, %v7631_v47  ;;  %v3134_v31 = vmul.f32 %v5915_v15, %v7631_v47  ;;  %v2497_v25 = vmul.f32 %v5759_v30, %v7643_v4 }
 0x242   : > { %v7639_v26 = vpop.permute.xlu0 %3232  ;;  %v7641_v60 = vpop.permute.xlu1 %2592 }
 0x243   : > { %8938 = vst [vmem:[#allocation137_spill] sm:$0xff] %v7639_v26  ;;  %8939 = vst [vmem:[#allocation138_spill] sm:$0xff] %v7641_v60  ;;  %v7655_v26 = vpop.f32.mrf.mxu1  ;;  %v5921_v60 = vunpack.i.h.bf16 %v7129_v16 }
 0x244   : > { %3294 = vrot.lane.b32.xlu1 %v3135_v27, %s6473_s22  ;;  %2654 = vrot.lane.b32.xlu0 %v2495_v53, %s6474_s29  ;;  %8943 = vst [vmem:[#allocation142_spill] sm:$0xff] %v7655_v26 }
 0x245   : > { %v3137_v33 = vmul.f32 %v5921_v60, %v7643_v4  ;;  %v7667_v27 = vpop.f32.mrf.mxu1 }
 0x246   : > { %v7651_v50 = vpop.permute.xlu1 %3238  ;;  %v7653_v17 = vpop.permute.xlu0 %2598  ;;  %8946 = vst [vmem:[#allocation145_spill] sm:$0xff] %v7667_v27 }
 0x247   : > { %8941 = vst [vmem:[#allocation140_spill] sm:$0xff] %v7651_v50  ;;  %8942 = vst [vmem:[#allocation141_spill] sm:$0xff] %v7653_v17  ;;  %v5920_v50 = vunpack.i.l.bf16 %v7129_v16  ;;  %v5758_v17 = vunpack.i.l.bf16 %v7062_v19  ;;  %v7679_v4 = vpop.f32.mrf.mxu1  ;;  %v5926_v16 = vunpack.i.h.bf16 %v7265_v40 }
 0x248   : > { %3292 = vrot.lane.b32.xlu0 %v3134_v31, %s6473_s22  ;;  %2652 = vrot.lane.b32.xlu1 %v2494_v5, %s6474_s29  ;;  %8949 = vst [vmem:[#allocation148_spill] sm:$0xff] %v7679_v4 }
 0x249   : > { %v2496_v5 = vmul.f32 %v5758_v17, %v7655_v26  ;;  %v3136_v31 = vmul.f32 %v5920_v50, %v7655_v26  ;;  %v3139_v17 = vmul.f32 %v5926_v16, %v7667_v27  ;;  %v7692_v26 = vpop.f32.mrf.mxu1 }
 0x24a   : > { %v7663_v53 = vpop.permute.xlu0 %3236  ;;  %v7665_v15 = vpop.permute.xlu1 %2596  ;;  %8952 = vst [vmem:[#allocation151_spill] sm:$0xff] %v7692_v26 }
 0x24b   : > { %8944 = vst [vmem:[#allocation143_spill] sm:$0xff] %v7663_v53  ;;  %8945 = vst [vmem:[#allocation144_spill] sm:$0xff] %v7665_v15  ;;  %v5764_v53 = vunpack.i.h.bf16 %v6891_v43  ;;  %v5763_v15 = vunpack.i.l.bf16 %v6891_v43  ;;  %v5931_v43 = vunpack.i.h.bf16 %v7149_v52 }
 0x24c   : > { %3298 = vrot.lane.b32.xlu1 %v3137_v33, %s6473_s22  ;;  %2658 = vrot.lane.b32.xlu0 %v2497_v25, %s6474_s29  ;;  %v5602_v33 = vunpack.i.h.bf16 %v6851_v57 }
 0x24d   : > { %v2499_v19 = vmul.f32 %v5764_v53, %v7667_v27 }
 0x24e   : > { %v7675_v30 = vpop.permute.xlu1 %3242  ;;  %v7677_v60 = vpop.permute.xlu0 %2602  ;;  %v2151_v53 = vmul.f32 %v5602_v33, %v7363_v24 }
 0x24f   : > { %8947 = vst [vmem:[#allocation146_spill] sm:$0xff] %v7675_v30  ;;  %8948 = vst [vmem:[#allocation147_spill] sm:$0xff] %v7677_v60  ;;  %v5925_v30 = vunpack.i.l.bf16 %v7265_v40  ;;  %v5769_v40 = vunpack.i.h.bf16 %v7082_v38 }
 0x250   : > { %3296 = vrot.lane.b32.xlu0 %v3136_v31, %s6473_s22  ;;  %2656 = vrot.lane.b32.xlu1 %v2496_v5, %s6474_s29  ;;  %v2498_v5 = vmul.f32 %v5763_v15, %v7679_v4 }
 0x251   : > { %v3138_v31 = vmul.f32 %v5925_v30, %v7679_v4  ;;  %v2501_v15 = vmul.f32 %v5769_v40, %v7692_v26  ;;  %v3141_v30 = vmul.f32 %v5931_v43, %v7692_v26  ;;  %v5930_v4 = vunpack.i.l.bf16 %v7149_v52 }
 0x252   : > { %v7687_v25 = vpop.permute.xlu0 %3240  ;;  %v7689_v50 = vpop.permute.xlu1 %2600 }
 0x253   : > { %8950 = vst [vmem:[#allocation149_spill] sm:$0xff] %v7687_v25  ;;  %8951 = vst [vmem:[#allocation150_spill] sm:$0xff] %v7689_v50  ;;  %v5601_v25 = vunpack.i.l.bf16 %v6851_v57  ;;  %v7702_v50 = vpop.f32.mrf.mxu1  ;;  %v6007_v57 = vunpack.i.h.bf16 %v7242_v58 }
 0x254   : > { %3302 = vrot.lane.b32.xlu1 %v3139_v17, %s6473_s22  ;;  %2662 = vrot.lane.b32.xlu0 %v2499_v19, %s6474_s29  ;;  %8953 = vst [vmem:[#allocation152_spill] sm:$0xff] %v7702_v50  ;;  %v3140_v43 = vmul.f32 %v5930_v4, %v7702_v50 }
 0x255   : > { %v2150_v24 = vmul.f32 %v5601_v25, %v7371_v18  ;;  %v7712_v33 = vpop.f32.mrf.mxu1  ;;  %v2153_v18 = vmul.f32 %v6007_v57, %v7383_v2  ;;  %v5774_v2 = vunpack.i.h.bf16 %v6900_v55 }
 0x256   : > { %v3247_v16 = vpop.permute.xlu1 %3246  ;;  %v2607_v27 = vpop.permute.xlu0 %2606 }
 0x257   : > { %v2791_v60 = vadd.f32 %v2607_v27, %v2151_v53 }
 0x258   : > { %3300 = vrot.lane.b32.xlu0 %v3138_v31, %s6473_s22  ;;  %2660 = vrot.lane.b32.xlu1 %v2498_v5, %s6474_s29  ;;  %v5768_v31 = vunpack.i.l.bf16 %v7082_v38 }
 0x259   : > { %v3431_v27 = vadd.f32 %v3247_v16, %v2791_v60  ;;  %v6006_v60 = vunpack.i.l.bf16 %v7242_v58  ;;  %v7722_v16 = vpop.f32.mrf.mxu1 }
 0x25a   : > { %v3245_v19 = vpop.permute.xlu0 %3244  ;;  %v2605_v17 = vpop.permute.xlu1 %2604  ;;  %v2500_v5 = vmul.f32 %v5768_v31, %v7702_v50  ;;  %v5935_v31 = vunpack.i.l.bf16 %v7269_v41 }
 0x25b   : > { %v2790_v53 = vadd.f32 %v2605_v17, %v2150_v24  ;;  %v7725_v52 = vmul.f32 %v7581_v22, %v3431_v27  ;;  %v2152_v4 = vmul.f32 %v6006_v60, %v7395_v42  ;;  %v2503_v22 = vmul.f32 %v5774_v2, %v7712_v33  ;;  %v7740_v17 = vpop.f32.mrf.mxu1 }
 0x25c   : > { %3306 = vrot.lane.b32.xlu1 %v3141_v30, %s6473_s22  ;;  %2666 = vrot.lane.b32.xlu0 %v2501_v15, %s6474_s29  ;;  %v5936_v15 = vunpack.i.h.bf16 %v7269_v41 }
 0x25d   : > { %v3430_v25 = vadd.f32 %v3245_v19, %v2790_v53  ;;  %v5773_v53 = vunpack.i.l.bf16 %v6900_v55 }
 0x25e   : > { %v3251_v40 = vpop.permute.xlu1 %3250  ;;  %v2611_v26 = vpop.permute.xlu0 %2610  ;;  %v3143_v30 = vmul.f32 %v5936_v15, %v7712_v33  ;;  %v5779_v15 = vunpack.i.h.bf16 %v7100_v63 }
 0x25f   : > { %v7728_v38 = vmul.f32 %v7569_v49, %v3430_v25  ;;  %v2793_v24 = vadd.f32 %v2611_v26, %v2153_v18  ;;  %v5607_v26 = vunpack.i.h.bf16 %v6856_v8  ;;  %v2502_v25 = vmul.f32 %v5773_v53, %v7722_v16 }
 0x260   : > { %3304 = vrot.lane.b32.xlu0 %v3140_v43, %s6473_s22  ;;  %2664 = vrot.lane.b32.xlu1 %v2500_v5, %s6474_s29  ;;  %v3142_v5 = vmul.f32 %v5935_v31, %v7722_v16  ;;  %v5778_v53 = vunpack.i.l.bf16 %v7100_v63 }
 0x261   : > { %v3433_v57 = vadd.f32 %v3251_v40, %v2793_v24  ;;  %v2155_v42 = vmul.f32 %v5607_v26, %v7403_v9  ;;  %v5606_v40 = vunpack.i.l.bf16 %v6856_v8  ;;  %v7750_v24 = vpop.f32.mrf.mxu1  ;;  %v5941_v9 = vunpack.i.h.bf16 %v7162_v11 }
 0x262   : > { %v3249_v49 = vpop.permute.xlu0 %3248  ;;  %v2609_v19 = vpop.permute.xlu1 %2608 }
 0x263   : > { %v2792_v27 = vadd.f32 %v2609_v19, %v2152_v4  ;;  %v7753_v55 = vmul.f32 %v7517_v12, %v3433_v57  ;;  %v2154_v4 = vmul.f32 %v5606_v40, %v7415_v44  ;;  %v2505_v12 = vmul.f32 %v5779_v15, %v7740_v17  ;;  %v7768_v19 = vpop.f32.mrf.mxu1 }
 0x264   : > { %3310 = vrot.lane.b32.xlu1 %v3143_v30, %s6473_s22  ;;  %2670 = vrot.lane.b32.xlu0 %v2503_v22, %s6474_s29  ;;  %v3145_v22 = vmul.f32 %v5941_v9, %v7740_v17 }
 0x265   : > { %v3432_v18 = vadd.f32 %v3249_v49, %v2792_v27  ;;  %v6012_v49 = vunpack.i.h.bf16 %v7248_v23  ;;  %v5940_v27 = vunpack.i.l.bf16 %v7162_v11 }
 0x266   : > { %v3255_v43 = vpop.permute.xlu1 %3254  ;;  %v2615_v60 = vpop.permute.xlu0 %2614 }
 0x267   : > { %v7756_v41 = vmul.f32 %v7505_v45, %v3432_v18  ;;  %v2795_v2 = vadd.f32 %v2615_v60, %v2155_v42  ;;  %v2157_v44 = vmul.f32 %v6012_v49, %v7427_v35  ;;  %v2504_v42 = vmul.f32 %v5778_v53, %v7750_v24  ;;  %v7778_v60 = vpop.f32.mrf.mxu1 }
 0x268   : > { %3308 = vrot.lane.b32.xlu0 %v3142_v5, %s6473_s22  ;;  %2668 = vrot.lane.b32.xlu1 %v2502_v25, %s6474_s29  ;;  %v3144_v18 = vmul.f32 %v5940_v27, %v7750_v24  ;;  %v5784_v35 = vunpack.i.h.bf16 %v6910_v21  ;;  %v5783_v49 = vunpack.i.l.bf16 %v6910_v21 }
 0x269   : > { %v3435_v26 = vadd.f32 %v3255_v43, %v2795_v2  ;;  %v6011_v43 = vunpack.i.l.bf16 %v7248_v23  ;;  %v5946_v2 = vunpack.i.h.bf16 %v7273_v36 }
 0x26a   : > { %v3253_v45 = vpop.permute.xlu0 %3252  ;;  %v2613_v30 = vpop.permute.xlu1 %2612  ;;  %v2506_v27 = vmul.f32 %v5783_v49, %v7778_v60 }
 0x26b   : > { %v2794_v57 = vadd.f32 %v2613_v30, %v2154_v4  ;;  %v7781_v11 = vmul.f32 %v7453_v62, %v3435_v26  ;;  %v2156_v9 = vmul.f32 %v6011_v43, %v7435_v34  ;;  %v2507_v62 = vmul.f32 %v5784_v35, %v7768_v19 }
 0x26c   : > { %3314 = vrot.lane.b32.xlu1 %v3145_v22, %s6473_s22  ;;  %2674 = vrot.lane.b32.xlu0 %v2505_v12, %s6474_s29  ;;  %v3147_v15 = vmul.f32 %v5946_v2, %v7768_v19  ;;  %v5612_v12 = vunpack.i.h.bf16 %v6862_v13  ;;  %v7796_v22 = vpop.f32.mrf.mxu1  ;;  %v5945_v26 = vunpack.i.l.bf16 %v7273_v36 }
 0x26d   : > { %v3434_v31 = vadd.f32 %v3253_v45, %v2794_v57 }
 0x26e   : > { %v3259_v25 = vpop.permute.xlu1 %3258  ;;  %v2619_v5 = vpop.permute.xlu0 %2618  ;;  %v2159_v34 = vmul.f32 %v5612_v12, %v7447_v61  ;;  %v3146_v53 = vmul.f32 %v5945_v26, %v7778_v60  ;;  %v5951_v61 = vunpack.i.h.bf16 %v7176_v20 }
 0x26f   : > { %v7784_v63 = vmul.f32 %v7441_v29, %v3434_v31  ;;  %v2797_v40 = vadd.f32 %v2619_v5, %v2157_v44  ;;  %v5789_v5 = vunpack.i.h.bf16 %v7118_v39 }
 0x270   : > { %3312 = vrot.lane.b32.xlu0 %v3144_v18, %s6473_s22  ;;  %2672 = vrot.lane.b32.xlu1 %v2504_v42, %s6474_s29  ;;  %v5611_v42 = vunpack.i.l.bf16 %v6862_v13  ;;  %v7806_v18 = vpop.f32.mrf.mxu1 }
 0x271   : > { %v3437_v45 = vadd.f32 %v3259_v25, %v2797_v40  ;;  %v3149_v40 = vmul.f32 %v5951_v61, %v7796_v22 }
 0x272   : > { %v3257_v29 = vpop.permute.xlu0 %3256  ;;  %v2617_v4 = vpop.permute.xlu1 %2616  ;;  %v2158_v43 = vmul.f32 %v5611_v42, %v7459_v37 }
 0x273   : > { %v2796_v30 = vadd.f32 %v2617_v4, %v2156_v9  ;;  %v7809_v21 = vmul.f32 %v7389_v0, %v3437_v45  ;;  %v2509_v0 = vmul.f32 %v5789_v5, %v7796_v22  ;;  %v7823_v2 = vpop.f32.mrf.mxu1 }
 0x274   : > { %3318 = vrot.lane.b32.xlu1 %v3147_v15, %s6473_s22  ;;  %2678 = vrot.lane.b32.xlu0 %v2507_v62, %s6474_s29  ;;  %v5950_v15 = vunpack.i.l.bf16 %v7176_v20  ;;  %v8956_v20 = vld [vmem:[#allocation14_spill] sm:$0xff] }
 0x275   : > { %v3436_v57 = vadd.f32 %v3257_v29, %v2796_v30  ;;  %v5788_v29 = vunpack.i.l.bf16 %v7118_v39  ;;  %v7835_v49 = vpop.f32.mrf.mxu1 }
 0x276   : > { %v3263_v44 = vpop.permute.xlu1 %3262  ;;  %v2623_v31 = vpop.permute.xlu0 %2622  ;;  %v3148_v12 = vmul.f32 %v5950_v15, %v7806_v18 }
 0x277   : > { %v7812_v36 = vmul.f32 %v7377_v1, %v3436_v57  ;;  %v2799_v25 = vadd.f32 %v2623_v31, %v2159_v34  ;;  %v2508_v4 = vmul.f32 %v5788_v29, %v7806_v18  ;;  %v5794_v34 = vunpack.i.h.bf16 %v8956_v20  ;;  %v8957_v57 = vld [vmem:[#allocation80_spill] sm:$0xff] }
 0x278   : > { %3316 = vrot.lane.b32.xlu0 %v3146_v53, %s6473_s22  ;;  %2676 = vrot.lane.b32.xlu1 %v2506_v27, %s6474_s29  ;;  %v5956_v27 = vunpack.i.h.bf16 %v8957_v57  ;;  %v5955_v61 = vunpack.i.l.bf16 %v8957_v57 }
 0x279   : > { %v3439_v9 = vadd.f32 %v3263_v44, %v2799_v25  ;;  %v2511_v44 = vmul.f32 %v5794_v34, %v7823_v2  ;;  %v5793_v25 = vunpack.i.l.bf16 %v8956_v20  ;;  %v8966_v20 = vld [vmem:[#allocation76_spill] sm:$0xff] }
 0x27a   : > { %v3261_v1 = vpop.permute.xlu0 %3260  ;;  %v2621_v35 = vpop.permute.xlu1 %2620  ;;  %v3151_v31 = vmul.f32 %v5956_v27, %v7823_v2  ;;  %v6022_v34 = vunpack.i.h.bf16 %v8966_v20 }
 0x27b   : > { %v2798_v62 = vadd.f32 %v2621_v35, %v2158_v43  ;;  %v7838_v26 = vmul.f32 %v7311_v6, %v3439_v9  ;;  %v2510_v5 = vmul.f32 %v5793_v25, %v7835_v49  ;;  %v3150_v43 = vmul.f32 %v5955_v61, %v7835_v49  ;;  %v8962_v35 = vld [vmem:[#allocation65_spill] sm:$0xff] }
 0x27c   : > { %3322 = vrot.lane.b32.xlu1 %v3149_v40, %s6473_s22  ;;  %2682 = vrot.lane.b32.xlu0 %v2509_v0, %s6474_s29  ;;  %v5961_v9 = vunpack.i.h.bf16 %v8962_v35  ;;  %v5960_v27 = vunpack.i.l.bf16 %v8962_v35  ;;  %v8967_v35 = vld [vmem:[#allocation19_spill] sm:$0xff] }
 0x27d   : > { %v3438_v37 = vadd.f32 %v3261_v1, %v2798_v62  ;;  %v8963_v62 = vld [vmem:[#allocation54_spill] sm:$0xff]  ;;  %v5804_v8 = vunpack.i.h.bf16 %v8967_v35  ;;  %v5803_v53 = vunpack.i.l.bf16 %v8967_v35 }
 0x27e   : > { %v7831_v45 = vpop.permute.xlu1 %3266  ;;  %v7833_v30 = vpop.permute.xlu0 %2626  ;;  %v5799_v15 = vunpack.i.h.bf16 %v8963_v62 }
 0x27f   : > { %8954 = vst [vmem:[#allocation153_spill] sm:$0xff] %v7831_v45  ;;  %8955 = vst [vmem:[#allocation154_spill] sm:$0xff] %v7833_v30  ;;  %v7841_v39 = vmul.f32 %v7325_v28, %v3438_v37  ;;  %v7855_v28 = vpop.f32.mrf.mxu1 }
 0x280   : > { %3320 = vrot.lane.b32.xlu0 %v3148_v12, %s6473_s22  ;;  %2680 = vrot.lane.b32.xlu1 %v2508_v4, %s6474_s29  ;;  %v2513_v29 = vmul.f32 %v5799_v15, %v7855_v28  ;;  %v3153_v37 = vmul.f32 %v5961_v9, %v7855_v28  ;;  %v6021_v9 = vunpack.i.l.bf16 %v8966_v20  ;;  %v8969_v20 = vld [vmem:[#allocation6_spill] sm:$0xff] }
 0x281   : > { %v7867_v1 = vpop.f32.mrf.mxu1 }
 0x282   : > { %v7851_v6 = vpop.permute.xlu0 %3264  ;;  %v7853_v42 = vpop.permute.xlu1 %2624  ;;  %v3152_v61 = vmul.f32 %v5960_v27, %v7867_v1 }
 0x283   : > { %8958 = vst [vmem:[#allocation14_spill] sm:$0xff] %v7851_v6  ;;  %8959 = vst [vmem:[#allocation80_spill] sm:$0xff] %v7853_v42  ;;  %v7880_v57 = vpop.f32.mrf.mxu1 }
 0x284   : > { %3326 = vrot.lane.b32.xlu1 %v3151_v31, %s6473_s22  ;;  %2686 = vrot.lane.b32.xlu0 %v2511_v44, %s6474_s29  ;;  %v5798_v44 = vunpack.i.l.bf16 %v8963_v62  ;;  %v2165_v31 = vmul.f32 %v6022_v34, %v7511_v32  ;;  %v8968_v62 = vld [vmem:[#allocation82_spill] sm:$0xff]  ;;  %v2164_v32 = vmul.f32 %v6021_v9, %v7523_v56 }
 0x285   : > { %v7890_v15 = vpop.f32.mrf.mxu1  ;;  %v5966_v23 = vunpack.i.h.bf16 %v8968_v62 }
 0x286   : > { %v7863_v0 = vpop.permute.xlu1 %3270  ;;  %v7865_v40 = vpop.permute.xlu0 %2630  ;;  %v2512_v25 = vmul.f32 %v5798_v44, %v7867_v1  ;;  %v5622_v44 = vunpack.i.h.bf16 %v8969_v20 }
 0x287   : > { %8960 = vst [vmem:[#allocation155_spill] sm:$0xff] %v7863_v0  ;;  %8961 = vst [vmem:[#allocation156_spill] sm:$0xff] %v7865_v40  ;;  %v7900_v13 = vpop.f32.mrf.mxu1 }
 0x288   : > { %3324 = vrot.lane.b32.xlu0 %v3150_v43, %s6473_s22  ;;  %2684 = vrot.lane.b32.xlu1 %v2510_v5, %s6474_s29  ;;  %8970 = vst [vmem:[#allocation76_spill] sm:$0xff] %v7900_v13  ;;  %v2167_v56 = vmul.f32 %v5622_v44, %v7531_v54 }
 0x28a   : > { %v7875_v4 = vpop.permute.xlu0 %3268  ;;  %v7877_v12 = vpop.permute.xlu1 %2628 }
 0x28b   : > { %8964 = vst [vmem:[#allocation65_spill] sm:$0xff] %v7875_v4  ;;  %8965 = vst [vmem:[#allocation54_spill] sm:$0xff] %v7877_v12 }
 0x28c   : > { %3330 = vrot.lane.b32.xlu1 %v3153_v37, %s6473_s22  ;;  %2690 = vrot.lane.b32.xlu0 %v2513_v29, %s6474_s29  ;;  %v2515_v29 = vmul.f32 %v5804_v8, %v7880_v57  ;;  %v3155_v37 = vmul.f32 %v5966_v23, %v7880_v57  ;;  %v2514_v23 = vmul.f32 %v5803_v53, %v7890_v15 }
 0x28e   : > { %v3275_v5 = vpop.permute.xlu1 %3274  ;;  %v2635_v43 = vpop.permute.xlu0 %2634 }
 0x28f   : > { %v2805_v58 = vadd.f32 %v2635_v43, %v2165_v31 }
 0x290   : > { %3328 = vrot.lane.b32.xlu0 %v3152_v61, %s6473_s22  ;;  %2688 = vrot.lane.b32.xlu1 %v2512_v25, %s6474_s29  ;;  %v5965_v61 = vunpack.i.l.bf16 %v8968_v62 }
 0x291   : > { %v3445_v31 = vadd.f32 %v3275_v5, %v2805_v58  ;;  %v5621_v58 = vunpack.i.l.bf16 %v8969_v20  ;;  %v7910_v5 = vpop.f32.mrf.mxu1 }
 0x292   : > { %v3273_v34 = vpop.permute.xlu0 %3272  ;;  %v2633_v27 = vpop.permute.xlu1 %2632  ;;  %v3154_v25 = vmul.f32 %v5965_v61, %v7890_v15  ;;  %8971 = vst [vmem:[#allocation19_spill] sm:$0xff] %v7910_v5 }
 0x293   : > { %v2804_v43 = vadd.f32 %v2633_v27, %v2164_v32  ;;  %v7913_v35 = vmul.f32 %v7613_v3, %v3445_v31  ;;  %v2166_v53 = vmul.f32 %v5621_v58, %v7543_v59 }
 0x294   : > { %3334 = vrot.lane.b32.xlu1 %v3155_v37, %s6473_s22  ;;  %2694 = vrot.lane.b32.xlu0 %v2515_v29, %s6474_s29  ;;  %v8972_v29 = vld [vmem:[#allocation68_spill] sm:$0xff]  ;;  %v8973_v37 = vld [vmem:[#allocation58_spill] sm:$0xff] }
 0x295   : > { %v3444_v8 = vadd.f32 %v3273_v34, %v2804_v43  ;;  %v5971_v54 = vunpack.i.h.bf16 %v8972_v29  ;;  %v5809_v34 = vunpack.i.h.bf16 %v8973_v37  ;;  %v7928_v43 = vpop.f32.mrf.mxu1 }
 0x296   : > { %v3279_v9 = vpop.permute.xlu1 %3278  ;;  %v2639_v45 = vpop.permute.xlu0 %2638 }
 0x297   : > { %v7916_v62 = vmul.f32 %v7601_v48, %v3444_v8  ;;  %v2807_v32 = vadd.f32 %v2639_v45, %v2167_v56  ;;  %v2517_v3 = vmul.f32 %v5809_v34, %v7900_v13  ;;  %v3157_v20 = vmul.f32 %v5971_v54, %v7900_v13  ;;  %v8974_v45 = vld [vmem:[#allocation77_spill] sm:$0xff] }
 0x298   : > { %3332 = vrot.lane.b32.xlu0 %v3154_v25, %s6473_s22  ;;  %2692 = vrot.lane.b32.xlu1 %v2514_v23, %s6474_s29  ;;  %v6027_v31 = vunpack.i.h.bf16 %v8974_v45  ;;  %v5970_v8 = vunpack.i.l.bf16 %v8972_v29  ;;  %v5808_v23 = vunpack.i.l.bf16 %v8973_v37  ;;  %v8975_v37 = vld [vmem:[#allocation126_spill] sm:$0xff] }
 0x299   : > { %v3447_v61 = vadd.f32 %v3279_v9, %v2807_v32  ;;  %v6026_v9 = vunpack.i.l.bf16 %v8974_v45  ;;  %v7938_v32 = vpop.f32.mrf.mxu1 }
 0x29a   : > { %v3277_v48 = vpop.permute.xlu0 %3276  ;;  %v2637_v44 = vpop.permute.xlu1 %2636  ;;  %v2169_v59 = vmul.f32 %v6027_v31, %v7555_v51  ;;  %v2516_v58 = vmul.f32 %v5808_v23, %v7910_v5  ;;  %v3156_v54 = vmul.f32 %v5970_v8, %v7910_v5  ;;  %v8978_v31 = vld [vmem:[#allocation128_spill] sm:$0xff]  ;;  %v629_v5 = vld [vmem:[%s6580_s23 + $0x90] sm:$0xff] }
 0x29b   : > { %v2806_v56 = vadd.f32 %v2637_v44, %v2166_v53  ;;  %v7941_v29 = vmul.f32 %v7549_v14, %v3447_v61 }
 0x29c   : > { %3338 = vrot.lane.b32.xlu1 %v3157_v20, %s6473_s22  ;;  %2698 = vrot.lane.b32.xlu0 %v2517_v3, %s6474_s29  ;;  %v8976_v20 = vld [vmem:[#allocation22_spill] sm:$0xff] }
 0x29d   : > { %v3446_v25 = vadd.f32 %v3277_v48, %v2806_v56  ;;  %v5814_v51 = vunpack.i.h.bf16 %v8976_v20  ;;  %v8977_v48 = vld [vmem:[#allocation84_spill] sm:$0xff]  ;;  %v2168_v56 = vmul.f32 %v6026_v9, %v8978_v31  ;;  %v8980_v9 = vld [vmem:[#allocation130_spill] sm:$0xff] }
 0x29e   : > { %v3283_v34 = vpop.permute.xlu1 %3282  ;;  %v2643_v27 = vpop.permute.xlu0 %2642  ;;  %v5976_v44 = vunpack.i.h.bf16 %v8977_v48 }
 0x29f   : > { %v7944_v53 = vmul.f32 %v8975_v37, %v3446_v25  ;;  %v2809_v3 = vadd.f32 %v2643_v27, %v2169_v59  ;;  %v2519_v14 = vmul.f32 %v5814_v51, %v7928_v43  ;;  %v8979_v27 = vld [vmem:[#allocation7_spill] sm:$0xff]  ;;  %v7956_v25 = vpop.f32.mrf.mxu1 }
 0x2a0   : > { %3336 = vrot.lane.b32.xlu0 %v3156_v54, %s6473_s22  ;;  %2696 = vrot.lane.b32.xlu1 %v2516_v58, %s6474_s29  ;;  %v3159_v61 = vmul.f32 %v5976_v44, %v7928_v43  ;;  %v5627_v59 = vunpack.i.h.bf16 %v8979_v27  ;;  %v5813_v54 = vunpack.i.l.bf16 %v8976_v20  ;;  %v5975_v58 = vunpack.i.l.bf16 %v8977_v48  ;;  %v8981_v20 = vld [vmem:[#allocation119_spill] sm:$0xff]  ;;  %v8982_v48 = vld [vmem:[#allocation117_spill] sm:$0xff] }
 0x2a1   : > { %v3449_v37 = vadd.f32 %v3283_v34, %v2809_v3  ;;  %v5626_v34 = vunpack.i.l.bf16 %v8979_v27  ;;  %v7966_v3 = vpop.f32.mrf.mxu1 }
 0x2a2   : > { %v3281_v8 = vpop.permute.xlu0 %3280  ;;  %v2641_v23 = vpop.permute.xlu1 %2640  ;;  %v2171_v51 = vmul.f32 %v5627_v59, %v8980_v9  ;;  %v2518_v44 = vmul.f32 %v5813_v54, %v7938_v32  ;;  %v3158_v45 = vmul.f32 %v5975_v58, %v7938_v32  ;;  %v8985_v54 = vld [vmem:[#allocation132_spill] sm:$0xff] }
 0x2a3   : > { %v2808_v6 = vadd.f32 %v2641_v23, %v2168_v56  ;;  %v7969_v56 = vmul.f32 %v8981_v20, %v3449_v37  ;;  %v8983_v23 = vld [vmem:[#allocation70_spill] sm:$0xff]  ;;  %v2170_v58 = vmul.f32 %v5626_v34, %v8985_v54 }
 0x2a4   : > { %3342 = vrot.lane.b32.xlu1 %v3159_v61, %s6473_s22  ;;  %2702 = vrot.lane.b32.xlu0 %v2519_v14, %s6474_s29  ;;  %v5981_v59 = vunpack.i.h.bf16 %v8983_v23 }
 0x2a5   : > { %v3448_v31 = vadd.f32 %v3281_v8, %v2808_v6  ;;  %v8984_v6 = vld [vmem:[#allocation61_spill] sm:$0xff] }
 0x2a6   : > { %v3287_v42 = vpop.permute.xlu1 %3286  ;;  %v2647_v30 = vpop.permute.xlu0 %2646  ;;  %v5819_v8 = vunpack.i.h.bf16 %v8984_v6  ;;  %v3161_v9 = vmul.f32 %v5981_v59, %v7956_v25 }
 0x2a7   : > { %v7972_v61 = vmul.f32 %v8982_v48, %v3448_v31  ;;  %v2811_v14 = vadd.f32 %v2647_v30, %v2171_v51  ;;  %v8986_v30 = vld [vmem:[#allocation78_spill] sm:$0xff]  ;;  %v7984_v48 = vpop.f32.mrf.mxu1 }
 0x2a8   : > { %3340 = vrot.lane.b32.xlu0 %v3158_v45, %s6473_s22  ;;  %2700 = vrot.lane.b32.xlu1 %v2518_v44, %s6474_s29  ;;  %v2521_v37 = vmul.f32 %v5819_v8, %v7956_v25  ;;  %v6032_v51 = vunpack.i.h.bf16 %v8986_v30  ;;  %v5980_v45 = vunpack.i.l.bf16 %v8983_v23  ;;  %v5818_v44 = vunpack.i.l.bf16 %v8984_v6  ;;  %v8987_v23 = vld [vmem:[#allocation111_spill] sm:$0xff] }
 0x2a9   : > { %v3451_v0 = vadd.f32 %v3287_v42, %v2811_v14  ;;  %v6031_v42 = vunpack.i.l.bf16 %v8986_v30  ;;  %v7994_v14 = vpop.f32.mrf.mxu1  ;;  %v615_v30 = vld [vmem:[%s6580_s23 + $0x20] sm:$0xff] }
 0x2aa   : > { %v3285_v31 = vpop.permute.xlu0 %3284  ;;  %v2645_v20 = vpop.permute.xlu1 %2644  ;;  %v2173_v34 = vmul.f32 %v6032_v51, %v7595_v10  ;;  %v2520_v8 = vmul.f32 %v5818_v44, %v7966_v3  ;;  %v3160_v54 = vmul.f32 %v5980_v45, %v7966_v3  ;;  %v8989_v10 = vld [vmem:[#allocation25_spill] sm:$0xff]  ;;  %v647_v45 = vld [vmem:[%s6580_s23 + $0x120] sm:$0xff] }
 0x2ab   : > { %v2810_v4 = vadd.f32 %v2645_v20, %v2170_v58  ;;  %v7997_v6 = vmul.f32 %v8987_v23, %v3451_v0  ;;  %v8988_v58 = vld [vmem:[#allocation110_spill] sm:$0xff]  ;;  %v5824_v20 = vunpack.i.h.bf16 %v8989_v10  ;;  %v2172_v51 = vmul.f32 %v6031_v42, %v7607_v7 }
 0x2ac   : > { %3346 = vrot.lane.b32.xlu1 %v3161_v9, %s6473_s22  ;;  %2706 = vrot.lane.b32.xlu0 %v2521_v37, %s6474_s29  ;;  %v3496_v42 = vmul.f32 1.442695, %v615_v30  ;;  %v8994_v30 = vld [vmem:[#allocation103_spill] sm:$0xff] }
 0x2ad   : > { %v3450_v59 = vadd.f32 %v3285_v31, %v2810_v4  ;;  %v8990_v4 = vld [vmem:[#allocation86_spill] sm:$0xff]  ;;  %v2523_v0 = vmul.f32 %v5824_v20, %v7984_v48 }
 0x2ae   : > { %v3291_v27 = vpop.permute.xlu1 %3290  ;;  %v2651_v12 = vpop.permute.xlu0 %2650  ;;  %v5986_v31 = vunpack.i.h.bf16 %v8990_v4  ;;  %v5985_v7 = vunpack.i.l.bf16 %v8990_v4  ;;  %6385 = vpow2.f32 %v3496_v42 }
 0x2af   : > { %v8000_v9 = vmul.f32 %v8988_v58, %v3450_v59  ;;  %v2813_v37 = vadd.f32 %v2651_v12, %v2173_v34  ;;  %v8991_v59 = vld [vmem:[#allocation8_spill] sm:$0xff]  ;;  %v8013_v58 = vpop.f32.mrf.mxu1 }
 0x2b0   : > { %3344 = vrot.lane.b32.xlu0 %v3160_v54, %s6473_s22  ;;  %2704 = vrot.lane.b32.xlu1 %v2520_v8, %s6474_s29  ;;  %v3163_v44 = vmul.f32 %v5986_v31, %v7984_v48  ;;  %v5632_v23 = vunpack.i.h.bf16 %v8991_v59  ;;  %8992 = vst [vmem:[#allocation82_spill] sm:$0xff] %v8013_v58  ;;  %v5823_v8 = vunpack.i.l.bf16 %v8989_v10  ;;  %v3162_v13 = vmul.f32 %v5985_v7, %v7994_v14 }
 0x2b1   : > { %v3453_v54 = vadd.f32 %v3291_v27, %v2813_v37  ;;  %v5631_v10 = vunpack.i.l.bf16 %v8991_v59  ;;  %v8024_v4 = vpop.f32.mrf.mxu1  ;;  %v664_v59 = vld [vmem:[%s6580_s23 + $0x1a8] sm:$0xff] }
 0x2b2   : > { %v3289_v12 = vpop.permute.xlu0 %3288  ;;  %v2649_v34 = vpop.permute.xlu1 %2648  ;;  %v2175_v20 = vmul.f32 %v5632_v23, %v7619_v46  ;;  %v2522_v50 = vmul.f32 %v5823_v8, %v7994_v14  ;;  %v3560_v8 = vmul.f32 1.442695, %v647_v45  ;;  %v3594_v45 = vmul.f32 1.442695, %v664_v59  ;;  %v9000_v59 = vld [vmem:[#allocation95_spill] sm:$0xff] }
 0x2b3   : > { %v2812_v40 = vadd.f32 %v2649_v34, %v2172_v51  ;;  %v8993_v51 = vld [vmem:[#allocation105_spill] sm:$0xff]  ;;  %v8996_v34 = vld [vmem:[#allocation63_spill] sm:$0xff]  ;;  %v2174_v7 = vmul.f32 %v5631_v10, %v7631_v47  ;;  %v3524_v10 = vmul.f32 1.442695, %v629_v5 }
 0x2b4   : > { %3350 = vrot.lane.b32.xlu1 %v3163_v44, %s6473_s22  ;;  %2710 = vrot.lane.b32.xlu0 %v2523_v0, %s6474_s29  ;;  %v8027_v44 = vmul.f32 %v8993_v51, %v3453_v54  ;;  %v5829_v23 = vunpack.i.h.bf16 %v8996_v34  ;;  %v5828_v47 = vunpack.i.l.bf16 %v8996_v34  ;;  %6387 = vpow2.f32 %v3560_v8  ;;  %v9001_v8 = vld [vmem:[#allocation90_spill] sm:$0xff] }
 0x2b5   : > { %v3452_v31 = vadd.f32 %v3289_v12, %v2812_v40  ;;  %v8995_v40 = vld [vmem:[#allocation72_spill] sm:$0xff]  ;;  %6389 = vpow2.f32 %v3594_v45 }
 0x2b6   : > { %v3295_v27 = vpop.permute.xlu1 %3294  ;;  %v2655_v37 = vpop.permute.xlu0 %2654  ;;  %v5991_v12 = vunpack.i.h.bf16 %v8995_v40  ;;  %6391 = vpow2.f32 %v3524_v10 }
 0x2b7   : > { %v8030_v0 = vmul.f32 %v8994_v30, %v3452_v31  ;;  %v2815_v46 = vadd.f32 %v2655_v37, %v2175_v20  ;;  %v2525_v20 = vmul.f32 %v5829_v23, %v8013_v58  ;;  %v5990_v30 = vunpack.i.l.bf16 %v8995_v40  ;;  %v616_v23 = vld [vmem:[%s6580_s23 + $0x28] sm:$0xff] }
 0x2b8   : > { %3348 = vrot.lane.b32.xlu0 %v3162_v13, %s6473_s22  ;;  %2708 = vrot.lane.b32.xlu1 %v2522_v50, %s6474_s29  ;;  %v3165_v31 = vmul.f32 %v5991_v12, %v8013_v58  ;;  %v8043_v13 = vpop.f32.mrf.mxu1  ;;  %v661_v12 = vld [vmem:[%s6580_s23 + $0x190] sm:$0xff]  ;;  %v2524_v58 = vmul.f32 %v5828_v47, %v8024_v4 }
 0x2b9   : > { %v3455_v50 = vadd.f32 %v3295_v27, %v2815_v46  ;;  %v3164_v27 = vmul.f32 %v5990_v30, %v8024_v4  ;;  %v648_v30 = vld [vmem:[%s6580_s23 + $0x128] sm:$0xff] }
 0x2ba   : > { %v3293_v37 = vpop.permute.xlu0 %3292  ;;  %v2653_v51 = vpop.permute.xlu1 %2652 }
 0x2bb   : > { %v2814_v42 = vadd.f32 %v2653_v51, %v2174_v7  ;;  %v8057_v34 = vpop.f32.mrf.mxu1  ;;  %v8060_v7 = vmul.f32 %v9000_v59, %v3455_v50  ;;  %v613_v50 = vld [vmem:[%s6580_s23 + $0x10] sm:$0xff] }
 0x2bc   : > { %3354 = vrot.lane.b32.xlu1 %v3165_v31, %s6473_s22  ;;  %2714 = vrot.lane.b32.xlu0 %v2525_v20, %s6474_s29  ;;  %8999 = vst [vmem:[#allocation58_spill] sm:$0xff] %v8057_v34  ;;  %v3498_v20 = vmul.f32 1.442695, %v616_v23  ;;  %v9002_v31 = vld [vmem:[#allocation28_spill] sm:$0xff] }
 0x2bd   : > { %v3454_v54 = vadd.f32 %v3293_v37, %v2814_v42  ;;  %v5834_v37 = vunpack.i.h.bf16 %v9002_v31  ;;  %v5833_v51 = vunpack.i.l.bf16 %v9002_v31  ;;  %v3588_v42 = vmul.f32 1.442695, %v661_v12  ;;  %v8083_v31 = vpop.eup %6385 }
 0x2be   : > { %v8053_v46 = vpop.permute.xlu1 %3298  ;;  %v8055_v40 = vpop.permute.xlu0 %2658  ;;  %6393 = vpow2.f32 %v3498_v20  ;;  %v3492_v12 = vmul.f32 1.442695, %v613_v50  ;;  %9006 = vst [vmem:[#allocation22_spill] sm:$0xff] %v8083_v31  ;;  %v662_v50 = vld [vmem:[%s6580_s23 + $0x198] sm:$0xff] }
 0x2bf   : > { %8997 = vst [vmem:[#allocation6_spill] sm:$0xff] %v8053_v46  ;;  %8998 = vst [vmem:[#allocation68_spill] sm:$0xff] %v8055_v40  ;;  %v8063_v5 = vmul.f32 %v9001_v8, %v3454_v54  ;;  %v2527_v45 = vmul.f32 %v5834_v37, %v8043_v13  ;;  %v2526_v47 = vmul.f32 %v5833_v51, %v8057_v34  ;;  %6395 = vpow2.f32 %v3588_v42  ;;  %v630_v8 = vld [vmem:[%s6580_s23 + $0x98] sm:$0xff]  ;;  %v645_v37 = vld [vmem:[%s6580_s23 + $0x110] sm:$0xff] }
 0x2c0   : > { %3352 = vrot.lane.b32.xlu0 %v3164_v27, %s6473_s22  ;;  %2712 = vrot.lane.b32.xlu1 %v2524_v58, %s6474_s29  ;;  %v3562_v27 = vmul.f32 1.442695, %v648_v30  ;;  %v9005_v58 = vld [vmem:[#allocation88_spill] sm:$0xff]  ;;  %v3526_v30 = vmul.f32 1.442695, %v630_v8 }
 0x2c1   : > { %v6077_v10 = vunpack.i.h.bf16 %v9005_v58  ;;  %v3556_v42 = vmul.f32 1.442695, %v645_v37  ;;  %v614_v37 = vld [vmem:[%s6580_s23 + $0x18] sm:$0xff] }
 0x2c2   : > { %v8075_v23 = vpop.permute.xlu0 %3296  ;;  %v8077_v59 = vpop.permute.xlu1 %2656  ;;  %6397 = vpow2.f32 %v3562_v27 }
 0x2c3   : > { %9003 = vst [vmem:[#allocation77_spill] sm:$0xff] %v8075_v23  ;;  %9004 = vst [vmem:[#allocation126_spill] sm:$0xff] %v8077_v59  ;;  %v3167_v51 = vmul.f32 %v6077_v10, %v8043_v13  ;;  %6399 = vpow2.f32 %v3492_v12  ;;  %v627_v10 = vld [vmem:[%s6580_s23 + $0x80] sm:$0xff] }
 0x2c4   : > { %2718 = vrot.lane.b32.xlu0 %v2527_v45, %s6474_s29  ;;  %2716 = vrot.lane.b32.xlu1 %v2526_v47, %s6474_s29  ;;  %v6076_v45 = vunpack.i.l.bf16 %v9005_v58  ;;  %v8095_v47 = vpop.eup %6387  ;;  %6401 = vpow2.f32 %v3526_v30  ;;  %v3590_v58 = vmul.f32 1.442695, %v662_v50  ;;  %v3520_v12 = vmul.f32 1.442695, %v627_v10 }
 0x2c5   : > { %9009 = vst [vmem:[#allocation7_spill] sm:$0xff] %v8095_v47  ;;  %v8103_v8 = vpop.eup %6389  ;;  %6403 = vpow2.f32 %v3556_v42  ;;  %v3494_v30 = vmul.f32 1.442695, %v614_v37  ;;  %v646_v42 = vld [vmem:[%s6580_s23 + $0x118] sm:$0xff] }
 0x2c6   : > { %v8087_v54 = vpop.permute.xlu1 %3302  ;;  %v8089_v20 = vpop.permute.xlu0 %2662  ;;  %v3166_v46 = vmul.f32 %v6076_v45, %v8057_v34  ;;  %9012 = vst [vmem:[#allocation117_spill] sm:$0xff] %v8103_v8  ;;  %v659_v45 = vld [vmem:[%s6580_s23 + $0x180] sm:$0xff]  ;;  %6405 = vpow2.f32 %v3590_v58  ;;  %v9020_v58 = vld [vmem:[#allocation10_spill] sm:$0xff] }
 0x2c7   : > { %9007 = vst [vmem:[#allocation84_spill] sm:$0xff] %v8087_v54  ;;  %9008 = vst [vmem:[#allocation128_spill] sm:$0xff] %v8089_v20  ;;  %6407 = vpow2.f32 %v3520_v12  ;;  %v5642_v37 = vunpack.i.h.bf16 %v9020_v58  ;;  %v643_v20 = vld [vmem:[%s6580_s23 + $0x100] sm:$0xff] }
 0x2c8   : > { %3358 = vrot.lane.b32.xlu0 %v3167_v51, %s6473_s22  ;;  %3638 = vperm.xlu1 %6078, %v8083_v31   ;;  %v8108_v51 = vpop.eup %6391  ;;  %6409 = vpow2.f32 %v3494_v30  ;;  %v5641_v30 = vunpack.i.l.bf16 %v9020_v58  ;;  %v9025_v58 = vld [vmem:[#allocation83_spill] sm:$0xff] }
 0x2c9   : > { %9013 = vst [vmem:[#allocation70_spill] sm:$0xff] %v8108_v51 }
 0x2ca   : > { %v8099_v23 = vpop.permute.xlu0 %3300  ;;  %v8101_v27 = vpop.permute.xlu1 %2660 }
 0x2cb   : > { %9010 = vst [vmem:[#allocation130_spill] sm:$0xff] %v8099_v23  ;;  %9011 = vst [vmem:[#allocation119_spill] sm:$0xff] %v8101_v27  ;;  %v8115_v50 = vpop.eup %6393  ;;  %v3558_v23 = vmul.f32 1.442695, %v646_v42 }
 0x2cc   : > { %3356 = vrot.lane.b32.xlu0 %v3166_v46, %s6473_s22  ;;  %3798 = vperm.xlu1 %6078, %v8095_v47   ;;  %9016 = vst [vmem:[#allocation78_spill] sm:$0xff] %v8115_v50  ;;  %v3584_v46 = vmul.f32 1.442695, %v659_v45  ;;  %v8120_v10 = vpop.eup %6395  ;;  %v611_v47 = vld [vmem:[%s6580_s23] sm:$0xff]  ;;  %v628_v45 = vld [vmem:[%s6580_s23 + $0x88] sm:$0xff] }
 0x2cd   : > { %9017 = vst [vmem:[#allocation111_spill] sm:$0xff] %v8120_v10  ;;  %v3488_v12 = vmul.f32 1.442695, %v611_v47  ;;  %v3552_v47 = vmul.f32 1.442695, %v643_v20 }
 0x2ce   : > { %v8111_v31 = vpop.permute.xlu1 %3306  ;;  %v8113_v59 = vpop.permute.xlu0 %2666  ;;  %6411 = vpow2.f32 %v3584_v46 }
 0x2cf   : > { %9014 = vst [vmem:[#allocation61_spill] sm:$0xff] %v8111_v31  ;;  %9015 = vst [vmem:[#allocation132_spill] sm:$0xff] %v8113_v59  ;;  %v8128_v27 = vpop.eup %6397  ;;  %6413 = vpow2.f32 %v3558_v23 }
 0x2d0   : > { %3883 = vperm.xlu0 %5992, %v8103_v8   ;;  %3708 = vperm.xlu1 %6078, %v8108_v51   ;;  %9021 = vst [vmem:[#allocation86_spill] sm:$0xff] %v8128_v27  ;;  %v8133_v51 = vpop.eup %6399  ;;  %v2183_v8 = vmul.f32 %v5642_v37, %v7712_v33  ;;  %6415 = vpow2.f32 %v3488_v12  ;;  %v2182_v33 = vmul.f32 %v5641_v30, %v7722_v16  ;;  %v660_v37 = vld [vmem:[%s6580_s23 + $0x188] sm:$0xff] }
 0x2d1   : > { %9022 = vst [vmem:[#allocation8_spill] sm:$0xff] %v8133_v51  ;;  %v8138_v59 = vpop.eup %6401  ;;  %v3586_v20 = vmul.f32 1.442695, %v660_v37 }
 0x2d2   : > { %v8123_v40 = vpop.permute.xlu0 %3304  ;;  %v8125_v54 = vpop.permute.xlu1 %2664  ;;  %9023 = vst [vmem:[#allocation105_spill] sm:$0xff] %v8138_v59 }
 0x2d3   : > { %9018 = vst [vmem:[#allocation110_spill] sm:$0xff] %v8123_v40  ;;  %9019 = vst [vmem:[#allocation25_spill] sm:$0xff] %v8125_v54  ;;  %v3522_v54 = vmul.f32 1.442695, %v628_v45  ;;  %v8142_v46 = vpop.eup %6403 }
 0x2d4   : > { %3643 = vperm.xlu0 %5992, %v8115_v50   ;;  %3868 = vperm.xlu1 %6078, %v8120_v10   ;;  %9024 = vst [vmem:[#allocation103_spill] sm:$0xff] %v8142_v46  ;;  %v8147_v45 = vpop.eup %6405 }
 0x2d5   : > { %6417 = vpow2.f32 %v3522_v54  ;;  %9026 = vst [vmem:[#allocation72_spill] sm:$0xff] %v8147_v45  ;;  %v8151_v12 = vpop.eup %6407  ;;  %v9028_v54 = vld [vmem:[#allocation133_spill] sm:$0xff] }
 0x2d6   : > { %v3311_v31 = vpop.permute.xlu1 %3310  ;;  %v2671_v40 = vpop.permute.xlu0 %2670  ;;  %6419 = vpow2.f32 %v3552_v47  ;;  %9027 = vst [vmem:[#allocation63_spill] sm:$0xff] %v8151_v12 }
 0x2d7   : > { %v2823_v42 = vadd.f32 %v2671_v40, %v2183_v8  ;;  %v6047_v40 = vunpack.i.h.bf16 %v9025_v58  ;;  %v8162_v47 = vpop.eup %6409  ;;  %6421 = vpow2.f32 %v3586_v20 }
 0x2d8   : > { %3803 = vperm.xlu0 %5992, %v8128_v27   ;;  %3628 = vperm.xlu1 %6078, %v8133_v51   ;;  %v612_v51 = vld [vmem:[%s6580_s23 + $0x8] sm:$0xff] }
 0x2d9   : > { %v3463_v23 = vadd.f32 %v3311_v31, %v2823_v42  ;;  %v2185_v16 = vmul.f32 %v6047_v40, %v7740_v17  ;;  %v6046_v31 = vunpack.i.l.bf16 %v9025_v58  ;;  %v9029_v42 = vld [vmem:[#allocation131_spill] sm:$0xff]  ;;  %v3490_v17 = vmul.f32 1.442695, %v612_v51  ;;  %v644_v58 = vld [vmem:[%s6580_s23 + $0x108] sm:$0xff]  ;;  %s6475_s23 = smov 1  }
 0x2da   : > { %v3309_v10 = vpop.permute.xlu0 %3308  ;;  %v2669_v50 = vpop.permute.xlu1 %2668  ;;  %v3554_v51 = vmul.f32 1.442695, %v644_v58 }
 0x2db   : > { %v2822_v8 = vadd.f32 %v2669_v50, %v2182_v33  ;;  %v8157_v50 = vmul.f32 %v9028_v54, %v3463_v23  ;;  %v2184_v37 = vmul.f32 %v6046_v31, %v7750_v24  ;;  %6423 = vpow2.f32 %v3490_v17 }
 0x2dc   : > { %3713 = vperm.xlu0 %5992, %v8138_v59   ;;  %3788 = vperm.xlu1 %6078, %v8142_v46   ;;  %v9034_v59 = vld [vmem:[#allocation125_spill] sm:$0xff]  ;;  %6425 = vpow2.f32 %v3554_v51 }
 0x2dd   : > { %v3462_v30 = vadd.f32 %v3309_v10, %v2822_v8  ;;  %v8166_v10 = vpop.eup %6411 }
 0x2de   : > { %v3315_v27 = vpop.permute.xlu1 %3314  ;;  %v2675_v34 = vpop.permute.xlu0 %2674  ;;  %9031 = vst [vmem:[#allocation90_spill] sm:$0xff] %v8166_v10 }
 0x2df   : > { %v8160_v33 = vmul.f32 %v9029_v42, %v3462_v30  ;;  %v2825_v46 = vadd.f32 %v2675_v34, %v2185_v16  ;;  %v9032_v30 = vld [vmem:[#allocation11_spill] sm:$0xff]  ;;  %v8173_v42 = vpop.eup %6413 }
 0x2e0   : > { %3873 = vperm.xlu0 %5992, %v8147_v45   ;;  %3698 = vperm.xlu1 %6078, %v8151_v12   ;;  %v5647_v34 = vunpack.i.h.bf16 %v9032_v30  ;;  %v8177_v20 = vpop.eup %6415  ;;  %v5646_v45 = vunpack.i.l.bf16 %v9032_v30  ;;  %v9036_v30 = vld [vmem:[#allocation85_spill] sm:$0xff] }
 0x2e1   : > { %9030 = vst [vmem:[#allocation95_spill] sm:$0xff] %v8160_v33  ;;  %v3465_v16 = vadd.f32 %v3315_v27, %v2825_v46  ;;  %9033 = vst [vmem:[#allocation28_spill] sm:$0xff] %v8177_v20  ;;  %v9035_v46 = vld [vmem:[#allocation124_spill] sm:$0xff] }
 0x2e2   : > { %v3313_v23 = vpop.permute.xlu0 %3312  ;;  %v2673_v8 = vpop.permute.xlu1 %2672  ;;  %v2187_v24 = vmul.f32 %v5647_v34, %v7768_v19  ;;  %v2186_v58 = vmul.f32 %v5646_v45, %v7778_v60  ;;  %v9037_v60 = vld [vmem:[#allocation116_spill] sm:$0xff] }
 0x2e3   : > { %v2824_v54 = vadd.f32 %v2673_v8, %v2184_v37  ;;  %v3977_v27 = vmul.f32 %v9034_v59, %v3465_v16  ;;  %v8183_v33 = vpop.eup %6417 }
 0x2e4   : > { %3633 = vperm.xlu0 %5992, %v8162_v47   ;;  %3858 = vperm.xlu1 %6078, %v8166_v10   ;;  %v8187_v17 = vpop.eup %6419 }
 0x2e5   : > { %v3464_v31 = vadd.f32 %v3313_v23, %v2824_v54  ;;  %v6052_v54 = vunpack.i.h.bf16 %v9036_v30 }
 0x2e6   : > { %v3319_v40 = vpop.permute.xlu1 %3318  ;;  %v2679_v12 = vpop.permute.xlu0 %2678 }
 0x2e7   : > { %v3976_v37 = vmul.f32 %v9035_v46, %v3464_v31  ;;  %v2827_v8 = vadd.f32 %v2679_v12, %v2187_v24  ;;  %v8193_v12 = vpop.eup %6421  ;;  %v2189_v51 = vmul.f32 %v6052_v54, %v7796_v22 }
 0x2e8   : > { %3793 = vperm.xlu0 %5992, %v8173_v42   ;;  %3618 = vperm.xlu1 %6078, %v8177_v20  }
 0x2e9   : > { %v6124_v19 = vpack.i.bf16 %v3977_v27, %v3976_v37  ;;  %v3467_v59 = vadd.f32 %v3319_v40, %v2827_v8  ;;  %v6051_v27 = vunpack.i.l.bf16 %v9036_v30  ;;  %v9038_v37 = vld [vmem:[#allocation114_spill] sm:$0xff]  ;;  %v9039_v40 = vpack.i.bf16 %v7838_v26, %v7841_v39  ;;  %v8204_v8 = vpop.eup %6423  ;;  %v9040_v30 = vld [vmem:[#allocation12_spill] sm:$0xff] }
 0x2ea   : > { %v3317_v23 = vpop.permute.xlu0 %3316  ;;  %v2677_v34 = vpop.permute.xlu1 %2676  ;;  %v5652_v54 = vunpack.i.h.bf16 %v9040_v30 }
 0x2eb   : > { %v2826_v16 = vadd.f32 %v2677_v34, %v2186_v58  ;;  %v3979_v45 = vmul.f32 %v9037_v60, %v3467_v59  ;;  %v2188_v58 = vmul.f32 %v6051_v27, %v7806_v18  ;;  %v8213_v26 = vpop.eup %6425  ;;  %v9042_v27 = vld [vmem:[#allocation109_spill] sm:$0xff] }
 0x2ec   : > { %3703 = vperm.xlu0 %5992, %v8183_v33   ;;  %3778 = vperm.xlu1 %6078, %v8187_v17  }
 0x2ed   : > { %v3466_v24 = vadd.f32 %v3317_v23, %v2826_v16 }
 0x2ee   : > { %v3323_v31 = vpop.permute.xlu1 %3322  ;;  %v2683_v46 = vpop.permute.xlu0 %2682 }
 0x2ef   : > { %v3978_v20 = vmul.f32 %v9038_v37, %v3466_v24  ;;  %v2829_v10 = vadd.f32 %v2683_v46, %v2189_v51  ;;  %v9041_v24 = vpack.i.bf16 %v7809_v21, %v7812_v36  ;;  %v5651_v46 = vunpack.i.l.bf16 %v9040_v30 }
 0x2f0   : > { %3863 = vperm.xlu0 %5992, %v8193_v12   ;;  %6080 = vrot.lane.b32.xlu1 %v9039_v40, %s6475_s23  ;;  %v9044_v21 = vpack.i.bf16 %v7997_v6, %v8000_v9 }
 0x2f1   : > { %v6129_v22 = vpack.i.bf16 %v3979_v45, %v3978_v20  ;;  %v3469_v59 = vadd.f32 %v3323_v31, %v2829_v10  ;;  %v2191_v20 = vmul.f32 %v5652_v54, %v7823_v2  ;;  %v9043_v10 = vld [vmem:[#allocation108_spill] sm:$0xff]  ;;  %v2190_v37 = vmul.f32 %v5651_v46, %v7835_v49 }
 0x2f2   : > { %v3321_v23 = vpop.permute.xlu0 %3320  ;;  %v2681_v34 = vpop.permute.xlu1 %2680  ;;  %v9046_v54 = vpack.i.bf16 %v8027_v44, %v8030_v0 }
 0x2f3   : > { %v2828_v16 = vadd.f32 %v2681_v34, %v2188_v58  ;;  %v3981_v60 = vmul.f32 %v9042_v27, %v3469_v59  ;;  %v9045_v58 = vld [vmem:[#allocation87_spill] sm:$0xff] }
 0x2f4   : > { %3623 = vperm.xlu0 %5992, %v8204_v8   ;;  %6085 = vrot.lane.b32.xlu1 %v9041_v24, %s6475_s23  ;;  %v6056_v49 = vunpack.i.l.bf16 %v9045_v58  ;;  %v9047_v24 = vld [vmem:[#allocation99_spill] sm:$0xff] }
 0x2f5   : > { %v3468_v39 = vadd.f32 %v3321_v23, %v2828_v16  ;;  %v6057_v23 = vunpack.i.h.bf16 %v9045_v58  ;;  %v9053_v58 = vpack.i.bf16 %v7753_v55, %v7756_v41  ;;  %v9056_v55 = vpack.i.bf16 %v7725_v52, %v7728_v38 }
 0x2f6   : > { %v3327_v51 = vpop.permute.xlu1 %3326  ;;  %v2687_v18 = vpop.permute.xlu0 %2686  ;;  %v2192_v0 = vmul.f32 %v6056_v49, %v7867_v1 }
 0x2f7   : > { %v3980_v31 = vmul.f32 %v9043_v10, %v3468_v39  ;;  %v2831_v45 = vadd.f32 %v2687_v18, %v2191_v20  ;;  %v2193_v6 = vmul.f32 %v6057_v23, %v7855_v28  ;;  %v9048_v20 = vld [vmem:[#allocation102_spill] sm:$0xff] }
 0x2f8   : > { %3783 = vperm.xlu0 %5992, %v8213_v26   ;;  %6090 = vrot.lane.b32.xlu1 %v9044_v21, %s6475_s23 }
 0x2f9   : > { %v6134_v36 = vpack.i.bf16 %v3981_v60, %v3980_v31  ;;  %v3471_v34 = vadd.f32 %v3327_v51, %v2831_v45  ;;  %v9050_v60 = vld [vmem:[#allocation13_spill] sm:$0xff] }
 0x2fa   : > { %v3325_v2 = vpop.permute.xlu0 %3324  ;;  %v2685_v40 = vpop.permute.xlu1 %2684  ;;  %v5657_v10 = vunpack.i.h.bf16 %v9050_v60  ;;  %v5656_v21 = vunpack.i.l.bf16 %v9050_v60 }
 0x2fb   : > { %v2830_v30 = vadd.f32 %v2685_v40, %v2190_v37  ;;  %v3983_v39 = vmul.f32 %v9047_v24, %v3471_v34 }
 0x2fc   : > { %6125 = vrot.lane.b32.xlu0 %v6124_v19, %s6475_s23  ;;  %6095 = vrot.lane.b32.xlu1 %v9046_v54, %s6475_s23  ;;  %v9049_v19 = vpack.i.bf16 %v8060_v7, %v8063_v5  ;;  %v2195_v7 = vmul.f32 %v5657_v10, %v7880_v57  ;;  %v9055_v54 = vld [vmem:[#allocation15_spill] sm:$0xff] }
 0x2fd   : > { %v3470_v59 = vadd.f32 %v3325_v2, %v2830_v30  ;;  %v2194_v2 = vmul.f32 %v5656_v21, %v7890_v15  ;;  %v9054_v15 = vpack.i.bf16 %v7941_v29, %v7944_v53  ;;  %v9057_v29 = vpack.i.bf16 %v7913_v35, %v7916_v62  ;;  %v9060_v35 = vld [vmem:[#allocation127_spill] sm:$0xff] }
 0x2fe   : > { %v3331_v9 = vpop.permute.xlu1 %3330  ;;  %v2691_v16 = vpop.permute.xlu0 %2690 }
 0x2ff   : > { %v3982_v18 = vmul.f32 %v9048_v20, %v3470_v59  ;;  %v2833_v51 = vadd.f32 %v2691_v16, %v2193_v6  ;;  %v5662_v59 = vunpack.i.h.bf16 %v9055_v54  ;;  %v5661_v16 = vunpack.i.l.bf16 %v9055_v54  ;;  %v9058_v20 = vld [vmem:[#allocation91_spill] sm:$0xff] }
 0x300   : > { %6130 = vrot.lane.b32.xlu0 %v6129_v22, %s6475_s23  ;;  %6100 = vrot.lane.b32.xlu1 %v9049_v19, %s6475_s23  ;;  %v9051_v22 = vpack.i.bf16 %v7781_v11, %v7784_v63 }
 0x301   : > { %v6139_v44 = vpack.i.bf16 %v3983_v39, %v3982_v18  ;;  %v8241_v28 = vadd.f32 %v3331_v9, %v2833_v51  ;;  %v2199_v41 = vmul.f32 %v5662_v59, %v7928_v43  ;;  %v2198_v53 = vmul.f32 %v5661_v16, %v7938_v32 }
 0x302   : > { %v3329_v46 = vpop.permute.xlu0 %3328  ;;  %v2689_v27 = vpop.permute.xlu1 %2688  ;;  %v6067_v18 = vunpack.i.h.bf16 %v9058_v20 }
 0x303   : > { %v2832_v31 = vadd.f32 %v2689_v27, %v2192_v0  ;;  %v6066_v0 = vunpack.i.l.bf16 %v9058_v20 }
 0x304   : > { %6135 = vrot.lane.b32.xlu0 %v6134_v36, %s6475_s23  ;;  %6105 = vrot.lane.b32.xlu1 %v9051_v22, %s6475_s23  ;;  %v9052_v36 = vpack.i.bf16 %v7969_v56, %v7972_v61  ;;  %v2201_v43 = vmul.f32 %v6067_v18, %v7956_v25  ;;  %v9066_v18 = vld [vmem:[#allocation113_spill] sm:$0xff] }
 0x305   : > { %v8250_v5 = vadd.f32 %v3329_v46, %v2832_v31  ;;  %v9059_v46 = vld [vmem:[#allocation129_spill] sm:$0xff]  ;;  %v2200_v10 = vmul.f32 %v6066_v0, %v7966_v3 }
 0x306   : > { %v3335_v45 = vpop.permute.xlu1 %3334  ;;  %v2695_v1 = vpop.permute.xlu0 %2694 }
 0x307   : > { %v2835_v37 = vadd.f32 %v2695_v1, %v2195_v7  ;;  %v9061_v7 = vld [vmem:[#allocation17_spill] sm:$0xff] }
 0x308   : > { %6140 = vrot.lane.b32.xlu0 %v6139_v44, %s6475_s23  ;;  %6110 = vrot.lane.b32.xlu1 %v9052_v36, %s6475_s23  ;;  %v5667_v25 = vunpack.i.h.bf16 %v9061_v7 }
 0x309   : > { %v8259_v11 = vadd.f32 %v3335_v45, %v2835_v37 }
 0x30a   : > { %v3333_v63 = vpop.permute.xlu0 %3332  ;;  %v2693_v57 = vpop.permute.xlu1 %2692  ;;  %v2203_v37 = vmul.f32 %v5667_v25, %v7984_v48 }
 0x30b   : > { %v2834_v40 = vadd.f32 %v2693_v57, %v2194_v2  ;;  %v9062_v57 = vld [vmem:[#allocation123_spill] sm:$0xff] }
 0x30c   : > { %6115 = vrot.lane.b32.xlu1 %v9053_v58, %s6475_s23  ;;  %v9063_v58 = vld [vmem:[#allocation120_spill] sm:$0xff] }
 0x30d   : > { %v8265_v23 = vadd.f32 %v3333_v63, %v2834_v40  ;;  %v5666_v63 = vunpack.i.l.bf16 %v9061_v7  ;;  %v9069_v7 = vld [vmem:[#allocation107_spill] sm:$0xff] }
 0x30e   : > { %v8267_v34 = vpop.permute.xlu1 %3338  ;;  %v8269_v30 = vpop.permute.xlu0 %2698 }
 0x30f   : > { %v2202_v3 = vmul.f32 %v5666_v63, %v7994_v14 }
 0x310   : > { %6120 = vrot.lane.b32.xlu1 %v9054_v15, %s6475_s23 }
 0x312   : > { %v8275_v56 = vpop.permute.xlu0 %3336  ;;  %v8277_v61 = vpop.permute.xlu1 %2696 }
 0x314   : > { %6170 = vrot.lane.b32.xlu1 %v9056_v55, %s6475_s23 }
 0x316   : > { %v3343_v6 = vpop.permute.xlu1 %3342  ;;  %v2703_v9 = vpop.permute.xlu0 %2702 }
 0x317   : > { %v2839_v49 = vadd.f32 %v2703_v9, %v2199_v41 }
 0x318   : > { %6180 = vrot.lane.b32.xlu1 %v9057_v29, %s6475_s23  ;;  %v9065_v29 = vld [vmem:[#allocation82_spill] sm:$0xff] }
 0x319   : > { %v3479_v52 = vadd.f32 %v3343_v6, %v2839_v49  ;;  %v9064_v6 = vld [vmem:[#allocation93_spill] sm:$0xff] }
 0x31a   : > { %v3341_v24 = vpop.permute.xlu0 %3340  ;;  %v2701_v39 = vpop.permute.xlu1 %2700  ;;  %v6072_v9 = vunpack.i.h.bf16 %v9064_v6  ;;  %v6071_v20 = vunpack.i.l.bf16 %v9064_v6 }
 0x31b   : > { %v2838_v38 = vadd.f32 %v2701_v39, %v2198_v53  ;;  %v8295_v27 = vmul.f32 %v9059_v46, %v3479_v52 }
 0x31c   : > { %v2205_v53 = vmul.f32 %v6072_v9, %v9065_v29  ;;  %v9074_v9 = vld [vmem:[#allocation92_spill] sm:$0xff] }
 0x31d   : > { %v3478_v51 = vadd.f32 %v3341_v24, %v2838_v38  ;;  %v9067_v38 = vld [vmem:[#allocation112_spill] sm:$0xff] }
 0x31e   : > { %v3347_v19 = vpop.permute.xlu1 %3346  ;;  %v2707_v44 = vpop.permute.xlu0 %2706 }
 0x31f   : > { %v8298_v62 = vmul.f32 %v9060_v35, %v3478_v51  ;;  %v2841_v32 = vadd.f32 %v2707_v44, %v2201_v43 }
 0x321   : > { %v6164_v60 = vpack.i.bf16 %v8295_v27, %v8298_v62  ;;  %v3481_v45 = vadd.f32 %v3347_v19, %v2841_v32  ;;  %v2204_v19 = vmul.f32 %v6071_v20, %v8024_v4 }
 0x322   : > { %v3345_v31 = vpop.permute.xlu0 %3344  ;;  %v2705_v22 = vpop.permute.xlu1 %2704 }
 0x323   : > { %v2840_v1 = vadd.f32 %v2705_v22, %v2200_v10  ;;  %v3993_v40 = vmul.f32 %v9062_v57, %v3481_v45  ;;  %v9070_v45 = vld [vmem:[#allocation106_spill] sm:$0xff] }
 0x324   : > { %v9071_v57 = vld [vmem:[#allocation58_spill] sm:$0xff] }
 0x325   : > { %v3480_v21 = vadd.f32 %v3345_v31, %v2840_v1  ;;  %v9068_v31 = vld [vmem:[#allocation20_spill] sm:$0xff] }
 0x326   : > { %v3351_v36 = vpop.permute.xlu1 %3350  ;;  %v2711_v2 = vpop.permute.xlu0 %2710  ;;  %v5672_v22 = vunpack.i.h.bf16 %v9068_v31 }
 0x327   : > { %v3992_v15 = vmul.f32 %v9063_v58, %v3480_v21  ;;  %v2843_v54 = vadd.f32 %v2711_v2, %v2203_v37  ;;  %v5671_v21 = vunpack.i.l.bf16 %v9068_v31 }
 0x329   : > { %v6144_v59 = vpack.i.bf16 %v3993_v40, %v3992_v15  ;;  %v3483_v16 = vadd.f32 %v3351_v36, %v2843_v54  ;;  %v2207_v36 = vmul.f32 %v5672_v22, %v8043_v13  ;;  %v2206_v40 = vmul.f32 %v5671_v21, %v9071_v57  ;;  %v9075_v13 = vld [vmem:[#allocation19_spill] sm:$0xff]  ;;  %v9082_v22 = vld [vmem:[#allocation150_spill] sm:$0xff] }
 0x32a   : > { %v3349_v55 = vpop.permute.xlu0 %3348  ;;  %v2709_v41 = vpop.permute.xlu1 %2708 }
 0x32b   : > { %v2842_v49 = vadd.f32 %v2709_v41, %v2202_v3  ;;  %6145 = vrot.lane.b32.xlu0 %v6144_v59, %s6475_s23  ;;  %v3995_v52 = vmul.f32 %v9066_v18, %v3483_v16  ;;  %v9072_v3 = vld [vmem:[#allocation89_spill] sm:$0xff]  ;;  %v9073_v41 = vld [vmem:[#allocation94_spill] sm:$0xff]  ;;  %v9077_v18 = vld [vmem:[#allocation4_spill] sm:$0xff] }
 0x32d   : > { %v3482_v48 = vadd.f32 %v3349_v55, %v2842_v49  ;;  %v6061_v55 = vunpack.i.l.bf16 %v9072_v3  ;;  %v6062_v49 = vunpack.i.h.bf16 %v9072_v3  ;;  %v9092_v3 = vld [vmem:[#allocation149_spill] sm:$0xff] }
 0x32e   : > { %v3355_v24 = vpop.permute.xlu1 %3354  ;;  %v2715_v39 = vpop.permute.xlu0 %2714 }
 0x32f   : > { %v3994_v51 = vmul.f32 %v9067_v38, %v3482_v48  ;;  %v2845_v14 = vadd.f32 %v2715_v39, %v2205_v53  ;;  %v2196_v48 = vmul.f32 %v6061_v55, %v9075_v13  ;;  %v5596_v38 = vunpack.i.l.bf16 %v9077_v18  ;;  %v9094_v13 = vld [vmem:[#allocation122_spill] sm:$0xff] }
 0x331   : > { %v6149_v43 = vpack.i.bf16 %v3995_v52, %v3994_v51  ;;  %v3485_v46 = vadd.f32 %v3355_v24, %v2845_v14  ;;  %v9076_v24 = vld [vmem:[#allocation76_spill] sm:$0xff]  ;;  %v2836_v20 = vadd.f32 %v8277_v61, %v2196_v48  ;;  %v5597_v52 = vunpack.i.h.bf16 %v9077_v18  ;;  %v9078_v14 = vld [vmem:[#allocation101_spill] sm:$0xff] }
 0x332   : > { %v3353_v44 = vpop.permute.xlu0 %3352  ;;  %v2713_v0 = vpop.permute.xlu1 %2712  ;;  %v2197_v39 = vmul.f32 %v6062_v49, %v9076_v24  ;;  %v9081_v61 = vld [vmem:[#allocation81_spill] sm:$0xff] }
 0x333   : > { %v2844_v35 = vadd.f32 %v2713_v0, %v2204_v19  ;;  %6150 = vrot.lane.b32.xlu0 %v6149_v43, %s6475_s23  ;;  %v3997_v25 = vmul.f32 %v9069_v7, %v3485_v46  ;;  %v2149_v43 = vmul.f32 %v5597_v52, %v9078_v14  ;;  %v3476_v46 = vadd.f32 %v8275_v56, %v2836_v20  ;;  %v9084_v56 = vld [vmem:[#allocation152_spill] sm:$0xff]  ;;  %v9096_v20 = vld [vmem:[#allocation54_spill] sm:$0xff]  ;;  %v9098_v14 = vld [vmem:[#allocation61_spill] sm:$0xff] }
 0x334   : > { %v2837_v51 = vadd.f32 %v8269_v30, %v2197_v39  ;;  %v6041_v31 = vunpack.i.l.bf16 %v9081_v61  ;;  %v9095_v39 = vld [vmem:[#allocation156_spill] sm:$0xff]  ;;  %v9097_v52 = vld [vmem:[#allocation110_spill] sm:$0xff] }
 0x335   : > { %v3484_v32 = vadd.f32 %v3353_v44, %v2844_v35  ;;  %v9079_v44 = vld [vmem:[#allocation104_spill] sm:$0xff]  ;;  %v9080_v35 = vld [vmem:[#allocation147_spill] sm:$0xff] }
 0x336   : > { %v2719_v10 = vpop.permute.xlu0 %2718  ;;  %v2717_v4 = vpop.permute.xlu1 %2716  ;;  %v2148_v0 = vmul.f32 %v5596_v38, %v9079_v44  ;;  %v3477_v7 = vadd.f32 %v8267_v34, %v2837_v51 }
 0x337   : > { %v3996_v1 = vmul.f32 %v9070_v45, %v3484_v32  ;;  %v2847_v63 = vadd.f32 %v2719_v10, %v2207_v36  ;;  %v2846_v58 = vadd.f32 %v2717_v4, %v2206_v40  ;;  %v2789_v32 = vadd.f32 %v9080_v35, %v2149_v43  ;;  %v9085_v36 = vld [vmem:[#allocation134_spill] sm:$0xff] }
 0x338   : > { %v6042_v10 = vunpack.i.h.bf16 %v9081_v61  ;;  %v2788_v30 = vadd.f32 %v9082_v22, %v2148_v0  ;;  %v3988_v4 = vmul.f32 %v9085_v36, %v3476_v46  ;;  %v9089_v40 = vld [vmem:[#allocation146_spill] sm:$0xff] }
 0x339   : > { %v6154_v37 = vpack.i.bf16 %v3997_v25, %v3996_v1  ;;  %v9083_v1 = vld [vmem:[#allocation151_spill] sm:$0xff]  ;;  %v3429_v34 = vadd.f32 %v9089_v40, %v2789_v32  ;;  %v9099_v32 = vld [vmem:[#allocation74_spill] sm:$0xff] }
 0x33a   : > { %v3359_v2 = vpop.permute.xlu0 %3358  ;;  %v2181_v21 = vmul.f32 %v6042_v10, %v9083_v1  ;;  %v3428_v55 = vadd.f32 %v9092_v3, %v2788_v30  ;;  %v6001_v61 = vunpack.i.l.bf16 %v9099_v32  ;;  %v9100_v10 = vld [vmem:[#allocation65_spill] sm:$0xff]  ;;  %v9101_v30 = vld [vmem:[#allocation155_spill] sm:$0xff]  ;;  %v9108_v3 = vld [vmem:[#allocation148_spill] sm:$0xff] }
 0x33b   : > { %6155 = vrot.lane.b32.xlu0 %v6154_v37, %s6475_s23  ;;  %v3487_v15 = vadd.f32 %v3359_v2, %v2847_v63  ;;  %v2180_v37 = vmul.f32 %v6041_v31, %v9084_v56  ;;  %v9086_v63 = vld [vmem:[#allocation5_spill] sm:$0xff] }
 0x33c   : > { %v5617_v27 = vunpack.i.h.bf16 %v9086_v63  ;;  %v5616_v62 = vunpack.i.l.bf16 %v9086_v63 }
 0x33d   : > { %v3999_v6 = vmul.f32 %v9073_v41, %v3487_v15 }
 0x33e   : > { %v3357_v54 = vpop.permute.xlu0 %3356  ;;  %v2162_v48 = vmul.f32 %v5616_v62, %v9094_v13  ;;  %v9110_v13 = vld [vmem:[#allocation140_spill] sm:$0xff] }
 0x33f   : > { %v3486_v59 = vadd.f32 %v3357_v54, %v2846_v58  ;;  %v9090_v58 = vld [vmem:[#allocation132_spill] sm:$0xff]  ;;  %v9091_v54 = vld [vmem:[#allocation25_spill] sm:$0xff] }
 0x340   : > { %v2821_v15 = vadd.f32 %v9090_v58, %v2181_v21  ;;  %v2802_v18 = vadd.f32 %v9096_v20, %v2162_v48  ;;  %v9113_v20 = vld [vmem:[#allocation143_spill] sm:$0xff] }
 0x341   : > { %v3998_v16 = vmul.f32 %v9074_v9, %v3486_v59  ;;  %v2820_v59 = vadd.f32 %v9091_v54, %v2180_v37  ;;  %v9103_v37 = vld [vmem:[#allocation100_spill] sm:$0xff]  ;;  %v9107_v54 = vld [vmem:[#allocation145_spill] sm:$0xff] }
 0x342   : > { %v3461_v43 = vadd.f32 %v9098_v14, %v2821_v15  ;;  %v3442_v31 = vadd.f32 %v9100_v10, %v2802_v18  ;;  %v2146_v36 = vmul.f32 %v6001_v61, %v9103_v37  ;;  %v9118_v61 = vld [vmem:[#allocation130_spill] sm:$0xff]  ;;  %v9120_v37 = vld [vmem:[#allocation73_spill] sm:$0xff] }
 0x343   : > { %v6159_v29 = vpack.i.bf16 %v3999_v6, %v3998_v16  ;;  %v3639_v53 = vpop.permute.xlu1 %3638  ;;  %v9093_v6 = vld [vmem:[#allocation121_spill] sm:$0xff]  ;;  %v3460_v38 = vadd.f32 %v9097_v52, %v2820_v59 }
 0x344   : > { %v2163_v9 = vmul.f32 %v5617_v27, %v9093_v6  ;;  %v9105_v27 = vld [vmem:[#allocation9_spill] sm:$0xff]  ;;  %v9109_v6 = vld [vmem:[#allocation75_spill] sm:$0xff] }
 0x345   : > { %6160 = vrot.lane.b32.xlu0 %v6159_v29, %s6475_s23  ;;  %v3940_v29 = vmul.f32 %v3639_v53, %v3428_v55  ;;  %v6002_v53 = vunpack.i.h.bf16 %v9099_v32  ;;  %v5637_v62 = vunpack.i.h.bf16 %v9105_v27  ;;  %v9117_v32 = vld [vmem:[#allocation80_spill] sm:$0xff] }
 0x347   : > { %v3799_v19 = vpop.permute.xlu1 %3798  ;;  %v2179_v59 = vmul.f32 %v5637_v62, %v9107_v54  ;;  %v9123_v62 = vld [vmem:[#allocation96_spill] sm:$0xff] }
 0x348   : > { %v3972_v46 = vmul.f32 %v3799_v19, %v3460_v38  ;;  %v9114_v38 = vld [vmem:[#allocation115_spill] sm:$0xff] }
 0x349   : > { %6165 = vrot.lane.b32.xlu0 %v6164_v60, %s6475_s23  ;;  %v9087_v60 = vld [vmem:[#allocation95_spill] sm:$0xff] }
 0x34a   : > { %v9088_v57 = vpack.i.bf16 %v8157_v50, %v9087_v60  ;;  %v2803_v50 = vadd.f32 %v9095_v39, %v2163_v9  ;;  %v5636_v60 = vunpack.i.l.bf16 %v9105_v27  ;;  %v6017_v9 = vunpack.i.h.bf16 %v9109_v6  ;;  %v9112_v39 = vld [vmem:[#allocation119_spill] sm:$0xff] }
 0x34b   : > { %v3884_v25 = vpop.permute.xlu0 %3883  ;;  %v3709_v45 = vpop.permute.xlu1 %3708 }
 0x34c   : > { %v3989_v2 = vmul.f32 %v3884_v25, %v3477_v7  ;;  %v3443_v7 = vadd.f32 %v9101_v30, %v2803_v50  ;;  %v9102_v25 = vld [vmem:[#allocation98_spill] sm:$0xff]  ;;  %v2178_v55 = vmul.f32 %v5636_v60, %v9108_v3 }
 0x34d   : > { %6175 = vrot.lane.b32.xlu0 %v9088_v57, %s6475_s23  ;;  %v2147_v1 = vmul.f32 %v6002_v53, %v9102_v25  ;;  %v9106_v57 = vld [vmem:[#allocation144_spill] sm:$0xff] }
 0x34e   : > { %v6184_v41 = vpack.i.bf16 %v3989_v2, %v3988_v4  ;;  %v3954_v4 = vmul.f32 %v3709_v45, %v3442_v31  ;;  %v9104_v2 = vld [vmem:[#allocation141_spill] sm:$0xff]  ;;  %v2786_v40 = vadd.f32 %v9106_v57, %v2146_v36  ;;  %v2818_v50 = vadd.f32 %v9112_v39, %v2178_v55  ;;  %v9126_v55 = vld [vmem:[#allocation79_spill] sm:$0xff]  ;;  %v9129_v39 = vld [vmem:[#allocation142_spill] sm:$0xff] }
 0x34f   : > { %v3644_v16 = vpop.permute.xlu0 %3643  ;;  %v3869_v49 = vpop.permute.xlu1 %3868  ;;  %v2787_v63 = vadd.f32 %v9104_v2, %v2147_v1  ;;  %v5996_v36 = vunpack.i.l.bf16 %v9120_v37 }
 0x350   : > { %v3941_v24 = vmul.f32 %v3644_v16, %v3429_v34  ;;  %v3986_v45 = vmul.f32 %v3869_v49, %v8265_v23  ;;  %v6016_v16 = vunpack.i.l.bf16 %v9109_v6  ;;  %v3426_v18 = vadd.f32 %v9113_v20, %v2786_v40  ;;  %v9127_v6 = vld [vmem:[#allocation138_spill] sm:$0xff] }
 0x351   : > { %6185 = vrot.lane.b32.xlu0 %v6184_v41, %s6475_s23  ;;  %v3427_v48 = vadd.f32 %v9110_v13, %v2787_v63  ;;  %v3458_v10 = vadd.f32 %v9118_v61, %v2818_v50  ;;  %v9122_v63 = vld [vmem:[#allocation153_spill] sm:$0xff] }
 0x352   : > { %v6189_v51 = vpack.i.bf16 %v3941_v24, %v3940_v29  ;;  %v9111_v29 = vld [vmem:[#allocation128_spill] sm:$0xff] }
 0x353   : > { %v3804_v44 = vpop.permute.xlu0 %3803  ;;  %v3629_v0 = vpop.permute.xlu1 %3628  ;;  %v2819_v24 = vadd.f32 %v9111_v29, %v2179_v59  ;;  %v9125_v59 = vld [vmem:[#allocation136_spill] sm:$0xff]  ;;  %v9128_v29 = vld [vmem:[#allocation139_spill] sm:$0xff] }
 0x354   : > { %v3973_v35 = vmul.f32 %v3804_v44, %v3461_v43  ;;  %6190 = vrot.lane.b32.xlu1 %v6189_v51, %s6475_s23  ;;  %v2161_v51 = vmul.f32 %v6017_v9, %v9114_v38  ;;  %v3938_v43 = vmul.f32 %v3629_v0, %v3426_v18  ;;  %v5997_v0 = vunpack.i.h.bf16 %v9120_v37  ;;  %v9130_v18 = vld [vmem:[#allocation135_spill] sm:$0xff]  ;;  %v6277_v38 = vld [vmem:[%s6592_s11 + $0x4] ss:$16 sps:$4 sm:$0xff]  }
 0x355   : > { %4473 = vmatprep.mubr.bf16.mxu1 %v6277_v38  ;;  %v9144_v38 = vld [vmem:[#allocation45_spill] sm:$0xff] }
 0x356   : > { %v6194_v22 = vpack.i.bf16 %v3973_v35, %v3972_v46  ;;  %v9116_v46 = vld [vmem:[#allocation154_spill] sm:$0xff]  ;;  %v2145_v60 = vmul.f32 %v5997_v0, %v9123_v62 }
 0x357   : > { %v3714_v21 = vpop.permute.xlu0 %3713  ;;  %v3789_v56 = vpop.permute.xlu1 %3788  ;;  %v2801_v35 = vadd.f32 %v9116_v46, %v2161_v51  ;;  %v9131_v51 = vld [vmem:[#allocation68_spill] sm:$0xff] }
 0x358   : > { %v3955_v19 = vmul.f32 %v3714_v21, %v3443_v7  ;;  %6195 = vrot.lane.b32.xlu0 %v6194_v22, %s6475_s23  ;;  %v9119_v22 = vld [vmem:[#allocation84_spill] sm:$0xff]  ;;  %v3970_v1 = vmul.f32 %v3789_v56, %v3458_v10  ;;  %v2785_v3 = vadd.f32 %v9125_v59, %v2145_v60  ;;  %v9138_v59 = vld [vmem:[#allocation26_spill] sm:$0xff] }
 0x359   : > { %v3459_v30 = vadd.f32 %v9119_v22, %v2819_v24  ;;  %v3441_v27 = vadd.f32 %v9122_v63, %v2801_v35  ;;  %v9136_v63 = vld [vmem:[#allocation33_spill] sm:$0xff] }
 0x35a   : > { %v6199_v34 = vpack.i.bf16 %v3955_v19, %v3954_v4  ;;  %v9121_v4 = vld [vmem:[#allocation14_spill] sm:$0xff] }
 0x35b   : > { %v3874_v58 = vpop.permute.xlu0 %3873  ;;  %v3699_v15 = vpop.permute.xlu1 %3698 }
 0x35c   : > { %v3987_v41 = vmul.f32 %v3874_v58, %v8259_v11  ;;  %6200 = vrot.lane.b32.xlu1 %v6199_v34, %s6475_s23  ;;  %v9115_v11 = vld [vmem:[#allocation118_spill] sm:$0xff]  ;;  %v9124_v34 = vld [vmem:[#allocation97_spill] sm:$0xff] }
 0x35d   : > { %v2160_v14 = vmul.f32 %v6016_v16, %v9115_v11  ;;  %v2144_v58 = vmul.f32 %v5996_v36, %v9124_v34  ;;  %v9132_v11 = vld [vmem:[#allocation126_spill] sm:$0xff] }
 0x35e   : > { %v6204_v52 = vpack.i.bf16 %v3987_v41, %v3986_v45  ;;  %v6037_v45 = vunpack.i.h.bf16 %v9126_v55  ;;  %v6036_v41 = vunpack.i.l.bf16 %v9126_v55  ;;  %v9139_v55 = vld [vmem:[#allocation16_spill] sm:$0xff] }
 0x35f   : > { %v3634_v23 = vpop.permute.xlu0 %3633  ;;  %v3859_v49 = vpop.permute.xlu1 %3858  ;;  %v2800_v53 = vadd.f32 %v9117_v32, %v2160_v14  ;;  %v2784_v9 = vadd.f32 %v9127_v6, %v2144_v58 }
 0x360   : > { %v3939_v44 = vmul.f32 %v3634_v23, %v3427_v48  ;;  %6205 = vrot.lane.b32.xlu0 %v6204_v52, %s6475_s23  ;;  %v2177_v24 = vmul.f32 %v6037_v45, %v9128_v29  ;;  %v2176_v50 = vmul.f32 %v6036_v41, %v9129_v39  ;;  %v3425_v52 = vadd.f32 %v9130_v18, %v2785_v3  ;;  %v9140_v41 = vld [vmem:[#allocation37_spill] sm:$0xff] }
 0x361   : > { %v3440_v19 = vadd.f32 %v9121_v4, %v2800_v53 }
 0x362   : > { %v6209_v31 = vpack.i.bf16 %v3939_v44, %v3938_v43  ;;  %v2817_v23 = vadd.f32 %v9131_v51, %v2177_v24  ;;  %v2816_v14 = vadd.f32 %v9132_v11, %v2176_v50  ;;  %v9133_v43 = vld [vmem:[#allocation137_spill] sm:$0xff]  ;;  %v9142_v24 = vld [vmem:[#allocation27_spill] sm:$0xff] }
 0x363   : > { %v3794_v7 = vpop.permute.xlu0 %3793  ;;  %v3619_v25 = vpop.permute.xlu1 %3618  ;;  %v3952_v54 = vmul.f32 %v3699_v15, %v3440_v19  ;;  %v3984_v15 = vmul.f32 %v3859_v49, %v8250_v5  ;;  %v3424_v44 = vadd.f32 %v9133_v43, %v2784_v9  ;;  %v9134_v5 = vld [vmem:[#allocation77_spill] sm:$0xff]  ;;  %v9141_v9 = vld [vmem:[#allocation23_spill] sm:$0xff] }
 0x364   : > { %v3971_v21 = vmul.f32 %v3794_v7, %v3459_v30  ;;  %6210 = vrot.lane.b32.xlu1 %v6209_v31, %s6475_s23  ;;  %v3456_v49 = vadd.f32 %v9134_v5, %v2816_v14  ;;  %v9135_v31 = vld [vmem:[#allocation6_spill] sm:$0xff]  ;;  %v9143_v50 = vld [vmem:[#allocation41_spill] sm:$0xff] }
 0x365   : > { %v3936_v53 = vmul.f32 %v3619_v25, %v3424_v44  ;;  %v3457_v22 = vadd.f32 %v9135_v31, %v2817_v23  ;;  %v9145_v23 = vld [vmem:[#allocation32_spill] sm:$0xff]  ;;  %v9148_v5 = vld [vmem:[#allocation53_spill] sm:$0xff] }
 0x366   : > { %v6214_v2 = vpack.i.bf16 %v3971_v21, %v3970_v1 }
 0x367   : > { %v3704_v57 = vpop.permute.xlu0 %3703  ;;  %v3779_v40 = vpop.permute.xlu1 %3778 }
 0x368   : > { %v3953_v56 = vmul.f32 %v3704_v57, %v3441_v27  ;;  %6215 = vrot.lane.b32.xlu0 %v6214_v2, %s6475_s23  ;;  %v3968_v1 = vmul.f32 %v3779_v40, %v3456_v49  ;;  %v9137_v40 = vld [vmem:[#allocation18_spill] sm:$0xff] }
 0x36a   : > { %v6219_v16 = vpack.i.bf16 %v3953_v56, %v3952_v54 }
 0x36b   : > { %v3864_v13 = vpop.permute.xlu0 %3863  ;;  %v6081_v48 = vpop.permute.xlu1 %6080 }
 0x36c   : > { %v3985_v20 = vmul.f32 %v3864_v13, %v8241_v28  ;;  %6220 = vrot.lane.b32.xlu1 %v6219_v16, %s6475_s23  ;;  %v6280_v28 = vld [vmem:[%s6592_s11 + $0xc] ss:$16 sps:$4 sm:$0xff]   ;;  %v6083_v36 = vunpack.i.h.bf16 %v6081_v48  ;;  %v6082_v25 = vunpack.i.l.bf16 %v6081_v48 }
 0x36d   : > { %4538 = vmatprep.mubr.bf16.mxu0 %v6280_v28 }
 0x36e   : > { %v6224_v46 = vpack.i.bf16 %v3985_v20, %v3984_v15  ;;  %v4272_v27 = vsel %vm4256_vm3, %v9136_v63, %v6083_v36  ;;  %v4271_v34 = vsel %vm4256_vm3, %v9137_v40, %v6082_v25  ;;  %v9151_v36 = vld [vmem:[#allocation59_spill] sm:$0xff] }
 0x36f   : > { %v3624_v35 = vpop.permute.xlu0 %3623  ;;  %v6086_v32 = vpop.permute.xlu1 %6085  ;;  %v4328_v29 = vpack.c.bf16 %v4272_v27, %v4271_v34  ;;  %v9152_v27 = vld [vmem:[#allocation62_spill] sm:$0xff] }
 0x370   : > { %v3937_v61 = vmul.f32 %v3624_v35, %v3425_v52  ;;  %6225 = vrot.lane.b32.xlu0 %v6224_v46, %s6475_s23  ;;  %v6088_v62 = vunpack.i.h.bf16 %v6086_v32  ;;  %v6087_v58 = vunpack.i.l.bf16 %v6086_v32  ;;  %v9146_v35 = vld [vmem:[#allocation36_spill] sm:$0xff] }
 0x372   : > { %v6229_v10 = vpack.i.bf16 %v3937_v61, %v3936_v53  ;;  %v4270_v39 = vsel %vm4256_vm3, %v9142_v24, %v6088_v62  ;;  %v4269_v15 = vsel %vm4256_vm3, %v9143_v50, %v6087_v58  ;;  %v9147_v53 = vld [vmem:[#allocation49_spill] sm:$0xff] }
 0x373   : > { %v3784_v30 = vpop.permute.xlu0 %3783  ;;  %v6091_v7 = vpop.permute.xlu1 %6090  ;;  %v4327_v43 = vpack.c.bf16 %v4270_v39, %v4269_v15 }
 0x374   : > { %v3969_v21 = vmul.f32 %v3784_v30, %v3457_v22  ;;  %6230 = vrot.lane.b32.xlu1 %v6229_v10, %s6475_s23  ;;  %v6093_v54 = vunpack.i.h.bf16 %v6091_v7  ;;  %v6092_v56 = vunpack.i.l.bf16 %v6091_v7  ;;  %v9149_v10 = vld [vmem:[#allocation40_spill] sm:$0xff] }
 0x376   : > { %v6234_v37 = vpack.i.bf16 %v3969_v21, %v3968_v1  ;;  %v4283_v51 = vsel %vm4256_vm3, %v9144_v38, %v6092_v56  ;;  %v4284_v11 = vsel %vm4256_vm3, %v9145_v23, %v6093_v54  ;;  %v9154_v56 = vld [vmem:[#allocation52_spill] sm:$0xff] }
 0x377   : > { %v6096_v0 = vpop.permute.xlu1 %6095  ;;  %v4334_v28 = vpack.c.bf16 %v4284_v11, %v4283_v51 }
 0x378   : > { %6235 = vrot.lane.b32.xlu0 %v6234_v37, %s6475_s23  ;;  %v6098_v4 = vunpack.i.h.bf16 %v6096_v0  ;;  %v6097_v19 = vunpack.i.l.bf16 %v6096_v0  ;;  %v9150_v37 = vld [vmem:[#allocation44_spill] sm:$0xff] }
 0x37a   : > { %v4285_v6 = vsel %vm4256_vm3, %v9140_v41, %v6097_v19  ;;  %v4286_v16 = vsel %vm4256_vm3, %v9141_v9, %v6098_v4 }
 0x37b   : > { %v6101_v2 = vpop.permute.xlu1 %6100  ;;  %v4335_v52 = vpack.c.bf16 %v4286_v16, %v4285_v6  ;;  %v6126_v16 = vpop.permute.xlu0 %6125 }
 0x37c   : > { %v6103_v60 = vunpack.i.h.bf16 %v6101_v2  ;;  %v6102_v57 = vunpack.i.l.bf16 %v6101_v2 }
 0x37e   : > { %v4287_v3 = vsel %vm4256_vm3, %v9138_v59, %v6102_v57  ;;  %v4288_v45 = vsel %vm4256_vm3, %v9139_v55, %v6103_v60  ;;  %v9153_v60 = vld [vmem:[#allocation48_spill] sm:$0xff] }
 0x37f   : > { %v6106_v13 = vpop.permute.xlu1 %6105  ;;  %v4336_v48 = vpack.c.bf16 %v4288_v45, %v4287_v3  ;;  %v9155_v3 = vld [vmem:[#allocation66_spill] sm:$0xff]  ;;  %v6131_v50 = vpop.permute.xlu0 %6130 }
 0x380   : > { %v6108_v20 = vunpack.i.h.bf16 %v6106_v13  ;;  %v6107_v18 = vunpack.i.l.bf16 %v6106_v13  ;;  %v9156_v13 = vld [vmem:[#allocation69_spill] sm:$0xff] }
 0x381   : > { %5308 = vmatprep.subr.bf16.mxu1 %v4336_v48 }
 0x382   : > { %5309 = vmatpush3.bf16.msra.mxu1 %v4328_v29  ;;  %v4268_v32 = vsel %vm4256_vm3, %v9146_v35, %v6108_v20  ;;  %v4267_v61 = vsel %vm4256_vm3, %v9147_v53, %v6107_v18  ;;  %v9157_v29 = vld [vmem:[#allocation57_spill] sm:$0xff]  ;;  %v9158_v53 = vld [vmem:[#allocation35_spill] sm:$0xff] }
 0x383   : > { %v6111_v14 = vpop.permute.xlu1 %6110  ;;  %5310 = vmatprep.subr.bf16.mxu1 %v4335_v52  ;;  %v4326_v30 = vpack.c.bf16 %v4268_v32, %v4267_v61  ;;  %v6136_v15 = vpop.permute.xlu0 %6135 }
 0x384   : > { %v6113_v44 = vunpack.i.h.bf16 %v6111_v14  ;;  %v6112_v46 = vunpack.i.l.bf16 %v6111_v14 }
 0x386   : > { %5311 = vmatpush3.bf16.msra.mxu1 %v4327_v43  ;;  %v4281_v49 = vsel %vm4256_vm3, %v9148_v5, %v6112_v46  ;;  %v4282_v31 = vsel %vm4256_vm3, %v9149_v10, %v6113_v44  ;;  %v6138_v44 = vunpack.i.h.bf16 %v6136_v15  ;;  %v6137_v46 = vunpack.i.l.bf16 %v6136_v15 }
 0x387   : > { %v6116_v22 = vpop.permute.xlu1 %6115  ;;  %5312 = vmatprep.subr.bf16.mxu1 %v4334_v28  ;;  %v4333_v21 = vpack.c.bf16 %v4282_v31, %v4281_v49  ;;  %v6141_v20 = vpop.permute.xlu0 %6140  ;;  %v9159_v28 = vld [vmem:[#allocation21_spill] sm:$0xff] }
 0x388   : > { %v6118_v7 = vunpack.i.h.bf16 %v6116_v22  ;;  %v6117_v1 = vunpack.i.l.bf16 %v6116_v22  ;;  %v6143_v51 = vunpack.i.h.bf16 %v6141_v20  ;;  %v6142_v23 = vunpack.i.l.bf16 %v6141_v20  ;;  %v9160_v31 = vld [vmem:[#allocation29_spill] sm:$0xff]  ;;  %v9171_v20 = vld [vmem:[#allocation42_spill] sm:$0xff] }
 0x38a   : > { %v4266_v0 = vsel %vm4256_vm3, %v9150_v37, %v6118_v7  ;;  %v4265_v25 = vsel %vm4256_vm3, %v9151_v36, %v6117_v1  ;;  %5313 = vmatpush3.bf16.msra.mxu1 %v4326_v30  ;;  %v4304_v61 = vsel %vm4256_vm3, %v9158_v53, %v6143_v51  ;;  %v4303_v5 = vsel %vm4256_vm3, %v9159_v28, %v6142_v23  ;;  %v9161_v30 = vld [vmem:[#allocation31_spill] sm:$0xff]  ;;  %v9163_v37 = vld [vmem:[#allocation24_spill] sm:$0xff] }
 0x38b   : > { %v4325_v4 = vpack.c.bf16 %v4266_v0, %v4265_v25  ;;  %v6121_v19 = vpop.permute.xlu1 %6120  ;;  %5314 = vmatprep.subr.bf16.mxu1 %v4333_v21  ;;  %v9162_v1 = vld [vmem:[#allocation39_spill] sm:$0xff]  ;;  %v9173_v51 = vld [vmem:[#allocation60_spill] sm:$0xff] }
 0x38c   : > { %v6123_v2 = vunpack.i.h.bf16 %v6121_v19  ;;  %v6122_v63 = vunpack.i.l.bf16 %v6121_v19  ;;  %v6132_v19 = vunpack.i.l.bf16 %v6131_v50 }
 0x38e   : > { %5315 = vmatpush3.bf16.msra.mxu1 %v4325_v4  ;;  %v4279_v62 = vsel %vm4256_vm3, %v9152_v27, %v6122_v63  ;;  %v4280_v57 = vsel %vm4256_vm3, %v9153_v60, %v6123_v2  ;;  %v6133_v4 = vunpack.i.h.bf16 %v6131_v50  ;;  %v4344_v2 = vpack.c.bf16 %v4304_v61, %v4303_v5  ;;  %v9164_v27 = vld [vmem:[#allocation30_spill] sm:$0xff]  ;;  %v9165_v60 = vld [vmem:[#allocation43_spill] sm:$0xff] }
 0x38f   : > { %v6171_v40 = vpop.permute.xlu1 %6170  ;;  %v4332_v34 = vpack.c.bf16 %v4280_v57, %v4279_v62  ;;  %v4302_v62 = vsel %vm4256_vm3, %v9164_v27, %v6138_v44  ;;  %v4301_v57 = vsel %vm4256_vm3, %v9165_v60, %v6137_v46  ;;  %v9174_v46 = vld [vmem:[#allocation64_spill] sm:$0xff]  ;;  %v9181_v27 = vld [vmem:[#allocation117_spill] sm:$0xff] }
 0x390   : > { %v6173_v58 = vunpack.i.h.bf16 %v6171_v40  ;;  %v6172_v54 = vunpack.i.l.bf16 %v6171_v40 }
 0x391   : > { %5316 = vmatprep.subr.bf16.mxu1 %v4332_v34 }
 0x392   : > { %v4264_v59 = vsel %vm4256_vm3, %v9154_v56, %v6173_v58  ;;  %v4263_v55 = vsel %vm4256_vm3, %v9155_v3, %v6172_v54  ;;  %v9166_v58 = vld [vmem:[#allocation47_spill] sm:$0xff]  ;;  %v9167_v56 = vld [vmem:[#allocation34_spill] sm:$0xff]  ;;  %v6128_v3 = vunpack.i.h.bf16 %v6126_v16 }
 0x393   : > { %v4324_v45 = vpack.c.bf16 %v4264_v59, %v4263_v55  ;;  %v6181_v41 = vpop.permute.xlu1 %6180  ;;  %v6127_v55 = vunpack.i.l.bf16 %v6126_v16 }
 0x394   : > { %v6183_v6 = vunpack.i.h.bf16 %v6181_v41  ;;  %v6182_v9 = vunpack.i.l.bf16 %v6181_v41  ;;  %v9168_v41 = vld [vmem:[#allocation38_spill] sm:$0xff] }
 0x395   : > { %5317 = vmatpush3.bf16.msra.mxu1 %v4324_v45  ;;  %v4297_v23 = vsel %vm4256_vm3, %v9173_v51, %v6127_v55 }
 0x396   : > { %v4277_v48 = vsel %vm4256_vm3, %v9156_v13, %v6182_v9  ;;  %v4278_v24 = vsel %vm4256_vm3, %v9157_v29, %v6183_v6  ;;  %v4300_v6 = vsel %vm4256_vm3, %v9168_v41, %v6133_v4  ;;  %v9169_v9 = vld [vmem:[#allocation51_spill] sm:$0xff]  ;;  %v9170_v29 = vld [vmem:[#allocation56_spill] sm:$0xff] }
 0x397   : > { %v4331_v39 = vpack.c.bf16 %v4278_v24, %v4277_v48  ;;  %v4299_v13 = vsel %vm4256_vm3, %v9169_v9, %v6132_v19  ;;  %v4343_v48 = vpack.c.bf16 %v4302_v62, %v4301_v57 }
 0x399   : > { %5318 = vmatprep.subr.bf16.mxu1 %v4331_v39 }
 0x39d   : > { %v6146_v18 = vpop.permute.xlu0 %6145 }
 0x39e   : > { %v6147_v63 = vunpack.i.l.bf16 %v6146_v18  ;;  %v6148_v40 = vunpack.i.h.bf16 %v6146_v18 }
 0x3a0   : > { %v4313_v24 = vsel %vm4256_vm3, %v9170_v29, %v6147_v63  ;;  %v4314_v18 = vsel %vm4256_vm3, %v9171_v20, %v6148_v40 }
 0x3a5   : > { %v6151_v52 = vpop.permute.xlu0 %6150 }
 0x3a6   : > { %v6153_v49 = vunpack.i.h.bf16 %v6151_v52  ;;  %v6152_v10 = vunpack.i.l.bf16 %v6151_v52  ;;  %v9172_v52 = vld [vmem:[#allocation46_spill] sm:$0xff] }
 0x3a8   : > { %v4315_v54 = vsel %vm4256_vm3, %v9166_v58, %v6152_v10  ;;  %v4316_v59 = vsel %vm4256_vm3, %v9167_v56, %v6153_v49 }
 0x3a9   : > { %v4350_v15 = vpack.c.bf16 %v4316_v59, %v4315_v54  ;;  %v9183_v54 = vld [vmem:[#allocation7_spill] sm:$0xff] }
 0x3ad   : > { %v6156_v38 = vpop.permute.xlu0 %6155 }
 0x3ae   : > { %v6158_v11 = vunpack.i.h.bf16 %v6156_v38  ;;  %v6157_v14 = vunpack.i.l.bf16 %v6156_v38  ;;  %v4298_v38 = vsel %vm4256_vm3, %v9172_v52, %v6128_v3 }
 0x3b0   : > { %v4317_v21 = vsel %vm4256_vm3, %v9162_v1, %v6157_v14  ;;  %v4318_v0 = vsel %vm4256_vm3, %v9163_v37, %v6158_v11  ;;  %v4342_v11 = vpack.c.bf16 %v4300_v6, %v4299_v13  ;;  %v4349_v14 = vpack.c.bf16 %v4314_v18, %v4313_v24  ;;  %v9177_v1 = vld [vmem:[#allocation67_spill] sm:$0xff]  ;;  %v9178_v37 = vld [vmem:[#allocation78_spill] sm:$0xff]  ;;  %v9185_v13 = vld [vmem:[#allocation105_spill] sm:$0xff] }
 0x3b1   : > { %v4351_v34 = vpack.c.bf16 %v4318_v0, %v4317_v21  ;;  %v9184_v6 = vld [vmem:[#allocation70_spill] sm:$0xff]  ;;  %v9187_v18 = vld [vmem:[#allocation72_spill] sm:$0xff] }
 0x3b7   : > { %v6161_v43 = vpop.permute.xlu0 %6160 }
 0x3b8   : > { %v6163_v35 = vunpack.i.h.bf16 %v6161_v43  ;;  %v6162_v32 = vunpack.i.l.bf16 %v6161_v43 }
 0x3ba   : > { %v4319_v22 = vsel %vm4256_vm3, %v9160_v31, %v6162_v32  ;;  %v4320_v7 = vsel %vm4256_vm3, %v9161_v30, %v6163_v35  ;;  %v9175_v32 = vld [vmem:[#allocation50_spill] sm:$0xff]  ;;  %v4341_v31 = vpack.c.bf16 %v4298_v38, %v4297_v23  ;;  %v9176_v30 = vld [vmem:[#allocation55_spill] sm:$0xff] }
 0x3bb   : > { %v6166_v36 = vpop.permute.xlu0 %6165  ;;  %v4352_v25 = vpack.c.bf16 %v4320_v7, %v4319_v22 }
 0x3bc   : > { %v6168_v39 = vunpack.i.h.bf16 %v6166_v36  ;;  %v6167_v50 = vunpack.i.l.bf16 %v6166_v36  ;;  %v9179_v36 = vld [vmem:[#allocation22_spill] sm:$0xff] }
 0x3bd   : > { %5348 = vmatprep.subr.bf16.mxu0 %v4352_v25 }
 0x3be   : > { %5349 = vmatpush3.bf16.msra.mxu0 %v4344_v2  ;;  %v4311_v35 = vsel %vm4256_vm3, %v9174_v46, %v6167_v50  ;;  %v4312_v53 = vsel %vm4256_vm3, %v9175_v32, %v6168_v39  ;;  %v9180_v2 = vld [vmem:[#allocation71_spill] sm:$0xff] }
 0x3bf   : > { %v6176_v45 = vpop.permute.xlu0 %6175  ;;  %5350 = vmatprep.subr.bf16.mxu0 %v4351_v34  ;;  %v4348_v22 = vpack.c.bf16 %v4312_v53, %v4311_v35  ;;  %v9182_v34 = vld [vmem:[#allocation86_spill] sm:$0xff] }
 0x3c0   : > { %v6178_v43 = vunpack.i.h.bf16 %v6176_v45  ;;  %v6177_v44 = vunpack.i.l.bf16 %v6176_v45 }
 0x3c2   : > { %5351 = vmatpush3.bf16.msra.mxu0 %v4343_v48  ;;  %v4296_v7 = vsel %vm4256_vm3, %v9176_v30, %v6178_v43  ;;  %v4295_v21 = vsel %vm4256_vm3, %v9177_v1, %v6177_v44 }
 0x3c3   : > { %v6186_v16 = vpop.permute.xlu0 %6185  ;;  %5352 = vmatprep.subr.bf16.mxu0 %v4350_v15  ;;  %v4340_v40 = vpack.c.bf16 %v4296_v7, %v4295_v21  ;;  %v9186_v15 = vld [vmem:[#allocation111_spill] sm:$0xff] }
 0x3c4   : > { %v6188_v61 = vunpack.i.h.bf16 %v6186_v16  ;;  %v6187_v28 = vunpack.i.l.bf16 %v6186_v16 }
 0x3c6   : > { %v6191_v5 = vpop.permute.xlu1 %6190  ;;  %5353 = vmatpush3.bf16.msra.mxu0 %v4342_v11  ;;  %v4309_v63 = vsel %vm4256_vm3, %v9180_v2, %v6187_v28  ;;  %v4310_v62 = vsel %vm4256_vm3, %v9181_v27, %v6188_v61  ;;  %v9189_v61 = vld [vmem:[#allocation103_spill] sm:$0xff] }
 0x3c7   : > { %v6193_v49 = vunpack.i.h.bf16 %v6191_v5  ;;  %v6192_v10 = vunpack.i.l.bf16 %v6191_v5  ;;  %5354 = vmatprep.subr.bf16.mxu0 %v4349_v14  ;;  %v4347_v59 = vpack.c.bf16 %v4310_v62, %v4309_v63  ;;  %v9188_v14 = vld [vmem:[#allocation8_spill] sm:$0xff] }
 0x3c8   : > { %v9192_v63 = vld [vmem:[#allocation28_spill] sm:$0xff] }
 0x3c9   : > { %v4262_v0 = vsel %vm4256_vm3, %v9178_v37, %v6193_v49  ;;  %v4261_v25 = vsel %vm4256_vm3, %v9179_v36, %v6192_v10 }
 0x3ca   : > { %v4323_v4 = vpack.c.bf16 %v4262_v0, %v4261_v25  ;;  %v6196_v19 = vpop.permute.xlu0 %6195  ;;  %5355 = vmatpush3.bf16.msra.mxu0 %v4341_v31 }
 0x3cb   : > { %v6198_v60 = vunpack.i.h.bf16 %v6196_v19  ;;  %v6197_v57 = vunpack.i.l.bf16 %v6196_v19  ;;  %5356 = vmatprep.subr.bf16.mxu0 %v4348_v22 }
 0x3cc   : > { %5319 = vmatpush3.bf16.msra.mxu1 %v4323_v4 }
 0x3cd   : > { %v4294_v58 = vsel %vm4256_vm3, %v9182_v34, %v6198_v60  ;;  %v4293_v56 = vsel %vm4256_vm3, %v9183_v54, %v6197_v57  ;;  %v6281_v34 = vld [vmem:[%s6592_s11 + $0x24] ss:$16 sps:$4 sm:$0xff]  }
 0x3ce   : > { %v6201_v3 = vpop.permute.xlu1 %6200  ;;  %5357 = vmatpush3.bf16.msra.mxu0 %v4340_v40  ;;  %v4339_v41 = vpack.c.bf16 %v4294_v58, %v4293_v56  ;;  %v6278_v56 = vld [vmem:[%s6592_s11 + $0x8] ss:$16 sps:$4 sm:$0xff]  }
 0x3cf   : > { %v6203_v55 = vunpack.i.h.bf16 %v6201_v3  ;;  %v6202_v45 = vunpack.i.l.bf16 %v6201_v3  ;;  %5358 = vmatprep.subr.bf16.mxu0 %v4347_v59  ;;  %v6283_v59 = vld [vmem:[%s6592_s11 + $0x2c] ss:$16 sps:$4 sm:$0xff]   ;;  %v6285_v3 = vld [vmem:[%s6592_s11 + $0x20] ss:$16 sps:$4 sm:$0xff]  }
 0x3d1   : > { %v4275_v9 = vsel %vm4256_vm3, %v9184_v6, %v6202_v45  ;;  %v4276_v48 = vsel %vm4256_vm3, %v9185_v13, %v6203_v55  ;;  %v6287_v55 = vld [vmem:[%s6592_s11 + $0x44] ss:$16 sps:$4 sm:$0xff]   ;;  %v6291_v45 = vld [vmem:[%s6592_s11 + $0x40] ss:$16 sps:$4 sm:$0xff]   ;;  %v6292_v6 = vld [vmem:[%s6592_s11 + $0x48] ss:$16 sps:$4 sm:$0xff]  }
 0x3d2   : > { %v6206_v29 = vpop.permute.xlu0 %6205  ;;  %5359 = vmatpush3.bf16.msra.mxu0 %v4339_v41  ;;  %v4330_v24 = vpack.c.bf16 %v4276_v48, %v4275_v9  ;;  %v6293_v41 = vld [vmem:[%s6592_s11 + $0x64] ss:$16 sps:$4 sm:$0xff]   ;;  %v6295_v9 = vld [vmem:[%s6592_s11 + $0x6c] ss:$16 sps:$4 sm:$0xff]   ;;  %v6297_v13 = vld [vmem:[%s6592_s11 + $0x60] ss:$16 sps:$4 sm:$0xff]  }
 0x3d3   : > { %v6208_v39 = vunpack.i.h.bf16 %v6206_v29  ;;  %v6207_v50 = vunpack.i.l.bf16 %v6206_v29  ;;  %v6298_v48 = vld [vmem:[%s6592_s11 + $0x68] ss:$16 sps:$4 sm:$0xff]  }
 0x3d4   : > { %5320 = vmatprep.subr.bf16.mxu1 %v4330_v24 }
 0x3d5   : > { %v4307_v20 = vsel %vm4256_vm3, %v9186_v15, %v6207_v50  ;;  %v4308_v16 = vsel %vm4256_vm3, %v9187_v18, %v6208_v39 }
 0x3d6   : > { %v6211_v52 = vpop.permute.xlu1 %6210  ;;  %v4346_v38 = vpack.c.bf16 %v4308_v16, %v4307_v20 }
 0x3d7   : > { %v6213_v51 = vunpack.i.h.bf16 %v6211_v52  ;;  %v6212_v23 = vunpack.i.l.bf16 %v6211_v52  ;;  %v4353_v52 = vld [vmem:[#allocation2] sm:$0xff] }
 0x3d8   : > { %5360 = vmatprep.subr.bf16.mxu0 %v4346_v38 }
 0x3d9   : > { %v4260_v11 = vsel %vm4256_vm3, %v8162_v47, %v6213_v51  ;;  %v4259_v43 = vsel %vm4256_vm3, %v9188_v14, %v6212_v23  ;;  %v9190_v47 = vld [vmem:[#allocation63_spill] sm:$0xff] }
 0x3da   : > { %v4322_v44 = vpack.c.bf16 %v4260_v11, %v4259_v43  ;;  %v6216_v46 = vpop.permute.xlu0 %6215 }
 0x3db   : > { %v6218_v35 = vunpack.i.h.bf16 %v6216_v46  ;;  %v6217_v32 = vunpack.i.l.bf16 %v6216_v46 }
 0x3dc   : > { %5321 = vmatpush3.bf16.msra.mxu1 %v4322_v44 }
 0x3dd   : > { %v4292_v53 = vsel %vm4256_vm3, %v8173_v42, %v6218_v35  ;;  %v4291_v28 = vsel %vm4256_vm3, %v9189_v61, %v6217_v32  ;;  %v9191_v42 = vld [vmem:[#allocation90_spill] sm:$0xff]  ;;  %v4354_v35 = vld [vmem:[#allocation2 + $0x8] sm:$0xff] }
 0x3de   : > { %v4338_v5 = vpack.c.bf16 %v4292_v53, %v4291_v28  ;;  %v6221_v49 = vpop.permute.xlu1 %6220 }
 0x3df   : > { %v6223_v10 = vunpack.i.h.bf16 %v6221_v49  ;;  %v6222_v31 = vunpack.i.l.bf16 %v6221_v49 }
 0x3e0   : > { %5361 = vmatpush3.bf16.msra.mxu0 %v4338_v5 }
 0x3e1   : > { %v4273_v22 = vsel %vm4256_vm3, %v9190_v47, %v6222_v31  ;;  %v4274_v30 = vsel %vm4256_vm3, %v8183_v33, %v6223_v10  ;;  %v4355_v47 = vld [vmem:[#allocation2 + $0x10] sm:$0xff] }
 0x3e2   : > { %v6226_v7 = vpop.permute.xlu0 %6225  ;;  %v4329_v1 = vpack.c.bf16 %v4274_v30, %v4273_v22 }
 0x3e3   : > { %v6228_v21 = vunpack.i.h.bf16 %v6226_v7  ;;  %v6227_v37 = vunpack.i.l.bf16 %v6226_v7 }
 0x3e4   : > { %5322 = vmatprep.subr.bf16.mxu1 %v4329_v1 }
 0x3e5   : > { %v4305_v0 = vsel %vm4256_vm3, %v9191_v42, %v6227_v37  ;;  %v4306_v36 = vsel %vm4256_vm3, %v8193_v12, %v6228_v21  ;;  %v6275_v12 = vld [vmem:[%s6592_s11] ss:$16 sps:$4 sm:$0xff]  }
 0x3e6   : > { %v6231_v25 = vpop.permute.xlu1 %6230  ;;  %v4345_v4 = vpack.c.bf16 %v4306_v36, %v4305_v0  ;;  %v4356_v36 = vld [vmem:[#allocation2 + $0x18] sm:$0xff] }
 0x3e7   : > { %v6233_v19 = vunpack.i.h.bf16 %v6231_v25  ;;  %v6232_v2 = vunpack.i.l.bf16 %v6231_v25 }
 0x3e8   : > { %5362 = vmatprep.subr.bf16.mxu0 %v4345_v4 }
 0x3e9   : > { %v4258_v33 = vsel %vm4256_vm3, %v8204_v8, %v6233_v19  ;;  %v4257_v27 = vsel %vm4256_vm3, %v9192_v63, %v6232_v2 }
 0x3ea   : > { %v4321_v62 = vpack.c.bf16 %v4258_v33, %v4257_v27  ;;  %v6236_v60 = vpop.permute.xlu0 %6235 }
 0x3eb   : > { %v6238_v57 = vunpack.i.h.bf16 %v6236_v60  ;;  %v6237_v40 = vunpack.i.l.bf16 %v6236_v60  ;;  %v4357_v60 = vld [vmem:[#allocation2 + $0x20] sm:$0xff] }
 0x3ec   : > { %5323 = vmatpush3.bf16.msra.mxu1 %v4321_v62 }
 0x3ed   : > { %v4290_v58 = vsel %vm4256_vm3, %v8213_v26, %v6238_v57  ;;  %v4289_v8 = vsel %vm4256_vm3, %v8187_v17, %v6237_v40  ;;  %v6286_v26 = vld [vmem:[%s6592_s11 + $0x28] ss:$16 sps:$4 sm:$0xff]   ;;  %v6289_v17 = vld [vmem:[%s6592_s11 + $0x4c] ss:$16 sps:$4 sm:$0xff]  }
 0x3ee   : > { %v4337_v54 = vpack.c.bf16 %v4290_v58, %v4289_v8 }
 0x3ef   : > { %4474 = vmatmul.mubr.bf16.vlgmr.msra.gmra.mxu1 %v6275_v12 }
 0x3f0   : > { %5363 = vmatpush3.bf16.msra.mxu0 %v4337_v54  ;;  %4481 = vmatprep.mubr.bf16.mxu1 %v6281_v34 }
 0x3f3   : > { %4539 = vmatmul.mubr.bf16.vlgmr.msra.gmra.mxu0 %v6278_v56 }
 0x3f4   : > { %4546 = vmatprep.mubr.bf16.mxu0 %v6283_v59  ;;  %v4358_v59 = vld [vmem:[#allocation2 + $0x28] sm:$0xff] }
 0x3f7   : > { %4482 = vmatmul.mubr.bf16.gmra.mxu1 %v6285_v3 }
 0x3f8   : > { %4489 = vmatprep.mubr.bf16.mxu1 %v6287_v55 }
 0x3fb   : > { %4547 = vmatmul.mubr.bf16.gmra.mxu0 %v6286_v26 }
 0x3fc   : > { %4554 = vmatprep.mubr.bf16.mxu0 %v6289_v17 }
 0x3ff   : > { %4490 = vmatmul.mubr.bf16.gmra.mxu1 %v6291_v45 }
 0x400   : > { %4497 = vmatprep.mubr.bf16.mxu1 %v6293_v41 }
 0x403   : > { %4555 = vmatmul.mubr.bf16.gmra.mxu0 %v6292_v6 }
 0x404   : > { %4562 = vmatprep.mubr.bf16.mxu0 %v6295_v9  ;;  %v4359_v9 = vld [vmem:[#allocation2 + $0x30] sm:$0xff] }
 0x407   : > { %4498 = vmatmul.mubr.bf16.gmra.mxu1 %v6297_v13 }
 0x40b   : > { %4563 = vmatmul.mubr.bf16.gmra.mxu0 %v6298_v48 }
 0x4af   : > { %v5324_v29 = vpop.f32.mrf.mxu1 }
 0x4b1   : > { %v5325_v24 = vpop.f32.mrf.mxu1 }
 0x4b2   : > { %v5326_v18 = vadd.f32 %v5325_v24, %v5324_v29 }
 0x4b3   : > { %v5364_v39 = vpop.f32.mrf.mxu0  ;;  %v5327_v50 = vpop.f32.mrf.mxu1 }
 0x4b5   : > { %v5365_v15 = vpop.f32.mrf.mxu0  ;;  %v5328_v20 = vpop.f32.mrf.mxu1 }
 0x4b6   : > { %v5366_v16 = vadd.f32 %v5365_v15, %v5364_v39  ;;  %v5329_v44 = vadd.f32 %v5328_v20, %v5327_v50  ;;  %v4360_v20 = vld [vmem:[#allocation2 + $0x38] sm:$0xff] }
 0x4b7   : > { %v5367_v38 = vpop.f32.mrf.mxu0  ;;  %v5330_v51 = vpop.f32.mrf.mxu1 }
 0x4b8   : > { %v4541_v23 = vadd.f32 %v5366_v16, %v5326_v18 }
 0x4b9   : > { %v5368_v11 = vpop.f32.mrf.mxu0  ;;  %v5331_v14 = vpop.f32.mrf.mxu1 }
 0x4ba   : > { %v4571_v43 = vadd.f32 %v4541_v23, %v4353_v52  ;;  %v5369_v46 = vadd.f32 %v5368_v11, %v5367_v38  ;;  %v5332_v10 = vadd.f32 %v5331_v14, %v5330_v51 }
 0x4bb   : > { %v5370_v32 = vpop.f32.mrf.mxu0  ;;  %v5333_v53 = vpop.f32.mrf.mxu1 }
 0x4bc   : > { %4580 = vst.msk [vmem:[#allocation2] sm:$0xff] %vm4579_vm4, %v4571_v43  ;;  %v4544_v61 = vadd.f32 %v5369_v46, %v5329_v44 }
 0x4bd   : > { %v5371_v28 = vpop.f32.mrf.mxu0  ;;  %v5334_v5 = vpop.f32.mrf.mxu1 }
 0x4be   : > { %v4572_v49 = vadd.f32 %v4544_v61, %v4354_v35  ;;  %v5372_v31 = vadd.f32 %v5371_v28, %v5370_v32  ;;  %v5335_v42 = vadd.f32 %v5334_v5, %v5333_v53 }
 0x4bf   : > { %v5373_v22 = vpop.f32.mrf.mxu0  ;;  %v5336_v30 = vpop.f32.mrf.mxu1 }
 0x4c0   : > { %4581 = vst.msk [vmem:[#allocation2 + $0x8] sm:$0xff] %vm4579_vm4, %v4572_v49  ;;  %v4549_v7 = vadd.f32 %v5372_v31, %v5332_v10 }
 0x4c1   : > { %v5374_v1 = vpop.f32.mrf.mxu0  ;;  %v5337_v21 = vpop.f32.mrf.mxu1 }
 0x4c2   : > { %v4573_v37 = vadd.f32 %v4549_v7, %v4355_v47  ;;  %v5375_v0 = vadd.f32 %v5374_v1, %v5373_v22  ;;  %v5338_v27 = vadd.f32 %v5337_v21, %v5336_v30 }
 0x4c3   : > { %v5376_v25 = vpop.f32.mrf.mxu0  ;;  %v5339_v4 = vpop.f32.mrf.mxu1 }
 0x4c4   : > { %4582 = vst.msk [vmem:[#allocation2 + $0x10] sm:$0xff] %vm4579_vm4, %v4573_v37  ;;  %v4552_v19 = vadd.f32 %v5375_v0, %v5335_v42 }
 0x4c5   : > { %v5377_v2 = vpop.f32.mrf.mxu0  ;;  %v5340_v33 = vpop.f32.mrf.mxu1 }
 0x4c6   : > { %v4574_v63 = vadd.f32 %v4552_v19, %v4356_v36  ;;  %v5378_v62 = vadd.f32 %v5377_v2, %v5376_v25  ;;  %v5341_v54 = vadd.f32 %v5340_v33, %v5339_v4 }
 0x4c7   : > { %v5379_v57 = vpop.f32.mrf.mxu0  ;;  %v5342_v40 = vpop.f32.mrf.mxu1 }
 0x4c8   : > { %4583 = vst.msk [vmem:[#allocation2 + $0x18] sm:$0xff] %vm4579_vm4, %v4574_v63  ;;  %v4557_v12 = vadd.f32 %v5378_v62, %v5338_v27 }
 0x4c9   : > { %v5380_v34 = vpop.f32.mrf.mxu0  ;;  %v5343_v58 = vpop.f32.mrf.mxu1 }
 0x4ca   : > { %v4575_v8 = vadd.f32 %v4557_v12, %v4357_v60  ;;  %v5381_v56 = vadd.f32 %v5380_v34, %v5379_v57  ;;  %v5344_v41 = vadd.f32 %v5343_v58, %v5342_v40 }
 0x4cb   : > { %v5382_v3 = vpop.f32.mrf.mxu0  ;;  %v5345_v55 = vpop.f32.mrf.mxu1 }
 0x4cc   : > { %4584 = vst.msk [vmem:[#allocation2 + $0x20] sm:$0xff] %vm4579_vm4, %v4575_v8  ;;  %v4560_v26 = vadd.f32 %v5381_v56, %v5341_v54 }
 0x4cd   : > { %v5383_v17 = vpop.f32.mrf.mxu0  ;;  %v5346_v48 = vpop.f32.mrf.mxu1 }
 0x4ce   : > { %v4576_v45 = vadd.f32 %v4560_v26, %v4358_v59  ;;  %v5384_v6 = vadd.f32 %v5383_v17, %v5382_v3  ;;  %v5347_v50 = vadd.f32 %v5346_v48, %v5345_v55 }
 0x4cf   : > { %v5385_v13 = vpop.f32.mrf.mxu0 }
 0x4d0   : > { %4585 = vst.msk [vmem:[#allocation2 + $0x28] sm:$0xff] %vm4579_vm4, %v4576_v45  ;;  %v4565_v29 = vadd.f32 %v5384_v6, %v5344_v41 }
 0x4d1   : > { %v5386_v24 = vpop.f32.mrf.mxu0 }
 0x4d2   : > { %v4577_v39 = vadd.f32 %v4565_v29, %v4359_v9  ;;  %v5387_v15 = vadd.f32 %v5386_v24, %v5385_v13 }
 0x4d4   : > { %4586 = vst.msk [vmem:[#allocation2 + $0x30] sm:$0xff] %vm4579_vm4, %v4577_v39  ;;  %v4568_v18 = vadd.f32 %v5387_v15, %v5347_v50  ;;  %4591 = sbr.rel (%p5043_p10) target bundleno = 1544 (0x608), region = 79 }
 0x4d6   : > { %v4578_v16 = vadd.f32 %v4568_v18, %v4360_v20 }
 0x4d8   : > { %4587 = vst.msk [vmem:[#allocation2 + $0x38] sm:$0xff] %vm4579_vm4, %v4578_v16 }
 0x4d9   : > { %v8576_v52 = vld [vmem:[#allocation2] sm:$0xff]  ;;  %v8578_v38 = vld [vmem:[#allocation2 + $0x8] sm:$0xff]  ;;  %v8580_v51 = vld [vmem:[#allocation2 + $0x10] sm:$0xff]  ;;  %v6476_v23 = vmov 0  }
 0x4da   : > { %6427 = vset.pattern.permute.xlu0 %v6476_v23  ;;  %vm4640_vm5 = vcmp.gt.f32.partialorder %v8576_v52, 0.0  ;;  %v4600_v11 = vmax.f32 %v8576_v52, 1e-30  ;;  %6428 = vset.pattern.permute.xlu1 %v6476_v23  ;;  %vm4641_vm6 = vcmp.gt.f32.partialorder %v8578_v38, 0.0  ;;  %v4601_v14 = vmax.f32 %v8578_v38, 1e-30 }
 0x4db   : > { %v4696_v43 = vsel %vm4640_vm5, 1, %v6476_v23  ;;  %v4697_v44 = vsel %vm4641_vm6, 1, %v6476_v23  ;;  %v4602_v46 = vmax.f32 %v8580_v51, 1e-30  ;;  %vm4642_vm7 = vcmp.gt.f32.partialorder %v8580_v51, 0.0  ;;  %v8592_v35 = vld [vmem:[#allocation2 + $0x18] sm:$0xff] }
 0x4dc   : > { %4705 = vperm.xlu0 %6427, %v4696_v43   ;;  %6429 = vrcp.f32 %v4600_v11  ;;  %4708 = vperm.xlu1 %6428, %v4697_v44   ;;  %v4698_v32 = vsel %vm4642_vm7, 1, %v6476_v23  ;;  %v4603_v53 = vmax.f32 %v8592_v35, 1e-30  ;;  %vm4643_vm8 = vcmp.gt.f32.partialorder %v8592_v35, 0.0  ;;  %v8597_v61 = vld [vmem:[#allocation2 + $0x28] sm:$0xff]  ;;  %v8599_v28 = vld [vmem:[#allocation2 + $0x20] sm:$0xff] }
 0x4dd   : > { %6431 = vrcp.f32 %v4601_v14  ;;  %v4699_v5 = vsel %vm4643_vm8, 1, %v6476_v23  ;;  %v4605_v49 = vmax.f32 %v8597_v61, 1e-30  ;;  %v4604_v10 = vmax.f32 %v8599_v28, 1e-30  ;;  %v8607_v22 = vld [vmem:[#allocation2 + $0x30] sm:$0xff] }
 0x4de   : > { %6433 = vrcp.f32 %v4602_v46  ;;  %v4606_v30 = vmax.f32 %v8607_v22, 1e-30  ;;  %vm4644_vm9 = vcmp.gt.f32.partialorder %v8599_v28, 0.0  ;;  %vm4645_vm10 = vcmp.gt.f32.partialorder %v8597_v61, 0.0  ;;  %v5044_v24 = vld [vmem:[%s8673_s2] ss:$0 sm:$0xff] }
 0x4df   : > { %v8604_v31 = vld [vmem:[#allocation2 + $0x38] sm:$0xff]  ;;  %6435 = vrcp.f32 %v4603_v53  ;;  %v4700_v9 = vsel %vm4644_vm9, 1, %v6476_v23  ;;  %vm4646_vm11 = vcmp.gt.f32.partialorder %v8607_v22, 0.0  ;;  %v4701_v13 = vsel %vm4645_vm10, 1, %v6476_v23 }
 0x4e0   : > { %v4607_v47 = vmax.f32 %v8604_v31, 1e-30  ;;  %4711 = vperm.xlu0 %6427, %v4698_v32   ;;  %4714 = vperm.xlu1 %6428, %v4699_v5   ;;  %6437 = vrcp.f32 %v4605_v49  ;;  %vm4647_vm12 = vcmp.gt.f32.partialorder %v8604_v31, 0.0  ;;  %v4702_v48 = vsel %vm4646_vm11, 1, %v6476_v23 }
 0x4e1   : > { %6439 = vrcp.f32 %v4604_v10  ;;  %v4703_v29 = vsel %vm4647_vm12, 1, %v6476_v23  ;;  %vm4801_vm5 = vcmask 130048  }
 0x4e2   : > { %6441 = vrcp.f32 %v4607_v47 }
 0x4e3   : > { %6443 = vrcp.f32 %v4606_v30 }
 0x4e9   : > { %v6430_v7 = vpop.eup %6429 }
 0x4ea   : > { %v6432_v1 = vpop.eup %6431  ;;  %v4616_v21 = vmul.f32 %v6430_v7, %v4600_v11 }
 0x4eb   : > { %v6434_v37 = vpop.eup %6433  ;;  %v4617_v42 = vmul.f32 %v6432_v1, %v4601_v14 }
 0x4ec   : > { %v6436_v0 = vpop.eup %6435  ;;  %v4618_v36 = vmul.f32 %v6434_v37, %v4602_v46  ;;  %v4624_v25 = vsub.f32 2.0, %v4616_v21 }
 0x4ed   : > { %v6438_v4 = vpop.eup %6437  ;;  %v4619_v19 = vmul.f32 %v6436_v0, %v4603_v53  ;;  %v4625_v2 = vsub.f32 2.0, %v4617_v42 }
 0x4ee   : > { %v6440_v33 = vpop.eup %6439  ;;  %v4626_v63 = vsub.f32 2.0, %v4618_v36  ;;  %v4632_v27 = vmul.f32 %v6430_v7, %v4624_v25  ;;  %v4621_v62 = vmul.f32 %v6438_v4, %v4605_v49 }
 0x4ef   : > { %v6442_v60 = vpop.eup %6441  ;;  %v4627_v57 = vsub.f32 2.0, %v4619_v19  ;;  %v4620_v40 = vmul.f32 %v6440_v33, %v4604_v10  ;;  %v4633_v58 = vmul.f32 %v6432_v1, %v4625_v2 }
 0x4f0   : > { %v6444_v12 = vpop.eup %6443  ;;  %v4634_v34 = vmul.f32 %v6434_v37, %v4626_v63  ;;  %4650 = vperm.xlu0 %6427, %v4632_v27   ;;  %v4629_v59 = vsub.f32 2.0, %v4621_v62  ;;  %v4623_v3 = vmul.f32 %v6442_v60, %v4607_v47 }
 0x4f1   : > { %v4628_v8 = vsub.f32 2.0, %v4620_v40  ;;  %v4622_v54 = vmul.f32 %v6444_v12, %v4606_v30  ;;  %v4635_v56 = vmul.f32 %v6436_v0, %v4627_v57 }
 0x4f2   : > { %4660 = vperm.xlu1 %6428, %v4634_v34   ;;  %v4637_v17 = vmul.f32 %v6438_v4, %v4629_v59  ;;  %v4631_v45 = vsub.f32 2.0, %v4623_v3 }
 0x4f3   : > { %v4636_v55 = vmul.f32 %v6440_v33, %v4628_v8  ;;  %v4630_v26 = vsub.f32 2.0, %v4622_v54 }
 0x4f4   : > { %4655 = vperm.xlu0 %6427, %v4633_v58   ;;  %v4639_v6 = vmul.f32 %v6442_v60, %v4631_v45 }
 0x4f5   : > { %v4638_v41 = vmul.f32 %v6444_v12, %v4630_v26 }
 0x4f6   : > { %4665 = vperm.xlu1 %6428, %v4635_v56  }
 0x4f8   : > { %4670 = vperm.xlu0 %6427, %v4636_v55  }
 0x4fa   : > { %4675 = vperm.xlu1 %6428, %v4637_v17  }
 0x4fc   : > { %4680 = vperm.xlu0 %6427, %v4638_v41  }
 0x4fe   : > { %4685 = vperm.xlu1 %6428, %v4639_v6  }
 0x500   : > { %4717 = vperm.xlu0 %6427, %v4700_v9  }
 0x502   : > { %4720 = vperm.xlu1 %6428, %v4701_v13  }
 0x504   : > { %4723 = vperm.xlu0 %6427, %v4702_v48  }
 0x506   : > { %4726 = vperm.xlu1 %6428, %v4703_v29  }
 0x508   : > { %4750 = vrot.lane.b32.xlu0 %v5044_v24, %s6477_s26 }
 0x557   : > { %v4706_v39 = vpop.permute.xlu0 %4705  ;;  %v4709_v50 = vpop.permute.xlu1 %4708 }
 0x558   : > { %vm4729_vm13 = vcmp.eq.s32.totalorder %v4709_v50, 1  ;;  %vm4728_vm14 = vcmp.eq.s32.totalorder %v4706_v39, 1 }
 0x55b   : > { %v4712_v15 = vpop.permute.xlu0 %4711  ;;  %v4715_v20 = vpop.permute.xlu1 %4714 }
 0x55c   : > { %vm4731_vm15 = vcmp.eq.s32.totalorder %v4715_v20, 1  ;;  %vm4730_vm0 = vcmp.eq.s32.totalorder %v4712_v15, 1 }
 0x56b   : > { %v4651_v18 = vpop.permute.xlu0 %4650 }
 0x56c   : > { %v4688_v53 = vmul.f32 %v4651_v18, %v8576_v52 }
 0x56d   : > { %v4661_v16 = vpop.permute.xlu1 %4660 }
 0x56e   : > { %v4690_v47 = vmul.f32 %v4661_v16, %v8580_v51  ;;  %v4736_v7 = vsel %vm4728_vm14, %v4688_v53, 0.0 }
 0x56f   : > { %v4656_v11 = vpop.permute.xlu0 %4655 }
 0x570   : > { %v4689_v5 = vmul.f32 %v4656_v11, %v8578_v38  ;;  %v4738_v0 = vsel %vm4730_vm0, %v4690_v47, 0.0 }
 0x571   : > { %v4666_v14 = vpop.permute.xlu1 %4665 }
 0x572   : > { %v4691_v30 = vmul.f32 %v4666_v14, %v8592_v35  ;;  %v4737_v1 = vsel %vm4729_vm13, %v4689_v5, 0.0 }
 0x573   : > { %v4671_v43 = vpop.permute.xlu0 %4670 }
 0x574   : > { %v4739_v36 = vsel %vm4731_vm15, %v4691_v30, 0.0  ;;  %v4692_v35 = vmul.f32 %v4671_v43, %v8599_v28 }
 0x575   : > { %v4676_v44 = vpop.permute.xlu1 %4675 }
 0x576   : > { %v4693_v51 = vmul.f32 %v4676_v44, %v8597_v61 }
 0x577   : > { %v4681_v46 = vpop.permute.xlu0 %4680 }
 0x578   : > { %v4694_v40 = vmul.f32 %v4681_v46, %v8607_v22 }
 0x579   : > { %v4686_v23 = vpop.permute.xlu1 %4685 }
 0x57a   : > { %v4695_v57 = vmul.f32 %v4686_v23, %v8604_v31 }
 0x57b   : > { %v4718_v32 = vpop.permute.xlu0 %4717 }
 0x57c   : > { %vm4732_vm2 = vcmp.eq.s32.totalorder %v4718_v32, 1 }
 0x57d   : > { %v4721_v10 = vpop.permute.xlu1 %4720  ;;  %v4740_v33 = vsel %vm4732_vm2, %v4692_v35, 0.0 }
 0x57e   : > { %vm4733_vm1 = vcmp.eq.s32.totalorder %v4721_v10, 1 }
 0x57f   : > { %v4724_v49 = vpop.permute.xlu0 %4723  ;;  %v4741_v2 = vsel %vm4733_vm1, %v4693_v51, 0.0 }
 0x580   : > { %vm4734_vm4 = vcmp.eq.s32.totalorder %v4724_v49, 1 }
 0x581   : > { %v4727_v52 = vpop.permute.xlu1 %4726  ;;  %v4742_v12 = vsel %vm4734_vm4, %v4694_v40, 0.0 }
 0x582   : > { %vm4735_vm3 = vcmp.eq.s32.totalorder %v4727_v52, 1 }
 0x583   : > { %v4751_v21 = vpop.permute.xlu0 %4750  ;;  %v4743_v61 = vsel %vm4735_vm3, %v4695_v57, 0.0 }
 0x584   : > { %v4754_v37 = vadd.f32 %v4751_v21, %v4737_v1  ;;  %v4753_v42 = vadd.f32 %v4751_v21, %v4736_v7  ;;  %v4756_v4 = vadd.f32 %v4751_v21, %v4739_v36  ;;  %v4755_v19 = vadd.f32 %v4751_v21, %v4738_v0 }
 0x585   : > { %v4758_v62 = vadd.f32 %v4751_v21, %v4741_v2  ;;  %v4757_v60 = vadd.f32 %v4751_v21, %v4740_v33  ;;  %v4760_v58 = vadd.f32 %v4751_v21, %v4743_v61  ;;  %v4759_v8 = vadd.f32 %v4751_v21, %v4742_v12 }
 0x586   : > { %v4762_v38 = vmax.f32 %v4754_v37, 0.0  ;;  %v4761_v25 = vmax.f32 %v4753_v42, 0.0  ;;  %v4764_v63 = vmax.f32 %v4756_v4, 0.0  ;;  %v4763_v27 = vmax.f32 %v4755_v19, 0.0 }
 0x587   : > { %v4766_v28 = vmax.f32 %v4758_v62, 0.0  ;;  %v4765_v34 = vmax.f32 %v4757_v60, 0.0  ;;  %v4768_v54 = vmax.f32 %v4760_v58, 0.0  ;;  %v4767_v56 = vmax.f32 %v4759_v8, 0.0 }
 0x588   : > { %4779 = vrot.lane.b32.xlu0 %v4762_v38, %s6478_s9  ;;  %4777 = vrot.lane.b32.xlu1 %v4761_v25, %s6478_s9 }
 0x58c   : > { %4783 = vrot.lane.b32.xlu0 %v4764_v63, %s6478_s9  ;;  %4781 = vrot.lane.b32.xlu1 %v4763_v27, %s6478_s9 }
 0x590   : > { %4787 = vrot.lane.b32.xlu0 %v4766_v28, %s6478_s9  ;;  %4785 = vrot.lane.b32.xlu1 %v4765_v34, %s6478_s9 }
 0x594   : > { %4791 = vrot.lane.b32.xlu0 %v4768_v54, %s6478_s9  ;;  %4789 = vrot.lane.b32.xlu1 %v4767_v56, %s6478_s9 }
 0x5fa   : > { %v4780_v59 = vpop.permute.xlu0 %4779  ;;  %v4778_v3 = vpop.permute.xlu1 %4777 }
 0x5fb   : > { %4803 = vst.msk [vmem:[%s8678_s7 + $0x8] sm:$0xff] %vm4801_vm5, %v4780_v59  ;;  %4802 = vst.msk [vmem:[%s8678_s7] sm:$0xff] %vm4801_vm5, %v4778_v3 }
 0x5fe   : > { %v4784_v31 = vpop.permute.xlu0 %4783  ;;  %v4782_v22 = vpop.permute.xlu1 %4781 }
 0x5ff   : > { %4805 = vst.msk [vmem:[%s8678_s7 + $0x18] sm:$0xff] %vm4801_vm5, %v4784_v31  ;;  %4804 = vst.msk [vmem:[%s8678_s7 + $0x10] sm:$0xff] %vm4801_vm5, %v4782_v22 }
 0x602   : > { %v4788_v55 = vpop.permute.xlu0 %4787  ;;  %v4786_v26 = vpop.permute.xlu1 %4785 }
 0x603   : > { %4807 = vst.msk [vmem:[%s8678_s7 + $0x28] sm:$0xff] %vm4801_vm5, %v4788_v55  ;;  %4806 = vst.msk [vmem:[%s8678_s7 + $0x20] sm:$0xff] %vm4801_vm5, %v4786_v26 }
 0x606   : > { %v4792_v17 = vpop.permute.xlu0 %4791  ;;  %v4790_v45 = vpop.permute.xlu1 %4789 }
 0x607   : > { %4809 = vst.msk [vmem:[%s8678_s7 + $0x38] sm:$0xff] %vm4801_vm5, %v4792_v17  ;;  %4808 = vst.msk [vmem:[%s8678_s7 + $0x30] sm:$0xff] %vm4801_vm5, %v4790_v45 }
 0x608 PF: > { %p14_p11 = scmp.ge.s32.totalorder %s6538_s28, 4   ;;  %s9193_s24 = smov %s6463_s25 }
 0x609   : > { %s9194_s25 = smov %s6547_s8  ;;  %s9195_s26 = smov %s6538_s28 }
 0x60a   :  { %16 = sbr.rel (!%p14_p11) target bundleno = 2 (0x2), region = 119 }

// kernel: rgat_forward.3
= control target key start
LH: loop header
LB: loop body
LE: loop exit
PB: predicated region body
PF: predicated region fallthrough
CT: control target
= control target key end

     0   :  { %s6876_s30 = smov 0   ;;  %s6878_s10 = smov 0   ;;  %s9096_s0 = inlined_call_operand.vmem [shape: bf16[64,16], index: 0, kind: input, shape index: {}]   ;;  %s9097_s1 = inlined_call_operand.vmem [shape: f32[16,48], index: 1, kind: input, shape index: {}]   ;;  %s9098_s2 = inlined_call_operand.vmem [shape: f32[1,16], index: 2, kind: input, shape index: {}]   ;;  %s9099_s3 = inlined_call_operand.vmem [shape: f32[1024,1], index: 3, kind: input, shape index: {}]   ;;  %s9100_s4 = inlined_call_operand.vmem [shape: bf16[1024,64], index: 4, kind: input, shape index: {}]   ;;  %s9101_s5 = inlined_call_operand.vmem [shape: bf16[64,1024], index: 5, kind: input, shape index: {}]   ;;  %s9102_s6 = inlined_call_operand.vmem [shape: bf16[1024,3], index: 6, kind: input, shape index: {}]   ;;  %s9103_s7 = inlined_call_operand.vmem [shape: f32[16,4], index: 7, kind: input, shape index: {}]   ;;  %s9104_s8 = inlined_call_operand.vmem [shape: f32[1,4], index: 8, kind: input, shape index: {}]   ;;  %s9105_s9 = inlined_call_operand.vmem [shape: f32[64,4], index: 9, kind: output, shape index: {}]  }
   0x1   :  { %s6880_s11 = smov 0  }
   0x2 LB: > { %s6892_s12 = sadd.s32 4294967295, %s6814_s11   ;;  %s6895_s13 = sadd.s32 1, %s6814_s11   ;;  %s6814_s11 = sphi %s6880_s11, %s9622_s11   ;;  %s6810_s10 = sphi %s6878_s10, %s9621_s10   ;;  %s6806_s30 = sphi %s6876_s30, %s9620_s30  }
   0x3   : > { %s138_s14 = ssub.s32 %s6814_s11, %s6895_s13  ;;  %s141_s15 = sadd.s32 1, %s6810_s10 }
   0x4   : > { %p139_p0 = scmp.eq.s32.totalorder %s138_s14, 0  ;;  %p148_p1 = scmp.ne.s32.totalorder %s6810_s10, %s6806_s30 }
   0x5   : > { %p149_p2 = scmp.eq.s32.totalorder %s6814_s11, 0  ;;  %p5155_p4 = scmp.ge.s32.totalorder %s6814_s11, 2 }
   0x6   : > { %s6904_s16 = scalar_select %p139_p0, %s6810_s10, %s141_s15  }
   0x7   : > { %p150_p3 = por %p149_p2, %p148_p1  ;;  %278 = sbr.rel (%p5155_p4) target bundleno = 24 (0x18), region = 36 }
   0xc   : > { %299 = sbr.rel (!%p150_p3) target bundleno = 24 (0x18), region = 48  ;;  %s301_s17 = sand.u32 (%p150_p3), 1, %s6810_s10  }
   0xd   : > { %s5329_s18 = sshll.u32 (%p150_p3), %s6814_s11, 4  ;;  %s5156_s19 = sshll.u32 (%p150_p3), %s301_s17, 7 }
   0xe   : > { %s6912_s22 = scalar_lea.vmem (%p150_p3), %s9101_s5, %s5329_s18  ;;  %s303_s23 = scalar_lea.vmem (%p150_p3), [#allocation3], %s5156_s19 }
   0xf   : > { %v319_v0 = vld [vmem:[%s6912_s22] sm:$0xff] (%p150_p3)  ;;  %v321_v1 = vld [vmem:[%s6912_s22 + $0x8] sm:$0xff] (%p150_p3) }
  0x10   : > { %v323_v2 = vld [vmem:[%s6912_s22 + $0x20] sm:$0xff] (%p150_p3)  ;;  %320 = vst [vmem:[%s303_s23] sm:$0xff] (%p150_p3), %v319_v0  ;;  %322 = vst [vmem:[%s303_s23 + $0x8] sm:$0xff] (%p150_p3), %v321_v1  ;;  %v325_v3 = vld [vmem:[%s6912_s22 + $0x28] sm:$0xff] (%p150_p3) }
  0x11   : > { %324 = vst [vmem:[%s303_s23 + $0x10] sm:$0xff] %v323_v2  ;;  %v327_v4 = vld [vmem:[%s6912_s22 + $0x40] sm:$0xff]  ;;  %v329_v5 = vld [vmem:[%s6912_s22 + $0x48] sm:$0xff]  ;;  %326 = vst [vmem:[%s303_s23 + $0x18] sm:$0xff] %v325_v3 }
  0x12   : > { %328 = vst [vmem:[%s303_s23 + $0x20] sm:$0xff] %v327_v4  ;;  %330 = vst [vmem:[%s303_s23 + $0x28] sm:$0xff] %v329_v5  ;;  %v331_v6 = vld [vmem:[%s6912_s22 + $0x60] sm:$0xff]  ;;  %v333_v7 = vld [vmem:[%s6912_s22 + $0x68] sm:$0xff] }
  0x13   : > { %v335_v8 = vld [vmem:[%s6912_s22 + $0x80] sm:$0xff]  ;;  %332 = vst [vmem:[%s303_s23 + $0x30] sm:$0xff] %v331_v6  ;;  %334 = vst [vmem:[%s303_s23 + $0x38] sm:$0xff] %v333_v7  ;;  %v337_v9 = vld [vmem:[%s6912_s22 + $0x88] sm:$0xff] }
  0x14   : > { %336 = vst [vmem:[%s303_s23 + $0x40] sm:$0xff] %v335_v8  ;;  %v339_v10 = vld [vmem:[%s6912_s22 + $0xa0] sm:$0xff]  ;;  %v341_v11 = vld [vmem:[%s6912_s22 + $0xa8] sm:$0xff]  ;;  %338 = vst [vmem:[%s303_s23 + $0x48] sm:$0xff] %v337_v9 }
  0x15   : > { %340 = vst [vmem:[%s303_s23 + $0x50] sm:$0xff] %v339_v10  ;;  %342 = vst [vmem:[%s303_s23 + $0x58] sm:$0xff] %v341_v11  ;;  %v343_v12 = vld [vmem:[%s6912_s22 + $0xc0] sm:$0xff]  ;;  %v345_v13 = vld [vmem:[%s6912_s22 + $0xc8] sm:$0xff] }
  0x16   : > { %v347_v14 = vld [vmem:[%s6912_s22 + $0xe0] sm:$0xff]  ;;  %344 = vst [vmem:[%s303_s23 + $0x60] sm:$0xff] %v343_v12  ;;  %346 = vst [vmem:[%s303_s23 + $0x68] sm:$0xff] %v345_v13  ;;  %v349_v15 = vld [vmem:[%s6912_s22 + $0xe8] sm:$0xff] }
  0x17   : > { %348 = vst [vmem:[%s303_s23 + $0x70] sm:$0xff] %v347_v14  ;;  %350 = vst [vmem:[%s303_s23 + $0x78] sm:$0xff] %v349_v15 }
  0x18 PF: > { %p5159_p5 = scmp.ge.s32.totalorder %s6814_s11, 1  ;;  %p364_p6 = scmp.lt.s32.totalorder %s6814_s11, 3 }
  0x1a   : > { %p365_p7 = pnand %p5159_p5, %p364_p6 }
  0x1c   : > { %368 = sbr.rel (%p365_p7) target bundleno = 2061 (0x80d), region = 75 }
  0x21   : > { %s371_s24 = sand.u32 1, %s6806_s30   ;;  %s5161_s25 = sshll.u32 %s6892_s12, 6 }
  0x22   : > { %s5160_s26 = sshll.u32 %s371_s24, 7  ;;  %p417_p8 = scmp.lt.s32.totalorder %s5161_s25, 127 }
  0x23   : > { %s6949_s21 = scalar_lea.vmem [#allocation3], %s5160_s26  ;;  %p5167_p9 = scmp.ne.s32.totalorder %s6892_s12, 0 }
  0x24   : > { %s9624_s25 = smov (!%p417_p8, %s5161_s25), 127 }
  0x25   : > { %s5162_s27 = sshll.u32 %s9624_s25, 3  ;;  %s5164_s28 = sshll.u32 %s9624_s25, 2 }
  0x26   : > { %s6937_s15 = scalar_lea.vmem %s9099_s3, %s5162_s27  ;;  %s6942_s11 = scalar_lea.vmem %s9100_s4, %s5164_s28 }
  0x27   : > { %s6947_s30 = scalar_lea.vmem %s9102_s6, %s5164_s28  ;;  %439 = sbr.rel (%p5167_p9) target bundleno = 49 (0x31), region = 83 }
  0x2c   : > { %vm440_vm0 = vcmask 138240   ;;  %v6816_v16 = vmov 0.0  }
  0x2d   : > { %441 = vst.msk [vmem:[#allocation2] sm:$0xff] %vm440_vm0, %v6816_v16  ;;  %442 = vst.msk [vmem:[#allocation2 + $0x8] sm:$0xff] %vm440_vm0, %v6816_v16 }
  0x2e   : > { %443 = vst.msk [vmem:[#allocation2 + $0x10] sm:$0xff] %vm440_vm0, %v6816_v16  ;;  %444 = vst.msk [vmem:[#allocation2 + $0x18] sm:$0xff] %vm440_vm0, %v6816_v16 }
  0x2f   : > { %445 = vst.msk [vmem:[#allocation2 + $0x20] sm:$0xff] %vm440_vm0, %v6816_v16  ;;  %446 = vst.msk [vmem:[#allocation2 + $0x28] sm:$0xff] %vm440_vm0, %v6816_v16 }
  0x30   : > { %447 = vst.msk [vmem:[#allocation2 + $0x30] sm:$0xff] %vm440_vm0, %v6816_v16  ;;  %448 = vst.msk [vmem:[#allocation2 + $0x38] sm:$0xff] %vm440_vm0, %v6816_v16 }
  0x31 PF: > { %v6554_v17 = vld [vmem:[%s9096_s0 + $0x18] sm:$0xff]   ;;  %v6817_v18 = vmov 1   ;;  %v5331_v19 = vld [vmem:[%s6947_s30] sm:$0xff]   ;;  %v6555_v22 = vld [vmem:[%s9096_s0 + $0x10] sm:$0xff]   ;;  %v6818_v27 = vmov 0   ;;  %vm913_vm1 = vcmask 523264  }
  0x32   : > { %5988 = vset.pattern.permute.xlu0 %v6817_v18  ;;  %5681 = vmatprep.subr.bf16.mxu0 %v6554_v17  ;;  %v5332_v20 = vunpack.c.l.bf16 %v5331_v19  ;;  %v5333_v21 = vunpack.c.h.bf16 %v5331_v19  ;;  %v5460_v23 = vld [vmem:[%s6947_s30 + $0x18] sm:$0xff]   ;;  %v5462_v26 = vld [vmem:[%s6947_s30 + $0x28] sm:$0xff]   ;;  %v6558_v33 = vld [vmem:[%s6942_s11] sm:$0xff]   ;;  %vm1301_vm2 = vcmask 130048   ;;  %s6821_s20 = smov 112   ;;  %vm4311_vm3 = vcmask 7168  }
  0x33   : > { %5682 = vmatpush3.bf16.msra.mxu0 %v6554_v17  ;;  %v5344_v24 = vunpack.c.l.bf16 %v5460_v23  ;;  %v5345_v25 = vunpack.c.h.bf16 %v5460_v23  ;;  %5907 = vset.pattern.permute.xlu1 %v6818_v27  ;;  %v6556_v29 = vld [vmem:[%s9096_s0 + $0x8] sm:$0xff]   ;;  %v5352_v31 = vunpack.c.l.bf16 %v5462_v26  ;;  %v5353_v32 = vunpack.c.h.bf16 %v5462_v26  ;;  %v5464_v34 = vld [vmem:[%s6947_s30 + $0x38] sm:$0xff]   ;;  %v6557_v35 = vld [vmem:[%s9096_s0] sm:$0xff]   ;;  %p5316_p10 = scmp.ne.s32.totalorder %s6892_s12, 1 }
  0x34   : > { %v6963_v28 = vpack.i.bf16 %v5333_v21, %v5332_v20  ;;  %5683 = vmatprep.subr.bf16.mxu0 %v6555_v22  ;;  %5689 = vmatprep.mubr.msk.bf16.mxu0 %vm913_vm1, %v6558_v33  ;;  %v5360_v37 = vunpack.c.l.bf16 %v5464_v34  ;;  %v5361_v38 = vunpack.c.h.bf16 %v5464_v34  ;;  %v5459_v39 = vld [vmem:[%s6947_s30 + $0x10] sm:$0xff]   ;;  %v5466_v40 = vld [vmem:[%s6947_s30 + $0x48] sm:$0xff]   ;;  %v5468_v48 = vld [vmem:[%s6947_s30 + $0x58] sm:$0xff]   ;;  %vm4634_vm4 = vcmask 138240   ;;  %s6825_s26 = smov (!%p5316_p10), 127  }
  0x35   : > { %v6969_v30 = vpack.i.bf16 %v5345_v25, %v5344_v24  ;;  %v6978_v36 = vpack.i.bf16 %v5353_v32, %v5352_v31  ;;  %v5340_v41 = vunpack.c.l.bf16 %v5459_v39  ;;  %v5341_v42 = vunpack.c.h.bf16 %v5459_v39  ;;  %v6559_v44 = vld [vmem:[%s6942_s11 + $0x8] sm:$0xff]   ;;  %v6560_v49 = vld [vmem:[%s6942_s11 + $0x10] sm:$0xff]   ;;  %v6561_v54 = vld [vmem:[%s6942_s11 + $0x18] sm:$0xff]  }
  0x36   : > { %5990 = vperm.xlu0 %5988, %v6963_v28   ;;  %v6983_v43 = vpack.i.bf16 %v5361_v38, %v5360_v37  ;;  %v5368_v45 = vunpack.c.l.bf16 %v5466_v40  ;;  %v5369_v46 = vunpack.c.h.bf16 %v5466_v40  ;;  %v5376_v51 = vunpack.c.l.bf16 %v5468_v48  ;;  %v5470_v53 = vld [vmem:[%s6947_s30 + $0x68] sm:$0xff]   ;;  %v5472_v58 = vld [vmem:[%s6947_s30 + $0x78] sm:$0xff]   ;;  %v6562_v59 = vld [vmem:[%s6942_s11 + $0x20] sm:$0xff]  }
  0x37   : > { %5684 = vmatpush3.bf16.msra.mxu0 %v6555_v22  ;;  %v6986_v47 = vpack.i.bf16 %v5341_v42, %v5340_v41  ;;  %v5377_v52 = vunpack.c.h.bf16 %v5468_v48  ;;  %v5384_v56 = vunpack.c.l.bf16 %v5470_v53  ;;  %v5385_v57 = vunpack.c.h.bf16 %v5470_v53  ;;  %v5458_v60 = vld [vmem:[%s6947_s30 + $0x8] sm:$0xff]   ;;  %v5461_v63 = vld [vmem:[%s6947_s30 + $0x20] sm:$0xff]   ;;  %v5463_v6 = vld [vmem:[%s6947_s30 + $0x30] sm:$0xff]  }
  0x38   : > { %5685 = vmatprep.subr.bf16.mxu0 %v6556_v29  ;;  %v6993_v50 = vpack.i.bf16 %v5369_v46, %v5368_v45  ;;  %v5336_v61 = vunpack.c.l.bf16 %v5458_v60  ;;  %v5337_v62 = vunpack.c.h.bf16 %v5458_v60  ;;  %v5392_v0 = vunpack.c.l.bf16 %v5472_v58  ;;  %v5474_v2 = vld [vmem:[%s6947_s30 + $0x88] sm:$0xff]   ;;  %v5465_v7 = vld [vmem:[%s6947_s30 + $0x40] sm:$0xff]   ;;  %v5476_v15 = vld [vmem:[%s6947_s30 + $0x98] sm:$0xff]  }
  0x39   : > { %5909 = vperm.xlu1 %5907, %v6986_v47   ;;  %v7000_v55 = vpack.i.bf16 %v5377_v52, %v5376_v51  ;;  %v5393_v1 = vunpack.c.h.bf16 %v5472_v58  ;;  %v7010_v3 = vpack.i.bf16 %v5385_v57, %v5384_v56  ;;  %v5348_v4 = vunpack.c.l.bf16 %v5461_v63  ;;  %v6563_v11 = vld [vmem:[%s6942_s11 + $0x28] sm:$0xff]   ;;  %v5467_v19 = vld [vmem:[%s6947_s30 + $0x50] sm:$0xff]   ;;  %v5469_v22 = vld [vmem:[%s6947_s30 + $0x60] sm:$0xff]  }
  0x3a   : > { %6006 = vperm.xlu0 %5988, %v6969_v30   ;;  %v5349_v5 = vunpack.c.h.bf16 %v5461_v63  ;;  %v7014_v8 = vpack.i.bf16 %v5337_v62, %v5336_v61  ;;  %v5356_v9 = vunpack.c.l.bf16 %v5463_v6  ;;  %v5357_v10 = vunpack.c.h.bf16 %v5463_v6  ;;  %v6564_v23 = vld [vmem:[%s6942_s11 + $0x30] sm:$0xff]   ;;  %v5473_v31 = vld [vmem:[%s6947_s30 + $0x80] sm:$0xff]   ;;  %v5478_v42 = vld [vmem:[%s6947_s30 + $0xa8] sm:$0xff]  }
  0x3b   : > { %5686 = vmatpush3.bf16.msra.mxu0 %v6556_v29  ;;  %v5400_v12 = vunpack.c.l.bf16 %v5474_v2  ;;  %v5401_v14 = vunpack.c.h.bf16 %v5474_v2  ;;  %v5364_v16 = vunpack.c.l.bf16 %v5465_v7  ;;  %v5365_v17 = vunpack.c.h.bf16 %v5465_v7  ;;  %v5471_v24 = vld [vmem:[%s6947_s30 + $0x70] sm:$0xff]   ;;  %v5480_v58 = vld [vmem:[%s6947_s30 + $0xb8] sm:$0xff]   ;;  %v5477_v60 = vld [vmem:[%s6947_s30 + $0xa0] sm:$0xff]  }
  0x3c   : > { %5687 = vmatprep.subr.bf16.mxu0 %v6557_v35  ;;  %v7019_v13 = vpack.i.bf16 %v5349_v5, %v5348_v4  ;;  %v7023_v20 = vpack.i.bf16 %v5357_v10, %v5356_v9  ;;  %v7026_v21 = vpack.i.bf16 %v5393_v1, %v5392_v0  ;;  %v5372_v26 = vunpack.c.l.bf16 %v5467_v19  ;;  %v5475_v40 = vld [vmem:[%s6947_s30 + $0x90] sm:$0xff]   ;;  %v5482_v5 = vld [vmem:[%s6947_s30 + $0xc8] sm:$0xff]  }
  0x3d   : > { %5914 = vperm.xlu1 %5907, %v6969_v30   ;;  %v7031_v25 = vpack.i.bf16 %v5365_v17, %v5364_v16  ;;  %v5373_v29 = vunpack.c.h.bf16 %v5467_v19  ;;  %v7035_v32 = vpack.i.bf16 %v5401_v14, %v5400_v12  ;;  %v5408_v33 = vunpack.c.l.bf16 %v5476_v15  ;;  %v5479_v0 = vld [vmem:[%s6947_s30 + $0xb0] sm:$0xff]   ;;  %v6567_v6 = vld [vmem:[%s6942_s11 + $0x48] sm:$0xff]   ;;  %v5481_v12 = vld [vmem:[%s6947_s30 + $0xc0] sm:$0xff]  }
  0x3e   : > { %6016 = vperm.xlu0 %5988, %v6978_v36   ;;  %v5409_v34 = vunpack.c.h.bf16 %v5476_v15  ;;  %v5381_v37 = vunpack.c.h.bf16 %v5469_v22  ;;  %v5388_v38 = vunpack.c.l.bf16 %v5471_v24  ;;  %v5389_v39 = vunpack.c.h.bf16 %v5471_v24  ;;  %v6568_v17 = vld [vmem:[%s6942_s11 + $0x50] sm:$0xff]  }
  0x3f   : > { %5688 = vmatpush3.bf16.msra.mxu0 %v6557_v35  ;;  %v5380_v35 = vunpack.c.l.bf16 %v5469_v22  ;;  %v7040_v41 = vpack.i.bf16 %v5373_v29, %v5372_v26  ;;  %v5397_v45 = vunpack.c.h.bf16 %v5473_v31  ;;  %v5404_v51 = vunpack.c.l.bf16 %v5475_v40  ;;  %v5483_v22 = vld [vmem:[%s6947_s30 + $0xd0] sm:$0xff]  }
  0x40   : > { %v7047_v48 = vpack.i.bf16 %v5389_v39, %v5388_v38  ;;  %v5405_v52 = vunpack.c.h.bf16 %v5475_v40  ;;  %v5416_v56 = vunpack.c.l.bf16 %v5478_v42  ;;  %v5417_v57 = vunpack.c.h.bf16 %v5478_v42  ;;  %v5485_v38 = vld [vmem:[%s6947_s30 + $0xe0] sm:$0xff]   ;;  %v6569_v40 = vld [vmem:[%s6942_s11 + $0x58] sm:$0xff]  }
  0x41   : > { %5919 = vperm.xlu1 %5907, %v6978_v36   ;;  %v7045_v46 = vpack.i.bf16 %v5381_v37, %v5380_v35  ;;  %v5424_v62 = vunpack.c.l.bf16 %v5480_v58  ;;  %v5425_v63 = vunpack.c.h.bf16 %v5480_v58  ;;  %v5412_v2 = vunpack.c.l.bf16 %v5477_v60 }
  0x42   : > { %6026 = vperm.xlu0 %5988, %v6983_v43   ;;  %5690 = vmatmul.mubr.msk.bf16.vlgmr.msra.gmra.mxu0 %vm913_vm1, %v6559_v44  ;;  %v5396_v44 = vunpack.c.l.bf16 %v5473_v31  ;;  %v7058_v61 = vpack.i.bf16 %v5405_v52, %v5404_v51  ;;  %v7064_v1 = vpack.i.bf16 %v5417_v57, %v5416_v56  ;;  %v5413_v4 = vunpack.c.h.bf16 %v5477_v60  ;;  %v6570_v51 = vld [vmem:[%s6942_s11 + $0x60] sm:$0xff]   ;;  %v5487_v57 = vld [vmem:[%s6947_s30 + $0xf0] sm:$0xff]  }
  0x43   : > { %5693 = vmatprep.mubr.msk.bf16.mxu0 %vm913_vm1, %v6560_v49  ;;  %v6565_v49 = vld [vmem:[%s6942_s11 + $0x38] sm:$0xff]   ;;  %v5420_v7 = vunpack.c.l.bf16 %v5479_v0  ;;  %v5421_v9 = vunpack.c.h.bf16 %v5479_v0  ;;  %v7075_v14 = vpack.i.bf16 %v5425_v63, %v5424_v62  ;;  %v5432_v15 = vunpack.c.l.bf16 %v5482_v5 }
  0x44   : > { %v7050_v53 = vpack.i.bf16 %v5397_v45, %v5396_v44  ;;  %v7070_v10 = vpack.i.bf16 %v5413_v4, %v5412_v2  ;;  %v5433_v16 = vunpack.c.h.bf16 %v5482_v5  ;;  %v5429_v24 = vunpack.c.h.bf16 %v5481_v12  ;;  %v6571_v4 = vld [vmem:[%s6942_s11 + $0x68] sm:$0xff]  }
  0x45   : > { %5924 = vperm.xlu1 %5907, %v6983_v43   ;;  %v7078_v19 = vpack.i.bf16 %v5421_v9, %v5420_v7  ;;  %v5436_v35 = vunpack.c.l.bf16 %v5483_v22  ;;  %v5437_v37 = vunpack.c.h.bf16 %v5483_v22  ;;  %v5444_v52 = vunpack.c.l.bf16 %v5485_v38  ;;  %v6573_v9 = vld [vmem:[%s6942_s11 + $0x78] sm:$0xff]   ;;  %v1299_v22 = vld [vmem:[%s9097_s1] sm:$0xff] }
  0x46   : > { %6036 = vperm.xlu0 %5988, %v6993_v50   ;;  %v7084_v26 = vpack.i.bf16 %v5433_v16, %v5432_v15  ;;  %v5445_v56 = vunpack.c.h.bf16 %v5485_v38  ;;  %v5452_v63 = vunpack.c.l.bf16 %v5487_v57  ;;  %v5453_v0 = vunpack.c.h.bf16 %v5487_v57  ;;  %v6576_v15 = vld [vmem:[%s6942_s11 + $0x90] sm:$0xff]   ;;  %v1300_v16 = vld [vmem:[%s9097_s1 + $0x8] sm:$0xff]  ;;  %v6586_v38 = vld [vmem:[%s6942_s11 + $0xe0] sm:$0xff]  }
  0x47   : > { %v7096_v45 = vpack.i.bf16 %v5437_v37, %v5436_v35  ;;  %v6819_v7 = vmov 2   ;;  %5753 = vmatprep.subr.mxu1 %v1300_v16  ;;  %v6584_v35 = vld [vmem:[%s6942_s11 + $0xd0] sm:$0xff]   ;;  %v6585_v37 = vld [vmem:[%s6942_s11 + $0xd8] sm:$0xff]  }
  0x48   : > { %v7106_v62 = vpack.i.bf16 %v5445_v56, %v5444_v52  ;;  %v7114_v5 = vpack.i.bf16 %v5453_v0, %v5452_v63  ;;  %5754 = vmatpush3.msra.mxu1 %v1300_v16  ;;  %v711_v0 = vld [vmem:[%s6937_s15 + $0x170] sm:$0xff] }
  0x49   : > { %5929 = vperm.xlu1 %5907, %v6993_v50   ;;  %5755 = vmatprep.subr.mxu1 %v1299_v22  ;;  %v727_v16 = vld [vmem:[%s6937_s15 + $0x1f0] sm:$0xff] }
  0x4a   : > { %6046 = vperm.xlu0 %5988, %v7000_v55   ;;  %5694 = vmatmul.mubr.msk.bf16.gmra.mxu0 %vm913_vm1, %v6561_v54  ;;  %v7053_v54 = vpack.i.bf16 %v5409_v34, %v5408_v33  ;;  %v5486_v34 = vld [vmem:[%s6947_s30 + $0xe8] sm:$0xff]  }
  0x4b   : > { %5697 = vmatprep.mubr.msk.bf16.mxu0 %vm913_vm1, %v6562_v59  ;;  %v6566_v59 = vld [vmem:[%s6942_s11 + $0x40] sm:$0xff]   ;;  %v5448_v42 = vunpack.c.l.bf16 %v5486_v34  ;;  %v5449_v44 = vunpack.c.h.bf16 %v5486_v34  ;;  %5756 = vmatpush3.msra.mxu1 %v1299_v22  ;;  %v6583_v34 = vld [vmem:[%s6942_s11 + $0xc8] sm:$0xff]  }
  0x4d   : > { %5934 = vperm.xlu1 %5907, %v7000_v55   ;;  %v7104_v58 = vpack.i.bf16 %v5449_v44, %v5448_v42  ;;  %v6588_v42 = vld [vmem:[%s6942_s11 + $0xf0] sm:$0xff]  }
  0x4e   : > { %6056 = vperm.xlu0 %5988, %v7010_v3  }
  0x51   : > { %5939 = vperm.xlu1 %5907, %v7010_v3  }
  0x52   : > { %6066 = vperm.xlu0 %5988, %v7026_v21   ;;  %5698 = vmatmul.mubr.msk.bf16.gmra.mxu0 %vm913_vm1, %v6563_v11  ;;  %v5484_v11 = vld [vmem:[%s6947_s30 + $0xd8] sm:$0xff]  }
  0x53   : > { %5701 = vmatprep.mubr.msk.bf16.mxu0 %vm913_vm1, %v6564_v23  ;;  %v5428_v23 = vunpack.c.l.bf16 %v5481_v12  ;;  %v5440_v29 = vunpack.c.l.bf16 %v5484_v11  ;;  %v5441_v31 = vunpack.c.h.bf16 %v5484_v11  ;;  %v6574_v11 = vld [vmem:[%s6942_s11 + $0x80] sm:$0xff]   ;;  %v6575_v12 = vld [vmem:[%s6942_s11 + $0x88] sm:$0xff]  }
  0x55   : > { %5944 = vperm.xlu1 %5907, %v7026_v21   ;;  %v7086_v33 = vpack.i.bf16 %v5429_v24, %v5428_v23  ;;  %v7093_v39 = vpack.i.bf16 %v5441_v31, %v5440_v29  ;;  %v6579_v23 = vld [vmem:[%s6942_s11 + $0xa8] sm:$0xff]   ;;  %v6580_v24 = vld [vmem:[%s6942_s11 + $0xb0] sm:$0xff]   ;;  %v6581_v29 = vld [vmem:[%s6942_s11 + $0xb8] sm:$0xff]  }
  0x56   : > { %6076 = vperm.xlu0 %5988, %v7035_v32   ;;  %v6582_v31 = vld [vmem:[%s6942_s11 + $0xc0] sm:$0xff]  }
  0x59   : > { %5949 = vperm.xlu1 %5907, %v7035_v32  }
  0x5a   : > { %6086 = vperm.xlu0 %5988, %v7053_v54   ;;  %5702 = vmatmul.mubr.msk.bf16.gmra.mxu0 %vm913_vm1, %v6565_v49  ;;  %v5488_v49 = vld [vmem:[%s6947_s30 + $0xf8] sm:$0xff]  }
  0x5b   : > { %5705 = vmatprep.mubr.msk.bf16.mxu0 %vm913_vm1, %v6566_v59  ;;  %v5456_v59 = vunpack.c.l.bf16 %v5488_v49  ;;  %v5457_v60 = vunpack.c.h.bf16 %v5488_v49 }
  0x5d   : > { %5954 = vperm.xlu1 %5907, %v7053_v54   ;;  %v7111_v2 = vpack.i.bf16 %v5457_v60, %v5456_v59 }
  0x5e   : > { %6096 = vperm.xlu0 %5988, %v7064_v1  }
  0x61   : > { %5959 = vperm.xlu1 %5907, %v7064_v1  }
  0x62   : > { %6106 = vperm.xlu0 %5988, %v7075_v14   ;;  %5706 = vmatmul.mubr.msk.bf16.gmra.mxu0 %vm913_vm1, %v6567_v6  ;;  %v6572_v6 = vld [vmem:[%s6942_s11 + $0x70] sm:$0xff]  }
  0x63   : > { %5709 = vmatprep.mubr.msk.bf16.mxu0 %vm913_vm1, %v6568_v17  ;;  %v6577_v17 = vld [vmem:[%s6942_s11 + $0x98] sm:$0xff]  }
  0x65   : > { %5964 = vperm.xlu1 %5907, %v7075_v14  }
  0x66   : > { %6116 = vperm.xlu0 %5988, %v7084_v26  }
  0x69   : > { %5969 = vperm.xlu1 %5907, %v7084_v26  }
  0x6a   : > { %6126 = vperm.xlu0 %5988, %v7093_v39   ;;  %5710 = vmatmul.mubr.msk.bf16.gmra.mxu0 %vm913_vm1, %v6569_v40  ;;  %v6587_v40 = vld [vmem:[%s6942_s11 + $0xe8] sm:$0xff]  }
  0x6b   : > { %5713 = vmatprep.mubr.msk.bf16.mxu0 %vm913_vm1, %v6570_v51  ;;  %v6589_v51 = vld [vmem:[%s6942_s11 + $0xf8] sm:$0xff]  }
  0x6d   : > { %5974 = vperm.xlu1 %5907, %v7093_v39  }
  0x6e   : > { %6136 = vperm.xlu0 %5988, %v7104_v58  }
  0x71   : > { %5979 = vperm.xlu1 %5907, %v7104_v58  }
  0x72   : > { %6146 = vperm.xlu0 %5988, %v7111_v2   ;;  %5714 = vmatmul.mubr.msk.bf16.gmra.mxu0 %vm913_vm1, %v6571_v4  ;;  %v694_v4 = vld [vmem:[%s6937_s15 + $0xe8] sm:$0xff] }
  0x73   : > { %5717 = vmatprep.mubr.msk.bf16.mxu0 %vm913_vm1, %v6572_v6  ;;  %v3601_v6 = vmul.f32 1.442695, %v694_v4 }
  0x75   : > { %5984 = vperm.xlu1 %5907, %v7111_v2  }
  0x76   : > { %6156 = vset.pattern.permute.xlu0 %v6819_v7 }
  0x77   : > { %6158 = vperm.xlu0 %6156, %v7014_v8  }
  0x79   : > { %5994 = vset.pattern.permute.xlu1 %v6817_v18  ;;  %v6578_v18 = vld [vmem:[%s6942_s11 + $0xa0] sm:$0xff]   ;;  %s6820_s11 = smov 96  }
  0x7a   : > { %5718 = vmatmul.mubr.msk.bf16.gmra.mxu0 %vm913_vm1, %v6573_v9  ;;  %5996 = vperm.xlu1 %5994, %v7014_v8  }
  0x7b   : > { %6173 = vperm.xlu0 %6156, %v7019_v13   ;;  %5721 = vmatprep.mubr.msk.bf16.mxu0 %vm913_vm1, %v6574_v11 }
  0x7e   : > { %6001 = vperm.xlu1 %5994, %v6986_v47  }
  0x7f   : > { %6183 = vperm.xlu0 %6156, %v7023_v20  }
  0x82   : > { %5722 = vmatmul.mubr.msk.bf16.gmra.mxu0 %vm913_vm1, %v6575_v12  ;;  %6011 = vperm.xlu1 %5994, %v7019_v13   ;;  %v678_v12 = vld [vmem:[%s6937_s15 + $0x68] sm:$0xff] }
  0x83   : > { %6193 = vperm.xlu0 %6156, %v7031_v25   ;;  %5725 = vmatprep.mubr.msk.bf16.mxu0 %vm913_vm1, %v6576_v15 }
  0x86   : > { %6021 = vperm.xlu1 %5994, %v7023_v20  }
  0x87   : > { %6203 = vperm.xlu0 %6156, %v7040_v41  }
  0x8a   : > { %5726 = vmatmul.mubr.msk.bf16.gmra.mxu0 %vm913_vm1, %v6577_v17  ;;  %6031 = vperm.xlu1 %5994, %v7031_v25  }
  0x8b   : > { %6213 = vperm.xlu0 %6156, %v7045_v46   ;;  %5729 = vmatprep.mubr.msk.bf16.mxu0 %vm913_vm1, %v6578_v18  ;;  %v710_v18 = vld [vmem:[%s6937_s15 + $0x168] sm:$0xff] }
  0x8e   : > { %6041 = vperm.xlu1 %5994, %v7040_v41  }
  0x8f   : > { %6223 = vperm.xlu0 %6156, %v7047_v48  }
  0x92   : > { %5730 = vmatmul.mubr.msk.bf16.gmra.mxu0 %vm913_vm1, %v6579_v23  ;;  %6051 = vperm.xlu1 %5994, %v7045_v46   ;;  %v3633_v23 = vmul.f32 1.442695, %v710_v18 }
  0x93   : > { %6233 = vperm.xlu0 %6156, %v7050_v53   ;;  %5733 = vmatprep.mubr.msk.bf16.mxu0 %vm913_vm1, %v6580_v24  ;;  %v728_v24 = vld [vmem:[%s6937_s15 + $0x1f8] sm:$0xff] }
  0x96   : > { %6061 = vperm.xlu1 %5994, %v7047_v48  }
  0x97   : > { %6243 = vperm.xlu0 %6156, %v7058_v61  }
  0x9a   : > { %5734 = vmatmul.mubr.msk.bf16.gmra.mxu0 %vm913_vm1, %v6581_v29  ;;  %6071 = vperm.xlu1 %5994, %v7050_v53  }
  0x9b   : > { %6253 = vperm.xlu0 %6156, %v7070_v10   ;;  %5737 = vmatprep.mubr.msk.bf16.mxu0 %vm913_vm1, %v6582_v31  ;;  %v692_v31 = vld [vmem:[%s6937_s15 + $0xd8] sm:$0xff] }
  0x9e   : > { %6081 = vperm.xlu1 %5994, %v7058_v61  }
  0x9f   : > { %6263 = vperm.xlu0 %6156, %v7078_v19  }
  0xa2   : > { %5738 = vmatmul.mubr.msk.bf16.gmra.mxu0 %vm913_vm1, %v6583_v34  ;;  %6091 = vperm.xlu1 %5994, %v7070_v10  }
  0xa3   : > { %6273 = vperm.xlu0 %6156, %v7086_v33   ;;  %5741 = vmatprep.mubr.msk.bf16.mxu0 %vm913_vm1, %v6584_v35 }
  0xa6   : > { %6101 = vperm.xlu1 %5994, %v7078_v19  }
  0xa7   : > { %6283 = vperm.xlu0 %6156, %v7096_v45  }
  0xaa   : > { %5742 = vmatmul.mubr.msk.bf16.gmra.mxu0 %vm913_vm1, %v6585_v37  ;;  %6111 = vperm.xlu1 %5994, %v7086_v33   ;;  %v3597_v37 = vmul.f32 1.442695, %v692_v31  ;;  %v725_v31 = vld [vmem:[%s6937_s15 + $0x1e0] sm:$0xff] }
  0xab   : > { %6293 = vperm.xlu0 %6156, %v7106_v62   ;;  %5745 = vmatprep.mubr.msk.bf16.mxu0 %vm913_vm1, %v6586_v38  ;;  %v680_v38 = vld [vmem:[%s6937_s15 + $0x78] sm:$0xff] }
  0xae   : > { %6121 = vperm.xlu1 %5994, %v7096_v45  }
  0xaf   : > { %6303 = vperm.xlu0 %6156, %v7114_v5  }
  0xb1   : > { %v7189_v44 = vpop.permute.xlu0 %5990 }
  0xb2   : > { %5746 = vmatmul.mubr.msk.bf16.gmra.mxu0 %vm913_vm1, %v6587_v40  ;;  %6131 = vperm.xlu1 %5994, %v7106_v62  }
  0xb3   : > { %6307 = vset.pattern.permute.xlu0 %v6818_v27  ;;  %5749 = vmatprep.mubr.msk.bf16.mxu0 %vm913_vm1, %v6588_v42  ;;  %v724_v42 = vld [vmem:[%s6937_s15 + $0x1d8] sm:$0xff] }
  0xb4   : > { %6309 = vperm.xlu0 %6307, %v6963_v28   ;;  %v7205_v56 = vpop.permute.xlu1 %5909 }
  0xb5   : > { %v7196_v49 = vpop.permute.xlu0 %6006  ;;  %9232 = vst [vmem:[#allocation4_spill] sm:$0xff] %v7205_v56 }
  0xb6   : > { %6141 = vperm.xlu1 %5994, %v7114_v5  }
  0xb8   : > { %6314 = vperm.xlu0 %6307, %v7014_v8   ;;  %v7211_v59 = vpop.permute.xlu1 %5914 }
  0xb9   : > { %v7201_v52 = vpop.permute.xlu0 %6016 }
  0xba   : > { %5750 = vmatmul.mubr.msk.bf16.gmra.mxu0 %vm913_vm1, %v6589_v51  ;;  %6150 = vset.pattern.permute.xlu1 %v6819_v7 }
  0xbb   : > { %6152 = vperm.xlu1 %6150, %v6963_v28  }
  0xbc   : > { %6319 = vperm.xlu0 %6307, %v7019_v13   ;;  %v7216_v8 = vpop.permute.xlu1 %5919 }
  0xbd   : > { %v7209_v57 = vpop.permute.xlu0 %6026 }
  0xbf   : > { %6163 = vperm.xlu1 %6150, %v6986_v47  }
  0xc0   : > { %6324 = vperm.xlu0 %6307, %v7023_v20   ;;  %v7222_v13 = vpop.permute.xlu1 %5924 }
  0xc1   : > { %v7219_v60 = vpop.permute.xlu0 %6036 }
  0xc3   : > { %6168 = vperm.xlu1 %6150, %v6969_v30  }
  0xc4   : > { %6329 = vperm.xlu0 %6307, %v7031_v25   ;;  %v7228_v20 = vpop.permute.xlu1 %5929 }
  0xc5   : > { %v7226_v63 = vpop.permute.xlu0 %6046  ;;  %9233 = vst [vmem:[#allocation5_spill] sm:$0xff] %v7228_v20 }
  0xc7   : > { %6178 = vperm.xlu1 %6150, %v6978_v36  }
  0xc8   : > { %6334 = vperm.xlu0 %6307, %v7040_v41   ;;  %v7232_v28 = vpop.permute.xlu1 %5934 }
  0xc9   : > { %9234 = vst [vmem:[#allocation6_spill] sm:$0xff] %v7232_v28  ;;  %v7235_v47 = vpop.permute.xlu0 %6056 }
  0xcb   : > { %6188 = vperm.xlu1 %6150, %v6983_v43  }
  0xcc   : > { %6339 = vperm.xlu0 %6307, %v7045_v46   ;;  %v7238_v25 = vpop.permute.xlu1 %5939  ;;  %v696_v46 = vld [vmem:[%s6937_s15 + $0xf8] sm:$0xff] }
  0xcd   : > { %9235 = vst [vmem:[#allocation7_spill] sm:$0xff] %v7238_v25  ;;  %v7242_v30 = vpop.permute.xlu0 %6066 }
  0xcf   : > { %6198 = vperm.xlu1 %6150, %v6993_v50   ;;  %v3605_v50 = vmul.f32 1.442695, %v696_v46  ;;  %v3661_v46 = vmul.f32 1.442695, %v724_v42 }
  0xd0   : > { %6344 = vperm.xlu0 %6307, %v7047_v48   ;;  %v7244_v41 = vpop.permute.xlu1 %5944 }
  0xd1   : > { %9236 = vst [vmem:[#allocation8_spill] sm:$0xff] %v7244_v41  ;;  %v7251_v43 = vpop.permute.xlu0 %6076  ;;  %6614 = vpow2.f32 %v3605_v50  ;;  %v712_v50 = vld [vmem:[%s6937_s15 + $0x178] sm:$0xff] }
  0xd3   : > { %6208 = vperm.xlu1 %6150, %v7000_v55  }
  0xd4   : > { %6349 = vperm.xlu0 %6307, %v7050_v53   ;;  %v7248_v36 = vpop.permute.xlu1 %5949  ;;  %v679_v53 = vld [vmem:[%s6937_s15 + $0x70] sm:$0xff] }
  0xd5   : > { %9237 = vst [vmem:[#allocation9_spill] sm:$0xff] %v7248_v36  ;;  %v7260_v55 = vpop.permute.xlu0 %6086  ;;  %v719_v36 = vld [vmem:[%s6937_s15 + $0x1b0] sm:$0xff] }
  0xd7   : > { %6218 = vperm.xlu1 %6150, %v7010_v3  }
  0xd8   : > { %6354 = vperm.xlu0 %6307, %v7058_v61   ;;  %v7255_v48 = vpop.permute.xlu1 %5954 }
  0xd9   : > { %9238 = vst [vmem:[#allocation10_spill] sm:$0xff] %v7255_v48 }
  0xdb   : > { %6228 = vperm.xlu1 %6150, %v7026_v21   ;;  %v7270_v21 = vpop.permute.xlu0 %6096 }
  0xdc   : > { %6359 = vperm.xlu0 %6307, %v7070_v10   ;;  %v7262_v61 = vpop.permute.xlu1 %5959  ;;  %v3571_v10 = vmul.f32 1.442695, %v679_v53 }
  0xdd   : > { %9239 = vst [vmem:[#allocation11_spill] sm:$0xff] %v7262_v61 }
  0xde   : > { %6616 = vpow2.f32 %v3571_v10  ;;  %v7285_v11 = vpop.eup %6614 }
  0xdf   : > { %6238 = vperm.xlu1 %6150, %v7035_v32   ;;  %v726_v32 = vld [vmem:[%s6937_s15 + $0x1e8] sm:$0xff]  ;;  %9244 = vst [vmem:[#allocation16_spill] sm:$0xff] %v7285_v11 }
  0xe0   : > { %6364 = vperm.xlu0 %6307, %v7078_v19   ;;  %v7267_v3 = vpop.permute.xlu1 %5964  ;;  %v3635_v19 = vmul.f32 1.442695, %v711_v0  ;;  %v3665_v9 = vmul.f32 1.442695, %v726_v32  ;;  %v676_v0 = vld [vmem:[%s6937_s15 + $0x58] sm:$0xff] }
  0xe1   : > { %9240 = vst [vmem:[#allocation12_spill] sm:$0xff] %v7267_v3 }
  0xe2   : > { %6618 = vpow2.f32 %v3635_v19 }
  0xe3   : > { %6248 = vperm.xlu1 %6150, %v7053_v54   ;;  %6620 = vpow2.f32 %v3601_v6  ;;  %v695_v54 = vld [vmem:[%s6937_s15 + $0xf0] sm:$0xff] }
  0xe4   : > { %6369 = vperm.xlu0 %6307, %v7086_v33   ;;  %v7274_v33 = vpop.permute.xlu1 %5969  ;;  %v3603_v15 = vmul.f32 1.442695, %v695_v54  ;;  %6622 = vpow2.f32 %v3665_v9  ;;  %v3565_v9 = vmul.f32 1.442695, %v676_v0  ;;  %v693_v54 = vld [vmem:[%s6937_s15 + $0xe0] sm:$0xff] }
  0xe5   : > { %9241 = vst [vmem:[#allocation13_spill] sm:$0xff] %v7274_v33  ;;  %v677_v0 = vld [vmem:[%s6937_s15 + $0x60] sm:$0xff] }
  0xe6   : > { %6624 = vpow2.f32 %v3603_v15  ;;  %v708_v15 = vld [vmem:[%s6937_s15 + $0x158] sm:$0xff] }
  0xe7   : > { %6258 = vperm.xlu1 %6150, %v7064_v1   ;;  %v3569_v1 = vmul.f32 1.442695, %v678_v12 }
  0xe8   : > { %6374 = vperm.xlu0 %6307, %v7096_v45   ;;  %v7279_v45 = vpop.permute.xlu0 %6106  ;;  %v7281_v7 = vpop.permute.xlu1 %5974 }
  0xe9   : > { %9242 = vst [vmem:[#allocation14_spill] sm:$0xff] %v7279_v45  ;;  %9243 = vst [vmem:[#allocation15_spill] sm:$0xff] %v7281_v7  ;;  %6626 = vpow2.f32 %v3569_v1 }
  0xeb   : > { %6268 = vperm.xlu1 %6150, %v7075_v14   ;;  %v7293_v17 = vpop.eup %6616  ;;  %v3667_v14 = vmul.f32 1.442695, %v727_v16  ;;  %v3599_v16 = vmul.f32 1.442695, %v693_v54  ;;  %v3567_v54 = vmul.f32 1.442695, %v677_v0 }
  0xec   : > { %6379 = vperm.xlu0 %6307, %v7106_v62   ;;  %v7289_v62 = vpop.permute.xlu1 %5979  ;;  %9246 = vst [vmem:[#allocation18_spill] sm:$0xff] %v7293_v17 }
  0xed   : > { %9245 = vst [vmem:[#allocation17_spill] sm:$0xff] %v7289_v62  ;;  %6628 = vpow2.f32 %v3667_v14 }
  0xee   : > { %6630 = vpow2.f32 %v3633_v23 }
  0xef   : > { %6278 = vperm.xlu1 %6150, %v7084_v26   ;;  %v7303_v29 = vpop.eup %6618  ;;  %v3669_v26 = vmul.f32 1.442695, %v728_v24  ;;  %v3629_v24 = vmul.f32 1.442695, %v708_v15 }
  0xf0   : > { %6384 = vperm.xlu0 %6307, %v7114_v5   ;;  %v7295_v5 = vpop.permute.xlu0 %6116  ;;  %v7299_v22 = vpop.permute.xlu1 %5984  ;;  %9249 = vst [vmem:[#allocation21_spill] sm:$0xff] %v7303_v29 }
  0xf1   : > { %9247 = vst [vmem:[#allocation19_spill] sm:$0xff] %v7295_v5  ;;  %9248 = vst [vmem:[#allocation20_spill] sm:$0xff] %v7299_v22  ;;  %v7313_v40 = vpop.eup %6620  ;;  %6632 = vpow2.f32 %v3669_v26 }
  0xf2   : > { %9251 = vst [vmem:[#allocation23_spill] sm:$0xff] %v7313_v40  ;;  %6634 = vpow2.f32 %v3597_v37  ;;  %v7321_v53 = vpop.eup %6622 }
  0xf3   : > { %6288 = vperm.xlu1 %6150, %v7093_v39   ;;  %v3573_v39 = vmul.f32 1.442695, %v680_v38  ;;  %9252 = vst [vmem:[#allocation24_spill] sm:$0xff] %v7321_v53  ;;  %v7327_v4 = vpop.eup %6624  ;;  %v3663_v38 = vmul.f32 1.442695, %v725_v31  ;;  %v709_v31 = vld [vmem:[%s6937_s15 + $0x160] sm:$0xff] }
  0xf4   : > { %3828 = vperm.xlu0 %6307, %v7285_v11   ;;  %v7307_v34 = vpop.permute.xlu0 %6126  ;;  %9254 = vst [vmem:[#allocation26_spill] sm:$0xff] %v7327_v4 }
  0xf5   : > { %9250 = vst [vmem:[#allocation22_spill] sm:$0xff] %v7307_v34  ;;  %v7310_v35 = vpop.permute.xlu1 %5996  ;;  %6636 = vpow2.f32 %v3573_v39 }
  0xf6   : > { %6638 = vpow2.f32 %v3661_v46  ;;  %v7333_v12 = vpop.eup %6626 }
  0xf7   : > { %6298 = vperm.xlu1 %6150, %v7104_v58   ;;  %v3637_v58 = vmul.f32 1.442695, %v712_v50  ;;  %9255 = vst [vmem:[#allocation27_spill] sm:$0xff] %v7333_v12 }
  0xf8   : > { %3743 = vperm.xlu0 %6307, %v7293_v17   ;;  %v7323_v10 = vpop.permute.xlu0 %6136 }
  0xf9   : > { %v7318_v51 = vpop.permute.xlu1 %6001  ;;  %9253 = vst [vmem:[#allocation25_spill] sm:$0xff] %v7323_v10  ;;  %6640 = vpow2.f32 %v3637_v58 }
  0xfa   : > { %v7341_v18 = vpop.eup %6628  ;;  %6642 = vpow2.f32 %v3565_v9 }
  0xfb   : > { %6389 = vperm.xlu1 %6150, %v7111_v2   ;;  %9257 = vst [vmem:[#allocation29_spill] sm:$0xff] %v7341_v18  ;;  %v7347_v26 = vpop.eup %6630  ;;  %6644 = vpow2.f32 %v3599_v16 }
  0xfc   : > { %3903 = vperm.xlu0 %6307, %v7303_v29   ;;  %v7338_v1 = vpop.permute.xlu0 %6146  ;;  %9258 = vst [vmem:[#allocation30_spill] sm:$0xff] %v7347_v26  ;;  %6646 = vpow2.f32 %v3629_v24 }
  0xfd   : > { %v7330_v32 = vpop.permute.xlu1 %6011  ;;  %9256 = vst [vmem:[#allocation28_spill] sm:$0xff] %v7338_v1  ;;  %6648 = vpow2.f32 %v3663_v38 }
  0xfe   : > { %v7353_v42 = vpop.eup %6632 }
  0xff   : > { %6393 = vset.pattern.permute.xlu1 %v6818_v27  ;;  %v690_v27 = vld [vmem:[%s6937_s15 + $0xc8] sm:$0xff]  ;;  %9259 = vst [vmem:[#allocation31_spill] sm:$0xff] %v7353_v42  ;;  %v7359_v58 = vpop.eup %6634 }
 0x100   : > { %3818 = vperm.xlu0 %6307, %v7313_v40   ;;  %3823 = vperm.xlu1 %6393, %v7327_v4   ;;  %v3593_v50 = vmul.f32 1.442695, %v690_v27  ;;  %9260 = vst [vmem:[#allocation32_spill] sm:$0xff] %v7359_v58  ;;  %v674_v27 = vld [vmem:[%s6937_s15 + $0x48] sm:$0xff]  ;;  %v707_v40 = vld [vmem:[%s6937_s15 + $0x150] sm:$0xff]  ;;  %v721_v4 = vld [vmem:[%s6937_s15 + $0x1c0] sm:$0xff] }
 0x101   : > { %v7344_v23 = vpop.permute.xlu1 %6021 }
 0x102   : > { %v5691_v19 = vpop.f32.mrf.mxu0  ;;  %v7367_v15 = vpop.eup %6636  ;;  %6650 = vpow2.f32 %v3593_v50  ;;  %v3631_v50 = vmul.f32 1.442695, %v709_v31 }
 0x103   : > { %9261 = vst [vmem:[#allocation33_spill] sm:$0xff] %v7367_v15  ;;  %6652 = vpow2.f32 %v3567_v54 }
 0x104   : > { %3978 = vperm.xlu0 %6307, %v7321_v53   ;;  %v1044_v6 = vpop.f32.mrf.mxu0  ;;  %3983 = vperm.xlu1 %6393, %v7341_v18   ;;  %v691_v53 = vld [vmem:[%s6937_s15 + $0xd0] sm:$0xff] }
 0x105   : > { %5757 = vmatprep.mubr.msk.f32.mxu1 %vm1301_vm2, %v1044_v6  ;;  %v7356_v46 = vpop.permute.xlu1 %6031  ;;  %v7361_v6 = vpop.permute.xlu0 %6158  ;;  %v3595_v54 = vmul.f32 1.442695, %v691_v53 }
 0x106   : > { %v5692_v2 = vpop.f32.mrf.mxu0 }
 0x108   : > { %3738 = vperm.xlu0 %6307, %v7333_v12   ;;  %v1047_v14 = vpop.f32.mrf.mxu0  ;;  %3988 = vperm.xlu1 %6393, %v7353_v42  }
 0x109   : > { %5758 = vmatmul.mubr.msk.f32.vlgmr.msra.gmra.mxu1 %vm1301_vm2, %v1047_v14  ;;  %v7370_v14 = vpop.permute.xlu1 %6041  ;;  %v7378_v38 = vpop.permute.xlu0 %6173 }
 0x10a   : > { %v5695_v37 = vpop.f32.mrf.mxu0  ;;  %5760 = vmatprep.mubr.msk.f32.mxu1 %vm1301_vm2, %v5691_v19  ;;  %v722_v19 = vld [vmem:[%s6937_s15 + $0x1c8] sm:$0xff] }
 0x10b   : > { %v3657_v24 = vmul.f32 1.442695, %v722_v19 }
 0x10c   : > { %3898 = vperm.xlu0 %6307, %v7347_v26   ;;  %v1060_v39 = vpop.f32.mrf.mxu0  ;;  %3748 = vperm.xlu1 %6393, %v7367_v15  }
 0x10d   : > { %5761 = vmatmul.mubr.msk.f32.gmra.mxu1 %vm1301_vm2, %v5692_v2  ;;  %v7373_v2 = vpop.eup %6638  ;;  %6654 = vpow2.f32 %v3657_v24  ;;  %v7384_v26 = vpop.permute.xlu1 %6051 }
 0x10e   : > { %v5696_v9 = vpop.f32.mrf.mxu0  ;;  %5763 = vmatprep.mubr.msk.f32.mxu1 %vm1301_vm2, %v1060_v39  ;;  %9262 = vst [vmem:[#allocation34_spill] sm:$0xff] %v7373_v2  ;;  %v7381_v0 = vpop.eup %6640  ;;  %6656 = vpow2.f32 %v3631_v50 }
 0x10f   : > { %9263 = vst [vmem:[#allocation35_spill] sm:$0xff] %v7381_v0  ;;  %v7387_v42 = vpop.eup %6642 }
 0x110   : > { %3808 = vperm.xlu0 %6307, %v7359_v58   ;;  %v1063_v16 = vpop.f32.mrf.mxu0  ;;  %9264 = vst [vmem:[#allocation36_spill] sm:$0xff] %v7387_v42  ;;  %3908 = vperm.xlu1 %6393, %v7381_v0   ;;  %v7393_v31 = vpop.eup %6644  ;;  %v675_v58 = vld [vmem:[%s6937_s15 + $0x50] sm:$0xff] }
 0x111   : > { %5764 = vmatmul.mubr.msk.f32.gmra.mxu1 %vm1301_vm2, %v1063_v16  ;;  %v3561_v16 = vmul.f32 1.442695, %v674_v27  ;;  %9265 = vst [vmem:[#allocation37_spill] sm:$0xff] %v7393_v31  ;;  %v7397_v29 = vpop.eup %6646  ;;  %v7404_v53 = vpop.permute.xlu1 %6061 }
 0x112   : > { %v5699_v39 = vpop.f32.mrf.mxu0  ;;  %5766 = vmatprep.mubr.msk.f32.mxu1 %vm1301_vm2, %v5695_v37  ;;  %v706_v37 = vld [vmem:[%s6937_s15 + $0x148] sm:$0xff]  ;;  %9266 = vst [vmem:[#allocation38_spill] sm:$0xff] %v7397_v29 }
 0x113   : > { %6658 = vpow2.f32 %v3561_v16  ;;  %v3625_v27 = vmul.f32 1.442695, %v706_v37  ;;  %v7407_v16 = vpop.eup %6648 }
 0x114   : > { %3968 = vperm.xlu0 %6307, %v7373_v2   ;;  %v1076_v19 = vpop.f32.mrf.mxu0  ;;  %v723_v2 = vld [vmem:[%s6937_s15 + $0x1d0] sm:$0xff]  ;;  %3813 = vperm.xlu1 %6393, %v7393_v31   ;;  %6660 = vpow2.f32 %v3595_v54  ;;  %9267 = vst [vmem:[#allocation39_spill] sm:$0xff] %v7407_v16 }
 0x115   : > { %5767 = vmatmul.mubr.msk.f32.gmra.mxu1 %vm1301_vm2, %v5696_v9  ;;  %v7399_v9 = vpop.permute.xlu0 %6183  ;;  %v3659_v50 = vmul.f32 1.442695, %v723_v2  ;;  %6662 = vpow2.f32 %v3625_v27  ;;  %v3563_v2 = vmul.f32 1.442695, %v675_v58  ;;  %v3627_v58 = vmul.f32 1.442695, %v707_v40 }
 0x116   : > { %v5700_v18 = vpop.f32.mrf.mxu0  ;;  %5769 = vmatprep.mubr.msk.f32.mxu1 %vm1301_vm2, %v1076_v19  ;;  %v688_v19 = vld [vmem:[%s6937_s15 + $0xb8] sm:$0xff] }
 0x117   : > { %6664 = vpow2.f32 %v3659_v50 }
 0x118   : > { %3728 = vperm.xlu0 %6307, %v7387_v42   ;;  %v1079_v24 = vpop.f32.mrf.mxu0  ;;  %v3589_v42 = vmul.f32 1.442695, %v688_v19  ;;  %3973 = vperm.xlu1 %6393, %v7407_v16   ;;  %v7422_v19 = vpop.permute.xlu1 %6071 }
 0x119   : > { %5770 = vmatmul.mubr.msk.f32.gmra.mxu1 %vm1301_vm2, %v1079_v24  ;;  %v7411_v24 = vpop.eup %6650  ;;  %v7416_v54 = vpop.permute.xlu0 %6193 }
 0x11a   : > { %v5703_v0 = vpop.f32.mrf.mxu0  ;;  %5772 = vmatprep.mubr.msk.f32.mxu1 %vm1301_vm2, %v5699_v39  ;;  %9268 = vst [vmem:[#allocation40_spill] sm:$0xff] %v7411_v24  ;;  %v720_v39 = vld [vmem:[%s6937_s15 + $0x1b8] sm:$0xff]  ;;  %6666 = vpow2.f32 %v3589_v42 }
 0x11b   : > { %6668 = vpow2.f32 %v3563_v2 }
 0x11c   : > { %3888 = vperm.xlu0 %6307, %v7397_v29   ;;  %v1092_v37 = vpop.f32.mrf.mxu0  ;;  %v7419_v29 = vpop.eup %6652 }
 0x11d   : > { %5773 = vmatmul.mubr.msk.f32.gmra.mxu1 %vm1301_vm2, %v5700_v18  ;;  %9269 = vst [vmem:[#allocation41_spill] sm:$0xff] %v7419_v29  ;;  %v3653_v18 = vmul.f32 1.442695, %v720_v39  ;;  %v7425_v31 = vpop.eup %6654  ;;  %3733 = vperm.xlu1 %6393, %v7419_v29   ;;  %v7442_v40 = vpop.permute.xlu1 %6081 }
 0x11e   : > { %v5704_v12 = vpop.f32.mrf.mxu0  ;;  %5775 = vmatprep.mubr.msk.f32.mxu1 %vm1301_vm2, %v1092_v37  ;;  %9270 = vst [vmem:[#allocation42_spill] sm:$0xff] %v7425_v31  ;;  %v672_v37 = vld [vmem:[%s6937_s15 + $0x38] sm:$0xff]  ;;  %v7431_v50 = vpop.eup %6656 }
 0x11f   : > { %9271 = vst [vmem:[#allocation43_spill] sm:$0xff] %v7431_v50  ;;  %6670 = vpow2.f32 %v3653_v18  ;;  %v3557_v39 = vmul.f32 1.442695, %v672_v37 }
 0x120   : > { %3798 = vperm.xlu0 %6307, %v7411_v24   ;;  %v1095_v27 = vpop.f32.mrf.mxu0  ;;  %v689_v24 = vld [vmem:[%s6937_s15 + $0xc0] sm:$0xff]  ;;  %v7435_v11 = vpop.eup %6658  ;;  %6672 = vpow2.f32 %v3627_v58 }
 0x121   : > { %5776 = vmatmul.mubr.msk.f32.gmra.mxu1 %vm1301_vm2, %v1095_v27  ;;  %9272 = vst [vmem:[#allocation44_spill] sm:$0xff] %v7435_v11  ;;  %v7437_v27 = vpop.permute.xlu0 %6203  ;;  %3893 = vperm.xlu1 %6393, %v7431_v50   ;;  %v3591_v2 = vmul.f32 1.442695, %v689_v24  ;;  %v7445_v18 = vpop.eup %6660  ;;  %6674 = vpow2.f32 %v3557_v39  ;;  %v3655_v24 = vmul.f32 1.442695, %v721_v4 }
 0x122   : > { %v5707_v16 = vpop.f32.mrf.mxu0  ;;  %5778 = vmatprep.mubr.msk.f32.mxu1 %vm1301_vm2, %v5703_v0  ;;  %v704_v0 = vld [vmem:[%s6937_s15 + $0x138] sm:$0xff]  ;;  %9273 = vst [vmem:[#allocation45_spill] sm:$0xff] %v7445_v18 }
 0x123   : > { %6676 = vpow2.f32 %v3591_v2 }
 0x124   : > { %3958 = vperm.xlu0 %6307, %v7425_v31   ;;  %v1108_v42 = vpop.f32.mrf.mxu0  ;;  %v3621_v31 = vmul.f32 1.442695, %v704_v0  ;;  %v7460_v0 = vpop.permute.xlu1 %6091 }
 0x125   : > { %5779 = vmatmul.mubr.msk.f32.gmra.mxu1 %vm1301_vm2, %v5704_v12  ;;  %v7449_v12 = vpop.eup %6662  ;;  %v7454_v50 = vpop.permute.xlu0 %6213  ;;  %3803 = vperm.xlu1 %6393, %v7445_v18  }
 0x126   : > { %v5708_v29 = vpop.f32.mrf.mxu0  ;;  %5781 = vmatprep.mubr.msk.f32.mxu1 %vm1301_vm2, %v1108_v42  ;;  %9274 = vst [vmem:[#allocation46_spill] sm:$0xff] %v7449_v12  ;;  %v686_v42 = vld [vmem:[%s6937_s15 + $0xa8] sm:$0xff]  ;;  %v7457_v58 = vpop.eup %6664  ;;  %6678 = vpow2.f32 %v3621_v31  ;;  %v705_v31 = vld [vmem:[%s6937_s15 + $0x140] sm:$0xff] }
 0x127   : > { %9275 = vst [vmem:[#allocation47_spill] sm:$0xff] %v7457_v58  ;;  %v7463_v15 = vpop.eup %6666  ;;  %6680 = vpow2.f32 %v3655_v24 }
 0x128   : > { %3718 = vperm.xlu0 %6307, %v7435_v11   ;;  %v1111_v37 = vpop.f32.mrf.mxu0  ;;  %v673_v11 = vld [vmem:[%s6937_s15 + $0x40] sm:$0xff]  ;;  %9276 = vst [vmem:[#allocation48_spill] sm:$0xff] %v7463_v15  ;;  %v7468_v2 = vpop.eup %6668 }
 0x129   : > { %5782 = vmatmul.mubr.msk.f32.gmra.mxu1 %vm1301_vm2, %v1111_v37  ;;  %v3585_v37 = vmul.f32 1.442695, %v686_v42  ;;  %3963 = vperm.xlu1 %6393, %v7457_v58   ;;  %v3559_v4 = vmul.f32 1.442695, %v673_v11  ;;  %9277 = vst [vmem:[#allocation49_spill] sm:$0xff] %v7468_v2  ;;  %v7474_v18 = vpop.permute.xlu0 %6223  ;;  %v687_v58 = vld [vmem:[%s6937_s15 + $0xb0] sm:$0xff] }
 0x12a   : > { %v5711_v17 = vpop.f32.mrf.mxu0  ;;  %5784 = vmatprep.mubr.msk.f32.mxu1 %vm1301_vm2, %v5707_v16  ;;  %v3623_v11 = vmul.f32 1.442695, %v705_v31 }
 0x12b   : > { %6682 = vpow2.f32 %v3585_v37 }
 0x12c   : > { %3878 = vperm.xlu0 %6307, %v7449_v12   ;;  %v1124_v39 = vpop.f32.mrf.mxu0  ;;  %v7472_v42 = vpop.eup %6670  ;;  %6684 = vpow2.f32 %v3559_v4  ;;  %v3587_v4 = vmul.f32 1.442695, %v687_v58  ;;  %v3651_v58 = vmul.f32 1.442695, %v719_v36 }
 0x12d   : > { %5785 = vmatmul.mubr.msk.f32.gmra.mxu1 %vm1301_vm2, %v5708_v29  ;;  %9278 = vst [vmem:[#allocation50_spill] sm:$0xff] %v7472_v42  ;;  %3723 = vperm.xlu1 %6393, %v7468_v2   ;;  %v7481_v24 = vpop.eup %6672  ;;  %6686 = vpow2.f32 %v3623_v11 }
 0x12e   : > { %v5712_v16 = vpop.f32.mrf.mxu0  ;;  %5787 = vmatprep.mubr.msk.f32.mxu1 %vm1301_vm2, %v1124_v39  ;;  %v7478_v39 = vpop.permute.xlu1 %6101  ;;  %9279 = vst [vmem:[#allocation51_spill] sm:$0xff] %v7481_v24  ;;  %6688 = vpow2.f32 %v3587_v4 }
 0x12f   : > { %6690 = vpow2.f32 %v3651_v58 }
 0x130   : > { %3788 = vperm.xlu0 %6307, %v7463_v15   ;;  %v1127_v12 = vpop.f32.mrf.mxu0  ;;  %v7485_v15 = vpop.eup %6674 }
 0x131   : > { %5788 = vmatmul.mubr.msk.f32.gmra.mxu1 %vm1301_vm2, %v1127_v12  ;;  %9280 = vst [vmem:[#allocation52_spill] sm:$0xff] %v7485_v15  ;;  %3883 = vperm.xlu1 %6393, %v7481_v24   ;;  %v7492_v31 = vpop.eup %6676  ;;  %v671_v24 = vld [vmem:[%s6937_s15 + $0x30] sm:$0xff] }
 0x132   : > { %v5715_v29 = vpop.f32.mrf.mxu0  ;;  %5790 = vmatprep.mubr.msk.f32.mxu1 %vm1301_vm2, %v5711_v17  ;;  %v7489_v17 = vpop.permute.xlu0 %6233  ;;  %9281 = vst [vmem:[#allocation53_spill] sm:$0xff] %v7492_v31  ;;  %v3555_v36 = vmul.f32 1.442695, %v671_v24 }
 0x133   : > { %v7495_v2 = vpop.permute.xlu1 %6111  ;;  %v7498_v20 = vpop.eup %6678 }
 0x134   : > { %3948 = vperm.xlu0 %6307, %v7472_v42   ;;  %v1140_v37 = vpop.f32.mrf.mxu0  ;;  %9282 = vst [vmem:[#allocation54_spill] sm:$0xff] %v7495_v2  ;;  %9283 = vst [vmem:[#allocation55_spill] sm:$0xff] %v7498_v20  ;;  %v7503_v11 = vpop.eup %6680  ;;  %6692 = vpow2.f32 %v3555_v36  ;;  %v717_v36 = vld [vmem:[%s6937_s15 + $0x1a0] sm:$0xff] }
 0x135   : > { %5791 = vmatmul.mubr.msk.f32.gmra.mxu1 %vm1301_vm2, %v5712_v16  ;;  %3793 = vperm.xlu1 %6393, %v7492_v31   ;;  %9284 = vst [vmem:[#allocation56_spill] sm:$0xff] %v7503_v11 }
 0x136   : > { %v5716_v12 = vpop.f32.mrf.mxu0  ;;  %5793 = vmatprep.mubr.msk.f32.mxu1 %vm1301_vm2, %v1140_v37  ;;  %v7509_v56 = vpop.permute.xlu0 %6243 }
 0x137   : > { %v7512_v22 = vpop.permute.xlu1 %6121 }
 0x138   : > { %3708 = vperm.xlu0 %6307, %v7485_v15   ;;  %v1143_v42 = vpop.f32.mrf.mxu0  ;;  %v7507_v15 = vpop.eup %6682  ;;  %9286 = vst [vmem:[#allocation58_spill] sm:$0xff] %v7512_v22 }
 0x139   : > { %5794 = vmatmul.mubr.msk.f32.gmra.mxu1 %vm1301_vm2, %v1143_v42  ;;  %9285 = vst [vmem:[#allocation57_spill] sm:$0xff] %v7507_v15  ;;  %3953 = vperm.xlu1 %6393, %v7503_v11  }
 0x13a   : > { %v5719_v16 = vpop.f32.mrf.mxu0  ;;  %5796 = vmatprep.mubr.msk.f32.mxu1 %vm1301_vm2, %v5715_v29  ;;  %v7516_v29 = vpop.eup %6684 }
 0x13b   : > { %9287 = vst [vmem:[#allocation59_spill] sm:$0xff] %v7516_v29  ;;  %v7527_v24 = vpop.permute.xlu1 %6131 }
 0x13c   : > { %3868 = vperm.xlu0 %6307, %v7498_v20   ;;  %v1156_v37 = vpop.f32.mrf.mxu0  ;;  %v703_v20 = vld [vmem:[%s6937_s15 + $0x130] sm:$0xff]  ;;  %9289 = vst [vmem:[#allocation61_spill] sm:$0xff] %v7527_v24 }
 0x13d   : > { %5797 = vmatmul.mubr.msk.f32.gmra.mxu1 %vm1301_vm2, %v5716_v12  ;;  %v7522_v12 = vpop.permute.xlu0 %6253  ;;  %3713 = vperm.xlu1 %6393, %v7516_v29   ;;  %v3619_v58 = vmul.f32 1.442695, %v703_v20 }
 0x13e   : > { %v5720_v42 = vpop.f32.mrf.mxu0  ;;  %5799 = vmatprep.mubr.msk.f32.mxu1 %vm1301_vm2, %v1156_v37  ;;  %v7525_v37 = vpop.eup %6686 }
 0x13f   : > { %9288 = vst [vmem:[#allocation60_spill] sm:$0xff] %v7525_v37  ;;  %6694 = vpow2.f32 %v3619_v58  ;;  %v7539_v7 = vpop.permute.xlu1 %6141 }
 0x140   : > { %3778 = vperm.xlu0 %6307, %v7507_v15   ;;  %v1159_v4 = vpop.f32.mrf.mxu0  ;;  %v685_v15 = vld [vmem:[%s6937_s15 + $0xa0] sm:$0xff]  ;;  %9291 = vst [vmem:[#allocation63_spill] sm:$0xff] %v7539_v7 }
 0x141   : > { %5800 = vmatmul.mubr.msk.f32.gmra.mxu1 %vm1301_vm2, %v1159_v4  ;;  %3873 = vperm.xlu1 %6393, %v7525_v37   ;;  %v7533_v4 = vpop.eup %6688  ;;  %v7536_v20 = vpop.permute.xlu0 %6263 }
 0x142   : > { %v5723_v31 = vpop.f32.mrf.mxu0  ;;  %5802 = vmatprep.mubr.msk.f32.mxu1 %vm1301_vm2, %v5719_v16  ;;  %v3583_v16 = vmul.f32 1.442695, %v685_v15  ;;  %9290 = vst [vmem:[#allocation62_spill] sm:$0xff] %v7533_v4 }
 0x144   : > { %v1172_v11 = vpop.f32.mrf.mxu0  ;;  %6696 = vpow2.f32 %v3583_v16 }
 0x145   : > { %5803 = vmatmul.mubr.msk.f32.gmra.mxu1 %vm1301_vm2, %v5720_v42  ;;  %3783 = vperm.xlu1 %6393, %v7533_v4   ;;  %v7543_v42 = vpop.eup %6690  ;;  %v7547_v37 = vpop.permute.xlu0 %6273 }
 0x146   : > { %v5724_v62 = vpop.f32.mrf.mxu0  ;;  %5805 = vmatprep.mubr.msk.f32.mxu1 %vm1301_vm2, %v1172_v11  ;;  %v3647_v11 = vmul.f32 1.442695, %v717_v36  ;;  %9292 = vst [vmem:[#allocation64_spill] sm:$0xff] %v7543_v42  ;;  %9293 = vst [vmem:[#allocation65_spill] sm:$0xff] %v7547_v37 }
 0x148   : > { %v1175_v29 = vpop.f32.mrf.mxu0  ;;  %6698 = vpow2.f32 %v3647_v11 }
 0x149   : > { %5806 = vmatmul.mubr.msk.f32.gmra.mxu1 %vm1301_vm2, %v1175_v29  ;;  %3943 = vperm.xlu1 %6393, %v7543_v42   ;;  %v7550_v29 = vpop.eup %6692 }
 0x14a   : > { %v5727_v33 = vpop.f32.mrf.mxu0  ;;  %5808 = vmatprep.mubr.msk.f32.mxu1 %vm1301_vm2, %v5723_v31  ;;  %9294 = vst [vmem:[#allocation66_spill] sm:$0xff] %v7550_v29  ;;  %v7552_v31 = vpop.permute.xlu1 %6152 }
 0x14c   : > { %v1188_v15 = vpop.f32.mrf.mxu0 }
 0x14d   : > { %5809 = vmatmul.mubr.msk.f32.gmra.mxu1 %vm1301_vm2, %v5724_v62  ;;  %3703 = vperm.xlu1 %6393, %v7550_v29   ;;  %v7557_v62 = vpop.eup %6694 }
 0x14e   : > { %v5728_v58 = vpop.f32.mrf.mxu0  ;;  %5811 = vmatprep.mubr.msk.f32.mxu1 %vm1301_vm2, %v1188_v15  ;;  %9295 = vst [vmem:[#allocation67_spill] sm:$0xff] %v7557_v62  ;;  %v7559_v15 = vpop.permute.xlu0 %6283 }
 0x14f   : > { %9296 = vst [vmem:[#allocation68_spill] sm:$0xff] %v7559_v15  ;;  %v7562_v11 = vpop.permute.xlu1 %6163 }
 0x150   : > { %v1191_v4 = vpop.f32.mrf.mxu0 }
 0x151   : > { %5812 = vmatmul.mubr.msk.f32.gmra.mxu1 %vm1301_vm2, %v1191_v4  ;;  %3863 = vperm.xlu1 %6393, %v7557_v62   ;;  %v7566_v4 = vpop.eup %6696 }
 0x152   : > { %v5731_v16 = vpop.f32.mrf.mxu0  ;;  %5814 = vmatprep.mubr.msk.f32.mxu1 %vm1301_vm2, %v5727_v33  ;;  %9297 = vst [vmem:[#allocation69_spill] sm:$0xff] %v7566_v4  ;;  %v7570_v29 = vpop.permute.xlu0 %6293 }
 0x153   : > { %9298 = vst [vmem:[#allocation70_spill] sm:$0xff] %v7570_v29  ;;  %v7575_v61 = vpop.permute.xlu1 %6168 }
 0x154   : > { %v1204_v36 = vpop.f32.mrf.mxu0 }
 0x155   : > { %5815 = vmatmul.mubr.msk.f32.gmra.mxu1 %vm1301_vm2, %v5728_v58  ;;  %3773 = vperm.xlu1 %6393, %v7566_v4   ;;  %v7573_v58 = vpop.eup %6698 }
 0x156   : > { %v5732_v42 = vpop.f32.mrf.mxu0  ;;  %5817 = vmatprep.mubr.msk.f32.mxu1 %vm1301_vm2, %v1204_v36  ;;  %9299 = vst [vmem:[#allocation71_spill] sm:$0xff] %v7573_v58  ;;  %v7580_v62 = vpop.permute.xlu0 %6303 }
 0x157   : > { %9300 = vst [vmem:[#allocation72_spill] sm:$0xff] %v7580_v62 }
 0x158   : > { %v1207_v3 = vpop.f32.mrf.mxu0 }
 0x159   : > { %5818 = vmatmul.mubr.msk.f32.gmra.mxu1 %vm1301_vm2, %v1207_v3  ;;  %3933 = vperm.xlu1 %6393, %v7573_v58  }
 0x15a   : > { %v5735_v33 = vpop.f32.mrf.mxu0  ;;  %5820 = vmatprep.mubr.msk.f32.mxu1 %vm1301_vm2, %v5731_v16  ;;  %v7583_v16 = vpop.permute.xlu1 %6178 }
 0x15c   : > { %v1220_v48 = vpop.f32.mrf.mxu0 }
 0x15d   : > { %5821 = vmatmul.mubr.msk.f32.gmra.mxu1 %vm1301_vm2, %v5732_v42  ;;  %v7588_v42 = vpop.permute.xlu0 %6309 }
 0x15e   : > { %v5736_v36 = vpop.f32.mrf.mxu0  ;;  %5823 = vmatprep.mubr.msk.f32.mxu1 %vm1301_vm2, %v1220_v48  ;;  %9301 = vst [vmem:[#allocation73_spill] sm:$0xff] %v7588_v42  ;;  %v7590_v48 = vpop.permute.xlu1 %6188 }
 0x160   : > { %v1223_v3 = vpop.f32.mrf.mxu0 }
 0x161   : > { %5824 = vmatmul.mubr.msk.f32.gmra.mxu1 %vm1301_vm2, %v1223_v3  ;;  %v7594_v41 = vpop.permute.xlu0 %6314 }
 0x162   : > { %v5739_v4 = vpop.f32.mrf.mxu0  ;;  %5826 = vmatprep.mubr.msk.f32.mxu1 %vm1301_vm2, %v5735_v33  ;;  %9302 = vst [vmem:[#allocation74_spill] sm:$0xff] %v7594_v41  ;;  %v7597_v33 = vpop.permute.xlu1 %6198 }
 0x164   : > { %v1236_v1 = vpop.f32.mrf.mxu0 }
 0x165   : > { %5827 = vmatmul.mubr.msk.f32.gmra.mxu1 %vm1301_vm2, %v5736_v36 }
 0x166   : > { %v5740_v7 = vpop.f32.mrf.mxu0  ;;  %5829 = vmatprep.mubr.msk.f32.mxu1 %vm1301_vm2, %v1236_v1  ;;  %v7604_v10 = vpop.permute.xlu1 %6208 }
 0x168   : > { %v1239_v58 = vpop.f32.mrf.mxu0 }
 0x169   : > { %5830 = vmatmul.mubr.msk.f32.gmra.mxu1 %vm1301_vm2, %v1239_v58  ;;  %v7602_v58 = vpop.permute.xlu0 %6319 }
 0x16a   : > { %v5743_v62 = vpop.f32.mrf.mxu0  ;;  %5832 = vmatprep.mubr.msk.f32.mxu1 %vm1301_vm2, %v5739_v4 }
 0x16c   : > { %v1252_v3 = vpop.f32.mrf.mxu0 }
 0x16d   : > { %5833 = vmatmul.mubr.msk.f32.gmra.mxu1 %vm1301_vm2, %v5740_v7  ;;  %v7608_v24 = vpop.permute.xlu0 %6324 }
 0x16e   : > { %v5744_v36 = vpop.f32.mrf.mxu0  ;;  %5835 = vmatprep.mubr.msk.f32.mxu1 %vm1301_vm2, %v1252_v3  ;;  %v7611_v3 = vpop.permute.xlu1 %6218 }
 0x170   : > { %v1255_v1 = vpop.f32.mrf.mxu0 }
 0x171   : > { %5836 = vmatmul.mubr.msk.f32.gmra.mxu1 %vm1301_vm2, %v1255_v1 }
 0x172   : > { %v5747_v42 = vpop.f32.mrf.mxu0  ;;  %5838 = vmatprep.mubr.msk.f32.mxu1 %vm1301_vm2, %v5743_v62  ;;  %v7618_v25 = vpop.permute.xlu1 %6228 }
 0x174   : > { %v1268_v4 = vpop.f32.mrf.mxu0 }
 0x175   : > { %5839 = vmatmul.mubr.msk.f32.gmra.mxu1 %vm1301_vm2, %v5744_v36  ;;  %v7616_v36 = vpop.permute.xlu0 %6329 }
 0x176   : > { %v5748_v41 = vpop.f32.mrf.mxu0  ;;  %5841 = vmatprep.mubr.msk.f32.mxu1 %vm1301_vm2, %v1268_v4  ;;  %9303 = vst [vmem:[#allocation75_spill] sm:$0xff] %v7616_v36 }
 0x178   : > { %v1271_v7 = vpop.f32.mrf.mxu0 }
 0x179   : > { %5842 = vmatmul.mubr.msk.f32.gmra.mxu1 %vm1301_vm2, %v1271_v7  ;;  %v7623_v7 = vpop.permute.xlu0 %6334 }
 0x17a   : > { %v5751_v1 = vpop.f32.mrf.mxu0  ;;  %5844 = vmatprep.mubr.msk.f32.mxu1 %vm1301_vm2, %v5747_v42  ;;  %9304 = vst [vmem:[#allocation76_spill] sm:$0xff] %v7623_v7  ;;  %v7625_v42 = vpop.permute.xlu1 %6238 }
 0x17c   : > { %v1284_v62 = vpop.f32.mrf.mxu0 }
 0x17d   : > { %5845 = vmatmul.mubr.msk.f32.gmra.mxu1 %vm1301_vm2, %v5748_v41  ;;  %v7627_v34 = vpop.permute.xlu0 %6339 }
 0x17e   : > { %v5752_v29 = vpop.f32.mrf.mxu0  ;;  %5847 = vmatprep.mubr.msk.f32.mxu1 %vm1301_vm2, %v1284_v62  ;;  %9305 = vst [vmem:[#allocation77_spill] sm:$0xff] %v7627_v34  ;;  %v7629_v41 = vpop.permute.xlu1 %6248 }
 0x180   : > { %v1287_v4 = vpop.f32.mrf.mxu0 }
 0x181   : > { %5848 = vmatmul.mubr.msk.f32.gmra.mxu1 %vm1301_vm2, %v1287_v4  ;;  %v7631_v62 = vpop.permute.xlu0 %6344 }
 0x182   : > { %5850 = vmatprep.mubr.msk.f32.mxu1 %vm1301_vm2, %v5751_v1  ;;  %9306 = vst [vmem:[#allocation78_spill] sm:$0xff] %v7631_v62  ;;  %v7633_v36 = vpop.permute.xlu1 %6258 }
 0x185   : > { %5851 = vmatmul.mubr.msk.f32.gmra.mxu1 %vm1301_vm2, %v5752_v29  ;;  %v7635_v22 = vpop.permute.xlu0 %6349 }
 0x186   : > { %9307 = vst [vmem:[#allocation79_spill] sm:$0xff] %v7635_v22  ;;  %v7637_v15 = vpop.permute.xlu1 %6268 }
 0x187   : > { %9308 = vst [vmem:[#allocation80_spill] sm:$0xff] %v7637_v15 }
 0x189   : > { %v7639_v4 = vpop.permute.xlu0 %6354 }
 0x18a   : > { %9309 = vst [vmem:[#allocation81_spill] sm:$0xff] %v7639_v4  ;;  %v7641_v1 = vpop.permute.xlu1 %6278 }
 0x18b   : > { %9310 = vst [vmem:[#allocation82_spill] sm:$0xff] %v7641_v1 }
 0x18d   : > { %v7643_v29 = vpop.permute.xlu0 %6359 }
 0x18e   : > { %9311 = vst [vmem:[#allocation83_spill] sm:$0xff] %v7643_v29  ;;  %v7645_v28 = vpop.permute.xlu1 %6288 }
 0x18f   : > { %9312 = vst [vmem:[#allocation84_spill] sm:$0xff] %v7645_v28 }
 0x191   : > { %v7647_v5 = vpop.permute.xlu0 %6364 }
 0x192   : > { %9313 = vst [vmem:[#allocation85_spill] sm:$0xff] %v7647_v5  ;;  %v7649_v34 = vpop.permute.xlu1 %6298  ;;  %v5993_v5 = vunpack.i.h.bf16 %v7189_v44 }
 0x193   : > { %9314 = vst [vmem:[#allocation86_spill] sm:$0xff] %v7649_v34  ;;  %v6155_v34 = vunpack.i.h.bf16 %v7552_v31 }
 0x195   : > { %v7651_v7 = vpop.permute.xlu0 %6369 }
 0x196   : > { %9315 = vst [vmem:[#allocation87_spill] sm:$0xff] %v7651_v7  ;;  %v7653_v62 = vpop.permute.xlu1 %6389 }
 0x197   : > { %9316 = vst [vmem:[#allocation88_spill] sm:$0xff] %v7653_v62 }
 0x199   : > { %v7655_v2 = vpop.permute.xlu0 %6374 }
 0x19a   : > { %9317 = vst [vmem:[#allocation89_spill] sm:$0xff] %v7655_v2  ;;  %v7657_v22 = vpop.permute.xlu1 %3823 }
 0x19b   : > { %9318 = vst [vmem:[#allocation90_spill] sm:$0xff] %v7657_v22 }
 0x19d   : > { %v7659_v37 = vpop.permute.xlu0 %6379 }
 0x19e   : > { %9319 = vst [vmem:[#allocation91_spill] sm:$0xff] %v7659_v37  ;;  %v7661_v4 = vpop.permute.xlu1 %3983 }
 0x19f   : > { %9320 = vst [vmem:[#allocation92_spill] sm:$0xff] %v7661_v4  ;;  %v5992_v4 = vunpack.i.l.bf16 %v7189_v44  ;;  %v6161_v44 = vunpack.i.h.bf16 %v7361_v6 }
 0x1a1   : > { %v7663_v1 = vpop.permute.xlu0 %6384 }
 0x1a2   : > { %9321 = vst [vmem:[#allocation93_spill] sm:$0xff] %v7663_v1  ;;  %v7665_v29 = vpop.permute.xlu1 %3988 }
 0x1a3   : > { %9322 = vst [vmem:[#allocation94_spill] sm:$0xff] %v7665_v29  ;;  %v6154_v29 = vunpack.i.l.bf16 %v7552_v31  ;;  %v5999_v31 = vunpack.i.h.bf16 %v7310_v35 }
 0x1a5   : > { %v7669_v28 = vpop.permute.xlu0 %3828 }
 0x1a6   : > { %9323 = vst [vmem:[#allocation95_spill] sm:$0xff] %v7669_v28  ;;  %v7671_v7 = vpop.permute.xlu1 %3748 }
 0x1a9   : > { %v7685_v28 = vpop.permute.xlu0 %3743 }
 0x1aa   : > { %v7687_v15 = vpop.permute.xlu1 %3908 }
 0x1ab   : > { %9327 = vst [vmem:[#allocation99_spill] sm:$0xff] %v7687_v15 }
 0x1ae   : > { %v7705_v15 = vpop.permute.xlu1 %3813 }
 0x1af   : > { %9331 = vst [vmem:[#allocation103_spill] sm:$0xff] %v7705_v15  ;;  %v6180_v15 = vunpack.i.l.bf16 %v7583_v16 }
 0x1c9   : > { %v7673_v62 = vpop.f32.mrf.mxu1 }
 0x1ca   : > { %9324 = vst [vmem:[#allocation96_spill] sm:$0xff] %v7673_v62  ;;  %v2520_v2 = vmul.f32 %v5993_v5, %v7673_v62  ;;  %v3160_v37 = vmul.f32 %v6155_v34, %v7673_v62 }
 0x1cb   : > { %v7677_v22 = vpop.f32.mrf.mxu1 }
 0x1cc   : > { %9325 = vst [vmem:[#allocation97_spill] sm:$0xff] %v7677_v22  ;;  %3289 = vrot.lane.b32.xlu1 %v3160_v37, %s6820_s11  ;;  %2649 = vrot.lane.b32.xlu0 %v2520_v2, %s6821_s20  ;;  %v2519_v5 = vmul.f32 %v5992_v4, %v7677_v22  ;;  %v3159_v34 = vmul.f32 %v6154_v29, %v7677_v22  ;;  %v6160_v4 = vunpack.i.l.bf16 %v7361_v6  ;;  %v5998_v29 = vunpack.i.l.bf16 %v7310_v35  ;;  %v7703_v22 = vpop.permute.xlu0 %3903 }
 0x1cd   : > { %v7683_v1 = vpop.f32.mrf.mxu1  ;;  %9330 = vst [vmem:[#allocation102_spill] sm:$0xff] %v7703_v22  ;;  %v6166_v6 = vunpack.i.h.bf16 %v7562_v11 }
 0x1ce   : > { %9326 = vst [vmem:[#allocation98_spill] sm:$0xff] %v7683_v1  ;;  %v2522_v2 = vmul.f32 %v5999_v31, %v7683_v1  ;;  %v3162_v37 = vmul.f32 %v6161_v44, %v7683_v1  ;;  %v6004_v44 = vunpack.i.h.bf16 %v7318_v51  ;;  %v7719_v1 = vpop.permute.xlu1 %3973 }
 0x1cf   : > { %v7691_v62 = vpop.f32.mrf.mxu1  ;;  %9334 = vst [vmem:[#allocation106_spill] sm:$0xff] %v7719_v1 }
 0x1d0   : > { %9328 = vst [vmem:[#allocation100_spill] sm:$0xff] %v7691_v62  ;;  %3287 = vrot.lane.b32.xlu0 %v3159_v34, %s6820_s11  ;;  %2647 = vrot.lane.b32.xlu1 %v2519_v5, %s6821_s20  ;;  %v2521_v5 = vmul.f32 %v5998_v29, %v7691_v62  ;;  %v3161_v34 = vmul.f32 %v6160_v4, %v7691_v62  ;;  %v7717_v35 = vpop.permute.xlu0 %3818  ;;  %v6003_v4 = vunpack.i.l.bf16 %v7318_v51  ;;  %v6165_v62 = vunpack.i.l.bf16 %v7562_v11 }
 0x1d1   : > { %v7699_v45 = vpop.f32.mrf.mxu1  ;;  %9333 = vst [vmem:[#allocation105_spill] sm:$0xff] %v7717_v35 }
 0x1d2   : > { %9329 = vst [vmem:[#allocation101_spill] sm:$0xff] %v7699_v45  ;;  %v7737_v1 = vpop.permute.xlu1 %3733 }
 0x1d3   : > { %v7711_v31 = vpop.f32.mrf.mxu1 }
 0x1d4   : > { %3293 = vrot.lane.b32.xlu1 %v3162_v37, %s6820_s11  ;;  %2653 = vrot.lane.b32.xlu0 %v2522_v2, %s6821_s20  ;;  %9332 = vst [vmem:[#allocation104_spill] sm:$0xff] %v7711_v31  ;;  %v2524_v2 = vmul.f32 %v6004_v44, %v7699_v45  ;;  %v3164_v37 = vmul.f32 %v6166_v6, %v7699_v45  ;;  %v6009_v44 = vunpack.i.h.bf16 %v7196_v49  ;;  %v6171_v6 = vunpack.i.h.bf16 %v7575_v61  ;;  %v7735_v45 = vpop.permute.xlu0 %3978 }
 0x1d5   : > { %v7723_v29 = vpop.f32.mrf.mxu1  ;;  %9335 = vst [vmem:[#allocation107_spill] sm:$0xff] %v7735_v45 }
 0x1d6   : > { %v2526_v51 = vmul.f32 %v6009_v44, %v7723_v29  ;;  %v3166_v11 = vmul.f32 %v6171_v6, %v7723_v29  ;;  %v6176_v6 = vunpack.i.h.bf16 %v7378_v38 }
 0x1d7   : > { %v7731_v22 = vpop.f32.mrf.mxu1 }
 0x1d8   : > { %3291 = vrot.lane.b32.xlu0 %v3161_v34, %s6820_s11  ;;  %2651 = vrot.lane.b32.xlu1 %v2521_v5, %s6821_s20  ;;  %v2523_v5 = vmul.f32 %v6003_v4, %v7711_v31  ;;  %v3163_v34 = vmul.f32 %v6165_v62, %v7711_v31  ;;  %v6008_v62 = vunpack.i.l.bf16 %v7196_v49  ;;  %v7749_v4 = vpop.permute.xlu0 %3738  ;;  %v7751_v31 = vpop.permute.xlu1 %3893  ;;  %v6014_v49 = vunpack.i.h.bf16 %v7330_v32 }
 0x1d9   : > { %9336 = vst [vmem:[#allocation108_spill] sm:$0xff] %v7751_v31 }
 0x1dc   : > { %3297 = vrot.lane.b32.xlu1 %v3164_v37, %s6820_s11  ;;  %2657 = vrot.lane.b32.xlu0 %v2524_v2, %s6821_s20  ;;  %v7743_v2 = vpop.f32.mrf.mxu1  ;;  %v6170_v37 = vunpack.i.l.bf16 %v7575_v61  ;;  %v7767_v45 = vpop.permute.xlu0 %3898 }
 0x1dd   : > { %v2528_v61 = vmul.f32 %v6014_v49, %v7743_v2  ;;  %9337 = vst [vmem:[#allocation109_spill] sm:$0xff] %v7767_v45  ;;  %v7769_v31 = vpop.permute.xlu1 %3803 }
 0x1de   : > { %v7755_v44 = vpop.f32.mrf.mxu1  ;;  %9338 = vst [vmem:[#allocation110_spill] sm:$0xff] %v7769_v31 }
 0x1e0   : > { %3295 = vrot.lane.b32.xlu0 %v3163_v34, %s6820_s11  ;;  %2655 = vrot.lane.b32.xlu1 %v2523_v5, %s6821_s20  ;;  %v2525_v5 = vmul.f32 %v6008_v62, %v7731_v22  ;;  %v3165_v34 = vmul.f32 %v6170_v37, %v7731_v22  ;;  %v6175_v62 = vunpack.i.l.bf16 %v7378_v38  ;;  %v6013_v37 = vunpack.i.l.bf16 %v7330_v32  ;;  %v7781_v32 = vpop.permute.xlu0 %3808 }
 0x1e1   : > { %v6181_v38 = vunpack.i.h.bf16 %v7583_v16  ;;  %9339 = vst [vmem:[#allocation111_spill] sm:$0xff] %v7781_v32  ;;  %v7783_v45 = vpop.permute.xlu1 %3963 }
 0x1e2   : > { %9340 = vst [vmem:[#allocation112_spill] sm:$0xff] %v7783_v45 }
 0x1e4   : > { %3301 = vrot.lane.b32.xlu1 %v3166_v11, %s6820_s11  ;;  %2661 = vrot.lane.b32.xlu0 %v2526_v51, %s6821_s20  ;;  %v3168_v51 = vmul.f32 %v6176_v6, %v7743_v2  ;;  %v7763_v11 = vpop.f32.mrf.mxu1  ;;  %v6019_v6 = vunpack.i.h.bf16 %v7201_v52  ;;  %v7799_v45 = vpop.permute.xlu0 %3968 }
 0x1e5   : > { %9341 = vst [vmem:[#allocation113_spill] sm:$0xff] %v7799_v45  ;;  %v7801_v31 = vpop.permute.xlu1 %3723 }
 0x1e6   : > { %v7775_v49 = vpop.f32.mrf.mxu1 }
 0x1e8   : > { %3299 = vrot.lane.b32.xlu0 %v3165_v34, %s6820_s11  ;;  %2659 = vrot.lane.b32.xlu1 %v2525_v5, %s6821_s20  ;;  %v2527_v5 = vmul.f32 %v6013_v37, %v7755_v44  ;;  %v3167_v34 = vmul.f32 %v6175_v62, %v7755_v44  ;;  %v7787_v37 = vpop.f32.mrf.mxu1  ;;  %v6018_v62 = vunpack.i.l.bf16 %v7201_v52 }
 0x1e9   : > { %v7815_v45 = vpop.permute.xlu1 %3883 }
 0x1ea   : > { %v7795_v35 = vpop.f32.mrf.mxu1  ;;  %9342 = vst [vmem:[#allocation114_spill] sm:$0xff] %v7815_v45 }
 0x1ec   : > { %3305 = vrot.lane.b32.xlu1 %v3168_v51, %s6820_s11  ;;  %2665 = vrot.lane.b32.xlu0 %v2528_v61, %s6821_s20  ;;  %v2530_v61 = vmul.f32 %v6019_v6, %v7763_v11  ;;  %v3170_v51 = vmul.f32 %v6181_v38, %v7763_v11  ;;  %v6186_v6 = vunpack.i.h.bf16 %v7399_v9  ;;  %v6024_v38 = vunpack.i.h.bf16 %v7344_v23 }
 0x1ed   : > { %v7833_v32 = vpop.permute.xlu1 %3793 }
 0x1ee   : > { %v2532_v52 = vmul.f32 %v6024_v38, %v7787_v37  ;;  %v3172_v16 = vmul.f32 %v6186_v6, %v7787_v37  ;;  %v6029_v6 = vunpack.i.h.bf16 %v7209_v57  ;;  %9345 = vst [vmem:[#allocation117_spill] sm:$0xff] %v7833_v32  ;;  %v6033_v32 = vunpack.i.l.bf16 %v7356_v46 }
 0x1f0   : > { %3303 = vrot.lane.b32.xlu0 %v3167_v34, %s6820_s11  ;;  %2663 = vrot.lane.b32.xlu1 %v2527_v5, %s6821_s20  ;;  %v2529_v5 = vmul.f32 %v6018_v62, %v7775_v49  ;;  %v3169_v34 = vmul.f32 %v6180_v15, %v7775_v49  ;;  %v6185_v15 = vunpack.i.l.bf16 %v7399_v9  ;;  %v7813_v62 = vpop.permute.xlu0 %3728  ;;  %v6191_v9 = vunpack.i.h.bf16 %v7590_v48 }
 0x1f4   : > { %3309 = vrot.lane.b32.xlu1 %v3170_v51, %s6820_s11  ;;  %2669 = vrot.lane.b32.xlu0 %v2530_v61, %s6821_s20  ;;  %v7807_v61 = vpop.f32.mrf.mxu1  ;;  %v6023_v51 = vunpack.i.l.bf16 %v7344_v23  ;;  %v7831_v45 = vpop.permute.xlu0 %3888 }
 0x1f5   : > { %v2534_v23 = vmul.f32 %v6029_v6, %v7807_v61  ;;  %9344 = vst [vmem:[#allocation116_spill] sm:$0xff] %v7831_v45  ;;  %v7847_v45 = vpop.permute.xlu1 %3953 }
 0x1f6   : > { %v7819_v38 = vpop.f32.mrf.mxu1  ;;  %9348 = vst [vmem:[#allocation120_spill] sm:$0xff] %v7847_v45 }
 0x1f8   : > { %3307 = vrot.lane.b32.xlu0 %v3169_v34, %s6820_s11  ;;  %2667 = vrot.lane.b32.xlu1 %v2529_v5, %s6821_s20  ;;  %v2531_v5 = vmul.f32 %v6023_v51, %v7795_v35  ;;  %v3171_v34 = vmul.f32 %v6185_v15, %v7795_v35  ;;  %v6028_v51 = vunpack.i.l.bf16 %v7209_v57  ;;  %v6190_v15 = vunpack.i.l.bf16 %v7590_v48  ;;  %v7845_v48 = vpop.permute.xlu0 %3798 }
 0x1f9   : > { %v6034_v57 = vunpack.i.h.bf16 %v7356_v46  ;;  %9347 = vst [vmem:[#allocation119_spill] sm:$0xff] %v7845_v48  ;;  %v7865_v45 = vpop.permute.xlu1 %3713 }
 0x1fc   : > { %3313 = vrot.lane.b32.xlu1 %v3172_v16, %s6820_s11  ;;  %2673 = vrot.lane.b32.xlu0 %v2532_v52, %s6821_s20  ;;  %v3174_v52 = vmul.f32 %v6191_v9, %v7807_v61  ;;  %v7827_v16 = vpop.f32.mrf.mxu1  ;;  %v6196_v9 = vunpack.i.h.bf16 %v7416_v54 }
 0x1fd   : > { %9343 = vst [vmem:[#allocation115_spill] sm:$0xff] %v7827_v16 }
 0x1fe   : > { %v7839_v6 = vpop.f32.mrf.mxu1 }
 0x1ff   : > { %9346 = vst [vmem:[#allocation118_spill] sm:$0xff] %v7839_v6 }
 0x200   : > { %3311 = vrot.lane.b32.xlu0 %v3171_v34, %s6820_s11  ;;  %2671 = vrot.lane.b32.xlu1 %v2531_v5, %s6821_s20  ;;  %v2533_v5 = vmul.f32 %v6028_v51, %v7819_v38  ;;  %v3173_v34 = vmul.f32 %v6190_v15, %v7819_v38  ;;  %v7851_v51 = vpop.f32.mrf.mxu1  ;;  %v6195_v15 = vunpack.i.l.bf16 %v7416_v54 }
 0x201   : > { %9349 = vst [vmem:[#allocation121_spill] sm:$0xff] %v7851_v51 }
 0x202   : > { %v7859_v48 = vpop.f32.mrf.mxu1 }
 0x203   : > { %9350 = vst [vmem:[#allocation122_spill] sm:$0xff] %v7859_v48 }
 0x204   : > { %3317 = vrot.lane.b32.xlu1 %v3174_v52, %s6820_s11  ;;  %2677 = vrot.lane.b32.xlu0 %v2534_v23, %s6821_s20  ;;  %v2536_v23 = vmul.f32 %v6034_v57, %v7827_v16  ;;  %v3176_v52 = vmul.f32 %v6196_v9, %v7827_v16  ;;  %v6039_v57 = vunpack.i.h.bf16 %v7219_v60  ;;  %v6201_v9 = vunpack.i.h.bf16 %v7597_v33  ;;  %v7863_v16 = vpop.permute.xlu0 %3958 }
 0x205   : > { %9351 = vst [vmem:[#allocation123_spill] sm:$0xff] %v7863_v16 }
 0x206   : > { %v2538_v46 = vmul.f32 %v6039_v57, %v7851_v51  ;;  %v3178_v54 = vmul.f32 %v6201_v9, %v7851_v51  ;;  %v6206_v9 = vunpack.i.h.bf16 %v7437_v27 }
 0x208   : > { %3315 = vrot.lane.b32.xlu0 %v3173_v34, %s6820_s11  ;;  %2675 = vrot.lane.b32.xlu1 %v2533_v5, %s6821_s20  ;;  %v2535_v5 = vmul.f32 %v6033_v32, %v7839_v6  ;;  %v3175_v34 = vmul.f32 %v6195_v15, %v7839_v6  ;;  %v7871_v32 = vpop.f32.mrf.mxu1  ;;  %v7877_v15 = vpop.permute.xlu0 %3718 }
 0x209   : > { %v7879_v6 = vpop.permute.xlu1 %3873 }
 0x20a   : > { %9352 = vst [vmem:[#allocation124_spill] sm:$0xff] %v7879_v6  ;;  %v7883_v57 = vpop.f32.mrf.mxu1  ;;  %v6210_v6 = vunpack.i.l.bf16 %v7604_v10 }
 0x20c   : > { %3321 = vrot.lane.b32.xlu1 %v3176_v52, %s6820_s11  ;;  %2681 = vrot.lane.b32.xlu0 %v2536_v23, %s6821_s20  ;;  %v6038_v23 = vunpack.i.l.bf16 %v7219_v60  ;;  %v6200_v52 = vunpack.i.l.bf16 %v7597_v33  ;;  %v6044_v60 = vunpack.i.h.bf16 %v7370_v14 }
 0x20d   : > { %v7897_v51 = vpop.permute.xlu1 %3783 }
 0x20e   : > { %v2540_v33 = vmul.f32 %v6044_v60, %v7871_v32  ;;  %9354 = vst [vmem:[#allocation126_spill] sm:$0xff] %v7897_v51 }
 0x210   : > { %3319 = vrot.lane.b32.xlu0 %v3175_v34, %s6820_s11  ;;  %2679 = vrot.lane.b32.xlu1 %v2535_v5, %s6821_s20  ;;  %v2537_v5 = vmul.f32 %v6038_v23, %v7859_v48  ;;  %v3177_v34 = vmul.f32 %v6200_v52, %v7859_v48  ;;  %v6205_v23 = vunpack.i.l.bf16 %v7437_v27  ;;  %v6043_v52 = vunpack.i.l.bf16 %v7370_v14  ;;  %v7895_v48 = vpop.permute.xlu0 %3878 }
 0x211   : > { %9353 = vst [vmem:[#allocation125_spill] sm:$0xff] %v7895_v48  ;;  %v6211_v27 = vunpack.i.h.bf16 %v7604_v10  ;;  %v7911_v16 = vpop.permute.xlu1 %3943 }
 0x212   : > { %9355 = vst [vmem:[#allocation127_spill] sm:$0xff] %v7911_v16 }
 0x214   : > { %3325 = vrot.lane.b32.xlu1 %v3178_v54, %s6820_s11  ;;  %2685 = vrot.lane.b32.xlu0 %v2538_v46, %s6821_s20  ;;  %v3180_v46 = vmul.f32 %v6206_v9, %v7871_v32  ;;  %v7891_v54 = vpop.f32.mrf.mxu1  ;;  %v6049_v9 = vunpack.i.h.bf16 %v7226_v63  ;;  %v7909_v14 = vpop.permute.xlu0 %3788 }
 0x215   : > { %v7929_v51 = vpop.permute.xlu1 %3703 }
 0x216   : > { %v7903_v60 = vpop.f32.mrf.mxu1 }
 0x218   : > { %3323 = vrot.lane.b32.xlu0 %v3177_v34, %s6820_s11  ;;  %2683 = vrot.lane.b32.xlu1 %v2537_v5, %s6821_s20  ;;  %v2539_v5 = vmul.f32 %v6043_v52, %v7883_v57  ;;  %v3179_v34 = vmul.f32 %v6205_v23, %v7883_v57  ;;  %v7915_v52 = vpop.f32.mrf.mxu1  ;;  %v6048_v23 = vunpack.i.l.bf16 %v7226_v63  ;;  %v7927_v16 = vpop.permute.xlu0 %3948 }
 0x219   : > { %9357 = vst [vmem:[#allocation129_spill] sm:$0xff] %v7927_v16  ;;  %v7943_v16 = vpop.permute.xlu1 %3863 }
 0x21a   : > { %v7923_v48 = vpop.f32.mrf.mxu1  ;;  %9359 = vst [vmem:[#allocation131_spill] sm:$0xff] %v7943_v16 }
 0x21b   : > { %9356 = vst [vmem:[#allocation128_spill] sm:$0xff] %v7923_v48 }
 0x21c   : > { %3329 = vrot.lane.b32.xlu1 %v3180_v46, %s6820_s11  ;;  %2689 = vrot.lane.b32.xlu0 %v2540_v33, %s6821_s20  ;;  %v2542_v33 = vmul.f32 %v6049_v9, %v7891_v54  ;;  %v3182_v46 = vmul.f32 %v6211_v27, %v7891_v54  ;;  %v6216_v9 = vunpack.i.h.bf16 %v7454_v50  ;;  %v6054_v27 = vunpack.i.h.bf16 %v7384_v26 }
 0x21e   : > { %v2544_v63 = vmul.f32 %v6054_v27, %v7915_v52  ;;  %v3184_v10 = vmul.f32 %v6216_v9, %v7915_v52  ;;  %v6059_v9 = vunpack.i.h.bf16 %v7235_v47 }
 0x220   : > { %3327 = vrot.lane.b32.xlu0 %v3179_v34, %s6820_s11  ;;  %2687 = vrot.lane.b32.xlu1 %v2539_v5, %s6821_s20  ;;  %v2541_v5 = vmul.f32 %v6048_v23, %v7903_v60  ;;  %v3181_v34 = vmul.f32 %v6210_v6, %v7903_v60  ;;  %v6215_v6 = vunpack.i.l.bf16 %v7454_v50  ;;  %v7941_v23 = vpop.permute.xlu0 %3708  ;;  %v6221_v50 = vunpack.i.h.bf16 %v7611_v3 }
 0x224   : > { %3333 = vrot.lane.b32.xlu1 %v3182_v46, %s6820_s11  ;;  %2693 = vrot.lane.b32.xlu0 %v2542_v33, %s6821_s20  ;;  %v7935_v33 = vpop.f32.mrf.mxu1  ;;  %v6053_v46 = vunpack.i.l.bf16 %v7384_v26  ;;  %v7959_v16 = vpop.permute.xlu0 %3868 }
 0x225   : > { %9358 = vst [vmem:[#allocation130_spill] sm:$0xff] %v7935_v33  ;;  %v2546_v26 = vmul.f32 %v6059_v9, %v7935_v33  ;;  %9361 = vst [vmem:[#allocation133_spill] sm:$0xff] %v7959_v16 }
 0x226   : > { %v7947_v27 = vpop.f32.mrf.mxu1 }
 0x227   : > { %9360 = vst [vmem:[#allocation132_spill] sm:$0xff] %v7947_v27 }
 0x228   : > { %3331 = vrot.lane.b32.xlu0 %v3181_v34, %s6820_s11  ;;  %2691 = vrot.lane.b32.xlu1 %v2541_v5, %s6821_s20  ;;  %v2543_v5 = vmul.f32 %v6053_v46, %v7923_v48  ;;  %v3183_v34 = vmul.f32 %v6215_v6, %v7923_v48  ;;  %v6058_v46 = vunpack.i.l.bf16 %v7235_v47  ;;  %v6220_v6 = vunpack.i.l.bf16 %v7611_v3  ;;  %v7961_v48 = vpop.permute.xlu1 %3773  ;;  %v7973_v3 = vpop.permute.xlu0 %3778 }
 0x229   : > { %v6064_v47 = vunpack.i.h.bf16 %v7404_v53 }
 0x22c   : > { %3337 = vrot.lane.b32.xlu1 %v3184_v10, %s6820_s11  ;;  %2697 = vrot.lane.b32.xlu0 %v2544_v63, %s6821_s20  ;;  %v3186_v63 = vmul.f32 %v6221_v50, %v7935_v33  ;;  %v7955_v10 = vpop.f32.mrf.mxu1  ;;  %v6226_v50 = vunpack.i.h.bf16 %v7474_v18  ;;  %v7975_v16 = vpop.permute.xlu1 %3933 }
 0x22d   : > { %9362 = vst [vmem:[#allocation134_spill] sm:$0xff] %v7975_v16 }
 0x22e   : > { %v7967_v9 = vpop.f32.mrf.mxu1 }
 0x230   : > { %3335 = vrot.lane.b32.xlu0 %v3183_v34, %s6820_s11  ;;  %2695 = vrot.lane.b32.xlu1 %v2543_v5, %s6821_s20  ;;  %v2545_v5 = vmul.f32 %v6058_v46, %v7947_v27  ;;  %v3185_v34 = vmul.f32 %v6220_v6, %v7947_v27  ;;  %v7979_v46 = vpop.f32.mrf.mxu1  ;;  %v6225_v6 = vunpack.i.l.bf16 %v7474_v18  ;;  %v6063_v27 = vunpack.i.l.bf16 %v7404_v53 }
 0x231   : > { %v6231_v18 = vunpack.i.h.bf16 %v7618_v25 }
 0x234   : > { %3341 = vrot.lane.b32.xlu1 %v3186_v63, %s6820_s11  ;;  %2701 = vrot.lane.b32.xlu0 %v2546_v26, %s6821_s20  ;;  %v2548_v26 = vmul.f32 %v6064_v47, %v7955_v10  ;;  %v3188_v63 = vmul.f32 %v6226_v50, %v7955_v10  ;;  %v7991_v47 = vpop.f32.mrf.mxu1  ;;  %v6069_v50 = vunpack.i.h.bf16 %v7242_v30 }
 0x236   : > { %v2550_v53 = vmul.f32 %v6069_v50, %v7979_v46 }
 0x238   : > { %3339 = vrot.lane.b32.xlu0 %v3185_v34, %s6820_s11  ;;  %2699 = vrot.lane.b32.xlu1 %v2545_v5, %s6821_s20  ;;  %v2547_v5 = vmul.f32 %v6063_v27, %v7967_v9  ;;  %v3187_v34 = vmul.f32 %v6225_v6, %v7967_v9  ;;  %v3190_v27 = vmul.f32 %v6231_v18, %v7979_v46  ;;  %v8003_v6 = vpop.f32.mrf.mxu1 }
 0x239   : > { %9367 = vst [vmem:[#allocation139_spill] sm:$0xff] %v8003_v6 }
 0x23c   : > { %3345 = vrot.lane.b32.xlu1 %v3188_v63, %s6820_s11  ;;  %2705 = vrot.lane.b32.xlu0 %v2548_v26, %s6821_s20 }
 0x23e   : > { %v7987_v33 = vpop.permute.xlu1 %3289  ;;  %v7989_v16 = vpop.permute.xlu0 %2649 }
 0x23f   : > { %9363 = vst [vmem:[#allocation135_spill] sm:$0xff] %v7987_v33  ;;  %9364 = vst [vmem:[#allocation136_spill] sm:$0xff] %v7989_v16  ;;  %v6068_v33 = vunpack.i.l.bf16 %v7242_v30  ;;  %v6230_v16 = vunpack.i.l.bf16 %v7618_v25  ;;  %v6074_v30 = vunpack.i.h.bf16 %v7422_v19 }
 0x240   : > { %3343 = vrot.lane.b32.xlu0 %v3187_v34, %s6820_s11  ;;  %2703 = vrot.lane.b32.xlu1 %v2547_v5, %s6821_s20 }
 0x241   : > { %v2549_v5 = vmul.f32 %v6068_v33, %v7991_v47  ;;  %v3189_v34 = vmul.f32 %v6230_v16, %v7991_v47  ;;  %v2552_v25 = vmul.f32 %v6074_v30, %v8003_v6 }
 0x242   : > { %v7999_v26 = vpop.permute.xlu0 %3287  ;;  %v8001_v63 = vpop.permute.xlu1 %2647 }
 0x243   : > { %9365 = vst [vmem:[#allocation137_spill] sm:$0xff] %v7999_v26  ;;  %9366 = vst [vmem:[#allocation138_spill] sm:$0xff] %v8001_v63  ;;  %v8015_v26 = vpop.f32.mrf.mxu1  ;;  %v6236_v63 = vunpack.i.h.bf16 %v7489_v17 }
 0x244   : > { %3349 = vrot.lane.b32.xlu1 %v3190_v27, %s6820_s11  ;;  %2709 = vrot.lane.b32.xlu0 %v2550_v53, %s6821_s20  ;;  %9370 = vst [vmem:[#allocation142_spill] sm:$0xff] %v8015_v26 }
 0x245   : > { %v3192_v33 = vmul.f32 %v6236_v63, %v8003_v6  ;;  %v8027_v27 = vpop.f32.mrf.mxu1 }
 0x246   : > { %v8011_v50 = vpop.permute.xlu1 %3293  ;;  %v8013_v18 = vpop.permute.xlu0 %2653  ;;  %9373 = vst [vmem:[#allocation145_spill] sm:$0xff] %v8027_v27 }
 0x247   : > { %9368 = vst [vmem:[#allocation140_spill] sm:$0xff] %v8011_v50  ;;  %9369 = vst [vmem:[#allocation141_spill] sm:$0xff] %v8013_v18  ;;  %v6235_v50 = vunpack.i.l.bf16 %v7489_v17  ;;  %v6073_v18 = vunpack.i.l.bf16 %v7422_v19  ;;  %v8039_v6 = vpop.f32.mrf.mxu1  ;;  %v6241_v17 = vunpack.i.h.bf16 %v7625_v42 }
 0x248   : > { %3347 = vrot.lane.b32.xlu0 %v3189_v34, %s6820_s11  ;;  %2707 = vrot.lane.b32.xlu1 %v2549_v5, %s6821_s20  ;;  %9376 = vst [vmem:[#allocation148_spill] sm:$0xff] %v8039_v6 }
 0x249   : > { %v2551_v5 = vmul.f32 %v6073_v18, %v8015_v26  ;;  %v3191_v34 = vmul.f32 %v6235_v50, %v8015_v26  ;;  %v3194_v18 = vmul.f32 %v6241_v17, %v8027_v27  ;;  %v8052_v26 = vpop.f32.mrf.mxu1 }
 0x24a   : > { %v8023_v53 = vpop.permute.xlu0 %3291  ;;  %v8025_v16 = vpop.permute.xlu1 %2651  ;;  %9379 = vst [vmem:[#allocation151_spill] sm:$0xff] %v8052_v26 }
 0x24b   : > { %9371 = vst [vmem:[#allocation143_spill] sm:$0xff] %v8023_v53  ;;  %9372 = vst [vmem:[#allocation144_spill] sm:$0xff] %v8025_v16  ;;  %v6079_v53 = vunpack.i.h.bf16 %v7251_v43  ;;  %v6078_v16 = vunpack.i.l.bf16 %v7251_v43  ;;  %v6246_v43 = vunpack.i.h.bf16 %v7509_v56 }
 0x24c   : > { %3353 = vrot.lane.b32.xlu1 %v3192_v33, %s6820_s11  ;;  %2713 = vrot.lane.b32.xlu0 %v2552_v25, %s6821_s20  ;;  %v5917_v33 = vunpack.i.h.bf16 %v7211_v59 }
 0x24d   : > { %v2554_v19 = vmul.f32 %v6079_v53, %v8027_v27 }
 0x24e   : > { %v8035_v30 = vpop.permute.xlu1 %3297  ;;  %v8037_v63 = vpop.permute.xlu0 %2657  ;;  %v2206_v53 = vmul.f32 %v5917_v33, %v7723_v29 }
 0x24f   : > { %9374 = vst [vmem:[#allocation146_spill] sm:$0xff] %v8035_v30  ;;  %9375 = vst [vmem:[#allocation147_spill] sm:$0xff] %v8037_v63  ;;  %v6240_v30 = vunpack.i.l.bf16 %v7625_v42  ;;  %v6084_v42 = vunpack.i.h.bf16 %v7442_v40 }
 0x250   : > { %3351 = vrot.lane.b32.xlu0 %v3191_v34, %s6820_s11  ;;  %2711 = vrot.lane.b32.xlu1 %v2551_v5, %s6821_s20  ;;  %v2553_v5 = vmul.f32 %v6078_v16, %v8039_v6 }
 0x251   : > { %v3193_v34 = vmul.f32 %v6240_v30, %v8039_v6  ;;  %v2556_v16 = vmul.f32 %v6084_v42, %v8052_v26  ;;  %v3196_v30 = vmul.f32 %v6246_v43, %v8052_v26  ;;  %v6245_v6 = vunpack.i.l.bf16 %v7509_v56 }
 0x252   : > { %v8047_v25 = vpop.permute.xlu0 %3295  ;;  %v8049_v50 = vpop.permute.xlu1 %2655 }
 0x253   : > { %9377 = vst [vmem:[#allocation149_spill] sm:$0xff] %v8047_v25  ;;  %9378 = vst [vmem:[#allocation150_spill] sm:$0xff] %v8049_v50  ;;  %v5916_v25 = vunpack.i.l.bf16 %v7211_v59  ;;  %v8062_v50 = vpop.f32.mrf.mxu1  ;;  %v6322_v59 = vunpack.i.h.bf16 %v7602_v58 }
 0x254   : > { %3357 = vrot.lane.b32.xlu1 %v3194_v18, %s6820_s11  ;;  %2717 = vrot.lane.b32.xlu0 %v2554_v19, %s6821_s20  ;;  %9380 = vst [vmem:[#allocation152_spill] sm:$0xff] %v8062_v50  ;;  %v3195_v43 = vmul.f32 %v6245_v6, %v8062_v50 }
 0x255   : > { %v2205_v29 = vmul.f32 %v5916_v25, %v7731_v22  ;;  %v8072_v33 = vpop.f32.mrf.mxu1  ;;  %v2208_v22 = vmul.f32 %v6322_v59, %v7743_v2  ;;  %v6089_v2 = vunpack.i.h.bf16 %v7260_v55 }
 0x256   : > { %v3302_v17 = vpop.permute.xlu1 %3301  ;;  %v2662_v27 = vpop.permute.xlu0 %2661 }
 0x257   : > { %v2846_v63 = vadd.f32 %v2662_v27, %v2206_v53 }
 0x258   : > { %3355 = vrot.lane.b32.xlu0 %v3193_v34, %s6820_s11  ;;  %2715 = vrot.lane.b32.xlu1 %v2553_v5, %s6821_s20  ;;  %v6083_v34 = vunpack.i.l.bf16 %v7442_v40 }
 0x259   : > { %v3486_v27 = vadd.f32 %v3302_v17, %v2846_v63  ;;  %v6321_v63 = vunpack.i.l.bf16 %v7602_v58  ;;  %v8082_v17 = vpop.f32.mrf.mxu1 }
 0x25a   : > { %v3300_v19 = vpop.permute.xlu0 %3299  ;;  %v2660_v18 = vpop.permute.xlu1 %2659  ;;  %v2555_v5 = vmul.f32 %v6083_v34, %v8062_v50  ;;  %v6250_v34 = vunpack.i.l.bf16 %v7629_v41 }
 0x25b   : > { %v2845_v53 = vadd.f32 %v2660_v18, %v2205_v29  ;;  %v8085_v56 = vmul.f32 %v7941_v23, %v3486_v27  ;;  %v2207_v6 = vmul.f32 %v6321_v63, %v7755_v44  ;;  %v2558_v23 = vmul.f32 %v6089_v2, %v8072_v33  ;;  %v8100_v18 = vpop.f32.mrf.mxu1 }
 0x25c   : > { %3361 = vrot.lane.b32.xlu1 %v3196_v30, %s6820_s11  ;;  %2721 = vrot.lane.b32.xlu0 %v2556_v16, %s6821_s20  ;;  %v6251_v16 = vunpack.i.h.bf16 %v7629_v41 }
 0x25d   : > { %v3485_v25 = vadd.f32 %v3300_v19, %v2845_v53  ;;  %v6088_v53 = vunpack.i.l.bf16 %v7260_v55 }
 0x25e   : > { %v3306_v42 = vpop.permute.xlu1 %3305  ;;  %v2666_v26 = vpop.permute.xlu0 %2665  ;;  %v3198_v30 = vmul.f32 %v6251_v16, %v8072_v33  ;;  %v6094_v16 = vunpack.i.h.bf16 %v7460_v0 }
 0x25f   : > { %v8088_v40 = vmul.f32 %v7929_v51, %v3485_v25  ;;  %v2848_v29 = vadd.f32 %v2666_v26, %v2208_v22  ;;  %v5922_v26 = vunpack.i.h.bf16 %v7216_v8  ;;  %v2557_v25 = vmul.f32 %v6088_v53, %v8082_v17 }
 0x260   : > { %3359 = vrot.lane.b32.xlu0 %v3195_v43, %s6820_s11  ;;  %2719 = vrot.lane.b32.xlu1 %v2555_v5, %s6821_s20  ;;  %v3197_v5 = vmul.f32 %v6250_v34, %v8082_v17  ;;  %v6093_v53 = vunpack.i.l.bf16 %v7460_v0 }
 0x261   : > { %v3488_v59 = vadd.f32 %v3306_v42, %v2848_v29  ;;  %v2210_v44 = vmul.f32 %v5922_v26, %v7763_v11  ;;  %v5921_v42 = vunpack.i.l.bf16 %v7216_v8  ;;  %v8110_v29 = vpop.f32.mrf.mxu1  ;;  %v6256_v11 = vunpack.i.h.bf16 %v7522_v12 }
 0x262   : > { %v3304_v51 = vpop.permute.xlu0 %3303  ;;  %v2664_v19 = vpop.permute.xlu1 %2663 }
 0x263   : > { %v2847_v27 = vadd.f32 %v2664_v19, %v2207_v6  ;;  %v8113_v55 = vmul.f32 %v7877_v15, %v3488_v59  ;;  %v2209_v6 = vmul.f32 %v5921_v42, %v7775_v49  ;;  %v2560_v15 = vmul.f32 %v6094_v16, %v8100_v18  ;;  %v8128_v19 = vpop.f32.mrf.mxu1 }
 0x264   : > { %3365 = vrot.lane.b32.xlu1 %v3198_v30, %s6820_s11  ;;  %2725 = vrot.lane.b32.xlu0 %v2558_v23, %s6821_s20  ;;  %v3200_v23 = vmul.f32 %v6256_v11, %v8100_v18 }
 0x265   : > { %v3487_v22 = vadd.f32 %v3304_v51, %v2847_v27  ;;  %v6327_v51 = vunpack.i.h.bf16 %v7608_v24  ;;  %v6255_v27 = vunpack.i.l.bf16 %v7522_v12 }
 0x266   : > { %v3310_v43 = vpop.permute.xlu1 %3309  ;;  %v2670_v63 = vpop.permute.xlu0 %2669 }
 0x267   : > { %v8116_v41 = vmul.f32 %v7865_v45, %v3487_v22  ;;  %v2850_v2 = vadd.f32 %v2670_v63, %v2210_v44  ;;  %v2212_v49 = vmul.f32 %v6327_v51, %v7787_v37  ;;  %v2559_v44 = vmul.f32 %v6093_v53, %v8110_v29  ;;  %v8138_v63 = vpop.f32.mrf.mxu1 }
 0x268   : > { %3363 = vrot.lane.b32.xlu0 %v3197_v5, %s6820_s11  ;;  %2723 = vrot.lane.b32.xlu1 %v2557_v25, %s6821_s20  ;;  %v3199_v22 = vmul.f32 %v6255_v27, %v8110_v29  ;;  %v6099_v37 = vunpack.i.h.bf16 %v7270_v21  ;;  %v6098_v51 = vunpack.i.l.bf16 %v7270_v21 }
 0x269   : > { %v3490_v26 = vadd.f32 %v3310_v43, %v2850_v2  ;;  %v6326_v43 = vunpack.i.l.bf16 %v7608_v24  ;;  %v6261_v2 = vunpack.i.h.bf16 %v7633_v36 }
 0x26a   : > { %v3308_v45 = vpop.permute.xlu0 %3307  ;;  %v2668_v30 = vpop.permute.xlu1 %2667  ;;  %v2561_v27 = vmul.f32 %v6098_v51, %v8138_v63 }
 0x26b   : > { %v2849_v59 = vadd.f32 %v2668_v30, %v2209_v6  ;;  %v8141_v12 = vmul.f32 %v7813_v62, %v3490_v26  ;;  %v2211_v11 = vmul.f32 %v6326_v43, %v7795_v35  ;;  %v2562_v62 = vmul.f32 %v6099_v37, %v8128_v19 }
 0x26c   : > { %3369 = vrot.lane.b32.xlu1 %v3200_v23, %s6820_s11  ;;  %2729 = vrot.lane.b32.xlu0 %v2560_v15, %s6821_s20  ;;  %v3202_v16 = vmul.f32 %v6261_v2, %v8128_v19  ;;  %v5927_v15 = vunpack.i.h.bf16 %v7222_v13  ;;  %v8156_v23 = vpop.f32.mrf.mxu1  ;;  %v6260_v26 = vunpack.i.l.bf16 %v7633_v36 }
 0x26d   : > { %v3489_v34 = vadd.f32 %v3308_v45, %v2849_v59 }
 0x26e   : > { %v3314_v25 = vpop.permute.xlu1 %3313  ;;  %v2674_v5 = vpop.permute.xlu0 %2673  ;;  %v2214_v35 = vmul.f32 %v5927_v15, %v7807_v61  ;;  %v3201_v53 = vmul.f32 %v6260_v26, %v8138_v63  ;;  %v6266_v61 = vunpack.i.h.bf16 %v7536_v20 }
 0x26f   : > { %v8144_v0 = vmul.f32 %v7801_v31, %v3489_v34  ;;  %v2852_v42 = vadd.f32 %v2674_v5, %v2212_v49  ;;  %v6104_v5 = vunpack.i.h.bf16 %v7478_v39 }
 0x270   : > { %3367 = vrot.lane.b32.xlu0 %v3199_v22, %s6820_s11  ;;  %2727 = vrot.lane.b32.xlu1 %v2559_v44, %s6821_s20  ;;  %v5926_v44 = vunpack.i.l.bf16 %v7222_v13  ;;  %v8166_v22 = vpop.f32.mrf.mxu1 }
 0x271   : > { %v3492_v45 = vadd.f32 %v3314_v25, %v2852_v42  ;;  %v3204_v42 = vmul.f32 %v6266_v61, %v8156_v23 }
 0x272   : > { %v3312_v31 = vpop.permute.xlu0 %3311  ;;  %v2672_v6 = vpop.permute.xlu1 %2671  ;;  %v2213_v43 = vmul.f32 %v5926_v44, %v7819_v38 }
 0x273   : > { %v2851_v30 = vadd.f32 %v2672_v6, %v2211_v11  ;;  %v8169_v21 = vmul.f32 %v7749_v4, %v3492_v45  ;;  %v2564_v4 = vmul.f32 %v6104_v5, %v8156_v23  ;;  %v8183_v2 = vpop.f32.mrf.mxu1 }
 0x274   : > { %3373 = vrot.lane.b32.xlu1 %v3202_v16, %s6820_s11  ;;  %2733 = vrot.lane.b32.xlu0 %v2562_v62, %s6821_s20  ;;  %v6265_v16 = vunpack.i.l.bf16 %v7536_v20  ;;  %v9383_v20 = vld [vmem:[#allocation14_spill] sm:$0xff] }
 0x275   : > { %v3491_v59 = vadd.f32 %v3312_v31, %v2851_v30  ;;  %v6103_v31 = vunpack.i.l.bf16 %v7478_v39  ;;  %v8195_v51 = vpop.f32.mrf.mxu1 }
 0x276   : > { %v3318_v49 = vpop.permute.xlu1 %3317  ;;  %v2678_v34 = vpop.permute.xlu0 %2677  ;;  %v3203_v15 = vmul.f32 %v6265_v16, %v8166_v22 }
 0x277   : > { %v8172_v36 = vmul.f32 %v7737_v1, %v3491_v59  ;;  %v2854_v25 = vadd.f32 %v2678_v34, %v2214_v35  ;;  %v2563_v6 = vmul.f32 %v6103_v31, %v8166_v22  ;;  %v6109_v35 = vunpack.i.h.bf16 %v9383_v20  ;;  %v9384_v59 = vld [vmem:[#allocation80_spill] sm:$0xff] }
 0x278   : > { %3371 = vrot.lane.b32.xlu0 %v3201_v53, %s6820_s11  ;;  %2731 = vrot.lane.b32.xlu1 %v2561_v27, %s6821_s20  ;;  %v6271_v27 = vunpack.i.h.bf16 %v9384_v59  ;;  %v6270_v61 = vunpack.i.l.bf16 %v9384_v59 }
 0x279   : > { %v3494_v11 = vadd.f32 %v3318_v49, %v2854_v25  ;;  %v2566_v49 = vmul.f32 %v6109_v35, %v8183_v2  ;;  %v6108_v25 = vunpack.i.l.bf16 %v9383_v20  ;;  %v9393_v20 = vld [vmem:[#allocation76_spill] sm:$0xff] }
 0x27a   : > { %v3316_v1 = vpop.permute.xlu0 %3315  ;;  %v2676_v37 = vpop.permute.xlu1 %2675  ;;  %v3206_v34 = vmul.f32 %v6271_v27, %v8183_v2  ;;  %v6337_v35 = vunpack.i.h.bf16 %v9393_v20 }
 0x27b   : > { %v2853_v62 = vadd.f32 %v2676_v37, %v2213_v43  ;;  %v8198_v26 = vmul.f32 %v7671_v7, %v3494_v11  ;;  %v2565_v5 = vmul.f32 %v6108_v25, %v8195_v51  ;;  %v3205_v43 = vmul.f32 %v6270_v61, %v8195_v51  ;;  %v9389_v37 = vld [vmem:[#allocation65_spill] sm:$0xff] }
 0x27c   : > { %3377 = vrot.lane.b32.xlu1 %v3204_v42, %s6820_s11  ;;  %2737 = vrot.lane.b32.xlu0 %v2564_v4, %s6821_s20  ;;  %v6276_v11 = vunpack.i.h.bf16 %v9389_v37  ;;  %v6275_v27 = vunpack.i.l.bf16 %v9389_v37  ;;  %v9394_v37 = vld [vmem:[#allocation19_spill] sm:$0xff] }
 0x27d   : > { %v3493_v38 = vadd.f32 %v3316_v1, %v2853_v62  ;;  %v9390_v62 = vld [vmem:[#allocation54_spill] sm:$0xff]  ;;  %v6119_v8 = vunpack.i.h.bf16 %v9394_v37  ;;  %v6118_v53 = vunpack.i.l.bf16 %v9394_v37 }
 0x27e   : > { %v8191_v45 = vpop.permute.xlu1 %3321  ;;  %v8193_v30 = vpop.permute.xlu0 %2681  ;;  %v6114_v16 = vunpack.i.h.bf16 %v9390_v62 }
 0x27f   : > { %9381 = vst [vmem:[#allocation153_spill] sm:$0xff] %v8191_v45  ;;  %9382 = vst [vmem:[#allocation154_spill] sm:$0xff] %v8193_v30  ;;  %v8201_v39 = vmul.f32 %v7685_v28, %v3493_v38  ;;  %v8215_v28 = vpop.f32.mrf.mxu1 }
 0x280   : > { %3375 = vrot.lane.b32.xlu0 %v3203_v15, %s6820_s11  ;;  %2735 = vrot.lane.b32.xlu1 %v2563_v6, %s6821_s20  ;;  %v2568_v31 = vmul.f32 %v6114_v16, %v8215_v28  ;;  %v3208_v38 = vmul.f32 %v6276_v11, %v8215_v28  ;;  %v6336_v11 = vunpack.i.l.bf16 %v9393_v20  ;;  %v9396_v20 = vld [vmem:[#allocation6_spill] sm:$0xff] }
 0x281   : > { %v8227_v1 = vpop.f32.mrf.mxu1 }
 0x282   : > { %v8211_v7 = vpop.permute.xlu0 %3319  ;;  %v8213_v44 = vpop.permute.xlu1 %2679  ;;  %v3207_v61 = vmul.f32 %v6275_v27, %v8227_v1 }
 0x283   : > { %9385 = vst [vmem:[#allocation14_spill] sm:$0xff] %v8211_v7  ;;  %9386 = vst [vmem:[#allocation80_spill] sm:$0xff] %v8213_v44  ;;  %v8240_v59 = vpop.f32.mrf.mxu1 }
 0x284   : > { %3381 = vrot.lane.b32.xlu1 %v3206_v34, %s6820_s11  ;;  %2741 = vrot.lane.b32.xlu0 %v2566_v49, %s6821_s20  ;;  %v6113_v49 = vunpack.i.l.bf16 %v9390_v62  ;;  %v2220_v34 = vmul.f32 %v6337_v35, %v7871_v32  ;;  %v9395_v62 = vld [vmem:[#allocation82_spill] sm:$0xff]  ;;  %v2219_v32 = vmul.f32 %v6336_v11, %v7883_v57 }
 0x285   : > { %v8250_v16 = vpop.f32.mrf.mxu1  ;;  %v6281_v24 = vunpack.i.h.bf16 %v9395_v62 }
 0x286   : > { %v8223_v4 = vpop.permute.xlu1 %3325  ;;  %v8225_v42 = vpop.permute.xlu0 %2685  ;;  %v2567_v25 = vmul.f32 %v6113_v49, %v8227_v1  ;;  %v5937_v49 = vunpack.i.h.bf16 %v9396_v20 }
 0x287   : > { %9387 = vst [vmem:[#allocation155_spill] sm:$0xff] %v8223_v4  ;;  %9388 = vst [vmem:[#allocation156_spill] sm:$0xff] %v8225_v42  ;;  %v8260_v13 = vpop.f32.mrf.mxu1 }
 0x288   : > { %3379 = vrot.lane.b32.xlu0 %v3205_v43, %s6820_s11  ;;  %2739 = vrot.lane.b32.xlu1 %v2565_v5, %s6821_s20  ;;  %9397 = vst [vmem:[#allocation76_spill] sm:$0xff] %v8260_v13  ;;  %v2222_v57 = vmul.f32 %v5937_v49, %v7891_v54 }
 0x28a   : > { %v8235_v6 = vpop.permute.xlu0 %3323  ;;  %v8237_v15 = vpop.permute.xlu1 %2683 }
 0x28b   : > { %9391 = vst [vmem:[#allocation65_spill] sm:$0xff] %v8235_v6  ;;  %9392 = vst [vmem:[#allocation54_spill] sm:$0xff] %v8237_v15 }
 0x28c   : > { %3385 = vrot.lane.b32.xlu1 %v3208_v38, %s6820_s11  ;;  %2745 = vrot.lane.b32.xlu0 %v2568_v31, %s6821_s20  ;;  %v2570_v31 = vmul.f32 %v6119_v8, %v8240_v59  ;;  %v3210_v38 = vmul.f32 %v6281_v24, %v8240_v59  ;;  %v2569_v24 = vmul.f32 %v6118_v53, %v8250_v16 }
 0x28e   : > { %v3330_v5 = vpop.permute.xlu1 %3329  ;;  %v2690_v43 = vpop.permute.xlu0 %2689 }
 0x28f   : > { %v2860_v58 = vadd.f32 %v2690_v43, %v2220_v34 }
 0x290   : > { %3383 = vrot.lane.b32.xlu0 %v3207_v61, %s6820_s11  ;;  %2743 = vrot.lane.b32.xlu1 %v2567_v25, %s6821_s20  ;;  %v6280_v61 = vunpack.i.l.bf16 %v9395_v62 }
 0x291   : > { %v3500_v34 = vadd.f32 %v3330_v5, %v2860_v58  ;;  %v5936_v58 = vunpack.i.l.bf16 %v9396_v20  ;;  %v8270_v5 = vpop.f32.mrf.mxu1 }
 0x292   : > { %v3328_v35 = vpop.permute.xlu0 %3327  ;;  %v2688_v27 = vpop.permute.xlu1 %2687  ;;  %v3209_v25 = vmul.f32 %v6280_v61, %v8250_v16  ;;  %9398 = vst [vmem:[#allocation19_spill] sm:$0xff] %v8270_v5 }
 0x293   : > { %v2859_v43 = vadd.f32 %v2688_v27, %v2219_v32  ;;  %v8273_v37 = vmul.f32 %v7973_v3, %v3500_v34  ;;  %v2221_v53 = vmul.f32 %v5936_v58, %v7903_v60 }
 0x294   : > { %3389 = vrot.lane.b32.xlu1 %v3210_v38, %s6820_s11  ;;  %2749 = vrot.lane.b32.xlu0 %v2570_v31, %s6821_s20  ;;  %v9399_v31 = vld [vmem:[#allocation68_spill] sm:$0xff]  ;;  %v9400_v38 = vld [vmem:[#allocation58_spill] sm:$0xff] }
 0x295   : > { %v3499_v8 = vadd.f32 %v3328_v35, %v2859_v43  ;;  %v6286_v54 = vunpack.i.h.bf16 %v9399_v31  ;;  %v6124_v35 = vunpack.i.h.bf16 %v9400_v38  ;;  %v8288_v43 = vpop.f32.mrf.mxu1 }
 0x296   : > { %v3334_v11 = vpop.permute.xlu1 %3333  ;;  %v2694_v45 = vpop.permute.xlu0 %2693 }
 0x297   : > { %v8276_v62 = vmul.f32 %v7961_v48, %v3499_v8  ;;  %v2862_v32 = vadd.f32 %v2694_v45, %v2222_v57  ;;  %v2572_v3 = vmul.f32 %v6124_v35, %v8260_v13  ;;  %v3212_v20 = vmul.f32 %v6286_v54, %v8260_v13  ;;  %v9401_v45 = vld [vmem:[#allocation77_spill] sm:$0xff] }
 0x298   : > { %3387 = vrot.lane.b32.xlu0 %v3209_v25, %s6820_s11  ;;  %2747 = vrot.lane.b32.xlu1 %v2569_v24, %s6821_s20  ;;  %v6342_v34 = vunpack.i.h.bf16 %v9401_v45  ;;  %v6285_v8 = vunpack.i.l.bf16 %v9399_v31  ;;  %v6123_v24 = vunpack.i.l.bf16 %v9400_v38  ;;  %v9402_v38 = vld [vmem:[#allocation126_spill] sm:$0xff] }
 0x299   : > { %v3502_v61 = vadd.f32 %v3334_v11, %v2862_v32  ;;  %v6341_v11 = vunpack.i.l.bf16 %v9401_v45  ;;  %v8298_v32 = vpop.f32.mrf.mxu1 }
 0x29a   : > { %v3332_v48 = vpop.permute.xlu0 %3331  ;;  %v2692_v49 = vpop.permute.xlu1 %2691  ;;  %v2224_v60 = vmul.f32 %v6342_v34, %v7915_v52  ;;  %v2571_v58 = vmul.f32 %v6123_v24, %v8270_v5  ;;  %v3211_v54 = vmul.f32 %v6285_v8, %v8270_v5  ;;  %v9405_v34 = vld [vmem:[#allocation128_spill] sm:$0xff]  ;;  %v683_v5 = vld [vmem:[%s6937_s15 + $0x90] sm:$0xff] }
 0x29b   : > { %v2861_v57 = vadd.f32 %v2692_v49, %v2221_v53  ;;  %v8301_v31 = vmul.f32 %v7909_v14, %v3502_v61 }
 0x29c   : > { %3393 = vrot.lane.b32.xlu1 %v3212_v20, %s6820_s11  ;;  %2753 = vrot.lane.b32.xlu0 %v2572_v3, %s6821_s20  ;;  %v9403_v20 = vld [vmem:[#allocation22_spill] sm:$0xff] }
 0x29d   : > { %v3501_v25 = vadd.f32 %v3332_v48, %v2861_v57  ;;  %v6129_v52 = vunpack.i.h.bf16 %v9403_v20  ;;  %v9404_v48 = vld [vmem:[#allocation84_spill] sm:$0xff]  ;;  %v2223_v57 = vmul.f32 %v6341_v11, %v9405_v34  ;;  %v9407_v11 = vld [vmem:[#allocation130_spill] sm:$0xff] }
 0x29e   : > { %v3338_v35 = vpop.permute.xlu1 %3337  ;;  %v2698_v27 = vpop.permute.xlu0 %2697  ;;  %v6291_v49 = vunpack.i.h.bf16 %v9404_v48 }
 0x29f   : > { %v8304_v53 = vmul.f32 %v9402_v38, %v3501_v25  ;;  %v2864_v3 = vadd.f32 %v2698_v27, %v2224_v60  ;;  %v2574_v14 = vmul.f32 %v6129_v52, %v8288_v43  ;;  %v9406_v27 = vld [vmem:[#allocation7_spill] sm:$0xff]  ;;  %v8316_v25 = vpop.f32.mrf.mxu1 }
 0x2a0   : > { %3391 = vrot.lane.b32.xlu0 %v3211_v54, %s6820_s11  ;;  %2751 = vrot.lane.b32.xlu1 %v2571_v58, %s6821_s20  ;;  %v3214_v61 = vmul.f32 %v6291_v49, %v8288_v43  ;;  %v5942_v60 = vunpack.i.h.bf16 %v9406_v27  ;;  %v6128_v54 = vunpack.i.l.bf16 %v9403_v20  ;;  %v6290_v58 = vunpack.i.l.bf16 %v9404_v48  ;;  %v9408_v20 = vld [vmem:[#allocation119_spill] sm:$0xff]  ;;  %v9409_v48 = vld [vmem:[#allocation117_spill] sm:$0xff] }
 0x2a1   : > { %v3504_v38 = vadd.f32 %v3338_v35, %v2864_v3  ;;  %v5941_v35 = vunpack.i.l.bf16 %v9406_v27  ;;  %v8326_v3 = vpop.f32.mrf.mxu1 }
 0x2a2   : > { %v3336_v8 = vpop.permute.xlu0 %3335  ;;  %v2696_v24 = vpop.permute.xlu1 %2695  ;;  %v2226_v52 = vmul.f32 %v5942_v60, %v9407_v11  ;;  %v2573_v49 = vmul.f32 %v6128_v54, %v8298_v32  ;;  %v3213_v45 = vmul.f32 %v6290_v58, %v8298_v32  ;;  %v9412_v54 = vld [vmem:[#allocation132_spill] sm:$0xff] }
 0x2a3   : > { %v2863_v7 = vadd.f32 %v2696_v24, %v2223_v57  ;;  %v8329_v57 = vmul.f32 %v9408_v20, %v3504_v38  ;;  %v9410_v24 = vld [vmem:[#allocation70_spill] sm:$0xff]  ;;  %v2225_v58 = vmul.f32 %v5941_v35, %v9412_v54 }
 0x2a4   : > { %3397 = vrot.lane.b32.xlu1 %v3214_v61, %s6820_s11  ;;  %2757 = vrot.lane.b32.xlu0 %v2574_v14, %s6821_s20  ;;  %v6296_v60 = vunpack.i.h.bf16 %v9410_v24 }
 0x2a5   : > { %v3503_v34 = vadd.f32 %v3336_v8, %v2863_v7  ;;  %v9411_v7 = vld [vmem:[#allocation61_spill] sm:$0xff] }
 0x2a6   : > { %v3342_v44 = vpop.permute.xlu1 %3341  ;;  %v2702_v30 = vpop.permute.xlu0 %2701  ;;  %v6134_v8 = vunpack.i.h.bf16 %v9411_v7  ;;  %v3216_v11 = vmul.f32 %v6296_v60, %v8316_v25 }
 0x2a7   : > { %v8332_v61 = vmul.f32 %v9409_v48, %v3503_v34  ;;  %v2866_v14 = vadd.f32 %v2702_v30, %v2226_v52  ;;  %v9413_v30 = vld [vmem:[#allocation78_spill] sm:$0xff]  ;;  %v8344_v48 = vpop.f32.mrf.mxu1 }
 0x2a8   : > { %3395 = vrot.lane.b32.xlu0 %v3213_v45, %s6820_s11  ;;  %2755 = vrot.lane.b32.xlu1 %v2573_v49, %s6821_s20  ;;  %v2576_v38 = vmul.f32 %v6134_v8, %v8316_v25  ;;  %v6347_v52 = vunpack.i.h.bf16 %v9413_v30  ;;  %v6295_v45 = vunpack.i.l.bf16 %v9410_v24  ;;  %v6133_v49 = vunpack.i.l.bf16 %v9411_v7  ;;  %v9414_v24 = vld [vmem:[#allocation111_spill] sm:$0xff] }
 0x2a9   : > { %v3506_v4 = vadd.f32 %v3342_v44, %v2866_v14  ;;  %v6346_v44 = vunpack.i.l.bf16 %v9413_v30  ;;  %v8354_v14 = vpop.f32.mrf.mxu1  ;;  %v669_v30 = vld [vmem:[%s6937_s15 + $0x20] sm:$0xff] }
 0x2aa   : > { %v3340_v34 = vpop.permute.xlu0 %3339  ;;  %v2700_v20 = vpop.permute.xlu1 %2699  ;;  %v2228_v35 = vmul.f32 %v6347_v52, %v7955_v10  ;;  %v2575_v8 = vmul.f32 %v6133_v49, %v8326_v3  ;;  %v3215_v54 = vmul.f32 %v6295_v45, %v8326_v3  ;;  %v9416_v10 = vld [vmem:[#allocation25_spill] sm:$0xff]  ;;  %v701_v45 = vld [vmem:[%s6937_s15 + $0x120] sm:$0xff] }
 0x2ab   : > { %v2865_v6 = vadd.f32 %v2700_v20, %v2225_v58  ;;  %v8357_v7 = vmul.f32 %v9414_v24, %v3506_v4  ;;  %v9415_v58 = vld [vmem:[#allocation110_spill] sm:$0xff]  ;;  %v6139_v20 = vunpack.i.h.bf16 %v9416_v10  ;;  %v2227_v52 = vmul.f32 %v6346_v44, %v7967_v9 }
 0x2ac   : > { %3401 = vrot.lane.b32.xlu1 %v3216_v11, %s6820_s11  ;;  %2761 = vrot.lane.b32.xlu0 %v2576_v38, %s6821_s20  ;;  %v3551_v44 = vmul.f32 1.442695, %v669_v30  ;;  %v9421_v30 = vld [vmem:[#allocation103_spill] sm:$0xff] }
 0x2ad   : > { %v3505_v60 = vadd.f32 %v3340_v34, %v2865_v6  ;;  %v9417_v6 = vld [vmem:[#allocation86_spill] sm:$0xff]  ;;  %v2578_v4 = vmul.f32 %v6139_v20, %v8344_v48 }
 0x2ae   : > { %v3346_v27 = vpop.permute.xlu1 %3345  ;;  %v2706_v15 = vpop.permute.xlu0 %2705  ;;  %v6301_v34 = vunpack.i.h.bf16 %v9417_v6  ;;  %v6300_v9 = vunpack.i.l.bf16 %v9417_v6  ;;  %6700 = vpow2.f32 %v3551_v44 }
 0x2af   : > { %v8360_v11 = vmul.f32 %v9415_v58, %v3505_v60  ;;  %v2868_v38 = vadd.f32 %v2706_v15, %v2228_v35  ;;  %v9418_v60 = vld [vmem:[#allocation8_spill] sm:$0xff]  ;;  %v8373_v58 = vpop.f32.mrf.mxu1 }
 0x2b0   : > { %3399 = vrot.lane.b32.xlu0 %v3215_v54, %s6820_s11  ;;  %2759 = vrot.lane.b32.xlu1 %v2575_v8, %s6821_s20  ;;  %v3218_v49 = vmul.f32 %v6301_v34, %v8344_v48  ;;  %v5947_v24 = vunpack.i.h.bf16 %v9418_v60  ;;  %9419 = vst [vmem:[#allocation82_spill] sm:$0xff] %v8373_v58  ;;  %v6138_v8 = vunpack.i.l.bf16 %v9416_v10  ;;  %v3217_v13 = vmul.f32 %v6300_v9, %v8354_v14 }
 0x2b1   : > { %v3508_v54 = vadd.f32 %v3346_v27, %v2868_v38  ;;  %v5946_v10 = vunpack.i.l.bf16 %v9418_v60  ;;  %v8384_v6 = vpop.f32.mrf.mxu1  ;;  %v718_v60 = vld [vmem:[%s6937_s15 + $0x1a8] sm:$0xff] }
 0x2b2   : > { %v3344_v15 = vpop.permute.xlu0 %3343  ;;  %v2704_v35 = vpop.permute.xlu1 %2703  ;;  %v2230_v20 = vmul.f32 %v5947_v24, %v7979_v46  ;;  %v2577_v50 = vmul.f32 %v6138_v8, %v8354_v14  ;;  %v3615_v8 = vmul.f32 1.442695, %v701_v45  ;;  %v3649_v45 = vmul.f32 1.442695, %v718_v60  ;;  %v9427_v60 = vld [vmem:[#allocation95_spill] sm:$0xff] }
 0x2b3   : > { %v2867_v42 = vadd.f32 %v2704_v35, %v2227_v52  ;;  %v9420_v52 = vld [vmem:[#allocation105_spill] sm:$0xff]  ;;  %v9423_v35 = vld [vmem:[#allocation63_spill] sm:$0xff]  ;;  %v2229_v9 = vmul.f32 %v5946_v10, %v7991_v47  ;;  %v3579_v10 = vmul.f32 1.442695, %v683_v5 }
 0x2b4   : > { %3405 = vrot.lane.b32.xlu1 %v3218_v49, %s6820_s11  ;;  %2765 = vrot.lane.b32.xlu0 %v2578_v4, %s6821_s20  ;;  %v8387_v49 = vmul.f32 %v9420_v52, %v3508_v54  ;;  %v6144_v24 = vunpack.i.h.bf16 %v9423_v35  ;;  %v6143_v47 = vunpack.i.l.bf16 %v9423_v35  ;;  %6702 = vpow2.f32 %v3615_v8  ;;  %v9428_v8 = vld [vmem:[#allocation90_spill] sm:$0xff] }
 0x2b5   : > { %v3507_v34 = vadd.f32 %v3344_v15, %v2867_v42  ;;  %v9422_v42 = vld [vmem:[#allocation72_spill] sm:$0xff]  ;;  %6704 = vpow2.f32 %v3649_v45 }
 0x2b6   : > { %v3350_v27 = vpop.permute.xlu1 %3349  ;;  %v2710_v38 = vpop.permute.xlu0 %2709  ;;  %v6306_v15 = vunpack.i.h.bf16 %v9422_v42  ;;  %6706 = vpow2.f32 %v3579_v10 }
 0x2b7   : > { %v8390_v4 = vmul.f32 %v9421_v30, %v3507_v34  ;;  %v2870_v46 = vadd.f32 %v2710_v38, %v2230_v20  ;;  %v2580_v20 = vmul.f32 %v6144_v24, %v8373_v58  ;;  %v6305_v30 = vunpack.i.l.bf16 %v9422_v42  ;;  %v670_v24 = vld [vmem:[%s6937_s15 + $0x28] sm:$0xff] }
 0x2b8   : > { %3403 = vrot.lane.b32.xlu0 %v3217_v13, %s6820_s11  ;;  %2763 = vrot.lane.b32.xlu1 %v2577_v50, %s6821_s20  ;;  %v3220_v34 = vmul.f32 %v6306_v15, %v8373_v58  ;;  %v8403_v13 = vpop.f32.mrf.mxu1  ;;  %v715_v15 = vld [vmem:[%s6937_s15 + $0x190] sm:$0xff]  ;;  %v2579_v58 = vmul.f32 %v6143_v47, %v8384_v6 }
 0x2b9   : > { %v3510_v50 = vadd.f32 %v3350_v27, %v2870_v46  ;;  %v3219_v27 = vmul.f32 %v6305_v30, %v8384_v6  ;;  %v702_v30 = vld [vmem:[%s6937_s15 + $0x128] sm:$0xff] }
 0x2ba   : > { %v3348_v38 = vpop.permute.xlu0 %3347  ;;  %v2708_v52 = vpop.permute.xlu1 %2707 }
 0x2bb   : > { %v2869_v44 = vadd.f32 %v2708_v52, %v2229_v9  ;;  %v8417_v35 = vpop.f32.mrf.mxu1  ;;  %v8420_v9 = vmul.f32 %v9427_v60, %v3510_v50  ;;  %v667_v50 = vld [vmem:[%s6937_s15 + $0x10] sm:$0xff] }
 0x2bc   : > { %3409 = vrot.lane.b32.xlu1 %v3220_v34, %s6820_s11  ;;  %2769 = vrot.lane.b32.xlu0 %v2580_v20, %s6821_s20  ;;  %9426 = vst [vmem:[#allocation58_spill] sm:$0xff] %v8417_v35  ;;  %v3553_v20 = vmul.f32 1.442695, %v670_v24  ;;  %v9429_v34 = vld [vmem:[#allocation28_spill] sm:$0xff] }
 0x2bd   : > { %v3509_v54 = vadd.f32 %v3348_v38, %v2869_v44  ;;  %v6149_v38 = vunpack.i.h.bf16 %v9429_v34  ;;  %v6148_v52 = vunpack.i.l.bf16 %v9429_v34  ;;  %v3643_v44 = vmul.f32 1.442695, %v715_v15  ;;  %v8443_v34 = vpop.eup %6700 }
 0x2be   : > { %v8413_v46 = vpop.permute.xlu1 %3353  ;;  %v8415_v42 = vpop.permute.xlu0 %2713  ;;  %6708 = vpow2.f32 %v3553_v20  ;;  %v3547_v15 = vmul.f32 1.442695, %v667_v50  ;;  %9433 = vst [vmem:[#allocation22_spill] sm:$0xff] %v8443_v34  ;;  %v716_v50 = vld [vmem:[%s6937_s15 + $0x198] sm:$0xff] }
 0x2bf   : > { %9424 = vst [vmem:[#allocation6_spill] sm:$0xff] %v8413_v46  ;;  %9425 = vst [vmem:[#allocation68_spill] sm:$0xff] %v8415_v42  ;;  %v8423_v5 = vmul.f32 %v9428_v8, %v3509_v54  ;;  %v2582_v45 = vmul.f32 %v6149_v38, %v8403_v13  ;;  %v2581_v47 = vmul.f32 %v6148_v52, %v8417_v35  ;;  %6710 = vpow2.f32 %v3643_v44  ;;  %v684_v8 = vld [vmem:[%s6937_s15 + $0x98] sm:$0xff]  ;;  %v699_v38 = vld [vmem:[%s6937_s15 + $0x110] sm:$0xff] }
 0x2c0   : > { %3407 = vrot.lane.b32.xlu0 %v3219_v27, %s6820_s11  ;;  %2767 = vrot.lane.b32.xlu1 %v2579_v58, %s6821_s20  ;;  %v3617_v27 = vmul.f32 1.442695, %v702_v30  ;;  %v9432_v58 = vld [vmem:[#allocation88_spill] sm:$0xff]  ;;  %v3581_v30 = vmul.f32 1.442695, %v684_v8 }
 0x2c1   : > { %v6392_v10 = vunpack.i.h.bf16 %v9432_v58  ;;  %v3611_v44 = vmul.f32 1.442695, %v699_v38  ;;  %v668_v38 = vld [vmem:[%s6937_s15 + $0x18] sm:$0xff] }
 0x2c2   : > { %v8435_v24 = vpop.permute.xlu0 %3351  ;;  %v8437_v60 = vpop.permute.xlu1 %2711  ;;  %6712 = vpow2.f32 %v3617_v27 }
 0x2c3   : > { %9430 = vst [vmem:[#allocation77_spill] sm:$0xff] %v8435_v24  ;;  %9431 = vst [vmem:[#allocation126_spill] sm:$0xff] %v8437_v60  ;;  %v3222_v52 = vmul.f32 %v6392_v10, %v8403_v13  ;;  %6714 = vpow2.f32 %v3547_v15  ;;  %v681_v10 = vld [vmem:[%s6937_s15 + $0x80] sm:$0xff] }
 0x2c4   : > { %2773 = vrot.lane.b32.xlu0 %v2582_v45, %s6821_s20  ;;  %2771 = vrot.lane.b32.xlu1 %v2581_v47, %s6821_s20  ;;  %v6391_v45 = vunpack.i.l.bf16 %v9432_v58  ;;  %v8455_v47 = vpop.eup %6702  ;;  %6716 = vpow2.f32 %v3581_v30  ;;  %v3645_v58 = vmul.f32 1.442695, %v716_v50  ;;  %v3575_v15 = vmul.f32 1.442695, %v681_v10 }
 0x2c5   : > { %9436 = vst [vmem:[#allocation7_spill] sm:$0xff] %v8455_v47  ;;  %v8463_v8 = vpop.eup %6704  ;;  %6718 = vpow2.f32 %v3611_v44  ;;  %v3549_v30 = vmul.f32 1.442695, %v668_v38  ;;  %v700_v44 = vld [vmem:[%s6937_s15 + $0x118] sm:$0xff] }
 0x2c6   : > { %v8447_v54 = vpop.permute.xlu1 %3357  ;;  %v8449_v20 = vpop.permute.xlu0 %2717  ;;  %v3221_v46 = vmul.f32 %v6391_v45, %v8417_v35  ;;  %9439 = vst [vmem:[#allocation117_spill] sm:$0xff] %v8463_v8  ;;  %v713_v45 = vld [vmem:[%s6937_s15 + $0x180] sm:$0xff]  ;;  %6720 = vpow2.f32 %v3645_v58  ;;  %v9447_v58 = vld [vmem:[#allocation10_spill] sm:$0xff] }
 0x2c7   : > { %9434 = vst [vmem:[#allocation84_spill] sm:$0xff] %v8447_v54  ;;  %9435 = vst [vmem:[#allocation128_spill] sm:$0xff] %v8449_v20  ;;  %6722 = vpow2.f32 %v3575_v15  ;;  %v5957_v38 = vunpack.i.h.bf16 %v9447_v58  ;;  %v697_v20 = vld [vmem:[%s6937_s15 + $0x100] sm:$0xff] }
 0x2c8   : > { %3413 = vrot.lane.b32.xlu0 %v3222_v52, %s6820_s11  ;;  %3693 = vperm.xlu1 %6393, %v8443_v34   ;;  %v8468_v52 = vpop.eup %6706  ;;  %6724 = vpow2.f32 %v3549_v30  ;;  %v5956_v30 = vunpack.i.l.bf16 %v9447_v58  ;;  %v9452_v58 = vld [vmem:[#allocation83_spill] sm:$0xff] }
 0x2c9   : > { %9440 = vst [vmem:[#allocation70_spill] sm:$0xff] %v8468_v52 }
 0x2ca   : > { %v8459_v24 = vpop.permute.xlu0 %3355  ;;  %v8461_v27 = vpop.permute.xlu1 %2715 }
 0x2cb   : > { %9437 = vst [vmem:[#allocation130_spill] sm:$0xff] %v8459_v24  ;;  %9438 = vst [vmem:[#allocation119_spill] sm:$0xff] %v8461_v27  ;;  %v8475_v50 = vpop.eup %6708  ;;  %v3613_v24 = vmul.f32 1.442695, %v700_v44 }
 0x2cc   : > { %3411 = vrot.lane.b32.xlu0 %v3221_v46, %s6820_s11  ;;  %3853 = vperm.xlu1 %6393, %v8455_v47   ;;  %9443 = vst [vmem:[#allocation78_spill] sm:$0xff] %v8475_v50  ;;  %v3639_v46 = vmul.f32 1.442695, %v713_v45  ;;  %v8480_v10 = vpop.eup %6710  ;;  %v665_v47 = vld [vmem:[%s6937_s15] sm:$0xff]  ;;  %v682_v45 = vld [vmem:[%s6937_s15 + $0x88] sm:$0xff] }
 0x2cd   : > { %9444 = vst [vmem:[#allocation111_spill] sm:$0xff] %v8480_v10  ;;  %v3543_v15 = vmul.f32 1.442695, %v665_v47  ;;  %v3607_v47 = vmul.f32 1.442695, %v697_v20 }
 0x2ce   : > { %v8471_v34 = vpop.permute.xlu1 %3361  ;;  %v8473_v60 = vpop.permute.xlu0 %2721  ;;  %6726 = vpow2.f32 %v3639_v46 }
 0x2cf   : > { %9441 = vst [vmem:[#allocation61_spill] sm:$0xff] %v8471_v34  ;;  %9442 = vst [vmem:[#allocation132_spill] sm:$0xff] %v8473_v60  ;;  %v8488_v27 = vpop.eup %6712  ;;  %6728 = vpow2.f32 %v3613_v24 }
 0x2d0   : > { %3938 = vperm.xlu0 %6307, %v8463_v8   ;;  %3763 = vperm.xlu1 %6393, %v8468_v52   ;;  %9448 = vst [vmem:[#allocation86_spill] sm:$0xff] %v8488_v27  ;;  %v8493_v52 = vpop.eup %6714  ;;  %v2238_v8 = vmul.f32 %v5957_v38, %v8072_v33  ;;  %6730 = vpow2.f32 %v3543_v15  ;;  %v2237_v33 = vmul.f32 %v5956_v30, %v8082_v17  ;;  %v714_v38 = vld [vmem:[%s6937_s15 + $0x188] sm:$0xff] }
 0x2d1   : > { %9449 = vst [vmem:[#allocation8_spill] sm:$0xff] %v8493_v52  ;;  %v8498_v60 = vpop.eup %6716  ;;  %v3641_v20 = vmul.f32 1.442695, %v714_v38 }
 0x2d2   : > { %v8483_v42 = vpop.permute.xlu0 %3359  ;;  %v8485_v54 = vpop.permute.xlu1 %2719  ;;  %9450 = vst [vmem:[#allocation105_spill] sm:$0xff] %v8498_v60 }
 0x2d3   : > { %9445 = vst [vmem:[#allocation110_spill] sm:$0xff] %v8483_v42  ;;  %9446 = vst [vmem:[#allocation25_spill] sm:$0xff] %v8485_v54  ;;  %v3577_v54 = vmul.f32 1.442695, %v682_v45  ;;  %v8502_v46 = vpop.eup %6718 }
 0x2d4   : > { %3698 = vperm.xlu0 %6307, %v8475_v50   ;;  %3923 = vperm.xlu1 %6393, %v8480_v10   ;;  %9451 = vst [vmem:[#allocation103_spill] sm:$0xff] %v8502_v46  ;;  %v8507_v45 = vpop.eup %6720 }
 0x2d5   : > { %6732 = vpow2.f32 %v3577_v54  ;;  %9453 = vst [vmem:[#allocation72_spill] sm:$0xff] %v8507_v45  ;;  %v8511_v15 = vpop.eup %6722  ;;  %v9455_v54 = vld [vmem:[#allocation133_spill] sm:$0xff] }
 0x2d6   : > { %v3366_v34 = vpop.permute.xlu1 %3365  ;;  %v2726_v42 = vpop.permute.xlu0 %2725  ;;  %6734 = vpow2.f32 %v3607_v47  ;;  %9454 = vst [vmem:[#allocation63_spill] sm:$0xff] %v8511_v15 }
 0x2d7   : > { %v2878_v44 = vadd.f32 %v2726_v42, %v2238_v8  ;;  %v6362_v42 = vunpack.i.h.bf16 %v9452_v58  ;;  %v8522_v47 = vpop.eup %6724  ;;  %6736 = vpow2.f32 %v3641_v20 }
 0x2d8   : > { %3858 = vperm.xlu0 %6307, %v8488_v27   ;;  %3683 = vperm.xlu1 %6393, %v8493_v52   ;;  %v666_v52 = vld [vmem:[%s6937_s15 + $0x8] sm:$0xff] }
 0x2d9   : > { %v3518_v24 = vadd.f32 %v3366_v34, %v2878_v44  ;;  %v2240_v17 = vmul.f32 %v6362_v42, %v8100_v18  ;;  %v6361_v34 = vunpack.i.l.bf16 %v9452_v58  ;;  %v9456_v44 = vld [vmem:[#allocation131_spill] sm:$0xff]  ;;  %v3545_v18 = vmul.f32 1.442695, %v666_v52  ;;  %v698_v58 = vld [vmem:[%s6937_s15 + $0x108] sm:$0xff]  ;;  %s6822_s15 = smov 1  }
 0x2da   : > { %v3364_v10 = vpop.permute.xlu0 %3363  ;;  %v2724_v50 = vpop.permute.xlu1 %2723  ;;  %v3609_v52 = vmul.f32 1.442695, %v698_v58 }
 0x2db   : > { %v2877_v8 = vadd.f32 %v2724_v50, %v2237_v33  ;;  %v8517_v50 = vmul.f32 %v9455_v54, %v3518_v24  ;;  %v2239_v38 = vmul.f32 %v6361_v34, %v8110_v29  ;;  %6738 = vpow2.f32 %v3545_v18 }
 0x2dc   : > { %3768 = vperm.xlu0 %6307, %v8498_v60   ;;  %3843 = vperm.xlu1 %6393, %v8502_v46   ;;  %v9461_v60 = vld [vmem:[#allocation125_spill] sm:$0xff]  ;;  %6740 = vpow2.f32 %v3609_v52 }
 0x2dd   : > { %v3517_v30 = vadd.f32 %v3364_v10, %v2877_v8  ;;  %v8526_v10 = vpop.eup %6726 }
 0x2de   : > { %v3370_v27 = vpop.permute.xlu1 %3369  ;;  %v2730_v35 = vpop.permute.xlu0 %2729  ;;  %9458 = vst [vmem:[#allocation90_spill] sm:$0xff] %v8526_v10 }
 0x2df   : > { %v8520_v33 = vmul.f32 %v9456_v44, %v3517_v30  ;;  %v2880_v46 = vadd.f32 %v2730_v35, %v2240_v17  ;;  %v9459_v30 = vld [vmem:[#allocation11_spill] sm:$0xff]  ;;  %v8533_v44 = vpop.eup %6728 }
 0x2e0   : > { %3928 = vperm.xlu0 %6307, %v8507_v45   ;;  %3753 = vperm.xlu1 %6393, %v8511_v15   ;;  %v5962_v35 = vunpack.i.h.bf16 %v9459_v30  ;;  %v8537_v20 = vpop.eup %6730  ;;  %v5961_v45 = vunpack.i.l.bf16 %v9459_v30  ;;  %v9463_v30 = vld [vmem:[#allocation85_spill] sm:$0xff] }
 0x2e1   : > { %9457 = vst [vmem:[#allocation95_spill] sm:$0xff] %v8520_v33  ;;  %v3520_v17 = vadd.f32 %v3370_v27, %v2880_v46  ;;  %9460 = vst [vmem:[#allocation28_spill] sm:$0xff] %v8537_v20  ;;  %v9462_v46 = vld [vmem:[#allocation124_spill] sm:$0xff] }
 0x2e2   : > { %v3368_v24 = vpop.permute.xlu0 %3367  ;;  %v2728_v8 = vpop.permute.xlu1 %2727  ;;  %v2242_v29 = vmul.f32 %v5962_v35, %v8128_v19  ;;  %v2241_v58 = vmul.f32 %v5961_v45, %v8138_v63  ;;  %v9464_v63 = vld [vmem:[#allocation116_spill] sm:$0xff] }
 0x2e3   : > { %v2879_v54 = vadd.f32 %v2728_v8, %v2239_v38  ;;  %v4032_v27 = vmul.f32 %v9461_v60, %v3520_v17  ;;  %v8543_v33 = vpop.eup %6732 }
 0x2e4   : > { %3688 = vperm.xlu0 %6307, %v8522_v47   ;;  %3913 = vperm.xlu1 %6393, %v8526_v10   ;;  %v8547_v18 = vpop.eup %6734 }
 0x2e5   : > { %v3519_v34 = vadd.f32 %v3368_v24, %v2879_v54  ;;  %v6367_v54 = vunpack.i.h.bf16 %v9463_v30 }
 0x2e6   : > { %v3374_v42 = vpop.permute.xlu1 %3373  ;;  %v2734_v15 = vpop.permute.xlu0 %2733 }
 0x2e7   : > { %v4031_v38 = vmul.f32 %v9462_v46, %v3519_v34  ;;  %v2882_v8 = vadd.f32 %v2734_v15, %v2242_v29  ;;  %v8553_v15 = vpop.eup %6736  ;;  %v2244_v52 = vmul.f32 %v6367_v54, %v8156_v23 }
 0x2e8   : > { %3848 = vperm.xlu0 %6307, %v8533_v44   ;;  %3673 = vperm.xlu1 %6393, %v8537_v20  }
 0x2e9   : > { %v6439_v19 = vpack.i.bf16 %v4032_v27, %v4031_v38  ;;  %v3522_v60 = vadd.f32 %v3374_v42, %v2882_v8  ;;  %v6366_v27 = vunpack.i.l.bf16 %v9463_v30  ;;  %v9465_v38 = vld [vmem:[#allocation114_spill] sm:$0xff]  ;;  %v9466_v42 = vpack.i.bf16 %v8198_v26, %v8201_v39  ;;  %v8564_v8 = vpop.eup %6738  ;;  %v9467_v30 = vld [vmem:[#allocation12_spill] sm:$0xff] }
 0x2ea   : > { %v3372_v24 = vpop.permute.xlu0 %3371  ;;  %v2732_v35 = vpop.permute.xlu1 %2731  ;;  %v5967_v54 = vunpack.i.h.bf16 %v9467_v30 }
 0x2eb   : > { %v2881_v17 = vadd.f32 %v2732_v35, %v2241_v58  ;;  %v4034_v45 = vmul.f32 %v9464_v63, %v3522_v60  ;;  %v2243_v58 = vmul.f32 %v6366_v27, %v8166_v22  ;;  %v8573_v26 = vpop.eup %6740  ;;  %v9469_v27 = vld [vmem:[#allocation109_spill] sm:$0xff] }
 0x2ec   : > { %3758 = vperm.xlu0 %6307, %v8543_v33   ;;  %3833 = vperm.xlu1 %6393, %v8547_v18  }
 0x2ed   : > { %v3521_v29 = vadd.f32 %v3372_v24, %v2881_v17 }
 0x2ee   : > { %v3378_v34 = vpop.permute.xlu1 %3377  ;;  %v2738_v46 = vpop.permute.xlu0 %2737 }
 0x2ef   : > { %v4033_v20 = vmul.f32 %v9465_v38, %v3521_v29  ;;  %v2884_v10 = vadd.f32 %v2738_v46, %v2244_v52  ;;  %v9468_v29 = vpack.i.bf16 %v8169_v21, %v8172_v36  ;;  %v5966_v46 = vunpack.i.l.bf16 %v9467_v30 }
 0x2f0   : > { %3918 = vperm.xlu0 %6307, %v8553_v15   ;;  %6395 = vrot.lane.b32.xlu1 %v9466_v42, %s6822_s15  ;;  %v9471_v21 = vpack.i.bf16 %v8357_v7, %v8360_v11 }
 0x2f1   : > { %v6444_v23 = vpack.i.bf16 %v4034_v45, %v4033_v20  ;;  %v3524_v60 = vadd.f32 %v3378_v34, %v2884_v10  ;;  %v2246_v20 = vmul.f32 %v5967_v54, %v8183_v2  ;;  %v9470_v10 = vld [vmem:[#allocation108_spill] sm:$0xff]  ;;  %v2245_v38 = vmul.f32 %v5966_v46, %v8195_v51 }
 0x2f2   : > { %v3376_v24 = vpop.permute.xlu0 %3375  ;;  %v2736_v35 = vpop.permute.xlu1 %2735  ;;  %v9473_v54 = vpack.i.bf16 %v8387_v49, %v8390_v4 }
 0x2f3   : > { %v2883_v17 = vadd.f32 %v2736_v35, %v2243_v58  ;;  %v4036_v63 = vmul.f32 %v9469_v27, %v3524_v60  ;;  %v9472_v58 = vld [vmem:[#allocation87_spill] sm:$0xff] }
 0x2f4   : > { %3678 = vperm.xlu0 %6307, %v8564_v8   ;;  %6400 = vrot.lane.b32.xlu1 %v9468_v29, %s6822_s15  ;;  %v6371_v51 = vunpack.i.l.bf16 %v9472_v58  ;;  %v9474_v29 = vld [vmem:[#allocation99_spill] sm:$0xff] }
 0x2f5   : > { %v3523_v39 = vadd.f32 %v3376_v24, %v2883_v17  ;;  %v6372_v24 = vunpack.i.h.bf16 %v9472_v58  ;;  %v9480_v58 = vpack.i.bf16 %v8113_v55, %v8116_v41  ;;  %v9483_v55 = vpack.i.bf16 %v8085_v56, %v8088_v40 }
 0x2f6   : > { %v3382_v52 = vpop.permute.xlu1 %3381  ;;  %v2742_v22 = vpop.permute.xlu0 %2741  ;;  %v2247_v4 = vmul.f32 %v6371_v51, %v8227_v1 }
 0x2f7   : > { %v4035_v34 = vmul.f32 %v9470_v10, %v3523_v39  ;;  %v2886_v45 = vadd.f32 %v2742_v22, %v2246_v20  ;;  %v2248_v7 = vmul.f32 %v6372_v24, %v8215_v28  ;;  %v9475_v20 = vld [vmem:[#allocation102_spill] sm:$0xff] }
 0x2f8   : > { %3838 = vperm.xlu0 %6307, %v8573_v26   ;;  %6405 = vrot.lane.b32.xlu1 %v9471_v21, %s6822_s15 }
 0x2f9   : > { %v6449_v36 = vpack.i.bf16 %v4036_v63, %v4035_v34  ;;  %v3526_v35 = vadd.f32 %v3382_v52, %v2886_v45  ;;  %v9477_v63 = vld [vmem:[#allocation13_spill] sm:$0xff] }
 0x2fa   : > { %v3380_v2 = vpop.permute.xlu0 %3379  ;;  %v2740_v42 = vpop.permute.xlu1 %2739  ;;  %v5972_v10 = vunpack.i.h.bf16 %v9477_v63  ;;  %v5971_v21 = vunpack.i.l.bf16 %v9477_v63 }
 0x2fb   : > { %v2885_v30 = vadd.f32 %v2740_v42, %v2245_v38  ;;  %v4038_v39 = vmul.f32 %v9474_v29, %v3526_v35 }
 0x2fc   : > { %6440 = vrot.lane.b32.xlu0 %v6439_v19, %s6822_s15  ;;  %6410 = vrot.lane.b32.xlu1 %v9473_v54, %s6822_s15  ;;  %v9476_v19 = vpack.i.bf16 %v8420_v9, %v8423_v5  ;;  %v2250_v9 = vmul.f32 %v5972_v10, %v8240_v59  ;;  %v9482_v54 = vld [vmem:[#allocation15_spill] sm:$0xff] }
 0x2fd   : > { %v3525_v60 = vadd.f32 %v3380_v2, %v2885_v30  ;;  %v2249_v2 = vmul.f32 %v5971_v21, %v8250_v16  ;;  %v9481_v16 = vpack.i.bf16 %v8301_v31, %v8304_v53  ;;  %v9484_v31 = vpack.i.bf16 %v8273_v37, %v8276_v62  ;;  %v9487_v37 = vld [vmem:[#allocation127_spill] sm:$0xff] }
 0x2fe   : > { %v3386_v11 = vpop.permute.xlu1 %3385  ;;  %v2746_v17 = vpop.permute.xlu0 %2745 }
 0x2ff   : > { %v4037_v22 = vmul.f32 %v9475_v20, %v3525_v60  ;;  %v2888_v52 = vadd.f32 %v2746_v17, %v2248_v7  ;;  %v5977_v60 = vunpack.i.h.bf16 %v9482_v54  ;;  %v5976_v17 = vunpack.i.l.bf16 %v9482_v54  ;;  %v9485_v20 = vld [vmem:[#allocation91_spill] sm:$0xff] }
 0x300   : > { %6445 = vrot.lane.b32.xlu0 %v6444_v23, %s6822_s15  ;;  %6415 = vrot.lane.b32.xlu1 %v9476_v19, %s6822_s15  ;;  %v9478_v23 = vpack.i.bf16 %v8141_v12, %v8144_v0 }
 0x301   : > { %v6454_v49 = vpack.i.bf16 %v4038_v39, %v4037_v22  ;;  %v8601_v28 = vadd.f32 %v3386_v11, %v2888_v52  ;;  %v2254_v41 = vmul.f32 %v5977_v60, %v8288_v43  ;;  %v2253_v53 = vmul.f32 %v5976_v17, %v8298_v32 }
 0x302   : > { %v3384_v46 = vpop.permute.xlu0 %3383  ;;  %v2744_v27 = vpop.permute.xlu1 %2743  ;;  %v6382_v22 = vunpack.i.h.bf16 %v9485_v20 }
 0x303   : > { %v2887_v34 = vadd.f32 %v2744_v27, %v2247_v4  ;;  %v6381_v4 = vunpack.i.l.bf16 %v9485_v20 }
 0x304   : > { %6450 = vrot.lane.b32.xlu0 %v6449_v36, %s6822_s15  ;;  %6420 = vrot.lane.b32.xlu1 %v9478_v23, %s6822_s15  ;;  %v9479_v36 = vpack.i.bf16 %v8329_v57, %v8332_v61  ;;  %v2256_v43 = vmul.f32 %v6382_v22, %v8316_v25  ;;  %v9493_v22 = vld [vmem:[#allocation113_spill] sm:$0xff] }
 0x305   : > { %v8610_v5 = vadd.f32 %v3384_v46, %v2887_v34  ;;  %v9486_v46 = vld [vmem:[#allocation129_spill] sm:$0xff]  ;;  %v2255_v10 = vmul.f32 %v6381_v4, %v8326_v3 }
 0x306   : > { %v3390_v45 = vpop.permute.xlu1 %3389  ;;  %v2750_v1 = vpop.permute.xlu0 %2749 }
 0x307   : > { %v2890_v38 = vadd.f32 %v2750_v1, %v2250_v9  ;;  %v9488_v9 = vld [vmem:[#allocation17_spill] sm:$0xff] }
 0x308   : > { %6455 = vrot.lane.b32.xlu0 %v6454_v49, %s6822_s15  ;;  %6425 = vrot.lane.b32.xlu1 %v9479_v36, %s6822_s15  ;;  %v5982_v25 = vunpack.i.h.bf16 %v9488_v9 }
 0x309   : > { %v8619_v12 = vadd.f32 %v3390_v45, %v2890_v38 }
 0x30a   : > { %v3388_v0 = vpop.permute.xlu0 %3387  ;;  %v2748_v59 = vpop.permute.xlu1 %2747  ;;  %v2258_v38 = vmul.f32 %v5982_v25, %v8344_v48 }
 0x30b   : > { %v2889_v42 = vadd.f32 %v2748_v59, %v2249_v2  ;;  %v9489_v59 = vld [vmem:[#allocation123_spill] sm:$0xff] }
 0x30c   : > { %6430 = vrot.lane.b32.xlu1 %v9480_v58, %s6822_s15  ;;  %v9490_v58 = vld [vmem:[#allocation120_spill] sm:$0xff] }
 0x30d   : > { %v8625_v24 = vadd.f32 %v3388_v0, %v2889_v42  ;;  %v5981_v0 = vunpack.i.l.bf16 %v9488_v9  ;;  %v9496_v9 = vld [vmem:[#allocation107_spill] sm:$0xff] }
 0x30e   : > { %v8627_v35 = vpop.permute.xlu1 %3393  ;;  %v8629_v30 = vpop.permute.xlu0 %2753 }
 0x30f   : > { %v2257_v3 = vmul.f32 %v5981_v0, %v8354_v14 }
 0x310   : > { %6435 = vrot.lane.b32.xlu1 %v9481_v16, %s6822_s15 }
 0x312   : > { %v8635_v57 = vpop.permute.xlu0 %3391  ;;  %v8637_v61 = vpop.permute.xlu1 %2751 }
 0x314   : > { %6485 = vrot.lane.b32.xlu1 %v9483_v55, %s6822_s15 }
 0x316   : > { %v3398_v7 = vpop.permute.xlu1 %3397  ;;  %v2758_v11 = vpop.permute.xlu0 %2757 }
 0x317   : > { %v2894_v51 = vadd.f32 %v2758_v11, %v2254_v41 }
 0x318   : > { %6495 = vrot.lane.b32.xlu1 %v9484_v31, %s6822_s15  ;;  %v9492_v31 = vld [vmem:[#allocation82_spill] sm:$0xff] }
 0x319   : > { %v3534_v56 = vadd.f32 %v3398_v7, %v2894_v51  ;;  %v9491_v7 = vld [vmem:[#allocation93_spill] sm:$0xff] }
 0x31a   : > { %v3396_v29 = vpop.permute.xlu0 %3395  ;;  %v2756_v39 = vpop.permute.xlu1 %2755  ;;  %v6387_v11 = vunpack.i.h.bf16 %v9491_v7  ;;  %v6386_v20 = vunpack.i.l.bf16 %v9491_v7 }
 0x31b   : > { %v2893_v40 = vadd.f32 %v2756_v39, %v2253_v53  ;;  %v8655_v27 = vmul.f32 %v9486_v46, %v3534_v56 }
 0x31c   : > { %v2260_v53 = vmul.f32 %v6387_v11, %v9492_v31  ;;  %v9501_v11 = vld [vmem:[#allocation92_spill] sm:$0xff] }
 0x31d   : > { %v3533_v52 = vadd.f32 %v3396_v29, %v2893_v40  ;;  %v9494_v40 = vld [vmem:[#allocation112_spill] sm:$0xff] }
 0x31e   : > { %v3402_v19 = vpop.permute.xlu1 %3401  ;;  %v2762_v49 = vpop.permute.xlu0 %2761 }
 0x31f   : > { %v8658_v62 = vmul.f32 %v9487_v37, %v3533_v52  ;;  %v2896_v32 = vadd.f32 %v2762_v49, %v2256_v43 }
 0x321   : > { %v6479_v63 = vpack.i.bf16 %v8655_v27, %v8658_v62  ;;  %v3536_v45 = vadd.f32 %v3402_v19, %v2896_v32  ;;  %v2259_v19 = vmul.f32 %v6386_v20, %v8384_v6 }
 0x322   : > { %v3400_v34 = vpop.permute.xlu0 %3399  ;;  %v2760_v23 = vpop.permute.xlu1 %2759 }
 0x323   : > { %v2895_v1 = vadd.f32 %v2760_v23, %v2255_v10  ;;  %v4048_v42 = vmul.f32 %v9489_v59, %v3536_v45  ;;  %v9497_v45 = vld [vmem:[#allocation106_spill] sm:$0xff] }
 0x324   : > { %v9498_v59 = vld [vmem:[#allocation58_spill] sm:$0xff] }
 0x325   : > { %v3535_v21 = vadd.f32 %v3400_v34, %v2895_v1  ;;  %v9495_v34 = vld [vmem:[#allocation20_spill] sm:$0xff] }
 0x326   : > { %v3406_v36 = vpop.permute.xlu1 %3405  ;;  %v2766_v2 = vpop.permute.xlu0 %2765  ;;  %v5987_v23 = vunpack.i.h.bf16 %v9495_v34 }
 0x327   : > { %v4047_v16 = vmul.f32 %v9490_v58, %v3535_v21  ;;  %v2898_v54 = vadd.f32 %v2766_v2, %v2258_v38  ;;  %v5986_v21 = vunpack.i.l.bf16 %v9495_v34 }
 0x329   : > { %v6459_v60 = vpack.i.bf16 %v4048_v42, %v4047_v16  ;;  %v3538_v17 = vadd.f32 %v3406_v36, %v2898_v54  ;;  %v2262_v36 = vmul.f32 %v5987_v23, %v8403_v13  ;;  %v2261_v42 = vmul.f32 %v5986_v21, %v9498_v59  ;;  %v9502_v13 = vld [vmem:[#allocation19_spill] sm:$0xff]  ;;  %v9509_v23 = vld [vmem:[#allocation150_spill] sm:$0xff] }
 0x32a   : > { %v3404_v55 = vpop.permute.xlu0 %3403  ;;  %v2764_v41 = vpop.permute.xlu1 %2763 }
 0x32b   : > { %v2897_v51 = vadd.f32 %v2764_v41, %v2257_v3  ;;  %6460 = vrot.lane.b32.xlu0 %v6459_v60, %s6822_s15  ;;  %v4050_v56 = vmul.f32 %v9493_v22, %v3538_v17  ;;  %v9499_v3 = vld [vmem:[#allocation89_spill] sm:$0xff]  ;;  %v9500_v41 = vld [vmem:[#allocation94_spill] sm:$0xff]  ;;  %v9504_v22 = vld [vmem:[#allocation4_spill] sm:$0xff] }
 0x32d   : > { %v3537_v48 = vadd.f32 %v3404_v55, %v2897_v51  ;;  %v6376_v55 = vunpack.i.l.bf16 %v9499_v3  ;;  %v6377_v51 = vunpack.i.h.bf16 %v9499_v3  ;;  %v9519_v3 = vld [vmem:[#allocation149_spill] sm:$0xff] }
 0x32e   : > { %v3410_v29 = vpop.permute.xlu1 %3409  ;;  %v2770_v39 = vpop.permute.xlu0 %2769 }
 0x32f   : > { %v4049_v52 = vmul.f32 %v9494_v40, %v3537_v48  ;;  %v2900_v14 = vadd.f32 %v2770_v39, %v2260_v53  ;;  %v2251_v48 = vmul.f32 %v6376_v55, %v9502_v13  ;;  %v5911_v40 = vunpack.i.l.bf16 %v9504_v22  ;;  %v9521_v13 = vld [vmem:[#allocation122_spill] sm:$0xff] }
 0x331   : > { %v6464_v43 = vpack.i.bf16 %v4050_v56, %v4049_v52  ;;  %v3540_v46 = vadd.f32 %v3410_v29, %v2900_v14  ;;  %v9503_v29 = vld [vmem:[#allocation76_spill] sm:$0xff]  ;;  %v2891_v20 = vadd.f32 %v8637_v61, %v2251_v48  ;;  %v5912_v56 = vunpack.i.h.bf16 %v9504_v22  ;;  %v9505_v14 = vld [vmem:[#allocation101_spill] sm:$0xff] }
 0x332   : > { %v3408_v49 = vpop.permute.xlu0 %3407  ;;  %v2768_v4 = vpop.permute.xlu1 %2767  ;;  %v2252_v39 = vmul.f32 %v6377_v51, %v9503_v29  ;;  %v9508_v61 = vld [vmem:[#allocation81_spill] sm:$0xff] }
 0x333   : > { %v2899_v37 = vadd.f32 %v2768_v4, %v2259_v19  ;;  %6465 = vrot.lane.b32.xlu0 %v6464_v43, %s6822_s15  ;;  %v4052_v25 = vmul.f32 %v9496_v9, %v3540_v46  ;;  %v2204_v43 = vmul.f32 %v5912_v56, %v9505_v14  ;;  %v3531_v46 = vadd.f32 %v8635_v57, %v2891_v20  ;;  %v9511_v57 = vld [vmem:[#allocation152_spill] sm:$0xff]  ;;  %v9523_v20 = vld [vmem:[#allocation54_spill] sm:$0xff]  ;;  %v9525_v14 = vld [vmem:[#allocation61_spill] sm:$0xff] }
 0x334   : > { %v2892_v52 = vadd.f32 %v8629_v30, %v2252_v39  ;;  %v6356_v34 = vunpack.i.l.bf16 %v9508_v61  ;;  %v9522_v39 = vld [vmem:[#allocation156_spill] sm:$0xff]  ;;  %v9524_v56 = vld [vmem:[#allocation110_spill] sm:$0xff] }
 0x335   : > { %v3539_v32 = vadd.f32 %v3408_v49, %v2899_v37  ;;  %v9506_v49 = vld [vmem:[#allocation104_spill] sm:$0xff]  ;;  %v9507_v37 = vld [vmem:[#allocation147_spill] sm:$0xff] }
 0x336   : > { %v2774_v10 = vpop.permute.xlu0 %2773  ;;  %v2772_v6 = vpop.permute.xlu1 %2771  ;;  %v2203_v4 = vmul.f32 %v5911_v40, %v9506_v49  ;;  %v3532_v9 = vadd.f32 %v8627_v35, %v2892_v52 }
 0x337   : > { %v4051_v1 = vmul.f32 %v9497_v45, %v3539_v32  ;;  %v2902_v0 = vadd.f32 %v2774_v10, %v2262_v36  ;;  %v2901_v58 = vadd.f32 %v2772_v6, %v2261_v42  ;;  %v2844_v32 = vadd.f32 %v9507_v37, %v2204_v43  ;;  %v9512_v36 = vld [vmem:[#allocation134_spill] sm:$0xff] }
 0x338   : > { %v6357_v10 = vunpack.i.h.bf16 %v9508_v61  ;;  %v2843_v30 = vadd.f32 %v9509_v23, %v2203_v4  ;;  %v4043_v6 = vmul.f32 %v9512_v36, %v3531_v46  ;;  %v9516_v42 = vld [vmem:[#allocation146_spill] sm:$0xff] }
 0x339   : > { %v6469_v38 = vpack.i.bf16 %v4052_v25, %v4051_v1  ;;  %v9510_v1 = vld [vmem:[#allocation151_spill] sm:$0xff]  ;;  %v3484_v35 = vadd.f32 %v9516_v42, %v2844_v32  ;;  %v9526_v32 = vld [vmem:[#allocation74_spill] sm:$0xff] }
 0x33a   : > { %v3414_v2 = vpop.permute.xlu0 %3413  ;;  %v2236_v21 = vmul.f32 %v6357_v10, %v9510_v1  ;;  %v3483_v55 = vadd.f32 %v9519_v3, %v2843_v30  ;;  %v6316_v61 = vunpack.i.l.bf16 %v9526_v32  ;;  %v9527_v10 = vld [vmem:[#allocation65_spill] sm:$0xff]  ;;  %v9528_v30 = vld [vmem:[#allocation155_spill] sm:$0xff]  ;;  %v9535_v3 = vld [vmem:[#allocation148_spill] sm:$0xff] }
 0x33b   : > { %6470 = vrot.lane.b32.xlu0 %v6469_v38, %s6822_s15  ;;  %v3542_v16 = vadd.f32 %v3414_v2, %v2902_v0  ;;  %v2235_v38 = vmul.f32 %v6356_v34, %v9511_v57  ;;  %v9513_v0 = vld [vmem:[#allocation5_spill] sm:$0xff] }
 0x33c   : > { %v5932_v27 = vunpack.i.h.bf16 %v9513_v0  ;;  %v5931_v62 = vunpack.i.l.bf16 %v9513_v0 }
 0x33d   : > { %v4054_v7 = vmul.f32 %v9500_v41, %v3542_v16 }
 0x33e   : > { %v3412_v54 = vpop.permute.xlu0 %3411  ;;  %v2217_v48 = vmul.f32 %v5931_v62, %v9521_v13  ;;  %v9537_v13 = vld [vmem:[#allocation140_spill] sm:$0xff] }
 0x33f   : > { %v3541_v60 = vadd.f32 %v3412_v54, %v2901_v58  ;;  %v9517_v58 = vld [vmem:[#allocation132_spill] sm:$0xff]  ;;  %v9518_v54 = vld [vmem:[#allocation25_spill] sm:$0xff] }
 0x340   : > { %v2876_v16 = vadd.f32 %v9517_v58, %v2236_v21  ;;  %v2857_v22 = vadd.f32 %v9523_v20, %v2217_v48  ;;  %v9540_v20 = vld [vmem:[#allocation143_spill] sm:$0xff] }
 0x341   : > { %v4053_v17 = vmul.f32 %v9501_v11, %v3541_v60  ;;  %v2875_v60 = vadd.f32 %v9518_v54, %v2235_v38  ;;  %v9530_v38 = vld [vmem:[#allocation100_spill] sm:$0xff]  ;;  %v9534_v54 = vld [vmem:[#allocation145_spill] sm:$0xff] }
 0x342   : > { %v3516_v43 = vadd.f32 %v9525_v14, %v2876_v16  ;;  %v3497_v34 = vadd.f32 %v9527_v10, %v2857_v22  ;;  %v2201_v36 = vmul.f32 %v6316_v61, %v9530_v38  ;;  %v9545_v61 = vld [vmem:[#allocation130_spill] sm:$0xff]  ;;  %v9547_v38 = vld [vmem:[#allocation73_spill] sm:$0xff] }
 0x343   : > { %v6474_v31 = vpack.i.bf16 %v4054_v7, %v4053_v17  ;;  %v3694_v53 = vpop.permute.xlu1 %3693  ;;  %v9520_v7 = vld [vmem:[#allocation121_spill] sm:$0xff]  ;;  %v3515_v40 = vadd.f32 %v9524_v56, %v2875_v60 }
 0x344   : > { %v2218_v11 = vmul.f32 %v5932_v27, %v9520_v7  ;;  %v9532_v27 = vld [vmem:[#allocation9_spill] sm:$0xff]  ;;  %v9536_v7 = vld [vmem:[#allocation75_spill] sm:$0xff] }
 0x345   : > { %6475 = vrot.lane.b32.xlu0 %v6474_v31, %s6822_s15  ;;  %v3995_v31 = vmul.f32 %v3694_v53, %v3483_v55  ;;  %v6317_v53 = vunpack.i.h.bf16 %v9526_v32  ;;  %v5952_v62 = vunpack.i.h.bf16 %v9532_v27  ;;  %v9544_v32 = vld [vmem:[#allocation80_spill] sm:$0xff] }
 0x347   : > { %v3854_v19 = vpop.permute.xlu1 %3853  ;;  %v2234_v60 = vmul.f32 %v5952_v62, %v9534_v54  ;;  %v9550_v62 = vld [vmem:[#allocation96_spill] sm:$0xff] }
 0x348   : > { %v4027_v46 = vmul.f32 %v3854_v19, %v3515_v40  ;;  %v9541_v40 = vld [vmem:[#allocation115_spill] sm:$0xff] }
 0x349   : > { %6480 = vrot.lane.b32.xlu0 %v6479_v63, %s6822_s15  ;;  %v9514_v63 = vld [vmem:[#allocation95_spill] sm:$0xff] }
 0x34a   : > { %v9515_v59 = vpack.i.bf16 %v8517_v50, %v9514_v63  ;;  %v2858_v50 = vadd.f32 %v9522_v39, %v2218_v11  ;;  %v5951_v63 = vunpack.i.l.bf16 %v9532_v27  ;;  %v6332_v11 = vunpack.i.h.bf16 %v9536_v7  ;;  %v9539_v39 = vld [vmem:[#allocation119_spill] sm:$0xff] }
 0x34b   : > { %v3939_v25 = vpop.permute.xlu0 %3938  ;;  %v3764_v45 = vpop.permute.xlu1 %3763 }
 0x34c   : > { %v4044_v2 = vmul.f32 %v3939_v25, %v3532_v9  ;;  %v3498_v9 = vadd.f32 %v9528_v30, %v2858_v50  ;;  %v9529_v25 = vld [vmem:[#allocation98_spill] sm:$0xff]  ;;  %v2233_v55 = vmul.f32 %v5951_v63, %v9535_v3 }
 0x34d   : > { %6490 = vrot.lane.b32.xlu0 %v9515_v59, %s6822_s15  ;;  %v2202_v1 = vmul.f32 %v6317_v53, %v9529_v25  ;;  %v9533_v59 = vld [vmem:[#allocation144_spill] sm:$0xff] }
 0x34e   : > { %v6499_v41 = vpack.i.bf16 %v4044_v2, %v4043_v6  ;;  %v4009_v6 = vmul.f32 %v3764_v45, %v3497_v34  ;;  %v9531_v2 = vld [vmem:[#allocation141_spill] sm:$0xff]  ;;  %v2841_v42 = vadd.f32 %v9533_v59, %v2201_v36  ;;  %v2873_v50 = vadd.f32 %v9539_v39, %v2233_v55  ;;  %v9553_v55 = vld [vmem:[#allocation79_spill] sm:$0xff]  ;;  %v9556_v39 = vld [vmem:[#allocation142_spill] sm:$0xff] }
 0x34f   : > { %v3699_v17 = vpop.permute.xlu0 %3698  ;;  %v3924_v51 = vpop.permute.xlu1 %3923  ;;  %v2842_v0 = vadd.f32 %v9531_v2, %v2202_v1  ;;  %v6311_v36 = vunpack.i.l.bf16 %v9547_v38 }
 0x350   : > { %v3996_v29 = vmul.f32 %v3699_v17, %v3484_v35  ;;  %v4041_v45 = vmul.f32 %v3924_v51, %v8625_v24  ;;  %v6331_v17 = vunpack.i.l.bf16 %v9536_v7  ;;  %v3481_v22 = vadd.f32 %v9540_v20, %v2841_v42  ;;  %v9554_v7 = vld [vmem:[#allocation138_spill] sm:$0xff] }
 0x351   : > { %6500 = vrot.lane.b32.xlu0 %v6499_v41, %s6822_s15  ;;  %v3482_v48 = vadd.f32 %v9537_v13, %v2842_v0  ;;  %v3513_v10 = vadd.f32 %v9545_v61, %v2873_v50  ;;  %v9549_v0 = vld [vmem:[#allocation153_spill] sm:$0xff] }
 0x352   : > { %v6504_v52 = vpack.i.bf16 %v3996_v29, %v3995_v31  ;;  %v9538_v31 = vld [vmem:[#allocation128_spill] sm:$0xff] }
 0x353   : > { %v3859_v49 = vpop.permute.xlu0 %3858  ;;  %v3684_v4 = vpop.permute.xlu1 %3683  ;;  %v2874_v29 = vadd.f32 %v9538_v31, %v2234_v60  ;;  %v9552_v60 = vld [vmem:[#allocation136_spill] sm:$0xff]  ;;  %v9555_v31 = vld [vmem:[#allocation139_spill] sm:$0xff] }
 0x354   : > { %v4028_v37 = vmul.f32 %v3859_v49, %v3516_v43  ;;  %6505 = vrot.lane.b32.xlu1 %v6504_v52, %s6822_s15  ;;  %v2216_v52 = vmul.f32 %v6332_v11, %v9541_v40  ;;  %v3993_v43 = vmul.f32 %v3684_v4, %v3481_v22  ;;  %v6312_v4 = vunpack.i.h.bf16 %v9547_v38  ;;  %v9557_v22 = vld [vmem:[#allocation135_spill] sm:$0xff]  ;;  %v6592_v40 = vld [vmem:[%s6949_s21 + $0x4] ss:$16 sps:$4 sm:$0xff]  }
 0x355   : > { %4528 = vmatprep.mubr.bf16.mxu1 %v6592_v40  ;;  %v9571_v40 = vld [vmem:[#allocation45_spill] sm:$0xff] }
 0x356   : > { %v6509_v23 = vpack.i.bf16 %v4028_v37, %v4027_v46  ;;  %v9543_v46 = vld [vmem:[#allocation154_spill] sm:$0xff]  ;;  %v2200_v63 = vmul.f32 %v6312_v4, %v9550_v62 }
 0x357   : > { %v3769_v21 = vpop.permute.xlu0 %3768  ;;  %v3844_v57 = vpop.permute.xlu1 %3843  ;;  %v2856_v37 = vadd.f32 %v9543_v46, %v2216_v52  ;;  %v9558_v52 = vld [vmem:[#allocation68_spill] sm:$0xff] }
 0x358   : > { %v4010_v19 = vmul.f32 %v3769_v21, %v3498_v9  ;;  %6510 = vrot.lane.b32.xlu0 %v6509_v23, %s6822_s15  ;;  %v9546_v23 = vld [vmem:[#allocation84_spill] sm:$0xff]  ;;  %v4025_v1 = vmul.f32 %v3844_v57, %v3513_v10  ;;  %v2840_v3 = vadd.f32 %v9552_v60, %v2200_v63  ;;  %v9565_v60 = vld [vmem:[#allocation26_spill] sm:$0xff] }
 0x359   : > { %v3514_v30 = vadd.f32 %v9546_v23, %v2874_v29  ;;  %v3496_v27 = vadd.f32 %v9549_v0, %v2856_v37  ;;  %v9563_v0 = vld [vmem:[#allocation33_spill] sm:$0xff] }
 0x35a   : > { %v6514_v35 = vpack.i.bf16 %v4010_v19, %v4009_v6  ;;  %v9548_v6 = vld [vmem:[#allocation14_spill] sm:$0xff] }
 0x35b   : > { %v3929_v58 = vpop.permute.xlu0 %3928  ;;  %v3754_v16 = vpop.permute.xlu1 %3753 }
 0x35c   : > { %v4042_v41 = vmul.f32 %v3929_v58, %v8619_v12  ;;  %6515 = vrot.lane.b32.xlu1 %v6514_v35, %s6822_s15  ;;  %v9542_v12 = vld [vmem:[#allocation118_spill] sm:$0xff]  ;;  %v9551_v35 = vld [vmem:[#allocation97_spill] sm:$0xff] }
 0x35d   : > { %v2215_v14 = vmul.f32 %v6331_v17, %v9542_v12  ;;  %v2199_v58 = vmul.f32 %v6311_v36, %v9551_v35  ;;  %v9559_v12 = vld [vmem:[#allocation126_spill] sm:$0xff] }
 0x35e   : > { %v6519_v56 = vpack.i.bf16 %v4042_v41, %v4041_v45  ;;  %v6352_v45 = vunpack.i.h.bf16 %v9553_v55  ;;  %v6351_v41 = vunpack.i.l.bf16 %v9553_v55  ;;  %v9566_v55 = vld [vmem:[#allocation16_spill] sm:$0xff] }
 0x35f   : > { %v3689_v24 = vpop.permute.xlu0 %3688  ;;  %v3914_v51 = vpop.permute.xlu1 %3913  ;;  %v2855_v53 = vadd.f32 %v9544_v32, %v2215_v14  ;;  %v2839_v11 = vadd.f32 %v9554_v7, %v2199_v58 }
 0x360   : > { %v3994_v49 = vmul.f32 %v3689_v24, %v3482_v48  ;;  %6520 = vrot.lane.b32.xlu0 %v6519_v56, %s6822_s15  ;;  %v2232_v29 = vmul.f32 %v6352_v45, %v9555_v31  ;;  %v2231_v50 = vmul.f32 %v6351_v41, %v9556_v39  ;;  %v3480_v56 = vadd.f32 %v9557_v22, %v2840_v3  ;;  %v9567_v41 = vld [vmem:[#allocation37_spill] sm:$0xff] }
 0x361   : > { %v3495_v19 = vadd.f32 %v9548_v6, %v2855_v53 }
 0x362   : > { %v6524_v34 = vpack.i.bf16 %v3994_v49, %v3993_v43  ;;  %v2872_v24 = vadd.f32 %v9558_v52, %v2232_v29  ;;  %v2871_v14 = vadd.f32 %v9559_v12, %v2231_v50  ;;  %v9560_v43 = vld [vmem:[#allocation137_spill] sm:$0xff]  ;;  %v9569_v29 = vld [vmem:[#allocation27_spill] sm:$0xff] }
 0x363   : > { %v3849_v9 = vpop.permute.xlu0 %3848  ;;  %v3674_v25 = vpop.permute.xlu1 %3673  ;;  %v4007_v54 = vmul.f32 %v3754_v16, %v3495_v19  ;;  %v4039_v16 = vmul.f32 %v3914_v51, %v8610_v5  ;;  %v3479_v49 = vadd.f32 %v9560_v43, %v2839_v11  ;;  %v9561_v5 = vld [vmem:[#allocation77_spill] sm:$0xff]  ;;  %v9568_v11 = vld [vmem:[#allocation23_spill] sm:$0xff] }
 0x364   : > { %v4026_v21 = vmul.f32 %v3849_v9, %v3514_v30  ;;  %6525 = vrot.lane.b32.xlu1 %v6524_v34, %s6822_s15  ;;  %v3511_v51 = vadd.f32 %v9561_v5, %v2871_v14  ;;  %v9562_v34 = vld [vmem:[#allocation6_spill] sm:$0xff]  ;;  %v9570_v50 = vld [vmem:[#allocation41_spill] sm:$0xff] }
 0x365   : > { %v3991_v53 = vmul.f32 %v3674_v25, %v3479_v49  ;;  %v3512_v23 = vadd.f32 %v9562_v34, %v2872_v24  ;;  %v9572_v24 = vld [vmem:[#allocation32_spill] sm:$0xff]  ;;  %v9575_v5 = vld [vmem:[#allocation53_spill] sm:$0xff] }
 0x366   : > { %v6529_v2 = vpack.i.bf16 %v4026_v21, %v4025_v1 }
 0x367   : > { %v3759_v59 = vpop.permute.xlu0 %3758  ;;  %v3834_v42 = vpop.permute.xlu1 %3833 }
 0x368   : > { %v4008_v57 = vmul.f32 %v3759_v59, %v3496_v27  ;;  %6530 = vrot.lane.b32.xlu0 %v6529_v2, %s6822_s15  ;;  %v4023_v1 = vmul.f32 %v3834_v42, %v3511_v51  ;;  %v9564_v42 = vld [vmem:[#allocation18_spill] sm:$0xff] }
 0x36a   : > { %v6534_v17 = vpack.i.bf16 %v4008_v57, %v4007_v54 }
 0x36b   : > { %v3919_v13 = vpop.permute.xlu0 %3918  ;;  %v6396_v48 = vpop.permute.xlu1 %6395 }
 0x36c   : > { %v4040_v20 = vmul.f32 %v3919_v13, %v8601_v28  ;;  %6535 = vrot.lane.b32.xlu1 %v6534_v17, %s6822_s15  ;;  %v6595_v28 = vld [vmem:[%s6949_s21 + $0xc] ss:$16 sps:$4 sm:$0xff]   ;;  %v6398_v36 = vunpack.i.h.bf16 %v6396_v48  ;;  %v6397_v25 = vunpack.i.l.bf16 %v6396_v48 }
 0x36d   : > { %4593 = vmatprep.mubr.bf16.mxu0 %v6595_v28 }
 0x36e   : > { %v6539_v46 = vpack.i.bf16 %v4040_v20, %v4039_v16  ;;  %v4327_v27 = vsel %vm4311_vm3, %v9563_v0, %v6398_v36  ;;  %v4326_v35 = vsel %vm4311_vm3, %v9564_v42, %v6397_v25  ;;  %v9578_v36 = vld [vmem:[#allocation59_spill] sm:$0xff] }
 0x36f   : > { %v3679_v37 = vpop.permute.xlu0 %3678  ;;  %v6401_v32 = vpop.permute.xlu1 %6400  ;;  %v4383_v31 = vpack.c.bf16 %v4327_v27, %v4326_v35  ;;  %v9579_v27 = vld [vmem:[#allocation62_spill] sm:$0xff] }
 0x370   : > { %v3992_v61 = vmul.f32 %v3679_v37, %v3480_v56  ;;  %6540 = vrot.lane.b32.xlu0 %v6539_v46, %s6822_s15  ;;  %v6403_v62 = vunpack.i.h.bf16 %v6401_v32  ;;  %v6402_v58 = vunpack.i.l.bf16 %v6401_v32  ;;  %v9573_v37 = vld [vmem:[#allocation36_spill] sm:$0xff] }
 0x372   : > { %v6544_v10 = vpack.i.bf16 %v3992_v61, %v3991_v53  ;;  %v4325_v39 = vsel %vm4311_vm3, %v9569_v29, %v6403_v62  ;;  %v4324_v16 = vsel %vm4311_vm3, %v9570_v50, %v6402_v58  ;;  %v9574_v53 = vld [vmem:[#allocation49_spill] sm:$0xff] }
 0x373   : > { %v3839_v30 = vpop.permute.xlu0 %3838  ;;  %v6406_v9 = vpop.permute.xlu1 %6405  ;;  %v4382_v43 = vpack.c.bf16 %v4325_v39, %v4324_v16 }
 0x374   : > { %v4024_v21 = vmul.f32 %v3839_v30, %v3512_v23  ;;  %6545 = vrot.lane.b32.xlu1 %v6544_v10, %s6822_s15  ;;  %v6408_v54 = vunpack.i.h.bf16 %v6406_v9  ;;  %v6407_v57 = vunpack.i.l.bf16 %v6406_v9  ;;  %v9576_v10 = vld [vmem:[#allocation40_spill] sm:$0xff] }
 0x376   : > { %v6549_v38 = vpack.i.bf16 %v4024_v21, %v4023_v1  ;;  %v4338_v52 = vsel %vm4311_vm3, %v9571_v40, %v6407_v57  ;;  %v4339_v12 = vsel %vm4311_vm3, %v9572_v24, %v6408_v54  ;;  %v9581_v57 = vld [vmem:[#allocation52_spill] sm:$0xff] }
 0x377   : > { %v6411_v4 = vpop.permute.xlu1 %6410  ;;  %v4389_v28 = vpack.c.bf16 %v4339_v12, %v4338_v52 }
 0x378   : > { %6550 = vrot.lane.b32.xlu0 %v6549_v38, %s6822_s15  ;;  %v6413_v6 = vunpack.i.h.bf16 %v6411_v4  ;;  %v6412_v19 = vunpack.i.l.bf16 %v6411_v4  ;;  %v9577_v38 = vld [vmem:[#allocation44_spill] sm:$0xff] }
 0x37a   : > { %v4340_v7 = vsel %vm4311_vm3, %v9567_v41, %v6412_v19  ;;  %v4341_v17 = vsel %vm4311_vm3, %v9568_v11, %v6413_v6 }
 0x37b   : > { %v6416_v2 = vpop.permute.xlu1 %6415  ;;  %v4390_v56 = vpack.c.bf16 %v4341_v17, %v4340_v7  ;;  %v6441_v17 = vpop.permute.xlu0 %6440 }
 0x37c   : > { %v6418_v63 = vunpack.i.h.bf16 %v6416_v2  ;;  %v6417_v59 = vunpack.i.l.bf16 %v6416_v2 }
 0x37e   : > { %v4342_v3 = vsel %vm4311_vm3, %v9565_v60, %v6417_v59  ;;  %v4343_v45 = vsel %vm4311_vm3, %v9566_v55, %v6418_v63  ;;  %v9580_v63 = vld [vmem:[#allocation48_spill] sm:$0xff] }
 0x37f   : > { %v6421_v13 = vpop.permute.xlu1 %6420  ;;  %v4391_v48 = vpack.c.bf16 %v4343_v45, %v4342_v3  ;;  %v9582_v3 = vld [vmem:[#allocation66_spill] sm:$0xff]  ;;  %v6446_v50 = vpop.permute.xlu0 %6445 }
 0x380   : > { %v6423_v20 = vunpack.i.h.bf16 %v6421_v13  ;;  %v6422_v22 = vunpack.i.l.bf16 %v6421_v13  ;;  %v9583_v13 = vld [vmem:[#allocation69_spill] sm:$0xff] }
 0x381   : > { %5591 = vmatprep.subr.bf16.mxu1 %v4391_v48 }
 0x382   : > { %5592 = vmatpush3.bf16.msra.mxu1 %v4383_v31  ;;  %v4323_v32 = vsel %vm4311_vm3, %v9573_v37, %v6423_v20  ;;  %v4322_v61 = vsel %vm4311_vm3, %v9574_v53, %v6422_v22  ;;  %v9584_v31 = vld [vmem:[#allocation57_spill] sm:$0xff]  ;;  %v9585_v53 = vld [vmem:[#allocation35_spill] sm:$0xff] }
 0x383   : > { %v6426_v14 = vpop.permute.xlu1 %6425  ;;  %5593 = vmatprep.subr.bf16.mxu1 %v4390_v56  ;;  %v4381_v30 = vpack.c.bf16 %v4323_v32, %v4322_v61  ;;  %v6451_v16 = vpop.permute.xlu0 %6450 }
 0x384   : > { %v6428_v49 = vunpack.i.h.bf16 %v6426_v14  ;;  %v6427_v46 = vunpack.i.l.bf16 %v6426_v14 }
 0x386   : > { %5594 = vmatpush3.bf16.msra.mxu1 %v4382_v43  ;;  %v4336_v51 = vsel %vm4311_vm3, %v9575_v5, %v6427_v46  ;;  %v4337_v34 = vsel %vm4311_vm3, %v9576_v10, %v6428_v49  ;;  %v6453_v49 = vunpack.i.h.bf16 %v6451_v16  ;;  %v6452_v46 = vunpack.i.l.bf16 %v6451_v16 }
 0x387   : > { %v6431_v23 = vpop.permute.xlu1 %6430  ;;  %5595 = vmatprep.subr.bf16.mxu1 %v4389_v28  ;;  %v4388_v21 = vpack.c.bf16 %v4337_v34, %v4336_v51  ;;  %v6456_v20 = vpop.permute.xlu0 %6455  ;;  %v9586_v28 = vld [vmem:[#allocation21_spill] sm:$0xff] }
 0x388   : > { %v6433_v9 = vunpack.i.h.bf16 %v6431_v23  ;;  %v6432_v1 = vunpack.i.l.bf16 %v6431_v23  ;;  %v6458_v52 = vunpack.i.h.bf16 %v6456_v20  ;;  %v6457_v24 = vunpack.i.l.bf16 %v6456_v20  ;;  %v9587_v34 = vld [vmem:[#allocation29_spill] sm:$0xff]  ;;  %v9598_v20 = vld [vmem:[#allocation42_spill] sm:$0xff] }
 0x38a   : > { %v4321_v4 = vsel %vm4311_vm3, %v9577_v38, %v6433_v9  ;;  %v4320_v25 = vsel %vm4311_vm3, %v9578_v36, %v6432_v1  ;;  %5596 = vmatpush3.bf16.msra.mxu1 %v4381_v30  ;;  %v4359_v61 = vsel %vm4311_vm3, %v9585_v53, %v6458_v52  ;;  %v4358_v5 = vsel %vm4311_vm3, %v9586_v28, %v6457_v24  ;;  %v9588_v30 = vld [vmem:[#allocation31_spill] sm:$0xff]  ;;  %v9590_v38 = vld [vmem:[#allocation24_spill] sm:$0xff] }
 0x38b   : > { %v4380_v6 = vpack.c.bf16 %v4321_v4, %v4320_v25  ;;  %v6436_v19 = vpop.permute.xlu1 %6435  ;;  %5597 = vmatprep.subr.bf16.mxu1 %v4388_v21  ;;  %v9589_v1 = vld [vmem:[#allocation39_spill] sm:$0xff]  ;;  %v9600_v52 = vld [vmem:[#allocation60_spill] sm:$0xff] }
 0x38c   : > { %v6438_v2 = vunpack.i.h.bf16 %v6436_v19  ;;  %v6437_v0 = vunpack.i.l.bf16 %v6436_v19  ;;  %v6447_v19 = vunpack.i.l.bf16 %v6446_v50 }
 0x38e   : > { %5598 = vmatpush3.bf16.msra.mxu1 %v4380_v6  ;;  %v4334_v62 = vsel %vm4311_vm3, %v9579_v27, %v6437_v0  ;;  %v4335_v59 = vsel %vm4311_vm3, %v9580_v63, %v6438_v2  ;;  %v6448_v6 = vunpack.i.h.bf16 %v6446_v50  ;;  %v4399_v2 = vpack.c.bf16 %v4359_v61, %v4358_v5  ;;  %v9591_v27 = vld [vmem:[#allocation30_spill] sm:$0xff]  ;;  %v9592_v63 = vld [vmem:[#allocation43_spill] sm:$0xff] }
 0x38f   : > { %v6486_v42 = vpop.permute.xlu1 %6485  ;;  %v4387_v35 = vpack.c.bf16 %v4335_v59, %v4334_v62  ;;  %v4357_v62 = vsel %vm4311_vm3, %v9591_v27, %v6453_v49  ;;  %v4356_v59 = vsel %vm4311_vm3, %v9592_v63, %v6452_v46  ;;  %v9601_v46 = vld [vmem:[#allocation64_spill] sm:$0xff]  ;;  %v9608_v27 = vld [vmem:[#allocation117_spill] sm:$0xff] }
 0x390   : > { %v6488_v58 = vunpack.i.h.bf16 %v6486_v42  ;;  %v6487_v54 = vunpack.i.l.bf16 %v6486_v42 }
 0x391   : > { %5599 = vmatprep.subr.bf16.mxu1 %v4387_v35 }
 0x392   : > { %v4319_v60 = vsel %vm4311_vm3, %v9581_v57, %v6488_v58  ;;  %v4318_v55 = vsel %vm4311_vm3, %v9582_v3, %v6487_v54  ;;  %v9593_v58 = vld [vmem:[#allocation47_spill] sm:$0xff]  ;;  %v9594_v57 = vld [vmem:[#allocation34_spill] sm:$0xff]  ;;  %v6443_v3 = vunpack.i.h.bf16 %v6441_v17 }
 0x393   : > { %v4379_v45 = vpack.c.bf16 %v4319_v60, %v4318_v55  ;;  %v6496_v41 = vpop.permute.xlu1 %6495  ;;  %v6442_v55 = vunpack.i.l.bf16 %v6441_v17 }
 0x394   : > { %v6498_v7 = vunpack.i.h.bf16 %v6496_v41  ;;  %v6497_v11 = vunpack.i.l.bf16 %v6496_v41  ;;  %v9595_v41 = vld [vmem:[#allocation38_spill] sm:$0xff] }
 0x395   : > { %5600 = vmatpush3.bf16.msra.mxu1 %v4379_v45  ;;  %v4352_v24 = vsel %vm4311_vm3, %v9600_v52, %v6442_v55 }
 0x396   : > { %v4332_v48 = vsel %vm4311_vm3, %v9583_v13, %v6497_v11  ;;  %v4333_v29 = vsel %vm4311_vm3, %v9584_v31, %v6498_v7  ;;  %v4355_v7 = vsel %vm4311_vm3, %v9595_v41, %v6448_v6  ;;  %v9596_v11 = vld [vmem:[#allocation51_spill] sm:$0xff]  ;;  %v9597_v31 = vld [vmem:[#allocation56_spill] sm:$0xff] }
 0x397   : > { %v4386_v39 = vpack.c.bf16 %v4333_v29, %v4332_v48  ;;  %v4354_v13 = vsel %vm4311_vm3, %v9596_v11, %v6447_v19  ;;  %v4398_v48 = vpack.c.bf16 %v4357_v62, %v4356_v59 }
 0x399   : > { %5601 = vmatprep.subr.bf16.mxu1 %v4386_v39 }
 0x39d   : > { %v6461_v22 = vpop.permute.xlu0 %6460 }
 0x39e   : > { %v6462_v0 = vunpack.i.l.bf16 %v6461_v22  ;;  %v6463_v42 = vunpack.i.h.bf16 %v6461_v22 }
 0x3a0   : > { %v4368_v29 = vsel %vm4311_vm3, %v9597_v31, %v6462_v0  ;;  %v4369_v22 = vsel %vm4311_vm3, %v9598_v20, %v6463_v42 }
 0x3a5   : > { %v6466_v56 = vpop.permute.xlu0 %6465 }
 0x3a6   : > { %v6468_v51 = vunpack.i.h.bf16 %v6466_v56  ;;  %v6467_v10 = vunpack.i.l.bf16 %v6466_v56  ;;  %v9599_v56 = vld [vmem:[#allocation46_spill] sm:$0xff] }
 0x3a8   : > { %v4370_v54 = vsel %vm4311_vm3, %v9593_v58, %v6467_v10  ;;  %v4371_v60 = vsel %vm4311_vm3, %v9594_v57, %v6468_v51 }
 0x3a9   : > { %v4405_v16 = vpack.c.bf16 %v4371_v60, %v4370_v54  ;;  %v9610_v54 = vld [vmem:[#allocation7_spill] sm:$0xff] }
 0x3ad   : > { %v6471_v40 = vpop.permute.xlu0 %6470 }
 0x3ae   : > { %v6473_v12 = vunpack.i.h.bf16 %v6471_v40  ;;  %v6472_v14 = vunpack.i.l.bf16 %v6471_v40  ;;  %v4353_v40 = vsel %vm4311_vm3, %v9599_v56, %v6443_v3 }
 0x3b0   : > { %v4372_v21 = vsel %vm4311_vm3, %v9589_v1, %v6472_v14  ;;  %v4373_v4 = vsel %vm4311_vm3, %v9590_v38, %v6473_v12  ;;  %v4397_v12 = vpack.c.bf16 %v4355_v7, %v4354_v13  ;;  %v4404_v14 = vpack.c.bf16 %v4369_v22, %v4368_v29  ;;  %v9604_v1 = vld [vmem:[#allocation67_spill] sm:$0xff]  ;;  %v9605_v38 = vld [vmem:[#allocation78_spill] sm:$0xff]  ;;  %v9612_v13 = vld [vmem:[#allocation105_spill] sm:$0xff] }
 0x3b1   : > { %v4406_v35 = vpack.c.bf16 %v4373_v4, %v4372_v21  ;;  %v9611_v7 = vld [vmem:[#allocation70_spill] sm:$0xff]  ;;  %v9614_v22 = vld [vmem:[#allocation72_spill] sm:$0xff] }
 0x3b7   : > { %v6476_v43 = vpop.permute.xlu0 %6475 }
 0x3b8   : > { %v6478_v37 = vunpack.i.h.bf16 %v6476_v43  ;;  %v6477_v32 = vunpack.i.l.bf16 %v6476_v43 }
 0x3ba   : > { %v4374_v23 = vsel %vm4311_vm3, %v9587_v34, %v6477_v32  ;;  %v4375_v9 = vsel %vm4311_vm3, %v9588_v30, %v6478_v37  ;;  %v9602_v32 = vld [vmem:[#allocation50_spill] sm:$0xff]  ;;  %v4396_v34 = vpack.c.bf16 %v4353_v40, %v4352_v24  ;;  %v9603_v30 = vld [vmem:[#allocation55_spill] sm:$0xff] }
 0x3bb   : > { %v6481_v36 = vpop.permute.xlu0 %6480  ;;  %v4407_v25 = vpack.c.bf16 %v4375_v9, %v4374_v23 }
 0x3bc   : > { %v6483_v39 = vunpack.i.h.bf16 %v6481_v36  ;;  %v6482_v50 = vunpack.i.l.bf16 %v6481_v36  ;;  %v9606_v36 = vld [vmem:[#allocation22_spill] sm:$0xff] }
 0x3bd   : > { %5631 = vmatprep.subr.bf16.mxu0 %v4407_v25 }
 0x3be   : > { %5632 = vmatpush3.bf16.msra.mxu0 %v4399_v2  ;;  %v4366_v37 = vsel %vm4311_vm3, %v9601_v46, %v6482_v50  ;;  %v4367_v53 = vsel %vm4311_vm3, %v9602_v32, %v6483_v39  ;;  %v9607_v2 = vld [vmem:[#allocation71_spill] sm:$0xff] }
 0x3bf   : > { %v6491_v45 = vpop.permute.xlu0 %6490  ;;  %5633 = vmatprep.subr.bf16.mxu0 %v4406_v35  ;;  %v4403_v23 = vpack.c.bf16 %v4367_v53, %v4366_v37  ;;  %v9609_v35 = vld [vmem:[#allocation86_spill] sm:$0xff] }
 0x3c0   : > { %v6493_v43 = vunpack.i.h.bf16 %v6491_v45  ;;  %v6492_v49 = vunpack.i.l.bf16 %v6491_v45 }
 0x3c2   : > { %5634 = vmatpush3.bf16.msra.mxu0 %v4398_v48  ;;  %v4351_v9 = vsel %vm4311_vm3, %v9603_v30, %v6493_v43  ;;  %v4350_v21 = vsel %vm4311_vm3, %v9604_v1, %v6492_v49 }
 0x3c3   : > { %v6501_v17 = vpop.permute.xlu0 %6500  ;;  %5635 = vmatprep.subr.bf16.mxu0 %v4405_v16  ;;  %v4395_v42 = vpack.c.bf16 %v4351_v9, %v4350_v21  ;;  %v9613_v16 = vld [vmem:[#allocation111_spill] sm:$0xff] }
 0x3c4   : > { %v6503_v61 = vunpack.i.h.bf16 %v6501_v17  ;;  %v6502_v28 = vunpack.i.l.bf16 %v6501_v17 }
 0x3c6   : > { %v6506_v5 = vpop.permute.xlu1 %6505  ;;  %5636 = vmatpush3.bf16.msra.mxu0 %v4397_v12  ;;  %v4364_v0 = vsel %vm4311_vm3, %v9607_v2, %v6502_v28  ;;  %v4365_v62 = vsel %vm4311_vm3, %v9608_v27, %v6503_v61  ;;  %v9616_v61 = vld [vmem:[#allocation103_spill] sm:$0xff] }
 0x3c7   : > { %v6508_v51 = vunpack.i.h.bf16 %v6506_v5  ;;  %v6507_v10 = vunpack.i.l.bf16 %v6506_v5  ;;  %5637 = vmatprep.subr.bf16.mxu0 %v4404_v14  ;;  %v4402_v60 = vpack.c.bf16 %v4365_v62, %v4364_v0  ;;  %v9615_v14 = vld [vmem:[#allocation8_spill] sm:$0xff] }
 0x3c8   : > { %v9619_v0 = vld [vmem:[#allocation28_spill] sm:$0xff] }
 0x3c9   : > { %v4317_v4 = vsel %vm4311_vm3, %v9605_v38, %v6508_v51  ;;  %v4316_v25 = vsel %vm4311_vm3, %v9606_v36, %v6507_v10 }
 0x3ca   : > { %v4378_v6 = vpack.c.bf16 %v4317_v4, %v4316_v25  ;;  %v6511_v19 = vpop.permute.xlu0 %6510  ;;  %5638 = vmatpush3.bf16.msra.mxu0 %v4396_v34 }
 0x3cb   : > { %v6513_v63 = vunpack.i.h.bf16 %v6511_v19  ;;  %v6512_v59 = vunpack.i.l.bf16 %v6511_v19  ;;  %5639 = vmatprep.subr.bf16.mxu0 %v4403_v23 }
 0x3cc   : > { %5602 = vmatpush3.bf16.msra.mxu1 %v4378_v6 }
 0x3cd   : > { %v4349_v58 = vsel %vm4311_vm3, %v9609_v35, %v6513_v63  ;;  %v4348_v57 = vsel %vm4311_vm3, %v9610_v54, %v6512_v59  ;;  %v6596_v35 = vld [vmem:[%s6949_s21 + $0x24] ss:$16 sps:$4 sm:$0xff]  }
 0x3ce   : > { %v6516_v3 = vpop.permute.xlu1 %6515  ;;  %5640 = vmatpush3.bf16.msra.mxu0 %v4395_v42  ;;  %v4394_v41 = vpack.c.bf16 %v4349_v58, %v4348_v57  ;;  %v6593_v57 = vld [vmem:[%s6949_s21 + $0x8] ss:$16 sps:$4 sm:$0xff]  }
 0x3cf   : > { %v6518_v55 = vunpack.i.h.bf16 %v6516_v3  ;;  %v6517_v45 = vunpack.i.l.bf16 %v6516_v3  ;;  %5641 = vmatprep.subr.bf16.mxu0 %v4402_v60  ;;  %v6598_v60 = vld [vmem:[%s6949_s21 + $0x2c] ss:$16 sps:$4 sm:$0xff]   ;;  %v6600_v3 = vld [vmem:[%s6949_s21 + $0x20] ss:$16 sps:$4 sm:$0xff]  }
 0x3d1   : > { %v4330_v11 = vsel %vm4311_vm3, %v9611_v7, %v6517_v45  ;;  %v4331_v48 = vsel %vm4311_vm3, %v9612_v13, %v6518_v55  ;;  %v6602_v55 = vld [vmem:[%s6949_s21 + $0x44] ss:$16 sps:$4 sm:$0xff]   ;;  %v6606_v45 = vld [vmem:[%s6949_s21 + $0x40] ss:$16 sps:$4 sm:$0xff]   ;;  %v6607_v7 = vld [vmem:[%s6949_s21 + $0x48] ss:$16 sps:$4 sm:$0xff]  }
 0x3d2   : > { %v6521_v31 = vpop.permute.xlu0 %6520  ;;  %5642 = vmatpush3.bf16.msra.mxu0 %v4394_v41  ;;  %v4385_v29 = vpack.c.bf16 %v4331_v48, %v4330_v11  ;;  %v6608_v41 = vld [vmem:[%s6949_s21 + $0x64] ss:$16 sps:$4 sm:$0xff]   ;;  %v6610_v11 = vld [vmem:[%s6949_s21 + $0x6c] ss:$16 sps:$4 sm:$0xff]   ;;  %v6612_v13 = vld [vmem:[%s6949_s21 + $0x60] ss:$16 sps:$4 sm:$0xff]  }
 0x3d3   : > { %v6523_v39 = vunpack.i.h.bf16 %v6521_v31  ;;  %v6522_v50 = vunpack.i.l.bf16 %v6521_v31  ;;  %v6613_v48 = vld [vmem:[%s6949_s21 + $0x68] ss:$16 sps:$4 sm:$0xff]  }
 0x3d4   : > { %5603 = vmatprep.subr.bf16.mxu1 %v4385_v29 }
 0x3d5   : > { %v4362_v20 = vsel %vm4311_vm3, %v9613_v16, %v6522_v50  ;;  %v4363_v17 = vsel %vm4311_vm3, %v9614_v22, %v6523_v39 }
 0x3d6   : > { %v6526_v56 = vpop.permute.xlu1 %6525  ;;  %v4401_v40 = vpack.c.bf16 %v4363_v17, %v4362_v20 }
 0x3d7   : > { %v6528_v52 = vunpack.i.h.bf16 %v6526_v56  ;;  %v6527_v24 = vunpack.i.l.bf16 %v6526_v56  ;;  %v4408_v56 = vld [vmem:[#allocation2] sm:$0xff] }
 0x3d8   : > { %5643 = vmatprep.subr.bf16.mxu0 %v4401_v40 }
 0x3d9   : > { %v4315_v12 = vsel %vm4311_vm3, %v8522_v47, %v6528_v52  ;;  %v4314_v43 = vsel %vm4311_vm3, %v9615_v14, %v6527_v24  ;;  %v9617_v47 = vld [vmem:[#allocation63_spill] sm:$0xff] }
 0x3da   : > { %v4377_v49 = vpack.c.bf16 %v4315_v12, %v4314_v43  ;;  %v6531_v46 = vpop.permute.xlu0 %6530 }
 0x3db   : > { %v6533_v37 = vunpack.i.h.bf16 %v6531_v46  ;;  %v6532_v32 = vunpack.i.l.bf16 %v6531_v46 }
 0x3dc   : > { %5604 = vmatpush3.bf16.msra.mxu1 %v4377_v49 }
 0x3dd   : > { %v4347_v53 = vsel %vm4311_vm3, %v8533_v44, %v6533_v37  ;;  %v4346_v28 = vsel %vm4311_vm3, %v9616_v61, %v6532_v32  ;;  %v9618_v44 = vld [vmem:[#allocation90_spill] sm:$0xff]  ;;  %v4409_v37 = vld [vmem:[#allocation2 + $0x8] sm:$0xff] }
 0x3de   : > { %v4393_v5 = vpack.c.bf16 %v4347_v53, %v4346_v28  ;;  %v6536_v51 = vpop.permute.xlu1 %6535 }
 0x3df   : > { %v6538_v10 = vunpack.i.h.bf16 %v6536_v51  ;;  %v6537_v34 = vunpack.i.l.bf16 %v6536_v51 }
 0x3e0   : > { %5644 = vmatpush3.bf16.msra.mxu0 %v4393_v5 }
 0x3e1   : > { %v4328_v23 = vsel %vm4311_vm3, %v9617_v47, %v6537_v34  ;;  %v4329_v30 = vsel %vm4311_vm3, %v8543_v33, %v6538_v10  ;;  %v4410_v47 = vld [vmem:[#allocation2 + $0x10] sm:$0xff] }
 0x3e2   : > { %v6541_v9 = vpop.permute.xlu0 %6540  ;;  %v4384_v1 = vpack.c.bf16 %v4329_v30, %v4328_v23 }
 0x3e3   : > { %v6543_v21 = vunpack.i.h.bf16 %v6541_v9  ;;  %v6542_v38 = vunpack.i.l.bf16 %v6541_v9 }
 0x3e4   : > { %5605 = vmatprep.subr.bf16.mxu1 %v4384_v1 }
 0x3e5   : > { %v4360_v4 = vsel %vm4311_vm3, %v9618_v44, %v6542_v38  ;;  %v4361_v36 = vsel %vm4311_vm3, %v8553_v15, %v6543_v21  ;;  %v6590_v15 = vld [vmem:[%s6949_s21] ss:$16 sps:$4 sm:$0xff]  }
 0x3e6   : > { %v6546_v25 = vpop.permute.xlu1 %6545  ;;  %v4400_v6 = vpack.c.bf16 %v4361_v36, %v4360_v4  ;;  %v4411_v36 = vld [vmem:[#allocation2 + $0x18] sm:$0xff] }
 0x3e7   : > { %v6548_v19 = vunpack.i.h.bf16 %v6546_v25  ;;  %v6547_v2 = vunpack.i.l.bf16 %v6546_v25 }
 0x3e8   : > { %5645 = vmatprep.subr.bf16.mxu0 %v4400_v6 }
 0x3e9   : > { %v4313_v33 = vsel %vm4311_vm3, %v8564_v8, %v6548_v19  ;;  %v4312_v27 = vsel %vm4311_vm3, %v9619_v0, %v6547_v2 }
 0x3ea   : > { %v4376_v62 = vpack.c.bf16 %v4313_v33, %v4312_v27  ;;  %v6551_v63 = vpop.permute.xlu0 %6550 }
 0x3eb   : > { %v6553_v59 = vunpack.i.h.bf16 %v6551_v63  ;;  %v6552_v42 = vunpack.i.l.bf16 %v6551_v63  ;;  %v4412_v63 = vld [vmem:[#allocation2 + $0x20] sm:$0xff] }
 0x3ec   : > { %5606 = vmatpush3.bf16.msra.mxu1 %v4376_v62 }
 0x3ed   : > { %v4345_v58 = vsel %vm4311_vm3, %v8573_v26, %v6553_v59  ;;  %v4344_v8 = vsel %vm4311_vm3, %v8547_v18, %v6552_v42  ;;  %v6601_v26 = vld [vmem:[%s6949_s21 + $0x28] ss:$16 sps:$4 sm:$0xff]   ;;  %v6604_v18 = vld [vmem:[%s6949_s21 + $0x4c] ss:$16 sps:$4 sm:$0xff]   ;;  %s6824_s21 = smov (!%p5316_p10), 1  }
 0x3ee   : > { %v4392_v54 = vpack.c.bf16 %v4345_v58, %v4344_v8 }
 0x3ef   : > { %4529 = vmatmul.mubr.bf16.vlgmr.msra.gmra.mxu1 %v6590_v15 }
 0x3f0   : > { %5646 = vmatpush3.bf16.msra.mxu0 %v4392_v54  ;;  %4536 = vmatprep.mubr.bf16.mxu1 %v6596_v35 }
 0x3f3   : > { %4594 = vmatmul.mubr.bf16.vlgmr.msra.gmra.mxu0 %v6593_v57 }
 0x3f4   : > { %4601 = vmatprep.mubr.bf16.mxu0 %v6598_v60  ;;  %v4413_v60 = vld [vmem:[#allocation2 + $0x28] sm:$0xff] }
 0x3f7   : > { %4537 = vmatmul.mubr.bf16.gmra.mxu1 %v6600_v3 }
 0x3f8   : > { %4544 = vmatprep.mubr.bf16.mxu1 %v6602_v55 }
 0x3fb   : > { %4602 = vmatmul.mubr.bf16.gmra.mxu0 %v6601_v26 }
 0x3fc   : > { %4609 = vmatprep.mubr.bf16.mxu0 %v6604_v18 }
 0x3ff   : > { %4545 = vmatmul.mubr.bf16.gmra.mxu1 %v6606_v45 }
 0x400   : > { %4552 = vmatprep.mubr.bf16.mxu1 %v6608_v41 }
 0x403   : > { %4610 = vmatmul.mubr.bf16.gmra.mxu0 %v6607_v7 }
 0x404   : > { %4617 = vmatprep.mubr.bf16.mxu0 %v6610_v11  ;;  %v4414_v11 = vld [vmem:[#allocation2 + $0x30] sm:$0xff] }
 0x407   : > { %4553 = vmatmul.mubr.bf16.gmra.mxu1 %v6612_v13 }
 0x40b   : > { %4618 = vmatmul.mubr.bf16.gmra.mxu0 %v6613_v48 }
 0x4af   : > { %v5607_v31 = vpop.f32.mrf.mxu1 }
 0x4b1   : > { %v5608_v29 = vpop.f32.mrf.mxu1 }
 0x4b2   : > { %v5609_v22 = vadd.f32 %v5608_v29, %v5607_v31 }
 0x4b3   : > { %v5647_v39 = vpop.f32.mrf.mxu0  ;;  %v5610_v50 = vpop.f32.mrf.mxu1 }
 0x4b5   : > { %v5648_v16 = vpop.f32.mrf.mxu0  ;;  %v5611_v20 = vpop.f32.mrf.mxu1 }
 0x4b6   : > { %v5649_v17 = vadd.f32 %v5648_v16, %v5647_v39  ;;  %v5612_v49 = vadd.f32 %v5611_v20, %v5610_v50  ;;  %v4415_v20 = vld [vmem:[#allocation2 + $0x38] sm:$0xff] }
 0x4b7   : > { %v5650_v40 = vpop.f32.mrf.mxu0  ;;  %v5613_v52 = vpop.f32.mrf.mxu1 }
 0x4b8   : > { %v4596_v24 = vadd.f32 %v5649_v17, %v5609_v22 }
 0x4b9   : > { %v5651_v12 = vpop.f32.mrf.mxu0  ;;  %v5614_v14 = vpop.f32.mrf.mxu1 }
 0x4ba   : > { %v4626_v43 = vadd.f32 %v4596_v24, %v4408_v56  ;;  %v5652_v46 = vadd.f32 %v5651_v12, %v5650_v40  ;;  %v5615_v10 = vadd.f32 %v5614_v14, %v5613_v52 }
 0x4bb   : > { %v5653_v32 = vpop.f32.mrf.mxu0  ;;  %v5616_v53 = vpop.f32.mrf.mxu1 }
 0x4bc   : > { %4635 = vst.msk [vmem:[#allocation2] sm:$0xff] %vm4634_vm4, %v4626_v43  ;;  %v4599_v61 = vadd.f32 %v5652_v46, %v5612_v49 }
 0x4bd   : > { %v5654_v28 = vpop.f32.mrf.mxu0  ;;  %v5617_v5 = vpop.f32.mrf.mxu1 }
 0x4be   : > { %v4627_v51 = vadd.f32 %v4599_v61, %v4409_v37  ;;  %v5655_v34 = vadd.f32 %v5654_v28, %v5653_v32  ;;  %v5618_v44 = vadd.f32 %v5617_v5, %v5616_v53 }
 0x4bf   : > { %v5656_v23 = vpop.f32.mrf.mxu0  ;;  %v5619_v30 = vpop.f32.mrf.mxu1 }
 0x4c0   : > { %4636 = vst.msk [vmem:[#allocation2 + $0x8] sm:$0xff] %vm4634_vm4, %v4627_v51  ;;  %v4604_v9 = vadd.f32 %v5655_v34, %v5615_v10 }
 0x4c1   : > { %v5657_v1 = vpop.f32.mrf.mxu0  ;;  %v5620_v21 = vpop.f32.mrf.mxu1 }
 0x4c2   : > { %v4628_v38 = vadd.f32 %v4604_v9, %v4410_v47  ;;  %v5658_v4 = vadd.f32 %v5657_v1, %v5656_v23  ;;  %v5621_v27 = vadd.f32 %v5620_v21, %v5619_v30 }
 0x4c3   : > { %v5659_v25 = vpop.f32.mrf.mxu0  ;;  %v5622_v6 = vpop.f32.mrf.mxu1 }
 0x4c4   : > { %4637 = vst.msk [vmem:[#allocation2 + $0x10] sm:$0xff] %vm4634_vm4, %v4628_v38  ;;  %v4607_v19 = vadd.f32 %v5658_v4, %v5618_v44 }
 0x4c5   : > { %v5660_v2 = vpop.f32.mrf.mxu0  ;;  %v5623_v33 = vpop.f32.mrf.mxu1 }
 0x4c6   : > { %v4629_v0 = vadd.f32 %v4607_v19, %v4411_v36  ;;  %v5661_v62 = vadd.f32 %v5660_v2, %v5659_v25  ;;  %v5624_v54 = vadd.f32 %v5623_v33, %v5622_v6 }
 0x4c7   : > { %v5662_v59 = vpop.f32.mrf.mxu0  ;;  %v5625_v42 = vpop.f32.mrf.mxu1 }
 0x4c8   : > { %4638 = vst.msk [vmem:[#allocation2 + $0x18] sm:$0xff] %vm4634_vm4, %v4629_v0  ;;  %v4612_v15 = vadd.f32 %v5661_v62, %v5621_v27 }
 0x4c9   : > { %v5663_v35 = vpop.f32.mrf.mxu0  ;;  %v5626_v58 = vpop.f32.mrf.mxu1 }
 0x4ca   : > { %v4630_v8 = vadd.f32 %v4612_v15, %v4412_v63  ;;  %v5664_v57 = vadd.f32 %v5663_v35, %v5662_v59  ;;  %v5627_v41 = vadd.f32 %v5626_v58, %v5625_v42 }
 0x4cb   : > { %v5665_v3 = vpop.f32.mrf.mxu0  ;;  %v5628_v55 = vpop.f32.mrf.mxu1 }
 0x4cc   : > { %4639 = vst.msk [vmem:[#allocation2 + $0x20] sm:$0xff] %vm4634_vm4, %v4630_v8  ;;  %v4615_v26 = vadd.f32 %v5664_v57, %v5624_v54 }
 0x4cd   : > { %v5666_v18 = vpop.f32.mrf.mxu0  ;;  %v5629_v48 = vpop.f32.mrf.mxu1 }
 0x4ce   : > { %v4631_v45 = vadd.f32 %v4615_v26, %v4413_v60  ;;  %v5667_v7 = vadd.f32 %v5666_v18, %v5665_v3  ;;  %v5630_v50 = vadd.f32 %v5629_v48, %v5628_v55 }
 0x4cf   : > { %v5668_v13 = vpop.f32.mrf.mxu0 }
 0x4d0   : > { %4640 = vst.msk [vmem:[#allocation2 + $0x28] sm:$0xff] %vm4634_vm4, %v4631_v45  ;;  %v4620_v31 = vadd.f32 %v5667_v7, %v5627_v41 }
 0x4d1   : > { %v5669_v29 = vpop.f32.mrf.mxu0 }
 0x4d2   : > { %v4632_v39 = vadd.f32 %v4620_v31, %v4414_v11  ;;  %v5670_v16 = vadd.f32 %v5669_v29, %v5668_v13 }
 0x4d4   : > { %4641 = vst.msk [vmem:[#allocation2 + $0x30] sm:$0xff] %vm4634_vm4, %v4632_v39  ;;  %v4623_v22 = vadd.f32 %v5670_v16, %v5630_v50  ;;  %4646 = sbr.rel (%p5316_p10) target bundleno = 2061 (0x80d), region = 87 }
 0x4d6   : > { %v4633_v17 = vadd.f32 %v4623_v22, %v4415_v20 }
 0x4d8   : > { %4642 = vst.msk [vmem:[#allocation2 + $0x38] sm:$0xff] %vm4634_vm4, %v4633_v17 }
 0x4d9   : > { %v8936_v56 = vld [vmem:[#allocation2] sm:$0xff]  ;;  %v8940_v52 = vld [vmem:[#allocation2 + $0x8] sm:$0xff]  ;;  %v6823_v24 = vmov 0   ;;  %v8959_v28 = vld [vmem:[#allocation2 + $0x10] sm:$0xff] }
 0x4da   : > { %v8938_v40 = vld [vmem:[#allocation2 + $0x20] sm:$0xff]  ;;  %6742 = vset.pattern.permute.xlu0 %v6823_v24  ;;  %vm4695_vm5 = vcmp.gt.f32.partialorder %v8936_v56, 0.0  ;;  %v4655_v12 = vmax.f32 %v8936_v56, 1e-30  ;;  %6743 = vset.pattern.permute.xlu1 %v6823_v24  ;;  %v4656_v46 = vmax.f32 %v8940_v52, 1e-30 }
 0x4db   : > { %vm4699_vm6 = vcmp.gt.f32.partialorder %v8938_v40, 0.0  ;;  %v4659_v14 = vmax.f32 %v8938_v40, 1e-30  ;;  %v4751_v43 = vsel %vm4695_vm5, 1, %v6823_v24  ;;  %vm4696_vm7 = vcmp.gt.f32.partialorder %v8940_v52, 0.0  ;;  %v8952_v37 = vld [vmem:[#allocation2 + $0x28] sm:$0xff] }
 0x4dc   : > { %v4755_v49 = vsel %vm4699_vm6, 1, %v6823_v24  ;;  %4760 = vperm.xlu0 %6742, %v4751_v43   ;;  %6744 = vrcp.f32 %v4655_v12  ;;  %v4752_v32 = vsel %vm4696_vm7, 1, %v6823_v24  ;;  %v4660_v53 = vmax.f32 %v8952_v37, 1e-30  ;;  %v8957_v61 = vld [vmem:[#allocation2 + $0x30] sm:$0xff]  ;;  %v8967_v23 = vld [vmem:[#allocation2 + $0x18] sm:$0xff] }
 0x4dd   : > { %4772 = vperm.xlu1 %6743, %v4755_v49   ;;  %vm4700_vm8 = vcmp.gt.f32.partialorder %v8952_v37, 0.0  ;;  %6746 = vrcp.f32 %v4659_v14  ;;  %v4661_v51 = vmax.f32 %v8957_v61, 1e-30  ;;  %v4657_v10 = vmax.f32 %v8959_v28, 1e-30 }
 0x4de   : > { %v4756_v5 = vsel %vm4700_vm8, 1, %v6823_v24  ;;  %6748 = vrcp.f32 %v4656_v46  ;;  %v4658_v30 = vmax.f32 %v8967_v23, 1e-30  ;;  %vm4697_vm9 = vcmp.gt.f32.partialorder %v8959_v28, 0.0  ;;  %v5317_v29 = vld [vmem:[%s9098_s2] ss:$0 sm:$0xff] }
 0x4df   : > { %v8964_v34 = vld [vmem:[#allocation2 + $0x38] sm:$0xff]  ;;  %6750 = vrcp.f32 %v4660_v53  ;;  %vm4701_vm10 = vcmp.gt.f32.partialorder %v8957_v61, 0.0  ;;  %v4753_v11 = vsel %vm4697_vm9, 1, %v6823_v24  ;;  %vm4698_vm11 = vcmp.gt.f32.partialorder %v8967_v23, 0.0 }
 0x4e0   : > { %v4662_v47 = vmax.f32 %v8964_v34, 1e-30  ;;  %4763 = vperm.xlu0 %6742, %v4752_v32   ;;  %6752 = vrcp.f32 %v4661_v51  ;;  %v4757_v13 = vsel %vm4701_vm10, 1, %v6823_v24  ;;  %vm4702_vm12 = vcmp.gt.f32.partialorder %v8964_v34, 0.0  ;;  %v4825_v32 = vld [vmem:[%s9103_s7 + $0x8] sm:$0xff] }
 0x4e1   : > { %4775 = vperm.xlu1 %6743, %v4756_v5   ;;  %6754 = vrcp.f32 %v4657_v10  ;;  %v4754_v48 = vsel %vm4698_vm11, 1, %v6823_v24  ;;  %v4758_v31 = vsel %vm4702_vm12, 1, %v6823_v24  ;;  %5853 = vmatprep.subr.mxu0 %v4825_v32  ;;  %v4824_v5 = vld [vmem:[%s9103_s7] sm:$0xff]  ;;  %vm4978_vm6 = vcmask 31744  }
 0x4e2   : > { %6756 = vrcp.f32 %v4662_v47  ;;  %5869 = vmatprep.subr.mxu1 %v4825_v32  ;;  %5854 = vmatpush3.msra.mxu0 %v4825_v32 }
 0x4e3   : > { %6758 = vrcp.f32 %v4658_v30  ;;  %5871 = vmatpush3.msra.mxu1 %v4825_v32  ;;  %5855 = vmatprep.subr.mxu0 %v4824_v5 }
 0x4e4   : > { %5870 = vmatprep.subr.mxu1 %v4824_v5  ;;  %5856 = vmatpush3.msra.mxu0 %v4824_v5 }
 0x4e5   : > { %5872 = vmatpush3.msra.mxu1 %v4824_v5 }
 0x4e9   : > { %v6745_v9 = vpop.eup %6744 }
 0x4ea   : > { %v6747_v1 = vpop.eup %6746  ;;  %v4671_v21 = vmul.f32 %v6745_v9, %v4655_v12 }
 0x4eb   : > { %v6749_v38 = vpop.eup %6748  ;;  %v4675_v44 = vmul.f32 %v6747_v1, %v4659_v14 }
 0x4ec   : > { %v6751_v4 = vpop.eup %6750  ;;  %v4672_v36 = vmul.f32 %v6749_v38, %v4656_v46  ;;  %v4679_v25 = vsub.f32 2.0, %v4671_v21 }
 0x4ed   : > { %v6753_v6 = vpop.eup %6752  ;;  %v4676_v19 = vmul.f32 %v6751_v4, %v4660_v53  ;;  %v4683_v2 = vsub.f32 2.0, %v4675_v44 }
 0x4ee   : > { %v6755_v33 = vpop.eup %6754  ;;  %v4680_v0 = vsub.f32 2.0, %v4672_v36  ;;  %v4687_v27 = vmul.f32 %v6745_v9, %v4679_v25  ;;  %v4677_v62 = vmul.f32 %v6753_v6, %v4661_v51 }
 0x4ef   : > { %v6757_v63 = vpop.eup %6756  ;;  %v4684_v59 = vsub.f32 2.0, %v4676_v19  ;;  %v4673_v42 = vmul.f32 %v6755_v33, %v4657_v10  ;;  %v4691_v58 = vmul.f32 %v6747_v1, %v4683_v2 }
 0x4f0   : > { %v6759_v15 = vpop.eup %6758  ;;  %v4688_v35 = vmul.f32 %v6749_v38, %v4680_v0  ;;  %4705 = vperm.xlu0 %6742, %v4687_v27   ;;  %v4685_v60 = vsub.f32 2.0, %v4677_v62  ;;  %v4678_v3 = vmul.f32 %v6757_v63, %v4662_v47 }
 0x4f1   : > { %v4681_v8 = vsub.f32 2.0, %v4673_v42  ;;  %v4674_v54 = vmul.f32 %v6759_v15, %v4658_v30  ;;  %v4692_v57 = vmul.f32 %v6751_v4, %v4684_v59 }
 0x4f2   : > { %4710 = vperm.xlu1 %6743, %v4688_v35   ;;  %v4693_v18 = vmul.f32 %v6753_v6, %v4685_v60  ;;  %v4686_v45 = vsub.f32 2.0, %v4678_v3 }
 0x4f3   : > { %v4689_v55 = vmul.f32 %v6755_v33, %v4681_v8  ;;  %v4682_v26 = vsub.f32 2.0, %v4674_v54 }
 0x4f4   : > { %4725 = vperm.xlu0 %6742, %v4691_v58   ;;  %v4694_v7 = vmul.f32 %v6757_v63, %v4686_v45 }
 0x4f5   : > { %v4690_v41 = vmul.f32 %v6759_v15, %v4682_v26 }
 0x4f6   : > { %4730 = vperm.xlu1 %6743, %v4692_v57  }
 0x4f8   : > { %4715 = vperm.xlu0 %6742, %v4689_v55  }
 0x4fa   : > { %4735 = vperm.xlu1 %6743, %v4693_v18  }
 0x4fc   : > { %4720 = vperm.xlu0 %6742, %v4690_v41  }
 0x4fe   : > { %4740 = vperm.xlu1 %6743, %v4694_v7  }
 0x500   : > { %4766 = vperm.xlu0 %6742, %v4753_v11   ;;  %v5318_v11 = vld [vmem:[%s9104_s8] ss:$0 sm:$0xff] }
 0x502   : > { %4778 = vperm.xlu1 %6743, %v4757_v13  }
 0x504   : > { %4769 = vperm.xlu0 %6742, %v4754_v48  }
 0x506   : > { %4781 = vperm.xlu1 %6743, %v4758_v31  }
 0x508   : > { %4805 = vrot.lane.b32.xlu0 %v5317_v29, %s6824_s21 }
 0x557   : > { %v4761_v39 = vpop.permute.xlu0 %4760 }
 0x558   : > { %v4773_v50 = vpop.permute.xlu1 %4772  ;;  %vm4783_vm14 = vcmp.eq.s32.totalorder %v4761_v39, 1 }
 0x559   : > { %vm4787_vm13 = vcmp.eq.s32.totalorder %v4773_v50, 1 }
 0x55b   : > { %v4764_v16 = vpop.permute.xlu0 %4763 }
 0x55c   : > { %v4776_v20 = vpop.permute.xlu1 %4775  ;;  %vm4784_vm0 = vcmp.eq.s32.totalorder %v4764_v16, 1 }
 0x55d   : > { %vm4788_vm15 = vcmp.eq.s32.totalorder %v4776_v20, 1 }
 0x56b   : > { %v4706_v22 = vpop.permute.xlu0 %4705 }
 0x56c   : > { %v4743_v51 = vmul.f32 %v4706_v22, %v8936_v56 }
 0x56d   : > { %v4711_v17 = vpop.permute.xlu1 %4710 }
 0x56e   : > { %v4744_v9 = vmul.f32 %v4711_v17, %v8940_v52  ;;  %v4791_v21 = vsel %vm4783_vm14, %v4743_v51, 0.0 }
 0x56f   : > { %v4726_v12 = vpop.permute.xlu0 %4725 }
 0x570   : > { %v4747_v10 = vmul.f32 %v4726_v12, %v8938_v40  ;;  %v4792_v25 = vsel %vm4784_vm0, %v4744_v9, 0.0 }
 0x571   : > { %v4731_v14 = vpop.permute.xlu1 %4730 }
 0x572   : > { %v4748_v1 = vmul.f32 %v4731_v14, %v8952_v37  ;;  %v4795_v38 = vsel %vm4787_vm13, %v4747_v10, 0.0 }
 0x573   : > { %v4716_v43 = vpop.permute.xlu0 %4715 }
 0x574   : > { %v4796_v6 = vsel %vm4788_vm15, %v4748_v1, 0.0  ;;  %v4745_v37 = vmul.f32 %v4716_v43, %v8959_v28 }
 0x575   : > { %v4736_v49 = vpop.permute.xlu1 %4735 }
 0x576   : > { %v4749_v52 = vmul.f32 %v4736_v49, %v8957_v61 }
 0x577   : > { %v4721_v46 = vpop.permute.xlu0 %4720 }
 0x578   : > { %v4746_v35 = vmul.f32 %v4721_v46, %v8967_v23 }
 0x579   : > { %v4741_v24 = vpop.permute.xlu1 %4740 }
 0x57a   : > { %v4750_v15 = vmul.f32 %v4741_v24, %v8964_v34 }
 0x57b   : > { %v4767_v53 = vpop.permute.xlu0 %4766 }
 0x57c   : > { %vm4785_vm3 = vcmp.eq.s32.totalorder %v4767_v53, 1 }
 0x57d   : > { %v4779_v30 = vpop.permute.xlu1 %4778  ;;  %v4793_v27 = vsel %vm4785_vm3, %v4745_v37, 0.0 }
 0x57e   : > { %vm4789_vm1 = vcmp.eq.s32.totalorder %v4779_v30, 1 }
 0x57f   : > { %v4770_v47 = vpop.permute.xlu0 %4769  ;;  %v4797_v0 = vsel %vm4789_vm1, %v4749_v52, 0.0 }
 0x580   : > { %vm4786_vm5 = vcmp.eq.s32.totalorder %v4770_v47, 1 }
 0x581   : > { %v4782_v56 = vpop.permute.xlu1 %4781  ;;  %v4794_v58 = vsel %vm4786_vm5, %v4746_v35, 0.0 }
 0x582   : > { %vm4790_vm4 = vcmp.eq.s32.totalorder %v4782_v56, 1 }
 0x583   : > { %v4806_v44 = vpop.permute.xlu0 %4805  ;;  %v4798_v61 = vsel %vm4790_vm4, %v4750_v15, 0.0 }
 0x584   : > { %v4812_v4 = vadd.f32 %v4806_v44, %v4795_v38  ;;  %v4808_v36 = vadd.f32 %v4806_v44, %v4791_v21  ;;  %v4813_v2 = vadd.f32 %v4806_v44, %v4796_v6  ;;  %v4809_v33 = vadd.f32 %v4806_v44, %v4792_v25 }
 0x585   : > { %v4814_v59 = vadd.f32 %v4806_v44, %v4797_v0  ;;  %v4810_v42 = vadd.f32 %v4806_v44, %v4793_v27  ;;  %v4815_v54 = vadd.f32 %v4806_v44, %v4798_v61  ;;  %v4811_v57 = vadd.f32 %v4806_v44, %v4794_v58 }
 0x586   : > { %v4820_v40 = vmax.f32 %v4812_v4, 0.0  ;;  %v4816_v19 = vmax.f32 %v4808_v36, 0.0  ;;  %v4821_v62 = vmax.f32 %v4813_v2, 0.0  ;;  %v4817_v63 = vmax.f32 %v4809_v33, 0.0 }
 0x587   : > { %v4822_v28 = vmax.f32 %v4814_v59, 0.0  ;;  %v4818_v8 = vmax.f32 %v4810_v42, 0.0  ;;  %v4823_v60 = vmax.f32 %v4815_v54, 0.0  ;;  %v4819_v3 = vmax.f32 %v4811_v57, 0.0 }
 0x588   : > { %4849 = vrot.lane.b32.xlu0 %v4820_v40, %s6825_s26  ;;  %4841 = vrot.lane.b32.xlu1 %v4816_v19, %s6825_s26 }
 0x58c   : > { %4851 = vrot.lane.b32.xlu0 %v4821_v62, %s6825_s26  ;;  %4843 = vrot.lane.b32.xlu1 %v4817_v63, %s6825_s26 }
 0x590   : > { %4853 = vrot.lane.b32.xlu0 %v4822_v28, %s6825_s26  ;;  %4845 = vrot.lane.b32.xlu1 %v4818_v8, %s6825_s26 }
 0x594   : > { %4855 = vrot.lane.b32.xlu0 %v4823_v60, %s6825_s26  ;;  %4847 = vrot.lane.b32.xlu1 %v4819_v3, %s6825_s26 }
 0x5fa   : > { %v4850_v55 = vpop.permute.xlu0 %4849  ;;  %v4842_v26 = vpop.permute.xlu1 %4841 }
 0x5fb   : > { %5857 = vmatprep.mubr.msk.f32.mxu0 %vm1301_vm2, %v4842_v26  ;;  %5863 = vmatprep.mubr.msk.f32.mxu1 %vm1301_vm2, %v4850_v55 }
 0x5fe   : > { %v4852_v34 = vpop.permute.xlu0 %4851  ;;  %v4844_v23 = vpop.permute.xlu1 %4843 }
 0x5ff   : > { %5858 = vmatmul.mubr.msk.f32.vlgmr.msra.gmra.mxu0 %vm1301_vm2, %v4844_v23  ;;  %5864 = vmatmul.mubr.msk.f32.vlgmr.msra.gmra.mxu1 %vm1301_vm2, %v4852_v34 }
 0x602   : > { %v4854_v18 = vpop.permute.xlu0 %4853  ;;  %v4846_v45 = vpop.permute.xlu1 %4845 }
 0x603   : > { %5860 = vmatprep.mubr.msk.f32.mxu0 %vm1301_vm2, %v4846_v45  ;;  %5866 = vmatprep.mubr.msk.f32.mxu1 %vm1301_vm2, %v4854_v18 }
 0x606   : > { %v4856_v41 = vpop.permute.xlu0 %4855  ;;  %v4848_v7 = vpop.permute.xlu1 %4847 }
 0x607   : > { %5861 = vmatmul.mubr.msk.f32.gmra.mxu0 %vm1301_vm2, %v4848_v7  ;;  %5867 = vmatmul.mubr.msk.f32.gmra.mxu1 %vm1301_vm2, %v4856_v41 }
 0x6bf   : > { %v5859_v13 = vpop.f32.mrf.mxu0  ;;  %v5865_v48 = vpop.f32.mrf.mxu1 }
 0x6c0   : > { %v4945_v31 = vadd.f32 %v5859_v13, %v5318_v11  ;;  %v4965_v29 = vadd.f32 %v5865_v48, %v5318_v11 }
 0x6c1   : > { %v4939_v39 = vpop.f32.mrf.mxu0  ;;  %v4959_v50 = vpop.f32.mrf.mxu1 }
 0x6c2   : > { %v4940_v16 = vadd.f32 %v5318_v11, %v4939_v39  ;;  %v4960_v20 = vadd.f32 %v5318_v11, %v4959_v50  ;;  %v4994_v22 = vsel %vm4978_vm6, %v4965_v29, -inf  ;;  %v4982_v17 = vsel %vm4978_vm6, %v4945_v31, -inf }
 0x6c3   : > { %4995 = vmax.xlane.f32.xlu1 %v4994_v22  ;;  %4983 = vmax.xlane.f32.xlu0 %v4982_v17 }
 0x6c4   : > { %v4991_v12 = vsel %vm4978_vm6, %v4960_v20, -inf  ;;  %v4979_v14 = vsel %vm4978_vm6, %v4940_v16, -inf }
 0x6c7   : > { %v5868_v43 = vpop.f32.mrf.mxu1  ;;  %4992 = vmax.xlane.f32.xlu0 %v4991_v12  ;;  %4980 = vmax.xlane.f32.xlu1 %v4979_v14  ;;  %v5862_v49 = vpop.f32.mrf.mxu0 }
 0x6c8   : > { %v4955_v46 = vadd.f32 %v5862_v49, %v5318_v11  ;;  %v4975_v53 = vadd.f32 %v5868_v43, %v5318_v11 }
 0x6c9   : > { %v4949_v24 = vpop.f32.mrf.mxu0  ;;  %v4969_v32 = vpop.f32.mrf.mxu1 }
 0x6ca   : > { %v4950_v5 = vadd.f32 %v5318_v11, %v4949_v24  ;;  %v4988_v51 = vsel %vm4978_vm6, %v4955_v46, -inf  ;;  %v4970_v10 = vadd.f32 %v5318_v11, %v4969_v32  ;;  %v5000_v30 = vsel %vm4978_vm6, %v4975_v53, -inf }
 0x6cb   : > { %4989 = vmax.xlane.f32.xlu1 %v4988_v51 }
 0x6cc   : > { %v4985_v47 = vsel %vm4978_vm6, %v4950_v5, -inf  ;;  %v4997_v9 = vsel %vm4978_vm6, %v4970_v10, -inf }
 0x6cd   : > { %4986 = vmax.xlane.f32.xlu0 %v4985_v47 }
 0x6cf   : > { %5001 = vmax.xlane.f32.xlu1 %v5000_v30 }
 0x6d1   : > { %4998 = vmax.xlane.f32.xlu0 %v4997_v9 }
 0x74c   : > { %v4984_v1 = vpop.xlane.xlu0 %4983  ;;  %v4996_v21 = vpop.xlane.xlu1 %4995 }
 0x74d   : > { %v9014_v38 = vsub.f32 %v4945_v31, %v4984_v1  ;;  %v9016_v44 = vsub.f32 %v4965_v29, %v4996_v21 }
 0x74f   : > { %v5013_v4 = vmul.f32 1.442695, %v9014_v38  ;;  %v5021_v36 = vmul.f32 1.442695, %v9016_v44 }
 0x750   : > { %v4993_v25 = vpop.xlane.xlu0 %4992  ;;  %v4981_v6 = vpop.xlane.xlu1 %4980 }
 0x751   : > { %6760 = vpow2.f32 %v5013_v4  ;;  %v9020_v56 = vsub.f32 %v4960_v20, %v4993_v25  ;;  %v9022_v40 = vsub.f32 %v4940_v16, %v4981_v6 }
 0x752   : > { %6762 = vpow2.f32 %v5021_v36 }
 0x753   : > { %v5011_v19 = vmul.f32 1.442695, %v9022_v40  ;;  %v5019_v2 = vmul.f32 1.442695, %v9020_v56 }
 0x754   : > { %v4990_v33 = vpop.xlane.xlu1 %4989 }
 0x755   : > { %v9026_v52 = vsub.f32 %v4955_v46, %v4990_v33  ;;  %6764 = vpow2.f32 %v5011_v19 }
 0x756   : > { %v4987_v37 = vpop.xlane.xlu0 %4986  ;;  %6766 = vpow2.f32 %v5019_v2 }
 0x757   : > { %v5017_v0 = vmul.f32 1.442695, %v9026_v52  ;;  %v9029_v27 = vsub.f32 %v4950_v5, %v4987_v37 }
 0x758   : > { %v5002_v62 = vpop.xlane.xlu1 %5001 }
 0x759   : > { %6768 = vpow2.f32 %v5017_v0  ;;  %v5015_v63 = vmul.f32 1.442695, %v9029_v27  ;;  %v9032_v59 = vsub.f32 %v4975_v53, %v5002_v62 }
 0x75a   : > { %v4999_v42 = vpop.xlane.xlu0 %4998 }
 0x75b   : > { %v5025_v15 = vmul.f32 1.442695, %v9032_v59  ;;  %v9035_v35 = vsub.f32 %v4970_v10, %v4999_v42  ;;  %6770 = vpow2.f32 %v5015_v63 }
 0x75d   : > { %6772 = vpow2.f32 %v5025_v15  ;;  %v5023_v61 = vmul.f32 1.442695, %v9035_v35 }
 0x75e   : > { %v6761_v58 = vpop.eup %6760 }
 0x75f   : > { %v5030_v28 = vsel %vm4978_vm6, %v6761_v58, 0.0  ;;  %v6763_v8 = vpop.eup %6762  ;;  %6774 = vpow2.f32 %v5023_v61 }
 0x760   : > { %5031 = vadd.xlane.f32.xlu1 %v5030_v28  ;;  %v5042_v57 = vsel %vm4978_vm6, %v6763_v8, 0.0 }
 0x762   : > { %v6765_v54 = vpop.eup %6764 }
 0x763   : > { %v5027_v60 = vsel %vm4978_vm6, %v6765_v54, 0.0  ;;  %v6767_v3 = vpop.eup %6766 }
 0x764   : > { %5043 = vadd.xlane.f32.xlu1 %v5042_v57  ;;  %5028 = vadd.xlane.f32.xlu0 %v5027_v60  ;;  %v5039_v34 = vsel %vm4978_vm6, %v6767_v3, 0.0 }
 0x766   : > { %v6769_v55 = vpop.eup %6768 }
 0x767   : > { %v5036_v26 = vsel %vm4978_vm6, %v6769_v55, 0.0 }
 0x768   : > { %5037 = vadd.xlane.f32.xlu1 %v5036_v26  ;;  %v6771_v23 = vpop.eup %6770  ;;  %5040 = vadd.xlane.f32.xlu0 %v5039_v34 }
 0x769   : > { %v5033_v41 = vsel %vm4978_vm6, %v6771_v23, 0.0 }
 0x76a   : > { %v6773_v18 = vpop.eup %6772 }
 0x76b   : > { %v5048_v45 = vsel %vm4978_vm6, %v6773_v18, 0.0 }
 0x76c   : > { %5049 = vadd.xlane.f32.xlu1 %v5048_v45  ;;  %v6775_v7 = vpop.eup %6774  ;;  %5034 = vadd.xlane.f32.xlu0 %v5033_v41 }
 0x76d   : > { %v5045_v11 = vsel %vm4978_vm6, %v6775_v7, 0.0 }
 0x770   : > { %5046 = vadd.xlane.f32.xlu0 %v5045_v11 }
 0x7e9   : > { %v5032_v13 = vpop.xlane.xlu1 %5031 }
 0x7ea   : > { %6776 = vlog2.f32 %v5032_v13 }
 0x7ed   : > { %v5044_v48 = vpop.xlane.xlu1 %5043  ;;  %v5029_v31 = vpop.xlane.xlu0 %5028 }
 0x7ee   : > { %6778 = vlog2.f32 %v5044_v48 }
 0x7ef   : > { %6780 = vlog2.f32 %v5029_v31 }
 0x7f1   : > { %v5038_v29 = vpop.xlane.xlu1 %5037  ;;  %v5041_v39 = vpop.xlane.xlu0 %5040 }
 0x7f2   : > { %6782 = vlog2.f32 %v5038_v29 }
 0x7f3   : > { %6784 = vlog2.f32 %v5041_v39 }
 0x7f5   : > { %v5050_v50 = vpop.xlane.xlu1 %5049  ;;  %v5035_v16 = vpop.xlane.xlu0 %5034 }
 0x7f6   : > { %6786 = vlog2.f32 %v5050_v50 }
 0x7f7   : > { %v6777_v20 = vpop.eup %6776  ;;  %6788 = vlog2.f32 %v5035_v16 }
 0x7f8   : > { %v5054_v22 = vmul.f32 0.6931472, %v6777_v20 }
 0x7f9   : > { %v5047_v12 = vpop.xlane.xlu0 %5046 }
 0x7fa   : > { %v5068_v17 = vsub.f32 %v9014_v38, %v5054_v22  ;;  %6790 = vlog2.f32 %v5047_v12 }
 0x7fb   : > { %v6779_v14 = vpop.eup %6778 }
 0x7fc   : > { %v6781_v43 = vpop.eup %6780  ;;  %5076 = vst.msk [vmem:[%s9105_s9 + $0x8] sm:$0xff] %vm4978_vm6, %v5068_v17  ;;  %v5062_v49 = vmul.f32 0.6931472, %v6779_v14 }
 0x7fd   : > { %v5052_v46 = vmul.f32 0.6931472, %v6781_v43 }
 0x7fe   : > { %v5072_v24 = vsub.f32 %v9016_v44, %v5062_v49 }
 0x7ff   : > { %v6783_v32 = vpop.eup %6782  ;;  %v5067_v53 = vsub.f32 %v9022_v40, %v5052_v46 }
 0x800   : > { %v6785_v5 = vpop.eup %6784  ;;  %5080 = vst.msk [vmem:[%s9105_s9 + $0x28] sm:$0xff] %vm4978_vm6, %v5072_v24  ;;  %v5058_v51 = vmul.f32 0.6931472, %v6783_v32 }
 0x801   : > { %5075 = vst.msk [vmem:[%s9105_s9] sm:$0xff] %vm4978_vm6, %v5067_v53  ;;  %v5060_v10 = vmul.f32 0.6931472, %v6785_v5 }
 0x802   : > { %v5070_v47 = vsub.f32 %v9026_v52, %v5058_v51 }
 0x803   : > { %v6787_v30 = vpop.eup %6786  ;;  %v5071_v9 = vsub.f32 %v9020_v56, %v5060_v10 }
 0x804   : > { %v6789_v1 = vpop.eup %6788  ;;  %5078 = vst.msk [vmem:[%s9105_s9 + $0x18] sm:$0xff] %vm4978_vm6, %v5070_v47  ;;  %v5066_v21 = vmul.f32 0.6931472, %v6787_v30 }
 0x805   : > { %5079 = vst.msk [vmem:[%s9105_s9 + $0x20] sm:$0xff] %vm4978_vm6, %v5071_v9  ;;  %v5056_v38 = vmul.f32 0.6931472, %v6789_v1 }
 0x806   : > { %v5074_v44 = vsub.f32 %v9032_v59, %v5066_v21 }
 0x807   : > { %v5069_v4 = vsub.f32 %v9029_v27, %v5056_v38  ;;  %v6791_v36 = vpop.eup %6790 }
 0x808   : > { %5082 = vst.msk [vmem:[%s9105_s9 + $0x38] sm:$0xff] %vm4978_vm6, %v5074_v44  ;;  %v5064_v25 = vmul.f32 0.6931472, %v6791_v36 }
 0x809   : > { %5077 = vst.msk [vmem:[%s9105_s9 + $0x10] sm:$0xff] %vm4978_vm6, %v5069_v4 }
 0x80a   : > { %v5073_v6 = vsub.f32 %v9035_v35, %v5064_v25 }
 0x80c   : > { %5081 = vst.msk [vmem:[%s9105_s9 + $0x30] sm:$0xff] %vm4978_vm6, %v5073_v6 }
 0x80d PF: > { %p16_p11 = scmp.ge.s32.totalorder %s6895_s13, 4   ;;  %s9620_s30 = smov %s6810_s10 }
 0x80e   : > { %s9621_s10 = smov %s6904_s16  ;;  %s9622_s11 = smov %s6895_s13 }
 0x80f   :  { %18 = sbr.rel (!%p16_p11) target bundleno = 2 (0x2), region = 127 }

</bundles_post_ra>
